<compile_context>
chip_gen: v7x
topology: tpu7x:2x2x1
jax: 0.10.0
libtpu: 0.0.40
codegen_flags: <defaults>
</compile_context>

<pallas_src>
import functools

import numpy as np
import jax
import jax.numpy as jnp
from jax import lax
from jax.experimental import pallas as pl
from jax.experimental.pallas import tpu as pltpu

MAXPAD = 2                       # circular H padding, serves both k=3 and k=5
EPS = 1e-5                       # InstanceNorm3d default
_SQRT1_2 = 0.7071067811865476


# ---------------------------------------------------------------------------
# In-kernel math helpers (all f32)
# ---------------------------------------------------------------------------
def _erf(x):
    # Abramowitz & Stegun 7.1.26 (|err| < 1.5e-7); uses only exp (EUP-safe).
    a1, a2, a3, a4, a5 = (0.254829592, -0.284496736, 1.421413741,
                          -1.453152027, 1.061405429)
    p = 0.3275911
    s = jnp.where(x >= 0.0, 1.0, -1.0)
    ax = jnp.abs(x)
    t = 1.0 / (1.0 + p * ax)
    poly = ((((a5 * t + a4) * t + a3) * t + a2) * t + a1) * t
    return s * (1.0 - poly * jnp.exp(-ax * ax))


def _gelu(x):
    # exact (erf-based) GELU, matching torch.nn.GELU() default
    return 0.5 * x * (1.0 + _erf(x * _SQRT1_2))


def _group_sum_matrix(lanes, channels):
    # G[l1, l2] = 1 iff lanes l1, l2 hold the same channel (lane layout (w, c),
    # channels a power of two).  rowvec @ G = per-channel sums broadcast back
    # to every (w, c) lane.
    l1 = lax.broadcasted_iota(jnp.int32, (lanes, lanes), 0)
    l2 = lax.broadcasted_iota(jnp.int32, (lanes, lanes), 1)
    cm = channels - 1
    return ((l1 & cm) == (l2 & cm)).astype(jnp.float32)


def _masked_instance_norm(x, mask, gsum, inv_count):
    # x: (R, W*C) f32 in H-padded row layout; mask zeroes the duplicated pad
    # rows so the per-(n, c) statistics are exact.  Biased variance, eps=1e-5.
    xm = x * mask
    s = jnp.concatenate([jnp.sum(xm, axis=0, keepdims=True),
                         jnp.sum(xm * xm, axis=0, keepdims=True)], axis=0)
    sg = jnp.dot(s, gsum, preferred_element_type=jnp.float32)   # (2, W*C)
    mean = sg[0:1] * inv_count
    var = sg[1:2] * inv_count - mean * mean
    return (x - mean) * lax.rsqrt(var + EPS)


# ---------------------------------------------------------------------------
# Kernel 1: fused InceptionBlock_1 (+ the outer SimpleLayerNet InstanceNorm)
# ---------------------------------------------------------------------------
def _inception_kernel(xp_ref, mask_ref,
                      wproj_ref, bproj_ref, w1_ref, b1_ref,
                      w3_ref, b3_ref, w5_ref, b5_ref, wc_ref, bc_ref,
                      o_ref, *, hp, inv_count, channels):
    x = xp_ref[0]                                   # (R, W*C) f32, R = D*Hpad
    mask = mask_ref[...]                            # (R, 1)
    lanes = x.shape[-1]
    gsum = _group_sum_matrix(lanes, channels)

    x1 = _masked_instance_norm(x, mask, gsum, inv_count)   # SimpleLayerNet.norm
    x2 = _masked_instance_norm(x1, mask, gsum, inv_count)  # block.norm

    # 1x1 proj (C -> C/2) + GELU
    h = _gelu(jnp.dot(x2.astype(jnp.bfloat16), wproj_ref[...],
                      preferred_element_type=jnp.float32) + bproj_ref[...])

    # branch1x1
    b1 = _gelu(jnp.dot(h.astype(jnp.bfloat16), w1_ref[...],
                       preferred_element_type=jnp.float32) + b1_ref[...])

    # branch3x3 / branch5x5 (circular): (kd, kh) taps are row rolls of the
    # H-padded resident block, folded into the contraction dim of one matmul;
    # the kw taps + circular W wrap live in the banded weight.
    def conv_branch(k, w_ref, b_ref):
        p = k // 2
        taps = []
        for kd in range(k):
            for kh in range(k):
                shift = -((kd - p) * hp + (kh - p))
                taps.append(h if shift == 0 else jnp.roll(h, shift, axis=0))
        xcat = jnp.concatenate(taps, axis=1).astype(jnp.bfloat16)
        return _gelu(jnp.dot(xcat, w_ref[...],
                             preferred_element_type=jnp.float32) + b_ref[...])

    b3 = conv_branch(3, w3_ref, b3_ref)
    b5 = conv_branch(5, w5_ref, b5_ref)

    cat = jnp.concatenate([b1, b3, b5], axis=1).astype(jnp.bfloat16)
    comb = _gelu(jnp.dot(cat, wc_ref[...],
                         preferred_element_type=jnp.float32) + bc_ref[...])

    # residual: x0 of the torch block is the once-(outer-)normalized tensor
    o_ref[0] = (comb + x1).astype(o_ref.dtype)


def inception_block(xp, bw, mask, *, hp, inv_count, channels):
    n, r, l = xp.shape
    names = ("wproj", "bproj", "w1", "b1", "w3", "b3", "w5", "b5", "wc", "bc")
    weights = [bw[k] for k in names]
    in_specs = [pl.BlockSpec((1, r, l), lambda i: (i, 0, 0)),
                pl.BlockSpec(mask.shape, lambda i: (0, 0))]
    in_specs += [pl.BlockSpec(a.shape, lambda i: (0, 0)) for a in weights]
    return pl.pallas_call(
        functools.partial(_inception_kernel, hp=hp, inv_count=inv_count,
                          channels=channels),
        out_shape=jax.ShapeDtypeStruct((n, r, l), jnp.float32),
        grid=(n,),
        in_specs=in_specs,
        out_specs=pl.BlockSpec((1, r, l), lambda i: (i, 0, 0)),
        compiler_params=pltpu.CompilerParams(
            dimension_semantics=("parallel",)),
    )(xp, mask, *weights)


# ---------------------------------------------------------------------------
# Kernel 2: fused ProjectionBlock (1x1 conv -> activation -> 1x1 conv)
# ---------------------------------------------------------------------------
def _projection_kernel(*refs, activ):
    if activ == "prelu":
        x_ref, w1_ref, b1_ref, w2_ref, b2_ref, a_ref, o_ref = refs
    else:
        x_ref, w1_ref, b1_ref, w2_ref, b2_ref, o_ref = refs
    y = jnp.dot(x_ref[0].astype(jnp.bfloat16), w1_ref[...],
                preferred_element_type=jnp.float32) + b1_ref[...]
    if activ == "prelu":
        y = jnp.where(y >= 0.0, y, a_ref[...] * y)
    else:
        y = _gelu(y)
    z = jnp.dot(y.astype(jnp.bfloat16), w2_ref[...],
                preferred_element_type=jnp.float32) + b2_ref[...]
    o_ref[0] = z.astype(o_ref.dtype)


def projection_pair(x2, pw, activ):
    n, r, lin = x2.shape
    lout = pw["w2"].shape[1]
    args = [x2, pw["w1"], pw["b1"], pw["w2"], pw["b2"]]
    in_specs = [pl.BlockSpec((1, r, lin), lambda i: (i, 0, 0))]
    in_specs += [pl.BlockSpec(a.shape, lambda i: (0, 0)) for a in args[1:]]
    if activ == "prelu":
        args.append(pw["alpha"])
        in_specs.append(pl.BlockSpec(pw["alpha"].shape, lambda i: (0, 0)))
    return pl.pallas_call(
        functools.partial(_projection_kernel, activ=activ),
        out_shape=jax.ShapeDtypeStruct((n, r, lout), jnp.float32),
        grid=(n,),
        in_specs=in_specs,
        out_specs=pl.BlockSpec((1, r, lout), lambda i: (i, 0, 0)),
        compiler_params=pltpu.CompilerParams(
            dimension_semantics=("parallel",)),
    )(*args)


# ---------------------------------------------------------------------------
# Wrapper glue: H-circular padding / unpadding in the fused 2D layout
# ---------------------------------------------------------------------------
def _pad_rows(x2, d, h, lanes):
    n = x2.shape[0]
    x4 = x2.reshape(n, d, h, lanes)
    x4 = jnp.pad(x4, ((0, 0), (0, 0), (MAXPAD, MAXPAD), (0, 0)), mode="wrap")
    return x4.reshape(n, d * (h + 2 * MAXPAD), lanes)


def _unpad_rows(xp, d, h, lanes):
    n = xp.shape[0]
    hp = h + 2 * MAXPAD
    x4 = xp.reshape(n, d, hp, lanes)
    return x4[:, :, MAXPAD:MAXPAD + h, :].reshape(n, d * h, lanes)


# ---------------------------------------------------------------------------
# Forward pass (accepts / returns PyTorch NCDHW)
# ---------------------------------------------------------------------------
def simple_layer_net(x_ncdhw, packed):
    n, cin, d, h, w = x_ncdhw.shape
    x = jnp.transpose(x_ncdhw, (0, 2, 3, 4, 1)).astype(jnp.float32)
    x2 = x.reshape(n, d * h, w * cin)                     # rows=(d,h), lanes=(w,c)

    x2 = projection_pair(x2, packed["lift"], activ="gelu")
    inner = packed["lift"]["w2"].shape[1] // w
    hp = h + 2 * MAXPAD
    inv_count = 1.0 / float(d * h * w)

    for bw in packed["blocks"]:
        xp = _pad_rows(x2, d, h, w * inner)
        xp = inception_block(xp, bw, packed["mask"], hp=hp,
                             inv_count=inv_count, channels=inner)
        x2 = _unpad_rows(xp, d, h, w * inner)

    out2 = projection_pair(x2, packed["proj"], activ="prelu")   # 'geluu' -> PReLU
    cout = packed["proj"]["w2"].shape[1] // w
    out = out2.reshape(n, d, h, w, cout)
    return jnp.transpose(out, (0, 4, 1, 2, 3))


# ---------------------------------------------------------------------------
# Parameters (compact, torch-equivalent layout) and one-time packing
# ---------------------------------------------------------------------------
def make_params(key, in_channels, out_channels, inner=32, num_blocks=3):
    counter = [0]

    def nkey():
        counter[0] += 1
        return jax.random.fold_in(key, counter[0])

    def conv_w(cin, cout, k=1):
        w = jax.random.normal(nkey(), (k, k, k, cin, cout), jnp.float32)
        w = w / np.sqrt(cin * k ** 3)
        b = 0.01 * jax.random.normal(nkey(), (cout,), jnp.float32)
        return w, b

    params = {}
    h_lift = max(in_channels, inner)
    w1, b1 = conv_w(in_channels, h_lift)
    w2, b2 = conv_w(h_lift, inner)
    params["lift"] = dict(w1=w1[0, 0, 0], b1=b1, w2=w2[0, 0, 0], b2=b2)

    half = inner // 2
    blocks = []
    for _ in range(num_blocks):
        pw, pb = conv_w(inner, half)
        b1w, b1b = conv_w(half, half, 1)
        b3w, b3b = conv_w(half, half, 3)
        b5w, b5b = conv_w(half, half, 5)
        cw, cb = conv_w(3 * half, inner)
        blocks.append(dict(proj_w=pw[0, 0, 0], proj_b=pb,
                           b1_w=b1w[0, 0, 0], b1_b=b1b,
                           b3_w=b3w, b3_b=b3b, b5_w=b5w, b5_b=b5b,
                           comb_w=cw[0, 0, 0], comb_b=cb))
    params["blocks"] = blocks

    h_proj = max(inner, out_channels)
    w1, b1 = conv_w(inner, h_proj)
    w2, b2 = conv_w(h_proj, out_channels)
    params["proj"] = dict(w1=w1[0, 0, 0], b1=b1, w2=w2[0, 0, 0], b2=b2,
                          alpha=jnp.full((h_proj,), 0.25, jnp.float32))
    return params


def _expand_pointwise(wc, w):
    # 1x1 conv (Cin, Cout) -> block-diagonal (W*Cin, W*Cout) in the fused
    # (w, c) lane layout (1x1 does not mix spatial positions).
    return jnp.kron(jnp.eye(w, dtype=wc.dtype), wc).astype(jnp.bfloat16)


def _tile_vec(b, w):
    # per-channel vector -> (1, W*C) lane layout (w outer, c inner)
    return jnp.tile(b, w).reshape(1, -1).astype(jnp.float32)


def _expand_conv(wt, k, w):
    # circular conv weights (kd, kh, kw, Cin, Cout) -> (k*k*W*Cin, W*Cout);
    # rows ordered (kd, kh, w_in, ci) to match the in-kernel tap concat.  The
    # kw taps and the circular W wrap are encoded in the band structure.
    p = k // 2
    cin, cout = wt.shape[-2], wt.shape[-1]
    wi = np.arange(w)[:, None]
    wo = np.arange(w)[None, :]
    kw = (wi - wo + p) % w
    valid = jnp.asarray((kw < k).astype(np.float32))
    kw_idx = np.minimum(kw, k - 1)
    banded = wt[:, :, kw_idx, :, :] * valid[None, None, :, :, None, None]
    banded = jnp.transpose(banded, (0, 1, 2, 4, 3, 5))   # (k,k,wi,ci,wo,co)
    return banded.reshape(k * k * w * cin, w * cout).astype(jnp.bfloat16)


def _expand_comb(wc, half, w):
    # combine 1x1: input lanes ordered (branch, w, c_half) after the in-kernel
    # concat of [b1, b3, b5].
    parts = [jnp.kron(jnp.eye(w, dtype=wc.dtype), wc[i * half:(i + 1) * half])
             for i in range(3)]
    return jnp.concatenate(parts, axis=0).astype(jnp.bfloat16)


def _row_mask(d, h):
    hp = h + 2 * MAXPAD
    j = np.arange(d * hp) % hp
    m = ((j >= MAXPAD) & (j < MAXPAD + h)).astype(np.float32)
    return jnp.asarray(m.reshape(d * hp, 1))


def pack_params(params, spatial):
    """One-time weight preprocessing into the kernels' fused-lane layout."""
    d, h, w = spatial
    packed = {
        "lift": dict(w1=_expand_pointwise(params["lift"]["w1"], w),
                     b1=_tile_vec(params["lift"]["b1"], w),
                     w2=_expand_pointwise(params["lift"]["w2"], w),
                     b2=_tile_vec(params["lift"]["b2"], w)),
        "proj": dict(w1=_expand_pointwise(params["proj"]["w1"], w),
                     b1=_tile_vec(params["proj"]["b1"], w),
                     w2=_expand_pointwise(params["proj"]["w2"], w),
                     b2=_tile_vec(params["proj"]["b2"], w),
                     alpha=_tile_vec(params["proj"]["alpha"], w)),
        "mask": _row_mask(d, h),
        "blocks": [],
    }
    for bp in params["blocks"]:
        half = bp["proj_w"].shape[1]
        packed["blocks"].append(dict(
            wproj=_expand_pointwise(bp["proj_w"], w),
            bproj=_tile_vec(bp["proj_b"], w),
            w1=_expand_pointwise(bp["b1_w"], w),
            b1=_tile_vec(bp["b1_b"], w),
            w3=_expand_conv(bp["b3_w"], 3, w),
            b3=_tile_vec(bp["b3_b"], w),
            w5=_expand_conv(bp["b5_w"], 5, w),
            b5=_tile_vec(bp["b5_b"], w),
            wc=_expand_comb(bp["comb_w"], half, w),
            bc=_tile_vec(bp["comb_b"], w)))
    return packed


if __name__ == "__main__":
    key = jax.random.PRNGKey(0)
    kx, kp = jax.random.split(key)
    N, Cin, D, H, W = 2, 4, 8, 8, 8
    Cout = 4
    x = jax.random.normal(kx, (N, Cin, D, H, W), jnp.float32)

    params = make_params(kp, Cin, Cout, inner=32, num_blocks=3)
    packed = pack_params(params, (D, H, W))   # one-time weight packing

    fwd = jax.jit(simple_layer_net)
    y = jax.block_until_ready(fwd(x, packed))

    assert y.shape == (N, Cout, D, H, W), y.shape
    assert bool(jnp.all(jnp.isfinite(y)))
    print("KERNEL_OK")
</pallas_src>

<mosaic_0001>
module attributes {stable_mosaic.version = 11 : i64} {
  func.func @_projection_kernel(%arg0: i32, %arg1: memref<1x64x32xf32, #tpu.memory_space<vmem>>, %arg2: memref<32x256xbf16, #tpu.memory_space<vmem>>, %arg3: memref<1x256xf32, #tpu.memory_space<vmem>>, %arg4: memref<256x256xbf16, #tpu.memory_space<vmem>>, %arg5: memref<1x256xf32, #tpu.memory_space<vmem>>, %arg6: memref<1x64x256xf32, #tpu.memory_space<vmem>>) attributes {dimension_semantics = [#tpu.dimension_semantics<parallel>], iteration_bounds = array<i64: 2>, scalar_prefetch = 0 : i64, scratch_operands = 0 : i64, tpu.core_type = #tpu.core_type<tc>, window_params = [{transform_indices = @transform_0, window_bounds = array<i64: 1, 64, 32>}, {pipeline_mode = #tpu.pipeline_mode<synchronous>, transform_indices = @transform_1, window_bounds = array<i64: 32, 256>}, {pipeline_mode = #tpu.pipeline_mode<synchronous>, transform_indices = @transform_2, window_bounds = array<i64: 1, 256>}, {pipeline_mode = #tpu.pipeline_mode<synchronous>, transform_indices = @transform_3, window_bounds = array<i64: 256, 256>}, {pipeline_mode = #tpu.pipeline_mode<synchronous>, transform_indices = @transform_4, window_bounds = array<i64: 1, 256>}, {transform_indices = @transform_5, window_bounds = array<i64: 1, 64, 256>}]} {
    %c0 = arith.constant 0 : index
    %c0_0 = arith.constant 0 : index
    %c0_1 = arith.constant 0 : index
    %0 = vector.load %arg1[%c0, %c0_0, %c0_1] : memref<1x64x32xf32, #tpu.memory_space<vmem>>, vector<1x64x32xf32>
    %1 = vector.shape_cast %0 : vector<1x64x32xf32> to vector<64x32xf32>
    %2 = arith.truncf %1 : vector<64x32xf32> to vector<64x32xbf16>
    %c0_2 = arith.constant 0 : index
    %c0_3 = arith.constant 0 : index
    %3 = vector.load %arg2[%c0_2, %c0_3] : memref<32x256xbf16, #tpu.memory_space<vmem>>, vector<32x256xbf16>
    %cst = arith.constant dense<0.000000e+00> : vector<64x256xf32>
    %4 = tpu.matmul %2, %3, %cst {dimension_numbers = #tpu.dot_dimension_numbers<[1], [0], [0], [1], [0, 0, 1, 1], [], []>} : vector<64x32xbf16>, vector<32x256xbf16>, vector<64x256xf32> -> vector<64x256xf32>
    %c0_4 = arith.constant 0 : index
    %c0_5 = arith.constant 0 : index
    %5 = vector.load %arg3[%c0_4, %c0_5] : memref<1x256xf32, #tpu.memory_space<vmem>>, vector<1x256xf32>
    %6 = vector.broadcast %5 : vector<1x256xf32> to vector<64x256xf32>
    %7 = arith.addf %4, %6 : vector<64x256xf32>
    %cst_6 = arith.constant 5.000000e-01 : f32
    %8 = vector.broadcast %cst_6 : f32 to vector<64x256xf32>
    %9 = arith.mulf %8, %7 : vector<64x256xf32>
    %cst_7 = arith.constant 0.707106769 : f32
    %10 = vector.broadcast %cst_7 : f32 to vector<64x256xf32>
    %11 = arith.mulf %7, %10 : vector<64x256xf32>
    %cst_8 = arith.constant 0.000000e+00 : f32
    %12 = vector.broadcast %cst_8 : f32 to vector<64x256xf32>
    %13 = arith.cmpf oge, %11, %12 : vector<64x256xf32>
    %cst_9 = arith.constant 1.000000e+00 : f32
    %cst_10 = arith.constant -1.000000e+00 : f32
    %14 = vector.broadcast %cst_9 : f32 to vector<64x256xf32>
    %15 = vector.broadcast %cst_10 : f32 to vector<64x256xf32>
    %16 = arith.select %13, %14, %15 : vector<64x256xi1>, vector<64x256xf32>
    %17 = math.absf %11 : vector<64x256xf32>
    %cst_11 = arith.constant 0.327591091 : f32
    %18 = vector.broadcast %cst_11 : f32 to vector<64x256xf32>
    %19 = arith.mulf %18, %17 : vector<64x256xf32>
    %cst_12 = arith.constant 1.000000e+00 : f32
    %20 = vector.broadcast %cst_12 : f32 to vector<64x256xf32>
    %21 = arith.addf %20, %19 : vector<64x256xf32>
    %cst_13 = arith.constant 1.000000e+00 : f32
    %22 = vector.broadcast %cst_13 : f32 to vector<64x256xf32>
    %23 = arith.divf %22, %21 : vector<64x256xf32>
    %cst_14 = arith.constant 1.06140542 : f32
    %24 = vector.broadcast %cst_14 : f32 to vector<64x256xf32>
    %25 = arith.mulf %24, %23 : vector<64x256xf32>
    %cst_15 = arith.constant -1.45315206 : f32
    %26 = vector.broadcast %cst_15 : f32 to vector<64x256xf32>
    %27 = arith.addf %25, %26 : vector<64x256xf32>
    %28 = arith.mulf %27, %23 : vector<64x256xf32>
    %cst_16 = arith.constant 1.42141378 : f32
    %29 = vector.broadcast %cst_16 : f32 to vector<64x256xf32>
    %30 = arith.addf %28, %29 : vector<64x256xf32>
    %31 = arith.mulf %30, %23 : vector<64x256xf32>
    %cst_17 = arith.constant -0.284496725 : f32
    %32 = vector.broadcast %cst_17 : f32 to vector<64x256xf32>
    %33 = arith.addf %31, %32 : vector<64x256xf32>
    %34 = arith.mulf %33, %23 : vector<64x256xf32>
    %cst_18 = arith.constant 0.254829586 : f32
    %35 = vector.broadcast %cst_18 : f32 to vector<64x256xf32>
    %36 = arith.addf %34, %35 : vector<64x256xf32>
    %37 = arith.mulf %36, %23 : vector<64x256xf32>
    %cst_19 = arith.constant 0.000000e+00 : f32
    %38 = vector.broadcast %cst_19 : f32 to vector<64x256xf32>
    %39 = arith.subf %38, %17 : vector<64x256xf32>
    %40 = arith.mulf %39, %17 : vector<64x256xf32>
    %41 = math.exp %40 : vector<64x256xf32>
    %42 = arith.mulf %37, %41 : vector<64x256xf32>
    %cst_20 = arith.constant 1.000000e+00 : f32
    %43 = vector.broadcast %cst_20 : f32 to vector<64x256xf32>
    %44 = arith.subf %43, %42 : vector<64x256xf32>
    %45 = arith.mulf %16, %44 : vector<64x256xf32>
    %cst_21 = arith.constant 1.000000e+00 : f32
    %46 = vector.broadcast %cst_21 : f32 to vector<64x256xf32>
    %47 = arith.addf %46, %45 : vector<64x256xf32>
    %48 = arith.mulf %9, %47 : vector<64x256xf32>
    %49 = arith.truncf %48 : vector<64x256xf32> to vector<64x256xbf16>
    %c0_22 = arith.constant 0 : index
    %c0_23 = arith.constant 0 : index
    %50 = vector.load %arg4[%c0_22, %c0_23] : memref<256x256xbf16, #tpu.memory_space<vmem>>, vector<256x256xbf16>
    %cst_24 = arith.constant dense<0.000000e+00> : vector<64x256xf32>
    %51 = tpu.matmul %49, %50, %cst_24 {dimension_numbers = #tpu.dot_dimension_numbers<[1], [0], [0], [1], [0, 0, 1, 1], [], []>} : vector<64x256xbf16>, vector<256x256xbf16>, vector<64x256xf32> -> vector<64x256xf32>
    %c0_25 = arith.constant 0 : index
    %c0_26 = arith.constant 0 : index
    %52 = vector.load %arg5[%c0_25, %c0_26] : memref<1x256xf32, #tpu.memory_space<vmem>>, vector<1x256xf32>
    %53 = vector.broadcast %52 : vector<1x256xf32> to vector<64x256xf32>
    %54 = arith.addf %51, %53 : vector<64x256xf32>
    %c0_27 = arith.constant 0 : index
    %c0_28 = arith.constant 0 : index
    %c0_29 = arith.constant 0 : index
    %55 = vector.load %arg6[%c0_27, %c0_28, %c0_29] : memref<1x64x256xf32, #tpu.memory_space<vmem>>, vector<1x64x256xf32>
    %56 = vector.shape_cast %55 : vector<1x64x256xf32> to vector<64x256xf32>
    %57 = vector.shape_cast %54 : vector<64x256xf32> to vector<1x64x256xf32>
    tpu.vector_store %arg6[%c0_27, %c0_28, %c0_29], %57 {strides = array<i32>} : memref<1x64x256xf32, #tpu.memory_space<vmem>>, vector<1x64x256xf32>,
    return
  }
  func.func @transform_0(%arg0: i32) -> (i32, i32, i32) {
    %c0_i32 = arith.constant 0 : i32
    %c0_i32_0 = arith.constant 0 : i32
    %c0_i32_1 = arith.constant 0 : i32
    return %arg0, %c0_i32, %c0_i32_0 : i32, i32, i32
  }
  func.func @transform_1(%arg0: i32) -> (i32, i32) {
    %c0_i32 = arith.constant 0 : i32
    %c0_i32_0 = arith.constant 0 : i32
    %c0_i32_1 = arith.constant 0 : i32
    return %c0_i32, %c0_i32_0 : i32, i32
  }
  func.func @transform_2(%arg0: i32) -> (i32, i32) {
    %c0_i32 = arith.constant 0 : i32
    %c0_i32_0 = arith.constant 0 : i32
    %c0_i32_1 = arith.constant 0 : i32
    return %c0_i32, %c0_i32_0 : i32, i32
  }
  func.func @transform_3(%arg0: i32) -> (i32, i32) {
    %c0_i32 = arith.constant 0 : i32
    %c0_i32_0 = arith.constant 0 : i32
    %c0_i32_1 = arith.constant 0 : i32
    return %c0_i32, %c0_i32_0 : i32, i32
  }
  func.func @transform_4(%arg0: i32) -> (i32, i32) {
    %c0_i32 = arith.constant 0 : i32
    %c0_i32_0 = arith.constant 0 : i32
    %c0_i32_1 = arith.constant 0 : i32
    return %c0_i32, %c0_i32_0 : i32, i32
  }
  func.func @transform_5(%arg0: i32) -> (i32, i32, i32) {
    %c0_i32 = arith.constant 0 : i32
    %c0_i32_0 = arith.constant 0 : i32
    %c0_i32_1 = arith.constant 0 : i32
    return %arg0, %c0_i32, %c0_i32_0 : i32, i32, i32
  }
}

module attributes {stable_mosaic.version = 11 : i64} {
  func.func @_inception_kernel(%arg0: i32, %arg1: memref<1x96x256xf32, #tpu.memory_space<vmem>>, %arg2: memref<96x1xf32, #tpu.memory_space<vmem>>, %arg3: memref<256x128xbf16, #tpu.memory_space<vmem>>, %arg4: memref<1x128xf32, #tpu.memory_space<vmem>>, %arg5: memref<128x128xbf16, #tpu.memory_space<vmem>>, %arg6: memref<1x128xf32, #tpu.memory_space<vmem>>, %arg7: memref<1152x128xbf16, #tpu.memory_space<vmem>>, %arg8: memref<1x128xf32, #tpu.memory_space<vmem>>, %arg9: memref<3200x128xbf16, #tpu.memory_space<vmem>>, %arg10: memref<1x128xf32, #tpu.memory_space<vmem>>, %arg11: memref<384x256xbf16, #tpu.memory_space<vmem>>, %arg12: memref<1x256xf32, #tpu.memory_space<vmem>>, %arg13: memref<1x96x256xf32, #tpu.memory_space<vmem>>) attributes {dimension_semantics = [#tpu.dimension_semantics<parallel>], iteration_bounds = array<i64: 2>, scalar_prefetch = 0 : i64, scratch_operands = 0 : i64, tpu.core_type = #tpu.core_type<tc>, window_params = [{transform_indices = @transform_0, window_bounds = array<i64: 1, 96, 256>}, {pipeline_mode = #tpu.pipeline_mode<synchronous>, transform_indices = @transform_1, window_bounds = array<i64: 96, 1>}, {pipeline_mode = #tpu.pipeline_mode<synchronous>, transform_indices = @transform_2, window_bounds = array<i64: 256, 128>}, {pipeline_mode = #tpu.pipeline_mode<synchronous>, transform_indices = @transform_3, window_bounds = array<i64: 1, 128>}, {pipeline_mode = #tpu.pipeline_mode<synchronous>, transform_indices = @transform_4, window_bounds = array<i64: 128, 128>}, {pipeline_mode = #tpu.pipeline_mode<synchronous>, transform_indices = @transform_5, window_bounds = array<i64: 1, 128>}, {pipeline_mode = #tpu.pipeline_mode<synchronous>, transform_indices = @transform_6, window_bounds = array<i64: 1152, 128>}, {pipeline_mode = #tpu.pipeline_mode<synchronous>, transform_indices = @transform_7, window_bounds = array<i64: 1, 128>}, {pipeline_mode = #tpu.pipeline_mode<synchronous>, transform_indices = @transform_8, window_bounds = array<i64: 3200, 128>}, {pipeline_mode = #tpu.pipeline_mode<synchronous>, transform_indices = @transform_9, window_bounds = array<i64: 1, 128>}, {pipeline_mode = #tpu.pipeline_mode<synchronous>, transform_indices = @transform_10, window_bounds = array<i64: 384, 256>}, {pipeline_mode = #tpu.pipeline_mode<synchronous>, transform_indices = @transform_11, window_bounds = array<i64: 1, 256>}, {transform_indices = @transform_12, window_bounds = array<i64: 1, 96, 256>}]} {
    %c0 = arith.constant 0 : index
    %c0_0 = arith.constant 0 : index
    %c0_1 = arith.constant 0 : index
    %0 = vector.load %arg1[%c0, %c0_0, %c0_1] : memref<1x96x256xf32, #tpu.memory_space<vmem>>, vector<1x96x256xf32>
    %1 = vector.shape_cast %0 : vector<1x96x256xf32> to vector<96x256xf32>
    %c0_2 = arith.constant 0 : index
    %c0_3 = arith.constant 0 : index
    %2 = vector.load %arg2[%c0_2, %c0_3] : memref<96x1xf32, #tpu.memory_space<vmem>>, vector<96x1xf32>
    %3 = tpu.iota {dimensions = array<i32: 0>} : vector<256x256xi32>
    %4 = tpu.iota {dimensions = array<i32: 1>} : vector<256x256xi32>
    %c31_i32 = arith.constant 31 : i32
    %5 = vector.broadcast %c31_i32 : i32 to vector<256x256xi32>
    %6 = arith.andi %3, %5 : vector<256x256xi32>
    %c31_i32_4 = arith.constant 31 : i32
    %7 = vector.broadcast %c31_i32_4 : i32 to vector<256x256xi32>
    %8 = arith.andi %4, %7 : vector<256x256xi32>
    %9 = arith.cmpi eq, %6, %8 : vector<256x256xi32>
    %10 = arith.extui %9 : vector<256x256xi1> to vector<256x256xi32>
    %11 = arith.sitofp %10 : vector<256x256xi32> to vector<256x256xf32>
    %12 = vector.broadcast %2 : vector<96x1xf32> to vector<96x256xf32>
    %13 = arith.mulf %1, %12 : vector<96x256xf32>
    %cst = arith.constant dense<0.000000e+00> : vector<256xf32>
    %14 = vector.multi_reduction <add>, %13, %cst [0] : vector<96x256xf32> to vector<256xf32>
    %15 = vector.shape_cast %14 : vector<256xf32> to vector<1x256xf32>
    %16 = arith.mulf %13, %13 : vector<96x256xf32>
    %cst_5 = arith.constant dense<0.000000e+00> : vector<256xf32>
    %17 = vector.multi_reduction <add>, %16, %cst_5 [0] : vector<96x256xf32> to vector<256xf32>
    %18 = vector.shape_cast %17 : vector<256xf32> to vector<1x256xf32>
    %19 = tpu.concatenate %15, %18 in 0 : vector<1x256xf32>, vector<1x256xf32> -> vector<2x256xf32>
    %cst_6 = arith.constant dense<0.000000e+00> : vector<2x256xf32>
    %20 = tpu.matmul %19, %11, %cst_6 {dimension_numbers = #tpu.dot_dimension_numbers<[1], [0], [0], [1], [0, 0, 1, 1], [], []>} : vector<2x256xf32>, vector<256x256xf32>, vector<2x256xf32> -> vector<2x256xf32>
    %21 = vector.extract_strided_slice %20 {offsets = [0, 0], sizes = [1, 256], strides = [1, 1]} : vector<2x256xf32> to vector<1x256xf32>
    %cst_7 = arith.constant 0.001953125 : f32
    %22 = vector.broadcast %cst_7 : f32 to vector<1x256xf32>
    %23 = arith.mulf %21, %22 : vector<1x256xf32>
    %24 = vector.extract_strided_slice %20 {offsets = [1, 0], sizes = [1, 256], strides = [1, 1]} : vector<2x256xf32> to vector<1x256xf32>
    %cst_8 = arith.constant 0.001953125 : f32
    %25 = vector.broadcast %cst_8 : f32 to vector<1x256xf32>
    %26 = arith.mulf %24, %25 : vector<1x256xf32>
    %27 = arith.mulf %23, %23 : vector<1x256xf32>
    %28 = arith.subf %26, %27 : vector<1x256xf32>
    %29 = vector.broadcast %23 : vector<1x256xf32> to vector<96x256xf32>
    %30 = arith.subf %1, %29 : vector<96x256xf32>
    %cst_9 = arith.constant 9.99999974E-6 : f32
    %31 = vector.broadcast %cst_9 : f32 to vector<1x256xf32>
    %32 = arith.addf %28, %31 : vector<1x256xf32>
    %33 = math.rsqrt %32 : vector<1x256xf32>
    %34 = vector.broadcast %33 : vector<1x256xf32> to vector<96x256xf32>
    %35 = arith.mulf %30, %34 : vector<96x256xf32>
    %36 = vector.broadcast %2 : vector<96x1xf32> to vector<96x256xf32>
    %37 = arith.mulf %35, %36 : vector<96x256xf32>
    %cst_10 = arith.constant dense<0.000000e+00> : vector<256xf32>
    %38 = vector.multi_reduction <add>, %37, %cst_10 [0] : vector<96x256xf32> to vector<256xf32>
    %39 = vector.shape_cast %38 : vector<256xf32> to vector<1x256xf32>
    %40 = arith.mulf %37, %37 : vector<96x256xf32>
    %cst_11 = arith.constant dense<0.000000e+00> : vector<256xf32>
    %41 = vector.multi_reduction <add>, %40, %cst_11 [0] : vector<96x256xf32> to vector<256xf32>
    %42 = vector.shape_cast %41 : vector<256xf32> to vector<1x256xf32>
    %43 = tpu.concatenate %39, %42 in 0 : vector<1x256xf32>, vector<1x256xf32> -> vector<2x256xf32>
    %cst_12 = arith.constant dense<0.000000e+00> : vector<2x256xf32>
    %44 = tpu.matmul %43, %11, %cst_12 {dimension_numbers = #tpu.dot_dimension_numbers<[1], [0], [0], [1], [0, 0, 1, 1], [], []>} : vector<2x256xf32>, vector<256x256xf32>, vector<2x256xf32> -> vector<2x256xf32>
    %45 = vector.extract_strided_slice %44 {offsets = [0, 0], sizes = [1, 256], strides = [1, 1]} : vector<2x256xf32> to vector<1x256xf32>
    %cst_13 = arith.constant 0.001953125 : f32
    %46 = vector.broadcast %cst_13 : f32 to vector<1x256xf32>
    %47 = arith.mulf %45, %46 : vector<1x256xf32>
    %48 = vector.extract_strided_slice %44 {offsets = [1, 0], sizes = [1, 256], strides = [1, 1]} : vector<2x256xf32> to vector<1x256xf32>
    %cst_14 = arith.constant 0.001953125 : f32
    %49 = vector.broadcast %cst_14 : f32 to vector<1x256xf32>
    %50 = arith.mulf %48, %49 : vector<1x256xf32>
    %51 = arith.mulf %47, %47 : vector<1x256xf32>
    %52 = arith.subf %50, %51 : vector<1x256xf32>
    %53 = vector.broadcast %47 : vector<1x256xf32> to vector<96x256xf32>
    %54 = arith.subf %35, %53 : vector<96x256xf32>
    %cst_15 = arith.constant 9.99999974E-6 : f32
    %55 = vector.broadcast %cst_15 : f32 to vector<1x256xf32>
    %56 = arith.addf %52, %55 : vector<1x256xf32>
    %57 = math.rsqrt %56 : vector<1x256xf32>
    %58 = vector.broadcast %57 : vector<1x256xf32> to vector<96x256xf32>
    %59 = arith.mulf %54, %58 : vector<96x256xf32>
    %60 = arith.truncf %59 : vector<96x256xf32> to vector<96x256xbf16>
    %c0_16 = arith.constant 0 : index
    %c0_17 = arith.constant 0 : index
    %61 = vector.load %arg3[%c0_16, %c0_17] : memref<256x128xbf16, #tpu.memory_space<vmem>>, vector<256x128xbf16>
    %cst_18 = arith.constant dense<0.000000e+00> : vector<96x128xf32>
    %62 = tpu.matmul %60, %61, %cst_18 {dimension_numbers = #tpu.dot_dimension_numbers<[1], [0], [0], [1], [0, 0, 1, 1], [], []>} : vector<96x256xbf16>, vector<256x128xbf16>, vector<96x128xf32> -> vector<96x128xf32>
    %c0_19 = arith.constant 0 : index
    %c0_20 = arith.constant 0 : index
    %63 = vector.load %arg4[%c0_19, %c0_20] : memref<1x128xf32, #tpu.memory_space<vmem>>, vector<1x128xf32>
    %64 = vector.broadcast %63 : vector<1x128xf32> to vector<96x128xf32>
    %65 = arith.addf %62, %64 : vector<96x128xf32>
    %cst_21 = arith.constant 5.000000e-01 : f32
    %66 = vector.broadcast %cst_21 : f32 to vector<96x128xf32>
    %67 = arith.mulf %66, %65 : vector<96x128xf32>
    %cst_22 = arith.constant 0.707106769 : f32
    %68 = vector.broadcast %cst_22 : f32 to vector<96x128xf32>
    %69 = arith.mulf %65, %68 : vector<96x128xf32>
    %cst_23 = arith.constant 0.000000e+00 : f32
    %70 = vector.broadcast %cst_23 : f32 to vector<96x128xf32>
    %71 = arith.cmpf oge, %69, %70 : vector<96x128xf32>
    %cst_24 = arith.constant 1.000000e+00 : f32
    %cst_25 = arith.constant -1.000000e+00 : f32
    %72 = vector.broadcast %cst_24 : f32 to vector<96x128xf32>
    %73 = vector.broadcast %cst_25 : f32 to vector<96x128xf32>
    %74 = arith.select %71, %72, %73 : vector<96x128xi1>, vector<96x128xf32>
    %75 = math.absf %69 : vector<96x128xf32>
    %cst_26 = arith.constant 0.327591091 : f32
    %76 = vector.broadcast %cst_26 : f32 to vector<96x128xf32>
    %77 = arith.mulf %76, %75 : vector<96x128xf32>
    %cst_27 = arith.constant 1.000000e+00 : f32
    %78 = vector.broadcast %cst_27 : f32 to vector<96x128xf32>
    %79 = arith.addf %78, %77 : vector<96x128xf32>
    %cst_28 = arith.constant 1.000000e+00 : f32
    %80 = vector.broadcast %cst_28 : f32 to vector<96x128xf32>
    %81 = arith.divf %80, %79 : vector<96x128xf32>
    %cst_29 = arith.constant 1.06140542 : f32
    %82 = vector.broadcast %cst_29 : f32 to vector<96x128xf32>
    %83 = arith.mulf %82, %81 : vector<96x128xf32>
    %cst_30 = arith.constant -1.45315206 : f32
    %84 = vector.broadcast %cst_30 : f32 to vector<96x128xf32>
    %85 = arith.addf %83, %84 : vector<96x128xf32>
    %86 = arith.mulf %85, %81 : vector<96x128xf32>
    %cst_31 = arith.constant 1.42141378 : f32
    %87 = vector.broadcast %cst_31 : f32 to vector<96x128xf32>
    %88 = arith.addf %86, %87 : vector<96x128xf32>
    %89 = arith.mulf %88, %81 : vector<96x128xf32>
    %cst_32 = arith.constant -0.284496725 : f32
    %90 = vector.broadcast %cst_32 : f32 to vector<96x128xf32>
    %91 = arith.addf %89, %90 : vector<96x128xf32>
    %92 = arith.mulf %91, %81 : vector<96x128xf32>
    %cst_33 = arith.constant 0.254829586 : f32
    %93 = vector.broadcast %cst_33 : f32 to vector<96x128xf32>
    %94 = arith.addf %92, %93 : vector<96x128xf32>
    %95 = arith.mulf %94, %81 : vector<96x128xf32>
    %cst_34 = arith.constant 0.000000e+00 : f32
    %96 = vector.broadcast %cst_34 : f32 to vector<96x128xf32>
    %97 = arith.subf %96, %75 : vector<96x128xf32>
    %98 = arith.mulf %97, %75 : vector<96x128xf32>
    %99 = math.exp %98 : vector<96x128xf32>
    %100 = arith.mulf %95, %99 : vector<96x128xf32>
    %cst_35 = arith.constant 1.000000e+00 : f32
    %101 = vector.broadcast %cst_35 : f32 to vector<96x128xf32>
    %102 = arith.subf %101, %100 : vector<96x128xf32>
    %103 = arith.mulf %74, %102 : vector<96x128xf32>
    %cst_36 = arith.constant 1.000000e+00 : f32
    %104 = vector.broadcast %cst_36 : f32 to vector<96x128xf32>
    %105 = arith.addf %104, %103 : vector<96x128xf32>
    %106 = arith.mulf %67, %105 : vector<96x128xf32>
    %107 = arith.truncf %106 : vector<96x128xf32> to vector<96x128xbf16>
    %c0_37 = arith.constant 0 : index
    %c0_38 = arith.constant 0 : index
    %108 = vector.load %arg5[%c0_37, %c0_38] : memref<128x128xbf16, #tpu.memory_space<vmem>>, vector<128x128xbf16>
    %cst_39 = arith.constant dense<0.000000e+00> : vector<96x128xf32>
    %109 = tpu.matmul %107, %108, %cst_39 {dimension_numbers = #tpu.dot_dimension_numbers<[1], [0], [0], [1], [0, 0, 1, 1], [], []>} : vector<96x128xbf16>, vector<128x128xbf16>, vector<96x128xf32> -> vector<96x128xf32>
    %c0_40 = arith.constant 0 : index
    %c0_41 = arith.constant 0 : index
    %110 = vector.load %arg6[%c0_40, %c0_41] : memref<1x128xf32, #tpu.memory_space<vmem>>, vector<1x128xf32>
    %111 = vector.broadcast %110 : vector<1x128xf32> to vector<96x128xf32>
    %112 = arith.addf %109, %111 : vector<96x128xf32>
    %cst_42 = arith.constant 5.000000e-01 : f32
    %113 = vector.broadcast %cst_42 : f32 to vector<96x128xf32>
    %114 = arith.mulf %113, %112 : vector<96x128xf32>
    %cst_43 = arith.constant 0.707106769 : f32
    %115 = vector.broadcast %cst_43 : f32 to vector<96x128xf32>
    %116 = arith.mulf %112, %115 : vector<96x128xf32>
    %cst_44 = arith.constant 0.000000e+00 : f32
    %117 = vector.broadcast %cst_44 : f32 to vector<96x128xf32>
    %118 = arith.cmpf oge, %116, %117 : vector<96x128xf32>
    %cst_45 = arith.constant 1.000000e+00 : f32
    %cst_46 = arith.constant -1.000000e+00 : f32
    %119 = vector.broadcast %cst_45 : f32 to vector<96x128xf32>
    %120 = vector.broadcast %cst_46 : f32 to vector<96x128xf32>
    %121 = arith.select %118, %119, %120 : vector<96x128xi1>, vector<96x128xf32>
    %122 = math.absf %116 : vector<96x128xf32>
    %cst_47 = arith.constant 0.327591091 : f32
    %123 = vector.broadcast %cst_47 : f32 to vector<96x128xf32>
    %124 = arith.mulf %123, %122 : vector<96x128xf32>
    %cst_48 = arith.constant 1.000000e+00 : f32
    %125 = vector.broadcast %cst_48 : f32 to vector<96x128xf32>
    %126 = arith.addf %125, %124 : vector<96x128xf32>
    %cst_49 = arith.constant 1.000000e+00 : f32
    %127 = vector.broadcast %cst_49 : f32 to vector<96x128xf32>
    %128 = arith.divf %127, %126 : vector<96x128xf32>
    %cst_50 = arith.constant 1.06140542 : f32
    %129 = vector.broadcast %cst_50 : f32 to vector<96x128xf32>
    %130 = arith.mulf %129, %128 : vector<96x128xf32>
    %cst_51 = arith.constant -1.45315206 : f32
    %131 = vector.broadcast %cst_51 : f32 to vector<96x128xf32>
    %132 = arith.addf %130, %131 : vector<96x128xf32>
    %133 = arith.mulf %132, %128 : vector<96x128xf32>
    %cst_52 = arith.constant 1.42141378 : f32
    %134 = vector.broadcast %cst_52 : f32 to vector<96x128xf32>
    %135 = arith.addf %133, %134 : vector<96x128xf32>
    %136 = arith.mulf %135, %128 : vector<96x128xf32>
    %cst_53 = arith.constant -0.284496725 : f32
    %137 = vector.broadcast %cst_53 : f32 to vector<96x128xf32>
    %138 = arith.addf %136, %137 : vector<96x128xf32>
    %139 = arith.mulf %138, %128 : vector<96x128xf32>
    %cst_54 = arith.constant 0.254829586 : f32
    %140 = vector.broadcast %cst_54 : f32 to vector<96x128xf32>
    %141 = arith.addf %139, %140 : vector<96x128xf32>
    %142 = arith.mulf %141, %128 : vector<96x128xf32>
    %cst_55 = arith.constant 0.000000e+00 : f32
    %143 = vector.broadcast %cst_55 : f32 to vector<96x128xf32>
    %144 = arith.subf %143, %122 : vector<96x128xf32>
    %145 = arith.mulf %144, %122 : vector<96x128xf32>
    %146 = math.exp %145 : vector<96x128xf32>
    %147 = arith.mulf %142, %146 : vector<96x128xf32>
    %cst_56 = arith.constant 1.000000e+00 : f32
    %148 = vector.broadcast %cst_56 : f32 to vector<96x128xf32>
    %149 = arith.subf %148, %147 : vector<96x128xf32>
    %150 = arith.mulf %121, %149 : vector<96x128xf32>
    %cst_57 = arith.constant 1.000000e+00 : f32
    %151 = vector.broadcast %cst_57 : f32 to vector<96x128xf32>
    %152 = arith.addf %151, %150 : vector<96x128xf32>
    %153 = arith.mulf %114, %152 : vector<96x128xf32>
    %154 = vector.extract_strided_slice %106 {offsets = [83, 0], sizes = [13, 128], strides = [1, 1]} : vector<96x128xf32> to vector<13x128xf32>
    %155 = vector.extract_strided_slice %106 {offsets = [0, 0], sizes = [83, 128], strides = [1, 1]} : vector<96x128xf32> to vector<83x128xf32>
    %156 = tpu.concatenate %154, %155 in 0 : vector<13x128xf32>, vector<83x128xf32> -> vector<96x128xf32>
    %157 = vector.extract_strided_slice %106 {offsets = [84, 0], sizes = [12, 128], strides = [1, 1]} : vector<96x128xf32> to vector<12x128xf32>
    %158 = vector.extract_strided_slice %106 {offsets = [0, 0], sizes = [84, 128], strides = [1, 1]} : vector<96x128xf32> to vector<84x128xf32>
    %159 = tpu.concatenate %157, %158 in 0 : vector<12x128xf32>, vector<84x128xf32> -> vector<96x128xf32>
    %160 = vector.extract_strided_slice %106 {offsets = [85, 0], sizes = [11, 128], strides = [1, 1]} : vector<96x128xf32> to vector<11x128xf32>
    %161 = vector.extract_strided_slice %106 {offsets = [0, 0], sizes = [85, 128], strides = [1, 1]} : vector<96x128xf32> to vector<85x128xf32>
    %162 = tpu.concatenate %160, %161 in 0 : vector<11x128xf32>, vector<85x128xf32> -> vector<96x128xf32>
    %163 = vector.extract_strided_slice %106 {offsets = [95, 0], sizes = [1, 128], strides = [1, 1]} : vector<96x128xf32> to vector<1x128xf32>
    %164 = vector.extract_strided_slice %106 {offsets = [0, 0], sizes = [95, 128], strides = [1, 1]} : vector<96x128xf32> to vector<95x128xf32>
    %165 = tpu.concatenate %163, %164 in 0 : vector<1x128xf32>, vector<95x128xf32> -> vector<96x128xf32>
    %166 = vector.extract_strided_slice %106 {offsets = [1, 0], sizes = [95, 128], strides = [1, 1]} : vector<96x128xf32> to vector<95x128xf32>
    %167 = vector.extract_strided_slice %106 {offsets = [0, 0], sizes = [1, 128], strides = [1, 1]} : vector<96x128xf32> to vector<1x128xf32>
    %168 = tpu.concatenate %166, %167 in 0 : vector<95x128xf32>, vector<1x128xf32> -> vector<96x128xf32>
    %169 = vector.extract_strided_slice %106 {offsets = [11, 0], sizes = [85, 128], strides = [1, 1]} : vector<96x128xf32> to vector<85x128xf32>
    %170 = vector.extract_strided_slice %106 {offsets = [0, 0], sizes = [11, 128], strides = [1, 1]} : vector<96x128xf32> to vector<11x128xf32>
    %171 = tpu.concatenate %169, %170 in 0 : vector<85x128xf32>, vector<11x128xf32> -> vector<96x128xf32>
    %172 = vector.extract_strided_slice %106 {offsets = [12, 0], sizes = [84, 128], strides = [1, 1]} : vector<96x128xf32> to vector<84x128xf32>
    %173 = vector.extract_strided_slice %106 {offsets = [0, 0], sizes = [12, 128], strides = [1, 1]} : vector<96x128xf32> to vector<12x128xf32>
    %174 = tpu.concatenate %172, %173 in 0 : vector<84x128xf32>, vector<12x128xf32> -> vector<96x128xf32>
    %175 = vector.extract_strided_slice %106 {offsets = [13, 0], sizes = [83, 128], strides = [1, 1]} : vector<96x128xf32> to vector<83x128xf32>
    %176 = vector.extract_strided_slice %106 {offsets = [0, 0], sizes = [13, 128], strides = [1, 1]} : vector<96x128xf32> to vector<13x128xf32>
    %177 = tpu.concatenate %175, %176 in 0 : vector<83x128xf32>, vector<13x128xf32> -> vector<96x128xf32>
    %178 = tpu.concatenate %156, %159, %162, %165, %106, %168, %171, %174, %177 in 1 : vector<96x128xf32>, vector<96x128xf32>, vector<96x128xf32>, vector<96x128xf32>, vector<96x128xf32>, vector<96x128xf32>, vector<96x128xf32>, vector<96x128xf32>, vector<96x128xf32> -> vector<96x1152xf32>
    %179 = arith.truncf %178 : vector<96x1152xf32> to vector<96x1152xbf16>
    %c0_58 = arith.constant 0 : index
    %c0_59 = arith.constant 0 : index
    %180 = vector.load %arg7[%c0_58, %c0_59] : memref<1152x128xbf16, #tpu.memory_space<vmem>>, vector<1152x128xbf16>
    %cst_60 = arith.constant dense<0.000000e+00> : vector<96x128xf32>
    %181 = tpu.matmul %179, %180, %cst_60 {dimension_numbers = #tpu.dot_dimension_numbers<[1], [0], [0], [1], [0, 0, 1, 1], [], []>} : vector<96x1152xbf16>, vector<1152x128xbf16>, vector<96x128xf32> -> vector<96x128xf32>
    %c0_61 = arith.constant 0 : index
    %c0_62 = arith.constant 0 : index
    %182 = vector.load %arg8[%c0_61, %c0_62] : memref<1x128xf32, #tpu.memory_space<vmem>>, vector<1x128xf32>
    %183 = vector.broadcast %182 : vector<1x128xf32> to vector<96x128xf32>
    %184 = arith.addf %181, %183 : vector<96x128xf32>
    %cst_63 = arith.constant 5.000000e-01 : f32
    %185 = vector.broadcast %cst_63 : f32 to vector<96x128xf32>
    %186 = arith.mulf %185, %184 : vector<96x128xf32>
    %cst_64 = arith.constant 0.707106769 : f32
    %187 = vector.broadcast %cst_64 : f32 to vector<96x128xf32>
    %188 = arith.mulf %184, %187 : vector<96x128xf32>
    %cst_65 = arith.constant 0.000000e+00 : f32
    %189 = vector.broadcast %cst_65 : f32 to vector<96x128xf32>
    %190 = arith.cmpf oge, %188, %189 : vector<96x128xf32>
    %cst_66 = arith.constant 1.000000e+00 : f32
    %cst_67 = arith.constant -1.000000e+00 : f32
    %191 = vector.broadcast %cst_66 : f32 to vector<96x128xf32>
    %192 = vector.broadcast %cst_67 : f32 to vector<96x128xf32>
    %193 = arith.select %190, %191, %192 : vector<96x128xi1>, vector<96x128xf32>
    %194 = math.absf %188 : vector<96x128xf32>
    %cst_68 = arith.constant 0.327591091 : f32
    %195 = vector.broadcast %cst_68 : f32 to vector<96x128xf32>
    %196 = arith.mulf %195, %194 : vector<96x128xf32>
    %cst_69 = arith.constant 1.000000e+00 : f32
    %197 = vector.broadcast %cst_69 : f32 to vector<96x128xf32>
    %198 = arith.addf %197, %196 : vector<96x128xf32>
    %cst_70 = arith.constant 1.000000e+00 : f32
    %199 = vector.broadcast %cst_70 : f32 to vector<96x128xf32>
    %200 = arith.divf %199, %198 : vector<96x128xf32>
    %cst_71 = arith.constant 1.06140542 : f32
    %201 = vector.broadcast %cst_71 : f32 to vector<96x128xf32>
    %202 = arith.mulf %201, %200 : vector<96x128xf32>
    %cst_72 = arith.constant -1.45315206 : f32
    %203 = vector.broadcast %cst_72 : f32 to vector<96x128xf32>
    %204 = arith.addf %202, %203 : vector<96x128xf32>
    %205 = arith.mulf %204, %200 : vector<96x128xf32>
    %cst_73 = arith.constant 1.42141378 : f32
    %206 = vector.broadcast %cst_73 : f32 to vector<96x128xf32>
    %207 = arith.addf %205, %206 : vector<96x128xf32>
    %208 = arith.mulf %207, %200 : vector<96x128xf32>
    %cst_74 = arith.constant -0.284496725 : f32
    %209 = vector.broadcast %cst_74 : f32 to vector<96x128xf32>
    %210 = arith.addf %208, %209 : vector<96x128xf32>
    %211 = arith.mulf %210, %200 : vector<96x128xf32>
    %cst_75 = arith.constant 0.254829586 : f32
    %212 = vector.broadcast %cst_75 : f32 to vector<96x128xf32>
    %213 = arith.addf %211, %212 : vector<96x128xf32>
    %214 = arith.mulf %213, %200 : vector<96x128xf32>
    %cst_76 = arith.constant 0.000000e+00 : f32
    %215 = vector.broadcast %cst_76 : f32 to vector<96x128xf32>
    %216 = arith.subf %215, %194 : vector<96x128xf32>
    %217 = arith.mulf %216, %194 : vector<96x128xf32>
    %218 = math.exp %217 : vector<96x128xf32>
    %219 = arith.mulf %214, %218 : vector<96x128xf32>
    %cst_77 = arith.constant 1.000000e+00 : f32
    %220 = vector.broadcast %cst_77 : f32 to vector<96x128xf32>
    %221 = arith.subf %220, %219 : vector<96x128xf32>
    %222 = arith.mulf %193, %221 : vector<96x128xf32>
    %cst_78 = arith.constant 1.000000e+00 : f32
    %223 = vector.broadcast %cst_78 : f32 to vector<96x128xf32>
    %224 = arith.addf %223, %222 : vector<96x128xf32>
    %225 = arith.mulf %186, %224 : vector<96x128xf32>
    %226 = vector.extract_strided_slice %106 {offsets = [70, 0], sizes = [26, 128], strides = [1, 1]} : vector<96x128xf32> to vector<26x128xf32>
    %227 = vector.extract_strided_slice %106 {offsets = [0, 0], sizes = [70, 128], strides = [1, 1]} : vector<96x128xf32> to vector<70x128xf32>
    %228 = tpu.concatenate %226, %227 in 0 : vector<26x128xf32>, vector<70x128xf32> -> vector<96x128xf32>
    %229 = vector.extract_strided_slice %106 {offsets = [71, 0], sizes = [25, 128], strides = [1, 1]} : vector<96x128xf32> to vector<25x128xf32>
    %230 = vector.extract_strided_slice %106 {offsets = [0, 0], sizes = [71, 128], strides = [1, 1]} : vector<96x128xf32> to vector<71x128xf32>
    %231 = tpu.concatenate %229, %230 in 0 : vector<25x128xf32>, vector<71x128xf32> -> vector<96x128xf32>
    %232 = vector.extract_strided_slice %106 {offsets = [72, 0], sizes = [24, 128], strides = [1, 1]} : vector<96x128xf32> to vector<24x128xf32>
    %233 = vector.extract_strided_slice %106 {offsets = [0, 0], sizes = [72, 128], strides = [1, 1]} : vector<96x128xf32> to vector<72x128xf32>
    %234 = tpu.concatenate %232, %233 in 0 : vector<24x128xf32>, vector<72x128xf32> -> vector<96x128xf32>
    %235 = vector.extract_strided_slice %106 {offsets = [73, 0], sizes = [23, 128], strides = [1, 1]} : vector<96x128xf32> to vector<23x128xf32>
    %236 = vector.extract_strided_slice %106 {offsets = [0, 0], sizes = [73, 128], strides = [1, 1]} : vector<96x128xf32> to vector<73x128xf32>
    %237 = tpu.concatenate %235, %236 in 0 : vector<23x128xf32>, vector<73x128xf32> -> vector<96x128xf32>
    %238 = vector.extract_strided_slice %106 {offsets = [74, 0], sizes = [22, 128], strides = [1, 1]} : vector<96x128xf32> to vector<22x128xf32>
    %239 = vector.extract_strided_slice %106 {offsets = [0, 0], sizes = [74, 128], strides = [1, 1]} : vector<96x128xf32> to vector<74x128xf32>
    %240 = tpu.concatenate %238, %239 in 0 : vector<22x128xf32>, vector<74x128xf32> -> vector<96x128xf32>
    %241 = vector.extract_strided_slice %106 {offsets = [82, 0], sizes = [14, 128], strides = [1, 1]} : vector<96x128xf32> to vector<14x128xf32>
    %242 = vector.extract_strided_slice %106 {offsets = [0, 0], sizes = [82, 128], strides = [1, 1]} : vector<96x128xf32> to vector<82x128xf32>
    %243 = tpu.concatenate %241, %242 in 0 : vector<14x128xf32>, vector<82x128xf32> -> vector<96x128xf32>
    %244 = vector.extract_strided_slice %106 {offsets = [83, 0], sizes = [13, 128], strides = [1, 1]} : vector<96x128xf32> to vector<13x128xf32>
    %245 = vector.extract_strided_slice %106 {offsets = [0, 0], sizes = [83, 128], strides = [1, 1]} : vector<96x128xf32> to vector<83x128xf32>
    %246 = tpu.concatenate %244, %245 in 0 : vector<13x128xf32>, vector<83x128xf32> -> vector<96x128xf32>
    %247 = vector.extract_strided_slice %106 {offsets = [84, 0], sizes = [12, 128], strides = [1, 1]} : vector<96x128xf32> to vector<12x128xf32>
    %248 = vector.extract_strided_slice %106 {offsets = [0, 0], sizes = [84, 128], strides = [1, 1]} : vector<96x128xf32> to vector<84x128xf32>
    %249 = tpu.concatenate %247, %248 in 0 : vector<12x128xf32>, vector<84x128xf32> -> vector<96x128xf32>
    %250 = vector.extract_strided_slice %106 {offsets = [85, 0], sizes = [11, 128], strides = [1, 1]} : vector<96x128xf32> to vector<11x128xf32>
    %251 = vector.extract_strided_slice %106 {offsets = [0, 0], sizes = [85, 128], strides = [1, 1]} : vector<96x128xf32> to vector<85x128xf32>
    %252 = tpu.concatenate %250, %251 in 0 : vector<11x128xf32>, vector<85x128xf32> -> vector<96x128xf32>
    %253 = vector.extract_strided_slice %106 {offsets = [86, 0], sizes = [10, 128], strides = [1, 1]} : vector<96x128xf32> to vector<10x128xf32>
    %254 = vector.extract_strided_slice %106 {offsets = [0, 0], sizes = [86, 128], strides = [1, 1]} : vector<96x128xf32> to vector<86x128xf32>
    %255 = tpu.concatenate %253, %254 in 0 : vector<10x128xf32>, vector<86x128xf32> -> vector<96x128xf32>
    %256 = vector.extract_strided_slice %106 {offsets = [94, 0], sizes = [2, 128], strides = [1, 1]} : vector<96x128xf32> to vector<2x128xf32>
    %257 = vector.extract_strided_slice %106 {offsets = [0, 0], sizes = [94, 128], strides = [1, 1]} : vector<96x128xf32> to vector<94x128xf32>
    %258 = tpu.concatenate %256, %257 in 0 : vector<2x128xf32>, vector<94x128xf32> -> vector<96x128xf32>
    %259 = vector.extract_strided_slice %106 {offsets = [95, 0], sizes = [1, 128], strides = [1, 1]} : vector<96x128xf32> to vector<1x128xf32>
    %260 = vector.extract_strided_slice %106 {offsets = [0, 0], sizes = [95, 128], strides = [1, 1]} : vector<96x128xf32> to vector<95x128xf32>
    %261 = tpu.concatenate %259, %260 in 0 : vector<1x128xf32>, vector<95x128xf32> -> vector<96x128xf32>
    %262 = vector.extract_strided_slice %106 {offsets = [1, 0], sizes = [95, 128], strides = [1, 1]} : vector<96x128xf32> to vector<95x128xf32>
    %263 = vector.extract_strided_slice %106 {offsets = [0, 0], sizes = [1, 128], strides = [1, 1]} : vector<96x128xf32> to vector<1x128xf32>
    %264 = tpu.concatenate %262, %263 in 0 : vector<95x128xf32>, vector<1x128xf32> -> vector<96x128xf32>
    %265 = vector.extract_strided_slice %106 {offsets = [2, 0], sizes = [94, 128], strides = [1, 1]} : vector<96x128xf32> to vector<94x128xf32>
    %266 = vector.extract_strided_slice %106 {offsets = [0, 0], sizes = [2, 128], strides = [1, 1]} : vector<96x128xf32> to vector<2x128xf32>
    %267 = tpu.concatenate %265, %266 in 0 : vector<94x128xf32>, vector<2x128xf32> -> vector<96x128xf32>
    %268 = vector.extract_strided_slice %106 {offsets = [10, 0], sizes = [86, 128], strides = [1, 1]} : vector<96x128xf32> to vector<86x128xf32>
    %269 = vector.extract_strided_slice %106 {offsets = [0, 0], sizes = [10, 128], strides = [1, 1]} : vector<96x128xf32> to vector<10x128xf32>
    %270 = tpu.concatenate %268, %269 in 0 : vector<86x128xf32>, vector<10x128xf32> -> vector<96x128xf32>
    %271 = vector.extract_strided_slice %106 {offsets = [11, 0], sizes = [85, 128], strides = [1, 1]} : vector<96x128xf32> to vector<85x128xf32>
    %272 = vector.extract_strided_slice %106 {offsets = [0, 0], sizes = [11, 128], strides = [1, 1]} : vector<96x128xf32> to vector<11x128xf32>
    %273 = tpu.concatenate %271, %272 in 0 : vector<85x128xf32>, vector<11x128xf32> -> vector<96x128xf32>
    %274 = vector.extract_strided_slice %106 {offsets = [12, 0], sizes = [84, 128], strides = [1, 1]} : vector<96x128xf32> to vector<84x128xf32>
    %275 = vector.extract_strided_slice %106 {offsets = [0, 0], sizes = [12, 128], strides = [1, 1]} : vector<96x128xf32> to vector<12x128xf32>
    %276 = tpu.concatenate %274, %275 in 0 : vector<84x128xf32>, vector<12x128xf32> -> vector<96x128xf32>
    %277 = vector.extract_strided_slice %106 {offsets = [13, 0], sizes = [83, 128], strides = [1, 1]} : vector<96x128xf32> to vector<83x128xf32>
    %278 = vector.extract_strided_slice %106 {offsets = [0, 0], sizes = [13, 128], strides = [1, 1]} : vector<96x128xf32> to vector<13x128xf32>
    %279 = tpu.concatenate %277, %278 in 0 : vector<83x128xf32>, vector<13x128xf32> -> vector<96x128xf32>
    %280 = vector.extract_strided_slice %106 {offsets = [14, 0], sizes = [82, 128], strides = [1, 1]} : vector<96x128xf32> to vector<82x128xf32>
    %281 = vector.extract_strided_slice %106 {offsets = [0, 0], sizes = [14, 128], strides = [1, 1]} : vector<96x128xf32> to vector<14x128xf32>
    %282 = tpu.concatenate %280, %281 in 0 : vector<82x128xf32>, vector<14x128xf32> -> vector<96x128xf32>
    %283 = vector.extract_strided_slice %106 {offsets = [22, 0], sizes = [74, 128], strides = [1, 1]} : vector<96x128xf32> to vector<74x128xf32>
    %284 = vector.extract_strided_slice %106 {offsets = [0, 0], sizes = [22, 128], strides = [1, 1]} : vector<96x128xf32> to vector<22x128xf32>
    %285 = tpu.concatenate %283, %284 in 0 : vector<74x128xf32>, vector<22x128xf32> -> vector<96x128xf32>
    %286 = vector.extract_strided_slice %106 {offsets = [23, 0], sizes = [73, 128], strides = [1, 1]} : vector<96x128xf32> to vector<73x128xf32>
    %287 = vector.extract_strided_slice %106 {offsets = [0, 0], sizes = [23, 128], strides = [1, 1]} : vector<96x128xf32> to vector<23x128xf32>
    %288 = tpu.concatenate %286, %287 in 0 : vector<73x128xf32>, vector<23x128xf32> -> vector<96x128xf32>
    %289 = vector.extract_strided_slice %106 {offsets = [24, 0], sizes = [72, 128], strides = [1, 1]} : vector<96x128xf32> to vector<72x128xf32>
    %290 = vector.extract_strided_slice %106 {offsets = [0, 0], sizes = [24, 128], strides = [1, 1]} : vector<96x128xf32> to vector<24x128xf32>
    %291 = tpu.concatenate %289, %290 in 0 : vector<72x128xf32>, vector<24x128xf32> -> vector<96x128xf32>
    %292 = vector.extract_strided_slice %106 {offsets = [25, 0], sizes = [71, 128], strides = [1, 1]} : vector<96x128xf32> to vector<71x128xf32>
    %293 = vector.extract_strided_slice %106 {offsets = [0, 0], sizes = [25, 128], strides = [1, 1]} : vector<96x128xf32> to vector<25x128xf32>
    %294 = tpu.concatenate %292, %293 in 0 : vector<71x128xf32>, vector<25x128xf32> -> vector<96x128xf32>
    %295 = vector.extract_strided_slice %106 {offsets = [26, 0], sizes = [70, 128], strides = [1, 1]} : vector<96x128xf32> to vector<70x128xf32>
    %296 = vector.extract_strided_slice %106 {offsets = [0, 0], sizes = [26, 128], strides = [1, 1]} : vector<96x128xf32> to vector<26x128xf32>
    %297 = tpu.concatenate %295, %296 in 0 : vector<70x128xf32>, vector<26x128xf32> -> vector<96x128xf32>
    %298 = tpu.concatenate %228, %231, %234, %237, %240, %243, %246, %249, %252, %255, %258, %261, %106, %264, %267, %270 in 1 : vector<96x128xf32>, vector<96x128xf32>, vector<96x128xf32>, vector<96x128xf32>, vector<96x128xf32>, vector<96x128xf32>, vector<96x128xf32>, vector<96x128xf32>, vector<96x128xf32>, vector<96x128xf32>, vector<96x128xf32>, vector<96x128xf32>, vector<96x128xf32>, vector<96x128xf32>, vector<96x128xf32>, vector<96x128xf32> -> vector<96x2048xf32>
    %299 = tpu.concatenate %273, %276, %279, %282, %285, %288, %291, %294, %297 in 1 : vector<96x128xf32>, vector<96x128xf32>, vector<96x128xf32>, vector<96x128xf32>, vector<96x128xf32>, vector<96x128xf32>, vector<96x128xf32>, vector<96x128xf32>, vector<96x128xf32> -> vector<96x1152xf32>
    %300 = tpu.concatenate %298, %299 in 1 : vector<96x2048xf32>, vector<96x1152xf32> -> vector<96x3200xf32>
    %301 = arith.truncf %300 : vector<96x3200xf32> to vector<96x3200xbf16>
    %c0_79 = arith.constant 0 : index
    %c0_80 = arith.constant 0 : index
    %302 = vector.load %arg9[%c0_79, %c0_80] : memref<3200x128xbf16, #tpu.memory_space<vmem>>, vector<3200x128xbf16>
    %cst_81 = arith.constant dense<0.000000e+00> : vector<96x128xf32>
    %303 = tpu.matmul %301, %302, %cst_81 {dimension_numbers = #tpu.dot_dimension_numbers<[1], [0], [0], [1], [0, 0, 1, 1], [], []>} : vector<96x3200xbf16>, vector<3200x128xbf16>, vector<96x128xf32> -> vector<96x128xf32>
    %c0_82 = arith.constant 0 : index
    %c0_83 = arith.constant 0 : index
    %304 = vector.load %arg10[%c0_82, %c0_83] : memref<1x128xf32, #tpu.memory_space<vmem>>, vector<1x128xf32>
    %305 = vector.broadcast %304 : vector<1x128xf32> to vector<96x128xf32>
    %306 = arith.addf %303, %305 : vector<96x128xf32>
    %cst_84 = arith.constant 5.000000e-01 : f32
    %307 = vector.broadcast %cst_84 : f32 to vector<96x128xf32>
    %308 = arith.mulf %307, %306 : vector<96x128xf32>
    %cst_85 = arith.constant 0.707106769 : f32
    %309 = vector.broadcast %cst_85 : f32 to vector<96x128xf32>
    %310 = arith.mulf %306, %309 : vector<96x128xf32>
    %cst_86 = arith.constant 0.000000e+00 : f32
    %311 = vector.broadcast %cst_86 : f32 to vector<96x128xf32>
    %312 = arith.cmpf oge, %310, %311 : vector<96x128xf32>
    %cst_87 = arith.constant 1.000000e+00 : f32
    %cst_88 = arith.constant -1.000000e+00 : f32
    %313 = vector.broadcast %cst_87 : f32 to vector<96x128xf32>
    %314 = vector.broadcast %cst_88 : f32 to vector<96x128xf32>
    %315 = arith.select %312, %313, %314 : vector<96x128xi1>, vector<96x128xf32>
    %316 = math.absf %310 : vector<96x128xf32>
    %cst_89 = arith.constant 0.327591091 : f32
    %317 = vector.broadcast %cst_89 : f32 to vector<96x128xf32>
    %318 = arith.mulf %317, %316 : vector<96x128xf32>
    %cst_90 = arith.constant 1.000000e+00 : f32
    %319 = vector.broadcast %cst_90 : f32 to vector<96x128xf32>
    %320 = arith.addf %319, %318 : vector<96x128xf32>
    %cst_91 = arith.constant 1.000000e+00 : f32
    %321 = vector.broadcast %cst_91 : f32 to vector<96x128xf32>
    %322 = arith.divf %321, %320 : vector<96x128xf32>
    %cst_92 = arith.constant 1.06140542 : f32
    %323 = vector.broadcast %cst_92 : f32 to vector<96x128xf32>
    %324 = arith.mulf %323, %322 : vector<96x128xf32>
    %cst_93 = arith.constant -1.45315206 : f32
    %325 = vector.broadcast %cst_93 : f32 to vector<96x128xf32>
    %326 = arith.addf %324, %325 : vector<96x128xf32>
    %327 = arith.mulf %326, %322 : vector<96x128xf32>
    %cst_94 = arith.constant 1.42141378 : f32
    %328 = vector.broadcast %cst_94 : f32 to vector<96x128xf32>
    %329 = arith.addf %327, %328 : vector<96x128xf32>
    %330 = arith.mulf %329, %322 : vector<96x128xf32>
    %cst_95 = arith.constant -0.284496725 : f32
    %331 = vector.broadcast %cst_95 : f32 to vector<96x128xf32>
    %332 = arith.addf %330, %331 : vector<96x128xf32>
    %333 = arith.mulf %332, %322 : vector<96x128xf32>
    %cst_96 = arith.constant 0.254829586 : f32
    %334 = vector.broadcast %cst_96 : f32 to vector<96x128xf32>
    %335 = arith.addf %333, %334 : vector<96x128xf32>
    %336 = arith.mulf %335, %322 : vector<96x128xf32>
    %cst_97 = arith.constant 0.000000e+00 : f32
    %337 = vector.broadcast %cst_97 : f32 to vector<96x128xf32>
    %338 = arith.subf %337, %316 : vector<96x128xf32>
    %339 = arith.mulf %338, %316 : vector<96x128xf32>
    %340 = math.exp %339 : vector<96x128xf32>
    %341 = arith.mulf %336, %340 : vector<96x128xf32>
    %cst_98 = arith.constant 1.000000e+00 : f32
    %342 = vector.broadcast %cst_98 : f32 to vector<96x128xf32>
    %343 = arith.subf %342, %341 : vector<96x128xf32>
    %344 = arith.mulf %315, %343 : vector<96x128xf32>
    %cst_99 = arith.constant 1.000000e+00 : f32
    %345 = vector.broadcast %cst_99 : f32 to vector<96x128xf32>
    %346 = arith.addf %345, %344 : vector<96x128xf32>
    %347 = arith.mulf %308, %346 : vector<96x128xf32>
    %348 = tpu.concatenate %153, %225, %347 in 1 : vector<96x128xf32>, vector<96x128xf32>, vector<96x128xf32> -> vector<96x384xf32>
    %349 = arith.truncf %348 : vector<96x384xf32> to vector<96x384xbf16>
    %c0_100 = arith.constant 0 : index
    %c0_101 = arith.constant 0 : index
    %350 = vector.load %arg11[%c0_100, %c0_101] : memref<384x256xbf16, #tpu.memory_space<vmem>>, vector<384x256xbf16>
    %cst_102 = arith.constant dense<0.000000e+00> : vector<96x256xf32>
    %351 = tpu.matmul %349, %350, %cst_102 {dimension_numbers = #tpu.dot_dimension_numbers<[1], [0], [0], [1], [0, 0, 1, 1], [], []>} : vector<96x384xbf16>, vector<384x256xbf16>, vector<96x256xf32> -> vector<96x256xf32>
    %c0_103 = arith.constant 0 : index
    %c0_104 = arith.constant 0 : index
    %352 = vector.load %arg12[%c0_103, %c0_104] : memref<1x256xf32, #tpu.memory_space<vmem>>, vector<1x256xf32>
    %353 = vector.broadcast %352 : vector<1x256xf32> to vector<96x256xf32>
    %354 = arith.addf %351, %353 : vector<96x256xf32>
    %cst_105 = arith.constant 5.000000e-01 : f32
    %355 = vector.broadcast %cst_105 : f32 to vector<96x256xf32>
    %356 = arith.mulf %355, %354 : vector<96x256xf32>
    %cst_106 = arith.constant 0.707106769 : f32
    %357 = vector.broadcast %cst_106 : f32 to vector<96x256xf32>
    %358 = arith.mulf %354, %357 : vector<96x256xf32>
    %cst_107 = arith.constant 0.000000e+00 : f32
    %359 = vector.broadcast %cst_107 : f32 to vector<96x256xf32>
    %360 = arith.cmpf oge, %358, %359 : vector<96x256xf32>
    %cst_108 = arith.constant 1.000000e+00 : f32
    %cst_109 = arith.constant -1.000000e+00 : f32
    %361 = vector.broadcast %cst_108 : f32 to vector<96x256xf32>
    %362 = vector.broadcast %cst_109 : f32 to vector<96x256xf32>
    %363 = arith.select %360, %361, %362 : vector<96x256xi1>, vector<96x256xf32>
    %364 = math.absf %358 : vector<96x256xf32>
    %cst_110 = arith.constant 0.327591091 : f32
    %365 = vector.broadcast %cst_110 : f32 to vector<96x256xf32>
    %366 = arith.mulf %365, %364 : vector<96x256xf32>
    %cst_111 = arith.constant 1.000000e+00 : f32
    %367 = vector.broadcast %cst_111 : f32 to vector<96x256xf32>
    %368 = arith.addf %367, %366 : vector<96x256xf32>
    %cst_112 = arith.constant 1.000000e+00 : f32
    %369 = vector.broadcast %cst_112 : f32 to vector<96x256xf32>
    %370 = arith.divf %369, %368 : vector<96x256xf32>
    %cst_113 = arith.constant 1.06140542 : f32
    %371 = vector.broadcast %cst_113 : f32 to vector<96x256xf32>
    %372 = arith.mulf %371, %370 : vector<96x256xf32>
    %cst_114 = arith.constant -1.45315206 : f32
    %373 = vector.broadcast %cst_114 : f32 to vector<96x256xf32>
    %374 = arith.addf %372, %373 : vector<96x256xf32>
    %375 = arith.mulf %374, %370 : vector<96x256xf32>
    %cst_115 = arith.constant 1.42141378 : f32
    %376 = vector.broadcast %cst_115 : f32 to vector<96x256xf32>
    %377 = arith.addf %375, %376 : vector<96x256xf32>
    %378 = arith.mulf %377, %370 : vector<96x256xf32>
    %cst_116 = arith.constant -0.284496725 : f32
    %379 = vector.broadcast %cst_116 : f32 to vector<96x256xf32>
    %380 = arith.addf %378, %379 : vector<96x256xf32>
    %381 = arith.mulf %380, %370 : vector<96x256xf32>
    %cst_117 = arith.constant 0.254829586 : f32
    %382 = vector.broadcast %cst_117 : f32 to vector<96x256xf32>
    %383 = arith.addf %381, %382 : vector<96x256xf32>
    %384 = arith.mulf %383, %370 : vector<96x256xf32>
    %cst_118 = arith.constant 0.000000e+00 : f32
    %385 = vector.broadcast %cst_118 : f32 to vector<96x256xf32>
    %386 = arith.subf %385, %364 : vector<96x256xf32>
    %387 = arith.mulf %386, %364 : vector<96x256xf32>
    %388 = math.exp %387 : vector<96x256xf32>
    %389 = arith.mulf %384, %388 : vector<96x256xf32>
    %cst_119 = arith.constant 1.000000e+00 : f32
    %390 = vector.broadcast %cst_119 : f32 to vector<96x256xf32>
    %391 = arith.subf %390, %389 : vector<96x256xf32>
    %392 = arith.mulf %363, %391 : vector<96x256xf32>
    %cst_120 = arith.constant 1.000000e+00 : f32
    %393 = vector.broadcast %cst_120 : f32 to vector<96x256xf32>
    %394 = arith.addf %393, %392 : vector<96x256xf32>
    %395 = arith.mulf %356, %394 : vector<96x256xf32>
    %396 = arith.addf %395, %35 : vector<96x256xf32>
    %c0_121 = arith.constant 0 : index
    %c0_122 = arith.constant 0 : index
    %c0_123 = arith.constant 0 : index
    %397 = vector.load %arg13[%c0_121, %c0_122, %c0_123] : memref<1x96x256xf32, #tpu.memory_space<vmem>>, vector<1x96x256xf32>
    %398 = vector.shape_cast %397 : vector<1x96x256xf32> to vector<96x256xf32>
    %399 = vector.shape_cast %396 : vector<96x256xf32> to vector<1x96x256xf32>
    tpu.vector_store %arg13[%c0_121, %c0_122, %c0_123], %399 {strides = array<i32>} : memref<1x96x256xf32, #tpu.memory_space<vmem>>, vector<1x96x256xf32>,
    return
  }
  func.func @transform_0(%arg0: i32) -> (i32, i32, i32) {
    %c0_i32 = arith.constant 0 : i32
    %c0_i32_0 = arith.constant 0 : i32
    %c0_i32_1 = arith.constant 0 : i32
    return %arg0, %c0_i32, %c0_i32_0 : i32, i32, i32
  }
  func.func @transform_1(%arg0: i32) -> (i32, i32) {
    %c0_i32 = arith.constant 0 : i32
    %c0_i32_0 = arith.constant 0 : i32
    %c0_i32_1 = arith.constant 0 : i32
    return %c0_i32, %c0_i32_0 : i32, i32
  }
  func.func @transform_2(%arg0: i32) -> (i32, i32) {
    %c0_i32 = arith.constant 0 : i32
    %c0_i32_0 = arith.constant 0 : i32
    %c0_i32_1 = arith.constant 0 : i32
    return %c0_i32, %c0_i32_0 : i32, i32
  }
  func.func @transform_3(%arg0: i32) -> (i32, i32) {
    %c0_i32 = arith.constant 0 : i32
    %c0_i32_0 = arith.constant 0 : i32
    %c0_i32_1 = arith.constant 0 : i32
    return %c0_i32, %c0_i32_0 : i32, i32
  }
  func.func @transform_4(%arg0: i32) -> (i32, i32) {
    %c0_i32 = arith.constant 0 : i32
    %c0_i32_0 = arith.constant 0 : i32
    %c0_i32_1 = arith.constant 0 : i32
    return %c0_i32, %c0_i32_0 : i32, i32
  }
  func.func @transform_5(%arg0: i32) -> (i32, i32) {
    %c0_i32 = arith.constant 0 : i32
    %c0_i32_0 = arith.constant 0 : i32
    %c0_i32_1 = arith.constant 0 : i32
    return %c0_i32, %c0_i32_0 : i32, i32
  }
  func.func @transform_6(%arg0: i32) -> (i32, i32) {
    %c0_i32 = arith.constant 0 : i32
    %c0_i32_0 = arith.constant 0 : i32
    %c0_i32_1 = arith.constant 0 : i32
    return %c0_i32, %c0_i32_0 : i32, i32
  }
  func.func @transform_7(%arg0: i32) -> (i32, i32) {
    %c0_i32 = arith.constant 0 : i32
    %c0_i32_0 = arith.constant 0 : i32
    %c0_i32_1 = arith.constant 0 : i32
    return %c0_i32, %c0_i32_0 : i32, i32
  }
  func.func @transform_8(%arg0: i32) -> (i32, i32) {
    %c0_i32 = arith.constant 0 : i32
    %c0_i32_0 = arith.constant 0 : i32
    %c0_i32_1 = arith.constant 0 : i32
    return %c0_i32, %c0_i32_0 : i32, i32
  }
  func.func @transform_9(%arg0: i32) -> (i32, i32) {
    %c0_i32 = arith.constant 0 : i32
    %c0_i32_0 = arith.constant 0 : i32
    %c0_i32_1 = arith.constant 0 : i32
    return %c0_i32, %c0_i32_0 : i32, i32
  }
  func.func @transform_10(%arg0: i32) -> (i32, i32) {
    %c0_i32 = arith.constant 0 : i32
    %c0_i32_0 = arith.constant 0 : i32
    %c0_i32_1 = arith.constant 0 : i32
    return %c0_i32, %c0_i32_0 : i32, i32
  }
  func.func @transform_11(%arg0: i32) -> (i32, i32) {
    %c0_i32 = arith.constant 0 : i32
    %c0_i32_0 = arith.constant 0 : i32
    %c0_i32_1 = arith.constant 0 : i32
    return %c0_i32, %c0_i32_0 : i32, i32
  }
  func.func @transform_12(%arg0: i32) -> (i32, i32, i32) {
    %c0_i32 = arith.constant 0 : i32
    %c0_i32_0 = arith.constant 0 : i32
    %c0_i32_1 = arith.constant 0 : i32
    return %arg0, %c0_i32, %c0_i32_0 : i32, i32, i32
  }
}

module attributes {stable_mosaic.version = 11 : i64} {
  func.func @_projection_kernel(%arg0: i32, %arg1: memref<1x64x256xf32, #tpu.memory_space<vmem>>, %arg2: memref<256x256xbf16, #tpu.memory_space<vmem>>, %arg3: memref<1x256xf32, #tpu.memory_space<vmem>>, %arg4: memref<256x32xbf16, #tpu.memory_space<vmem>>, %arg5: memref<1x32xf32, #tpu.memory_space<vmem>>, %arg6: memref<1x256xf32, #tpu.memory_space<vmem>>, %arg7: memref<1x64x32xf32, #tpu.memory_space<vmem>>) attributes {dimension_semantics = [#tpu.dimension_semantics<parallel>], iteration_bounds = array<i64: 2>, scalar_prefetch = 0 : i64, scratch_operands = 0 : i64, tpu.core_type = #tpu.core_type<tc>, window_params = [{transform_indices = @transform_0, window_bounds = array<i64: 1, 64, 256>}, {pipeline_mode = #tpu.pipeline_mode<synchronous>, transform_indices = @transform_1, window_bounds = array<i64: 256, 256>}, {pipeline_mode = #tpu.pipeline_mode<synchronous>, transform_indices = @transform_2, window_bounds = array<i64: 1, 256>}, {pipeline_mode = #tpu.pipeline_mode<synchronous>, transform_indices = @transform_3, window_bounds = array<i64: 256, 32>}, {pipeline_mode = #tpu.pipeline_mode<synchronous>, transform_indices = @transform_4, window_bounds = array<i64: 1, 32>}, {pipeline_mode = #tpu.pipeline_mode<synchronous>, transform_indices = @transform_5, window_bounds = array<i64: 1, 256>}, {transform_indices = @transform_6, window_bounds = array<i64: 1, 64, 32>}]} {
    %c0 = arith.constant 0 : index
    %c0_0 = arith.constant 0 : index
    %c0_1 = arith.constant 0 : index
    %0 = vector.load %arg1[%c0, %c0_0, %c0_1] : memref<1x64x256xf32, #tpu.memory_space<vmem>>, vector<1x64x256xf32>
    %1 = vector.shape_cast %0 : vector<1x64x256xf32> to vector<64x256xf32>
    %2 = arith.truncf %1 : vector<64x256xf32> to vector<64x256xbf16>
    %c0_2 = arith.constant 0 : index
    %c0_3 = arith.constant 0 : index
    %3 = vector.load %arg2[%c0_2, %c0_3] : memref<256x256xbf16, #tpu.memory_space<vmem>>, vector<256x256xbf16>
    %cst = arith.constant dense<0.000000e+00> : vector<64x256xf32>
    %4 = tpu.matmul %2, %3, %cst {dimension_numbers = #tpu.dot_dimension_numbers<[1], [0], [0], [1], [0, 0, 1, 1], [], []>} : vector<64x256xbf16>, vector<256x256xbf16>, vector<64x256xf32> -> vector<64x256xf32>
    %c0_4 = arith.constant 0 : index
    %c0_5 = arith.constant 0 : index
    %5 = vector.load %arg3[%c0_4, %c0_5] : memref<1x256xf32, #tpu.memory_space<vmem>>, vector<1x256xf32>
    %6 = vector.broadcast %5 : vector<1x256xf32> to vector<64x256xf32>
    %7 = arith.addf %4, %6 : vector<64x256xf32>
    %cst_6 = arith.constant 0.000000e+00 : f32
    %8 = vector.broadcast %cst_6 : f32 to vector<64x256xf32>
    %9 = arith.cmpf oge, %7, %8 : vector<64x256xf32>
    %c0_7 = arith.constant 0 : index
    %c0_8 = arith.constant 0 : index
    %10 = vector.load %arg6[%c0_7, %c0_8] : memref<1x256xf32, #tpu.memory_space<vmem>>, vector<1x256xf32>
    %11 = vector.broadcast %10 : vector<1x256xf32> to vector<64x256xf32>
    %12 = arith.mulf %11, %7 : vector<64x256xf32>
    %13 = arith.select %9, %7, %12 : vector<64x256xi1>, vector<64x256xf32>
    %14 = arith.truncf %13 : vector<64x256xf32> to vector<64x256xbf16>
    %c0_9 = arith.constant 0 : index
    %c0_10 = arith.constant 0 : index
    %15 = vector.load %arg4[%c0_9, %c0_10] : memref<256x32xbf16, #tpu.memory_space<vmem>>, vector<256x32xbf16>
    %cst_11 = arith.constant dense<0.000000e+00> : vector<64x32xf32>
    %16 = tpu.matmul %14, %15, %cst_11 {dimension_numbers = #tpu.dot_dimension_numbers<[1], [0], [0], [1], [0, 0, 1, 1], [], []>} : vector<64x256xbf16>, vector<256x32xbf16>, vector<64x32xf32> -> vector<64x32xf32>
    %c0_12 = arith.constant 0 : index
    %c0_13 = arith.constant 0 : index
    %17 = vector.load %arg5[%c0_12, %c0_13] : memref<1x32xf32, #tpu.memory_space<vmem>>, vector<1x32xf32>
    %18 = vector.broadcast %17 : vector<1x32xf32> to vector<64x32xf32>
    %19 = arith.addf %16, %18 : vector<64x32xf32>
    %c0_14 = arith.constant 0 : index
    %c0_15 = arith.constant 0 : index
    %c0_16 = arith.constant 0 : index
    %20 = vector.load %arg7[%c0_14, %c0_15, %c0_16] : memref<1x64x32xf32, #tpu.memory_space<vmem>>, vector<1x64x32xf32>
    %21 = vector.shape_cast %20 : vector<1x64x32xf32> to vector<64x32xf32>
    %22 = vector.shape_cast %19 : vector<64x32xf32> to vector<1x64x32xf32>
    tpu.vector_store %arg7[%c0_14, %c0_15, %c0_16], %22 {strides = array<i32>} : memref<1x64x32xf32, #tpu.memory_space<vmem>>, vector<1x64x32xf32>,
    return
  }
  func.func @transform_0(%arg0: i32) -> (i32, i32, i32) {
    %c0_i32 = arith.constant 0 : i32
    %c0_i32_0 = arith.constant 0 : i32
    %c0_i32_1 = arith.constant 0 : i32
    return %arg0, %c0_i32, %c0_i32_0 : i32, i32, i32
  }
  func.func @transform_1(%arg0: i32) -> (i32, i32) {
    %c0_i32 = arith.constant 0 : i32
    %c0_i32_0 = arith.constant 0 : i32
    %c0_i32_1 = arith.constant 0 : i32
    return %c0_i32, %c0_i32_0 : i32, i32
  }
  func.func @transform_2(%arg0: i32) -> (i32, i32) {
    %c0_i32 = arith.constant 0 : i32
    %c0_i32_0 = arith.constant 0 : i32
    %c0_i32_1 = arith.constant 0 : i32
    return %c0_i32, %c0_i32_0 : i32, i32
  }
  func.func @transform_3(%arg0: i32) -> (i32, i32) {
    %c0_i32 = arith.constant 0 : i32
    %c0_i32_0 = arith.constant 0 : i32
    %c0_i32_1 = arith.constant 0 : i32
    return %c0_i32, %c0_i32_0 : i32, i32
  }
  func.func @transform_4(%arg0: i32) -> (i32, i32) {
    %c0_i32 = arith.constant 0 : i32
    %c0_i32_0 = arith.constant 0 : i32
    %c0_i32_1 = arith.constant 0 : i32
    return %c0_i32, %c0_i32_0 : i32, i32
  }
  func.func @transform_5(%arg0: i32) -> (i32, i32) {
    %c0_i32 = arith.constant 0 : i32
    %c0_i32_0 = arith.constant 0 : i32
    %c0_i32_1 = arith.constant 0 : i32
    return %c0_i32, %c0_i32_0 : i32, i32
  }
  func.func @transform_6(%arg0: i32) -> (i32, i32, i32) {
    %c0_i32 = arith.constant 0 : i32
    %c0_i32_0 = arith.constant 0 : i32
    %c0_i32_1 = arith.constant 0 : i32
    return %arg0, %c0_i32, %c0_i32_0 : i32, i32, i32
  }
}

</mosaic_0001>

<bundles_post_ra>
// kernel: simple_layer_net.5
= control target key start
LH: loop header
LB: loop body
LE: loop exit
PB: predicated region body
PF: predicated region fallthrough
CT: control target
= control target key end

     0   :  { %s1401_s18 = smov 0   ;;  %s1975_s0 = inlined_call_operand.vmem [shape: f32[2,64,32], index: 0, kind: input, shape index: {}]   ;;  %s1976_s1 = inlined_call_operand.vmem [shape: bf16[32,256], index: 1, kind: input, shape index: {}]   ;;  %s1977_s2 = inlined_call_operand.vmem [shape: f32[1,256], index: 2, kind: input, shape index: {}]   ;;  %s1978_s3 = inlined_call_operand.vmem [shape: bf16[256,256], index: 3, kind: input, shape index: {}]   ;;  %s1979_s4 = inlined_call_operand.vmem [shape: f32[1,256], index: 4, kind: input, shape index: {}]   ;;  %s1980_s5 = inlined_call_operand.vmem [shape: f32[2,64,256], index: 5, kind: output, shape index: {}]  }
   0x1 LB: > { %s1148_s19 = sadd.s32 4294967295, %s1367_s18   ;;  %p1152_p0 = scmp.ge.s32.totalorder %s1367_s18, 1  ;;  %s1367_s18 = sphi %s1401_s18, %s15_s18  }
   0x2   : > { %p187_p1 = scmp.lt.s32.totalorder %s1367_s18, 3 }
   0x4   : > { %p188_p2 = pnand %p1152_p0, %p187_p1 }
   0x5   : > { %v1243_v0 = vld [vmem:[%s1976_s1 + $0x4] ss:$8 sps:$4 sm:$0xff] (!%p188_p2)   ;;  %p215_p3 = scmp.lt.s32.totalorder (!%p188_p2), %s1148_s19, 1  ;;  %v1245_v1 = vld [vmem:[%s1976_s1] ss:$8 sps:$4 sm:$0xff] (!%p188_p2)   ;;  %v1369_v2 = vmov (!%p188_p2), 0   ;;  %v244_v49 = vlaneseq (!%p188_p2) }
   0x6   : > { %191 = sbr.rel (%p188_p2) target bundleno = 580 (0x244), region = 40  ;;  %319 = vmatprep.mubr.bf16.mxu0 (!%p188_p2), %v1369_v2  ;;  %287 = vmatprep.subr.bf16.mxu0 (!%p188_p2), %v1243_v0  ;;  %v1246_v3 = vld [vmem:[%s1976_s1 + $0x14] ss:$8 sps:$4 sm:$0xff] (!%p188_p2)   ;;  %v1248_v4 = vld [vmem:[%s1976_s1 + $0x10] ss:$8 sps:$4 sm:$0xff] (!%p188_p2)   ;;  %vm274_vm0 = vcmask (!%p188_p2), 261120  }
   0x7   : > { %288 = vmatpush1.bf16.msra.mxu0 (!%p188_p2), %v1245_v1  ;;  %v1251_v5 = vld [vmem:[%s1978_s3 + $0x4] ss:$8 sps:$4 sm:$0xff] (!%p188_p2)   ;;  %v1249_v6 = vld [vmem:[%s1978_s3] ss:$8 sps:$4 sm:$0xff] (!%p188_p2)   ;;  %v1254_v7 = vld [vmem:[%s1978_s3 + $0x14] ss:$8 sps:$4 sm:$0xff] (!%p188_p2)  }
   0x8   : > { %289 = vmatprep.subr.bf16.mxu0 (!%p188_p2), %v1246_v3  ;;  %1201 = vmatprep.subr.bf16.mxu1 (!%p188_p2), %v1251_v5  ;;  %v1252_v11 = vld [vmem:[%s1978_s3 + $0x10] ss:$8 sps:$4 sm:$0xff] (!%p188_p2)   ;;  %v1257_v21 = vld [vmem:[%s1978_s3 + $0x24] ss:$8 sps:$4 sm:$0xff] (!%p188_p2)   ;;  %v1255_v22 = vld [vmem:[%s1978_s3 + $0x20] ss:$8 sps:$4 sm:$0xff] (!%p188_p2)  }
   0x9   : > { %1217 = vmatpush1.bf16.msra.mxu1 (!%p188_p2), %v1249_v6  ;;  %v1260_v23 = vld [vmem:[%s1978_s3 + $0x34] ss:$8 sps:$4 sm:$0xff] (!%p188_p2)   ;;  %v1258_v24 = vld [vmem:[%s1978_s3 + $0x30] ss:$8 sps:$4 sm:$0xff] (!%p188_p2)   ;;  %v1263_v25 = vld [vmem:[%s1978_s3 + $0x44] ss:$8 sps:$4 sm:$0xff] (!%p188_p2)  }
   0xa   : > { %1202 = vmatprep.subr.bf16.mxu1 (!%p188_p2), %v1254_v7  ;;  %v1261_v26 = vld [vmem:[%s1978_s3 + $0x40] ss:$8 sps:$4 sm:$0xff] (!%p188_p2)   ;;  %v1266_v27 = vld [vmem:[%s1978_s3 + $0x54] ss:$8 sps:$4 sm:$0xff] (!%p188_p2)   ;;  %v1264_v28 = vld [vmem:[%s1978_s3 + $0x50] ss:$8 sps:$4 sm:$0xff] (!%p188_p2)  }
   0xb   : > { %290 = vmatpush1.bf16.msra.mxu0 (!%p188_p2), %v1248_v4  ;;  %v1269_v29 = vld [vmem:[%s1978_s3 + $0x64] ss:$8 sps:$4 sm:$0xff] (!%p188_p2)   ;;  %v1267_v30 = vld [vmem:[%s1978_s3 + $0x60] ss:$8 sps:$4 sm:$0xff] (!%p188_p2)   ;;  %v1272_v31 = vld [vmem:[%s1978_s3 + $0x74] ss:$8 sps:$4 sm:$0xff] (!%p188_p2)  }
   0xc   : > { %1004 = vmatprep.subr.bf16.mxu0 (!%p188_p2), %v1251_v5  ;;  %v1270_v32 = vld [vmem:[%s1978_s3 + $0x70] ss:$8 sps:$4 sm:$0xff] (!%p188_p2)   ;;  %v1275_v33 = vld [vmem:[%s1978_s3 + $0x84] ss:$8 sps:$4 sm:$0xff] (!%p188_p2)   ;;  %v1273_v34 = vld [vmem:[%s1978_s3 + $0x80] ss:$8 sps:$4 sm:$0xff] (!%p188_p2)  }
   0xd   : > { %s1986_s19 = smov (!%p215_p3, %s1148_s19), 1  ;;  %1218 = vmatpush1.bf16.msra.mxu1 %v1252_v11  ;;  %v1278_v35 = vld [vmem:[%s1978_s3 + $0x94] ss:$8 sps:$4 sm:$0xff]   ;;  %v1276_v36 = vld [vmem:[%s1978_s3 + $0x90] ss:$8 sps:$4 sm:$0xff]   ;;  %v1527_v50 = vshrl.u32 %v244_v49, 7 }
   0xe   : > { %s1199_s30 = sshll.u32 %s1986_s19, 6  ;;  %1203 = vmatprep.subr.bf16.mxu1 %v1257_v21  ;;  %v1281_v37 = vld [vmem:[%s1978_s3 + $0xa4] ss:$8 sps:$4 sm:$0xff]   ;;  %v1279_v38 = vld [vmem:[%s1978_s3 + $0xa0] ss:$8 sps:$4 sm:$0xff]   ;;  %s1200_s6 = sshll.u32 %s1986_s19, 7 }
   0xf   : > { %s219_s10 = scalar_lea.vmem %s1975_s0, %s1199_s30  ;;  %v1284_v39 = vld [vmem:[%s1978_s3 + $0xb4] ss:$8 sps:$4 sm:$0xff]   ;;  %v1282_v40 = vld [vmem:[%s1978_s3 + $0xb0] ss:$8 sps:$4 sm:$0xff]   ;;  %v1287_v41 = vld [vmem:[%s1978_s3 + $0xc4] ss:$8 sps:$4 sm:$0xff]   ;;  %s1954_s9 = scalar_lea.vmem %s1980_s5, %s1200_s6 }
  0x10   : > { %v226_v8 = vld [vmem:[%s219_s10] sm:$0xff]  ;;  %v227_v9 = vld [vmem:[%s219_s10 + $0x8] sm:$0xff]  ;;  %v228_v12 = vld [vmem:[%s219_s10 + $0x10] sm:$0xff]  ;;  %v1982_v51 = vsub.s32 0, %v1527_v50  ;;  %v1981_v53 = vsub.s32 1, %v1527_v50 }
  0x11   : > { %v234_v10 = vpack.c.bf16 %v227_v9, %v226_v8  ;;  %v229_v13 = vld [vmem:[%s219_s10 + $0x18] sm:$0xff]  ;;  %v230_v15 = vld [vmem:[%s219_s10 + $0x20] sm:$0xff]  ;;  %v231_v16 = vld [vmem:[%s219_s10 + $0x28] sm:$0xff]  ;;  %1219 = vmatpush1.bf16.msra.mxu1 %v1255_v22 }
  0x12   : > { %v235_v14 = vpack.c.bf16 %v229_v13, %v228_v12  ;;  %v236_v17 = vpack.c.bf16 %v231_v16, %v230_v15  ;;  %v232_v18 = vld [vmem:[%s219_s10 + $0x30] sm:$0xff]  ;;  %v233_v19 = vld [vmem:[%s219_s10 + $0x38] sm:$0xff]  ;;  %1204 = vmatprep.subr.bf16.mxu1 %v1260_v23  ;;  %v1285_v42 = vld [vmem:[%s1978_s3 + $0xc0] ss:$8 sps:$4 sm:$0xff]  }
  0x13   : > { %1161 = vmatmul.mubr.msk.bf16.vlgmr.msra.gmra.mrb[0].mxu0 %vm274_vm0, %v234_v10  ;;  %v237_v20 = vpack.c.bf16 %v233_v19, %v232_v18  ;;  %v1290_v43 = vld [vmem:[%s1978_s3 + $0xd4] ss:$8 sps:$4 sm:$0xff]   ;;  %v1288_v44 = vld [vmem:[%s1978_s3 + $0xd0] ss:$8 sps:$4 sm:$0xff]   ;;  %v1293_v45 = vld [vmem:[%s1978_s3 + $0xe4] ss:$8 sps:$4 sm:$0xff]  }
  0x14   : > { %329 = vmatprep.mubr.bf16.mxu0 %v1369_v2  ;;  %1005 = vmatpush1.bf16.msra.mxu0 %v1249_v6  ;;  %v1291_v46 = vld [vmem:[%s1978_s3 + $0xe0] ss:$8 sps:$4 sm:$0xff]   ;;  %v1296_v47 = vld [vmem:[%s1978_s3 + $0xf4] ss:$8 sps:$4 sm:$0xff]   ;;  %v1294_v48 = vld [vmem:[%s1978_s3 + $0xf0] ss:$8 sps:$4 sm:$0xff]  }
  0x15   : > { %1006 = vmatprep.subr.bf16.mxu0 %v1254_v7  ;;  %1220 = vmatpush1.bf16.msra.mxu1 %v1258_v24  ;;  %v242_v52 = vld [vmem:[%s1977_s2] sm:$0x3] }
  0x16   : > { %1205 = vmatprep.subr.bf16.mxu1 %v1263_v25  ;;  %v1536_v54 = vrot.slane %v242_v52, %v1982_v51  ;;  %v1540_v55 = vrot.slane %v242_v52, %v1981_v53 }
  0x18   : > { %1007 = vmatpush1.bf16.msra.mxu0 %v1252_v11 }
  0x19   : > { %1008 = vmatprep.subr.bf16.mxu0 %v1257_v21  ;;  %1221 = vmatpush1.bf16.msra.mxu1 %v1261_v26 }
  0x1a   : > { %1206 = vmatprep.subr.bf16.mxu1 %v1266_v27 }
  0x1b   : > { %1162 = vmatmul.mubr.msk.bf16.gmra.mrb[4].mxu0 %vm274_vm0, %v235_v14 }
  0x1c   : > { %339 = vmatprep.mubr.bf16.mxu0 %v1369_v2  ;;  %1009 = vmatpush1.bf16.msra.mxu0 %v1255_v22 }
  0x1d   : > { %1010 = vmatprep.subr.bf16.mxu0 %v1260_v23  ;;  %1222 = vmatpush1.bf16.msra.mxu1 %v1264_v28 }
  0x1e   : > { %1207 = vmatprep.subr.bf16.mxu1 %v1269_v29 }
  0x20   : > { %1011 = vmatpush1.bf16.msra.mxu0 %v1258_v24 }
  0x21   : > { %1012 = vmatprep.subr.bf16.mxu0 %v1263_v25  ;;  %1223 = vmatpush1.bf16.msra.mxu1 %v1267_v30 }
  0x22   : > { %1208 = vmatprep.subr.bf16.mxu1 %v1272_v31 }
  0x23   : > { %1163 = vmatmul.mubr.msk.bf16.gmra.mrb[8].mxu0 %vm274_vm0, %v236_v17 }
  0x24   : > { %349 = vmatprep.mubr.bf16.mxu0 %v1369_v2  ;;  %1013 = vmatpush1.bf16.msra.mxu0 %v1261_v26 }
  0x25   : > { %1014 = vmatprep.subr.bf16.mxu0 %v1266_v27  ;;  %1224 = vmatpush1.bf16.msra.mxu1 %v1270_v32 }
  0x26   : > { %1209 = vmatprep.subr.bf16.mxu1 %v1275_v33 }
  0x28   : > { %1015 = vmatpush1.bf16.msra.mxu0 %v1264_v28 }
  0x29   : > { %1016 = vmatprep.subr.bf16.mxu0 %v1269_v29  ;;  %1225 = vmatpush1.bf16.msra.mxu1 %v1273_v34 }
  0x2a   : > { %1210 = vmatprep.subr.bf16.mxu1 %v1278_v35 }
  0x2b   : > { %1164 = vmatmul.mubr.msk.bf16.gmra.mrb[12].mxu0 %vm274_vm0, %v237_v20 }
  0x2c   : > { %1017 = vmatpush1.bf16.msra.mxu0 %v1267_v30 }
  0x2d   : > { %1018 = vmatprep.subr.bf16.mxu0 %v1272_v31  ;;  %1226 = vmatpush1.bf16.msra.mxu1 %v1276_v36 }
  0x2e   : > { %1211 = vmatprep.subr.bf16.mxu1 %v1281_v37 }
  0x30   : > { %1019 = vmatpush1.bf16.msra.mxu0 %v1270_v32 }
  0x31   : > { %1020 = vmatprep.subr.bf16.mxu0 %v1275_v33  ;;  %1227 = vmatpush1.bf16.msra.mxu1 %v1279_v38 }
  0x32   : > { %1212 = vmatprep.subr.bf16.mxu1 %v1284_v39 }
  0x34   : > { %1021 = vmatpush1.bf16.msra.mxu0 %v1273_v34 }
  0x35   : > { %1022 = vmatprep.subr.bf16.mxu0 %v1278_v35  ;;  %1228 = vmatpush1.bf16.msra.mxu1 %v1282_v40 }
  0x36   : > { %1213 = vmatprep.subr.bf16.mxu1 %v1287_v41 }
  0x38   : > { %1023 = vmatpush1.bf16.msra.mxu0 %v1276_v36 }
  0x39   : > { %1024 = vmatprep.subr.bf16.mxu0 %v1281_v37  ;;  %1229 = vmatpush1.bf16.msra.mxu1 %v1285_v42 }
  0x3a   : > { %1214 = vmatprep.subr.bf16.mxu1 %v1290_v43 }
  0x3c   : > { %1025 = vmatpush1.bf16.msra.mxu0 %v1279_v38 }
  0x3d   : > { %1026 = vmatprep.subr.bf16.mxu0 %v1284_v39  ;;  %1230 = vmatpush1.bf16.msra.mxu1 %v1288_v44 }
  0x3e   : > { %1215 = vmatprep.subr.bf16.mxu1 %v1293_v45 }
  0x40   : > { %1027 = vmatpush1.bf16.msra.mxu0 %v1282_v40 }
  0x41   : > { %1028 = vmatprep.subr.bf16.mxu0 %v1287_v41  ;;  %1231 = vmatpush1.bf16.msra.mxu1 %v1291_v46 }
  0x42   : > { %1216 = vmatprep.subr.bf16.mxu1 %v1296_v47 }
  0x44   : > { %1029 = vmatpush1.bf16.msra.mxu0 %v1285_v42  ;;  %v1370_v42 = vmov -1.0  }
  0x45   : > { %1030 = vmatprep.subr.bf16.mxu0 %v1290_v43  ;;  %1232 = vmatpush1.bf16.msra.mxu1 %v1294_v48 }
  0x48   : > { %1031 = vmatpush1.bf16.msra.mxu0 %v1288_v44 }
  0x49   : > { %1032 = vmatprep.subr.bf16.mxu0 %v1293_v45 }
  0x4c   : > { %1033 = vmatpush1.bf16.msra.mxu0 %v1291_v46 }
  0x4d   : > { %1034 = vmatprep.subr.bf16.mxu0 %v1296_v47 }
  0x50   : > { %1035 = vmatpush1.bf16.msra.mxu0 %v1294_v48 }
  0xe6   : > { %v321_v56 = vpop.f32.mrb[0].mxu0 }
  0xe7   : > { %v322_v57 = vadd.f32 %v321_v56, %v1536_v54  ;;  %v323_v58 = vpop.f32.mrb[1].mxu0 }
  0xe8   : > { %v324_v59 = vadd.f32 %v323_v58, %v1540_v55  ;;  %v325_v60 = vpop.f32.mrb[2].mxu0 }
  0xe9   : > { %v376_v61 = vmul.f32 0.70710677, %v322_v57  ;;  %v326_v62 = vadd.f32 %v325_v60, %v1536_v54  ;;  %v327_v63 = vpop.f32.mrb[3].mxu0  ;;  %v1561_v27 = vmul.f32 0.5, %v322_v57 }
  0xea   : > { %v1545_v0 = vmul.f32 0.70710677, %v324_v59  ;;  %v328_v3 = vadd.f32 %v327_v63, %v1540_v55  ;;  %v1575_v37 = vmul.f32 0.5, %v324_v59 }
  0xeb   : > { %v424_v1 = vand.u32 2147483647, %v376_v61  ;;  %v1547_v2 = vmul.f32 0.70710677, %v326_v62  ;;  %vm392_vm1 = vcmp.ge.f32.partialorder %v376_v61, 0.0  ;;  %v1577_v39 = vmul.f32 0.5, %v326_v62 }
  0xec   : > { %v425_v4 = vand.u32 2147483647, %v1545_v0  ;;  %v1552_v10 = vmul.f32 0.70710677, %v328_v3  ;;  %v1585_v43 = vsel %vm392_vm1, 1.0, %v1370_v42  ;;  %vm393_vm2 = vcmp.ge.f32.partialorder %v1545_v0, 0.0 }
  0xed   : > { %v440_v5 = vmul.f32 0.3275911, %v424_v1  ;;  %v426_v7 = vand.u32 2147483647, %v1547_v2  ;;  %v648_v9 = vsub.f32 0.0, %v424_v1  ;;  %vm394_vm3 = vcmp.ge.f32.partialorder %v1547_v2, 0.0 }
  0xee   : > { %v441_v6 = vmul.f32 0.3275911, %v425_v4  ;;  %v331_v11 = vpop.f32.mrb[4].mxu0  ;;  %v649_v15 = vsub.f32 0.0, %v425_v4  ;;  %v427_v16 = vand.u32 2147483647, %v1552_v10 }
  0xef   : > { %v456_v8 = vadd.f32 1.0, %v440_v5  ;;  %v442_v13 = vmul.f32 0.3275911, %v426_v7  ;;  %v333_v14 = vpop.f32.mrb[5].mxu0  ;;  %v664_v20 = vmul.f32 %v648_v9, %v424_v1  ;;  %v650_v21 = vsub.f32 0.0, %v426_v7 }
  0xf0   : > { %v457_v12 = vadd.f32 1.0, %v441_v6  ;;  %v335_v17 = vpop.f32.mrb[6].mxu0  ;;  %v443_v22 = vmul.f32 0.3275911, %v427_v16  ;;  %v332_v23 = vadd.f32 %v331_v11, %v1536_v54  ;;  %v665_v24 = vmul.f32 %v649_v15, %v425_v4 }
  0xf1   : > { %1297 = vrcp.f32 %v456_v8  ;;  %v458_v18 = vadd.f32 1.0, %v442_v13  ;;  %v1555_v19 = vpop.f32.mrb[7].mxu0  ;;  %v1559_v26 = vadd.f32 %v335_v17, %v1536_v54  ;;  %v680_v30 = vmul.f32 1.442695, %v664_v20 }
  0xf2   : > { %1299 = vrcp.f32 %v457_v12  ;;  %v459_v25 = vadd.f32 1.0, %v443_v22  ;;  %v1563_v28 = vmul.f32 0.70710677, %v332_v23  ;;  %v666_v31 = vmul.f32 %v650_v21, %v426_v7 }
  0xf3   : > { %1301 = vrcp.f32 %v458_v18  ;;  %v651_v33 = vsub.f32 0.0, %v427_v16  ;;  %v1571_v35 = vmul.f32 0.70710677, %v1559_v26  ;;  %v682_v38 = vmul.f32 1.442695, %v665_v24 }
  0xf4   : > { %1303 = vrcp.f32 %v459_v25  ;;  %v1568_v34 = vand.u32 2147483647, %v1563_v28  ;;  %v1580_v40 = vadd.f32 %v333_v14, %v1540_v55  ;;  %v684_v47 = vmul.f32 1.442695, %v666_v31 }
  0xf5   : > { %v1590_v45 = vand.u32 2147483647, %v1571_v35  ;;  %1305 = vpow2.f32 %v680_v30  ;;  %vm395_vm4 = vcmp.ge.f32.partialorder %v1552_v10, 0.0  ;;  %v667_v52 = vmul.f32 %v651_v33, %v427_v16 }
  0xf6   : > { %v341_v29 = vpop.f32.mrb[8].mxu0  ;;  %v444_v44 = vmul.f32 0.3275911, %v1568_v34  ;;  %1307 = vpow2.f32 %v682_v38  ;;  %v1601_v59 = vmul.f32 0.5, %v328_v3  ;;  %v1604_v60 = vmul.f32 0.70710677, %v1580_v40 }
  0xf7   : > { %v1565_v32 = vpop.f32.mrb[9].mxu0  ;;  %v446_v57 = vmul.f32 0.3275911, %v1590_v45  ;;  %v1609_v62 = vsel %vm393_vm2, 1.0, %v1370_v42  ;;  %v1618_v3 = vsel %vm394_vm3, 1.0, %v1370_v42  ;;  %v1623_v6 = vsel %vm395_vm4, 1.0, %v1370_v42 }
  0xf8   : > { %v1573_v36 = vpop.f32.mrb[10].mxu0  ;;  %v460_v56 = vadd.f32 1.0, %v444_v44  ;;  %v686_v9 = vmul.f32 1.442695, %v667_v52  ;;  %v1629_v11 = vmul.f32 0.5, %v332_v23  ;;  %vm396_vm5 = vcmp.ge.f32.partialorder %v1563_v28, 0.0 }
  0xf9   : > { %v1582_v41 = vpop.f32.mrb[11].mxu0  ;;  %v462_v63 = vadd.f32 1.0, %v446_v57  ;;  %v429_v10 = vand.u32 2147483647, %v1604_v60  ;;  %v1639_v14 = vadd.f32 %v341_v29, %v1536_v54  ;;  %v652_v21 = vsub.f32 0.0, %v1568_v34 }
  0xfa   : > { %1309 = vrcp.f32 %v460_v56  ;;  %v1646_v22 = vmul.f32 0.5, %v1559_v26  ;;  %v1650_v23 = vadd.f32 %v1555_v19, %v1540_v55  ;;  %v1658_v33 = vsel %vm396_vm5, 1.0, %v1370_v42 }
  0xfb   : > { %v1592_v46 = vpop.eup %1297  ;;  %1311 = vpow2.f32 %v684_v47  ;;  %v445_v26 = vmul.f32 0.3275911, %v429_v10  ;;  %v653_v38 = vsub.f32 0.0, %v429_v10  ;;  %v668_v57 = vmul.f32 %v652_v21, %v1568_v34 }
  0xfc   : > { %v1596_v48 = vpop.eup %1299  ;;  %v504_v49 = vmul.f32 1.0614054, %v1592_v46  ;;  %1313 = vrcp.f32 %v462_v63  ;;  %vm398_vm6 = vcmp.ge.f32.partialorder %v1571_v35, 0.0  ;;  %vm397_vm11 = vcmp.ge.f32.partialorder %v1604_v60, 0.0 }
  0xfd   : > { %v505_v58 = vmul.f32 1.0614054, %v1596_v48  ;;  %v1613_v4 = vpop.eup %1301  ;;  %1315 = vpow2.f32 %v686_v9  ;;  %v461_v34 = vadd.f32 1.0, %v445_v26 }
  0xfe   : > { %v520_v61 = vadd.f32 -1.4531521, %v504_v49  ;;  %v1611_v1 = vpop.f32.mrb[12].mxu0  ;;  %v506_v8 = vmul.f32 1.0614054, %v1613_v4  ;;  %v1633_v2 = vpop.eup %1303 }
  0xff   : > { %v521_v5 = vadd.f32 -1.4531521, %v505_v58  ;;  %v1625_v0 = vpop.f32.mrb[13].mxu0  ;;  %v507_v18 = vmul.f32 1.0614054, %v1633_v2  ;;  %v1306_v30 = vpop.eup %1305  ;;  %v654_v58 = vsub.f32 0.0, %v1590_v45 }
 0x100   : > { %v536_v7 = vmul.f32 %v1592_v46, %v520_v61  ;;  %v1631_v12 = vpop.f32.mrb[14].mxu0  ;;  %v522_v17 = vadd.f32 -1.4531521, %v506_v8  ;;  %v1662_v49 = vmul.f32 0.70710677, %v1639_v14  ;;  %v1308_v52 = vpop.eup %1307 }
 0x101   : > { %v537_v13 = vmul.f32 %v1596_v48, %v521_v5  ;;  %v1641_v15 = vpop.f32.mrb[15].mxu0  ;;  %v523_v29 = vadd.f32 -1.4531521, %v507_v18  ;;  %v1667_v61 = vmul.f32 0.70710677, %v1650_v23 }
 0x102   : > { %v552_v16 = vadd.f32 1.4214138, %v536_v7  ;;  %v538_v25 = vmul.f32 %v1613_v4, %v522_v17  ;;  %v1678_v21 = vand.u32 2147483647, %v1662_v49  ;;  %vm400_vm7 = vcmp.ge.f32.partialorder %v1662_v49, 0.0 }
 0x103   : > { %v553_v20 = vadd.f32 1.4214138, %v537_v13  ;;  %v539_v19 = vmul.f32 %v1633_v2, %v523_v29  ;;  %v670_v29 = vmul.f32 %v654_v58, %v1590_v45  ;;  %vm399_vm12 = vcmp.ge.f32.partialorder %v1667_v61, 0.0 }
 0x104   : > { %v568_v24 = vmul.f32 %v1592_v46, %v552_v16  ;;  %v554_v47 = vadd.f32 1.4214138, %v538_v25  ;;  %v1669_v28 = vpop.eup %1309  ;;  %v669_v16 = vmul.f32 %v653_v38, %v429_v10  ;;  %v688_v25 = vmul.f32 1.442695, %v668_v57 }
 0x105   : > { %v569_v31 = vmul.f32 %v1596_v48, %v553_v20  ;;  %v555_v7 = vadd.f32 1.4214138, %v539_v19  ;;  %v1312_v8 = vpop.eup %1311  ;;  %v508_v13 = vmul.f32 1.0614054, %v1669_v28  ;;  %v448_v38 = vmul.f32 0.3275911, %v1678_v21 }
 0x106   : > { %v584_v44 = vadd.f32 -0.28449672, %v568_v24  ;;  %v570_v5 = vmul.f32 %v1613_v4, %v554_v47  ;;  %v1691_v57 = vadd.f32 %v1565_v32, %v1540_v55  ;;  %1317 = vpow2.f32 %v688_v25 }
 0x107   : > { %v585_v56 = vadd.f32 -0.28449672, %v569_v31  ;;  %v571_v20 = vmul.f32 %v1633_v2, %v555_v7  ;;  %v524_v24 = vadd.f32 -1.4531521, %v508_v13  ;;  %v431_v31 = vand.u32 2147483647, %v1667_v61 }
 0x108   : > { %v600_v63 = vmul.f32 %v1592_v46, %v584_v44  ;;  %v586_v18 = vadd.f32 -0.28449672, %v570_v5  ;;  %v1682_v44 = vpop.eup %1313  ;;  %v1700_v25 = vmul.f32 0.70710677, %v1691_v57 }
 0x109   : > { %v601_v9 = vmul.f32 %v1596_v48, %v585_v56  ;;  %v587_v10 = vadd.f32 -0.28449672, %v571_v20  ;;  %v540_v56 = vmul.f32 %v1669_v28, %v524_v24  ;;  %v1316_v45 = vpop.eup %1315 }
 0x10a   : > { %v616_v17 = vadd.f32 0.2548296, %v600_v63  ;;  %v602_v26 = vmul.f32 %v1613_v4, %v586_v18  ;;  %v510_v63 = vmul.f32 1.0614054, %v1682_v44  ;;  %v433_v35 = vand.u32 2147483647, %v1700_v25 }
 0x10b   : > { %v617_v19 = vadd.f32 0.2548296, %v601_v9  ;;  %v603_v7 = vmul.f32 %v1633_v2, %v587_v10  ;;  %v556_v13 = vadd.f32 1.4214138, %v540_v56  ;;  %v655_v10 = vsub.f32 0.0, %v431_v31 }
 0x10c   : > { %v632_v47 = vmul.f32 %v1592_v46, %v616_v17  ;;  %v618_v5 = vadd.f32 0.2548296, %v602_v26  ;;  %v464_v46 = vadd.f32 1.0, %v448_v38  ;;  %v690_v17 = vmul.f32 1.442695, %v669_v16 }
 0x10d   : > { %v526_v18 = vadd.f32 -1.4531521, %v510_v63  ;;  %v619_v24 = vadd.f32 0.2548296, %v603_v7  ;;  %v633_v53 = vmul.f32 %v1596_v48, %v617_v19  ;;  %v572_v32 = vmul.f32 %v1669_v28, %v556_v13 }
 0x10e   : > { %v712_v58 = vmul.f32 %v1306_v30, %v632_v47  ;;  %v634_v9 = vmul.f32 %v1613_v4, %v618_v5  ;;  %1319 = vrcp.f32 %v464_v46  ;;  %v692_v30 = vmul.f32 1.442695, %v670_v29 }
 0x10f   : > { %v542_v51 = vmul.f32 %v1682_v44, %v526_v18  ;;  %v588_v16 = vadd.f32 -0.28449672, %v572_v32  ;;  %1321 = vrcp.f32 %v461_v34  ;;  %v1705_v4 = vsel %vm398_vm6, 1.0, %v1370_v42 }
 0x110   : > { %v728_v20 = vsub.f32 1.0, %v712_v58  ;;  %v714_v26 = vmul.f32 %v1312_v8, %v634_v9  ;;  %v635_v19 = vmul.f32 %v1633_v2, %v619_v24  ;;  %1323 = vpow2.f32 %v690_v17  ;;  %v1318_v17 = vpop.eup %1317 }
 0x111   : > { %v558_v48 = vadd.f32 1.4214138, %v542_v51  ;;  %v447_v29 = vmul.f32 0.3275911, %v431_v31  ;;  %v713_v56 = vmul.f32 %v1308_v52, %v633_v53  ;;  %1325 = vpow2.f32 %v692_v30 }
 0x112   : > { %v744_v47 = vmul.f32 %v728_v20, %v1585_v43  ;;  %v730_v38 = vsub.f32 1.0, %v714_v26  ;;  %v604_v43 = vmul.f32 %v1669_v28, %v588_v16  ;;  %v671_v58 = vmul.f32 %v655_v10, %v431_v31 }
 0x113   : > { %v574_v8 = vmul.f32 %v1682_v44, %v558_v48  ;;  %v656_v51 = vsub.f32 0.0, %v1678_v21  ;;  %v1715_v2 = vadd.f32 %v1573_v36, %v1536_v54  ;;  %v715_v52 = vmul.f32 %v1316_v45, %v635_v19 }
 0x114   : > { %v760_v63 = vadd.f32 1.0, %v744_v47  ;;  %v746_v34 = vmul.f32 %v730_v38, %v1618_v3  ;;  %v620_v5 = vadd.f32 0.2548296, %v604_v43  ;;  %v463_v46 = vadd.f32 1.0, %v447_v29 }
 0x115   : > { %v590_v7 = vadd.f32 -0.28449672, %v574_v8  ;;  %v449_v13 = vmul.f32 0.3275911, %v433_v35  ;;  %v729_v18 = vsub.f32 1.0, %v713_v56  ;;  %v1732_v30 = vmul.f32 0.5, %v1639_v14 }
 0x116   : > { %v762_v53 = vadd.f32 1.0, %v746_v34  ;;  %v636_v20 = vmul.f32 %v1669_v28, %v620_v5  ;;  %v1723_v9 = vmul.f32 %v760_v63, %v1561_v27  ;;  %v1729_v45 = vmul.f32 0.70710677, %v1715_v2 }
 0x117   : > { %v606_v3 = vmul.f32 %v1682_v44, %v590_v7  ;;  %v465_v24 = vadd.f32 1.0, %v449_v13  ;;  %v694_v32 = vmul.f32 1.442695, %v671_v58  ;;  %v672_v47 = vmul.f32 %v656_v51, %v1678_v21 }
 0x118   : > { %v1720_v31 = vpop.eup %1319  ;;  %v1726_v36 = vmul.f32 %v762_v53, %v1577_v39  ;;  %v731_v27 = vsub.f32 1.0, %v715_v52  ;;  %v716_v10 = vmul.f32 %v1318_v17, %v636_v20  ;;  %v745_v16 = vmul.f32 %v729_v18, %v1609_v62 }
 0x119   : > { %v512_v28 = vmul.f32 1.0614054, %v1720_v31  ;;  %1327 = vrcp.f32 %v465_v24  ;;  %v1738_v39 = vpop.eup %1321  ;;  %v622_v48 = vadd.f32 0.2548296, %v606_v3  ;;  %v1744_v14 = vsel %vm400_vm7, 1.0, %v1370_v42 }
 0x11a   : > { %v792_v26 = vpack.c.bf16 %v1726_v36, %v1723_v9  ;;  %v1746_v19 = vpop.eup %1323  ;;  %1329 = vrcp.f32 %v463_v46  ;;  %v657_v21 = vsub.f32 0.0, %v433_v35  ;;  %v434_v29 = vand.u32 2147483647, %v1729_v45 }
 0x11b   : > { %v528_v38 = vadd.f32 -1.4531521, %v512_v28  ;;  %v1751_v56 = vadd.f32 %v1582_v41, %v1540_v55  ;;  %v1326_v43 = vpop.eup %1325  ;;  %1331 = vpow2.f32 %v694_v32  ;;  %v696_v8 = vmul.f32 1.442695, %v672_v47 }
 0x11c   : > { %vm401_vm8 = vcmp.ge.f32.partialorder %v1700_v25, 0.0  ;;  %v747_v49 = vmul.f32 %v731_v27, %v1623_v6  ;;  %v732_v63 = vsub.f32 1.0, %v716_v10  ;;  %v450_v34 = vmul.f32 0.3275911, %v434_v29 }
 0x11d   : > { %v544_v62 = vmul.f32 %v1720_v31, %v528_v38  ;;  %v1757_v58 = vmul.f32 0.70710677, %v1751_v56  ;;  %v761_v5 = vadd.f32 1.0, %v745_v16  ;;  %v638_v7 = vmul.f32 %v1682_v44, %v622_v48 }
 0x11e   : > { %v1762_v41 = vadd.f32 %v1611_v1, %v1536_v54  ;;  %v1765_v53 = vmul.f32 0.5, %v1691_v57  ;;  %v673_v52 = vmul.f32 %v657_v21, %v433_v35  ;;  %v466_v25 = vadd.f32 1.0, %v450_v34 }
 0x11f   : > { %v560_v51 = vadd.f32 1.4214138, %v544_v62  ;;  %v435_v6 = vand.u32 2147483647, %v1757_v58  ;;  %1333 = vpow2.f32 %v696_v8  ;;  %v1770_v13 = vsel %vm401_vm8, 1.0, %v1370_v42 }
 0x120   : > { %v1774_v44 = vadd.f32 %v1625_v0, %v1540_v55  ;;  %v763_v17 = vadd.f32 1.0, %v747_v49  ;;  %v748_v1 = vmul.f32 %v732_v63, %v1658_v33  ;;  %1335 = vrcp.f32 %v466_v25 }
 0x121   : > { %v576_v46 = vmul.f32 %v1720_v31, %v560_v51  ;;  %v451_v57 = vmul.f32 0.3275911, %v435_v6  ;;  %v1778_v35 = vmul.f32 %v761_v5, %v1575_v37  ;;  %v718_v18 = vmul.f32 %v1326_v43, %v638_v7 }
 0x122   : > { %v1781_v3 = vmul.f32 0.70710677, %v1762_v41  ;;  %v698_v32 = vmul.f32 1.442695, %v673_v52  ;;  %v1786_v28 = vmul.f32 0.5, %v1715_v2  ;;  %v658_v0 = vsub.f32 0.0, %v434_v29 }
 0x123   : > { %v592_v20 = vadd.f32 -0.28449672, %v576_v46  ;;  %v1783_v24 = vpop.eup %1327  ;;  %v467_v47 = vadd.f32 1.0, %v451_v57  ;;  %vm402_vm9 = vcmp.ge.f32.partialorder %v1729_v45, 0.0  ;;  %v1792_v37 = vmul.f32 0.70710677, %v1774_v44 }
 0x124   : > { %v513_v27 = vmul.f32 1.0614054, %v1783_v24  ;;  %v1794_v10 = vpop.eup %1329  ;;  %v1797_v16 = vmul.f32 %v763_v17, %v1601_v59  ;;  %v764_v48 = vadd.f32 1.0, %v748_v1  ;;  %v436_v2 = vand.u32 2147483647, %v1781_v3 }
 0x125   : > { %v608_v33 = vmul.f32 %v1720_v31, %v592_v20  ;;  %1337 = vrcp.f32 %v467_v47  ;;  %v1800_v38 = vpop.eup %1331  ;;  %v734_v21 = vsub.f32 1.0, %v718_v18  ;;  %v1804_v45 = vadd.f32 %v1631_v12, %v1536_v54 }
 0x126   : > { %v529_v62 = vadd.f32 -1.4531521, %v513_v27  ;;  %1339 = vpow2.f32 %v698_v32  ;;  %v1807_v8 = vsel %vm402_vm9, 1.0, %v1370_v42  ;;  %v674_v49 = vmul.f32 %v658_v0, %v434_v29 }
 0x127   : > { %v624_v43 = vadd.f32 0.2548296, %v608_v33  ;;  %v452_v59 = vmul.f32 0.3275911, %v436_v2  ;;  %v659_v5 = vsub.f32 0.0, %v435_v6  ;;  %vm403_vm10 = vcmp.ge.f32.partialorder %v1757_v58, 0.0 }
 0x128   : > { %v545_v34 = vmul.f32 %v1783_v24, %v529_v62  ;;  %v437_v7 = vand.u32 2147483647, %v1792_v37  ;;  %v660_v52 = vsub.f32 0.0, %v436_v2  ;;  %v1814_v54 = vmul.f32 0.70710677, %v1804_v45 }
 0x129   : > { %v640_v63 = vmul.f32 %v1720_v31, %v624_v43  ;;  %v468_v51 = vadd.f32 1.0, %v452_v59  ;;  %v1334_v12 = vpop.eup %1333  ;;  %v1817_v25 = vmul.f32 %v764_v48, %v1629_v11  ;;  %v750_v29 = vmul.f32 %v734_v21, %v1705_v4 }
 0x12a   : > { %v561_v46 = vadd.f32 1.4214138, %v545_v34  ;;  %v453_v31 = vmul.f32 0.3275911, %v437_v7  ;;  %v1820_v17 = vpop.eup %1335  ;;  %v661_v57 = vsub.f32 0.0, %v437_v7  ;;  %v675_v0 = vmul.f32 %v659_v5, %v435_v6 }
 0x12b   : > { %v720_v1 = vmul.f32 %v1334_v12, %v640_v63  ;;  %1341 = vrcp.f32 %v468_v51  ;;  %v438_v18 = vand.u32 2147483647, %v1814_v54  ;;  %v514_v32 = vmul.f32 1.0614054, %v1820_v17 }
 0x12c   : > { %v577_v20 = vmul.f32 %v1783_v24, %v561_v46  ;;  %v469_v47 = vadd.f32 1.0, %v453_v31  ;;  %v1828_v11 = vsel %vm403_vm10, 1.0, %v1370_v42  ;;  %v676_v4 = vmul.f32 %v660_v52, %v436_v2 }
 0x12d   : > { %v454_v33 = vmul.f32 0.3275911, %v438_v18  ;;  %v1832_v27 = vadd.f32 %v1641_v15, %v1540_v55  ;;  %v530_v21 = vadd.f32 -1.4531521, %v514_v32  ;;  %v700_v43 = vmul.f32 1.442695, %v674_v49 }
 0x12e   : > { %v593_v48 = vadd.f32 -0.28449672, %v577_v20  ;;  %1343 = vrcp.f32 %v469_v47  ;;  %v766_v59 = vadd.f32 1.0, %v750_v29  ;;  %v736_v6 = vsub.f32 1.0, %v720_v1 }
 0x12f   : > { %v1834_v62 = vpop.eup %1337  ;;  %v677_v63 = vmul.f32 %v661_v57, %v437_v7  ;;  %v470_v34 = vadd.f32 1.0, %v454_v33  ;;  %v546_v5 = vmul.f32 %v1820_v17, %v530_v21  ;;  %v702_v51 = vmul.f32 1.442695, %v675_v0 }
 0x130   : > { %v609_v58 = vmul.f32 %v1783_v24, %v593_v48  ;;  %v515_v2 = vmul.f32 1.0614054, %v1834_v62  ;;  %v1340_v52 = vpop.eup %1339  ;;  %v704_v55 = vmul.f32 1.442695, %v676_v4  ;;  %v662_v15 = vsub.f32 0.0, %v438_v18 }
 0x131   : > { %v1840_v12 = vmul.f32 0.70710677, %v1832_v27  ;;  %v793_v49 = vpack.c.bf16 %v1797_v16, %v1778_v35  ;;  %v562_v46 = vadd.f32 1.4214138, %v546_v5  ;;  %1345 = vpow2.f32 %v700_v43 }
 0x132   : > { %v625_v29 = vadd.f32 0.2548296, %v609_v58  ;;  %v531_v7 = vadd.f32 -1.4531521, %v515_v2  ;;  %v752_v31 = vmul.f32 %v736_v6, %v1744_v14  ;;  %v706_v1 = vmul.f32 1.442695, %v677_v63 }
 0x133   : > { %1347 = vrcp.f32 %v470_v34  ;;  %v439_v57 = vand.u32 2147483647, %v1840_v12  ;;  %1036 = vmatprep.mubr.bf16.mxu0 %v793_v49  ;;  %v578_v32 = vmul.f32 %v1820_v17, %v562_v46  ;;  %v1855_v14 = vmul.f32 %v766_v59, %v1646_v22 }
 0x134   : > { %v641_v20 = vmul.f32 %v1783_v24, %v625_v29  ;;  %v547_v0 = vmul.f32 %v1834_v62, %v531_v7  ;;  %1349 = vpow2.f32 %v702_v51  ;;  %1037 = vmatmul.mubr.bf16.vlgmr.msra.gmra.mrb[16].mxu0 %v792_v26  ;;  %v678_v16 = vmul.f32 %v662_v15, %v438_v18 }
 0x135   : > { %v1852_v35 = vpop.eup %1341  ;;  %1351 = vpow2.f32 %v704_v55  ;;  %v455_v47 = vmul.f32 0.3275911, %v439_v57  ;;  %v594_v33 = vadd.f32 -0.28449672, %v578_v32  ;;  %v768_v21 = vadd.f32 1.0, %v752_v31 }
 0x136   : > { %v721_v4 = vmul.f32 %v1340_v52, %v641_v20  ;;  %v563_v24 = vadd.f32 1.4214138, %v547_v0  ;;  %v516_v48 = vmul.f32 1.0614054, %v1852_v35  ;;  %1353 = vpow2.f32 %v706_v1 }
 0x137   : > { %v471_v43 = vadd.f32 1.0, %v455_v47  ;;  %v509_v6 = vmul.f32 1.0614054, %v1738_v39  ;;  %v610_v36 = vmul.f32 %v1820_v17, %v594_v33  ;;  %v663_v59 = vsub.f32 0.0, %v439_v57 }
 0x138   : > { %v1859_v9 = vpop.eup %1343  ;;  %v579_v22 = vmul.f32 %v1834_v62, %v563_v24  ;;  %v532_v26 = vadd.f32 -1.4531521, %v516_v48  ;;  %v708_v63 = vmul.f32 1.442695, %v678_v16  ;;  %v511_v34 = vmul.f32 1.0614054, %v1794_v10 }
 0x139   : > { %v517_v18 = vmul.f32 1.0614054, %v1859_v9  ;;  %1355 = vrcp.f32 %v471_v43  ;;  %v737_v58 = vsub.f32 1.0, %v721_v4  ;;  %v626_v5 = vadd.f32 0.2548296, %v610_v36 }
 0x13a   : > { %v595_v2 = vadd.f32 -0.28449672, %v579_v22  ;;  %v548_v51 = vmul.f32 %v1852_v35, %v532_v26  ;;  %v1867_v52 = vmul.f32 %v768_v21, %v1732_v30  ;;  %v525_v15 = vadd.f32 -1.4531521, %v509_v6 }
 0x13b   : > { %v533_v55 = vadd.f32 -1.4531521, %v517_v18  ;;  %v527_v49 = vadd.f32 -1.4531521, %v511_v34  ;;  %v1346_v29 = vpop.eup %1345  ;;  %v642_v46 = vmul.f32 %v1820_v17, %v626_v5  ;;  %v679_v1 = vmul.f32 %v663_v59, %v439_v57 }
 0x13c   : > { %v611_v7 = vmul.f32 %v1834_v62, %v595_v2  ;;  %v564_v31 = vadd.f32 1.4214138, %v548_v51  ;;  %v541_v0 = vmul.f32 %v1738_v39, %v525_v15  ;;  %v794_v30 = vpack.c.bf16 %v1855_v14, %v1817_v25 }
 0x13d   : > { %v1871_v20 = vpop.eup %1347  ;;  %v549_v32 = vmul.f32 %v1859_v9, %v533_v55  ;;  %v543_v16 = vmul.f32 %v1794_v10, %v527_v49  ;;  %v722_v4 = vmul.f32 %v1346_v29, %v642_v46  ;;  %1357 = vpow2.f32 %v708_v63 }
 0x13e   : > { %v1350_v47 = vpop.eup %1349  ;;  %v627_v33 = vadd.f32 0.2548296, %v611_v7  ;;  %v580_v17 = vmul.f32 %v1852_v35, %v564_v31  ;;  %v753_v57 = vmul.f32 %v737_v58, %v1770_v13  ;;  %v518_v21 = vmul.f32 1.0614054, %v1871_v20 }
 0x13f   : > { %v1352_v24 = vpop.eup %1351  ;;  %v565_v48 = vadd.f32 1.4214138, %v549_v32  ;;  %v557_v43 = vadd.f32 1.4214138, %v541_v0  ;;  %v738_v6 = vsub.f32 1.0, %v722_v4  ;;  %vm404_vm13 = vcmp.ge.f32.partialorder %v1781_v3, 0.0 }
 0x140   : > { %v643_v36 = vmul.f32 %v1834_v62, %v627_v33  ;;  %v596_v22 = vadd.f32 -0.28449672, %v580_v17  ;;  %v559_v26 = vadd.f32 1.4214138, %v543_v16  ;;  %v1354_v59 = vpop.eup %1353  ;;  %v534_v34 = vadd.f32 -1.4531521, %v518_v21 }
 0x141   : > { %v581_v18 = vmul.f32 %v1859_v9, %v565_v48  ;;  %v710_v5 = vmul.f32 1.442695, %v679_v1  ;;  %v573_v2 = vmul.f32 %v1738_v39, %v557_v43  ;;  %v754_v63 = vmul.f32 %v738_v6, %v1807_v8 }
 0x142   : > { %v723_v51 = vmul.f32 %v1350_v47, %v643_v36  ;;  %v612_v13 = vmul.f32 %v1852_v35, %v596_v22  ;;  %v575_v58 = vmul.f32 %v1794_v10, %v559_v26  ;;  %v769_v62 = vadd.f32 1.0, %v753_v57 }
 0x143   : > { %v1887_v55 = vpop.eup %1355  ;;  %v597_v15 = vadd.f32 -0.28449672, %v581_v18  ;;  %v550_v49 = vmul.f32 %v1871_v20, %v534_v34  ;;  %v589_v29 = vadd.f32 -0.28449672, %v573_v2  ;;  %v770_v46 = vadd.f32 1.0, %v754_v63 }
 0x144   : > { %v739_v7 = vsub.f32 1.0, %v723_v51  ;;  %v628_v31 = vadd.f32 0.2548296, %v612_v13  ;;  %v519_v1 = vmul.f32 1.0614054, %v1887_v55  ;;  %v371_v36 = vmul.f32 0.5, %v1751_v56 }
 0x145   : > { %v613_v8 = vmul.f32 %v1859_v9, %v597_v15  ;;  %v566_v32 = vadd.f32 1.4214138, %v550_v49  ;;  %v591_v0 = vadd.f32 -0.28449672, %v575_v58  ;;  %v605_v16 = vmul.f32 %v1738_v39, %v589_v29 }
 0x146   : > { %v1895_v47 = vmul.f32 %v770_v46, %v1786_v28  ;;  %v755_v4 = vmul.f32 %v739_v7, %v1828_v11  ;;  %v644_v33 = vmul.f32 %v1852_v35, %v628_v31  ;;  %v535_v17 = vadd.f32 -1.4531521, %v519_v1 }
 0x147   : > { %v629_v57 = vadd.f32 0.2548296, %v613_v8  ;;  %v582_v48 = vmul.f32 %v1871_v20, %v566_v32  ;;  %v607_v21 = vmul.f32 %v1794_v10, %v591_v0  ;;  %v621_v43 = vadd.f32 0.2548296, %v605_v16  ;;  %v1358_v6 = vpop.eup %1357 }
 0x148   : > { %v771_v22 = vadd.f32 1.0, %v755_v4  ;;  %v551_v26 = vmul.f32 %v1887_v55, %v535_v17  ;;  %v796_v28 = vpack.c.bf16 %v1895_v47, %v1867_v52  ;;  %v724_v18 = vmul.f32 %v1352_v24, %v644_v33 }
 0x149   : > { %v598_v11 = vadd.f32 -0.28449672, %v582_v48  ;;  %v623_v34 = vadd.f32 0.2548296, %v607_v21  ;;  %v637_v35 = vmul.f32 %v1738_v39, %v621_v43  ;;  %v785_v2 = vmul.f32 %v769_v62, %v1765_v53 }
 0x14a   : > { %v787_v63 = vmul.f32 %v771_v22, %v371_v36  ;;  %v645_v51 = vmul.f32 %v1859_v9, %v629_v57  ;;  %v567_v13 = vadd.f32 1.4214138, %v551_v26  ;;  %1359 = vpow2.f32 %v710_v5 }
 0x14b   : > { %v614_v58 = vmul.f32 %v1871_v20, %v598_v11  ;;  %v639_v56 = vmul.f32 %v1794_v10, %v623_v34  ;;  %v717_v15 = vmul.f32 %v1746_v19, %v637_v35  ;;  %v740_v49 = vsub.f32 1.0, %v724_v18 }
 0x14c   : > { %v583_v24 = vmul.f32 %v1887_v55, %v567_v13  ;;  %v797_v39 = vpack.c.bf16 %v787_v63, %v785_v2  ;;  %v725_v29 = vmul.f32 %v1354_v59, %v645_v51  ;;  %v413_v10 = vsel %vm397_vm11, 1.0, %v1370_v42 }
 0x14d   : > { %v630_v53 = vadd.f32 0.2548296, %v614_v58  ;;  %v719_v62 = vmul.f32 %v1800_v38, %v639_v56  ;;  %v733_v9 = vsub.f32 1.0, %v717_v15  ;;  %v420_v19 = vsel %vm404_vm13, 1.0, %v1370_v42 }
 0x14e   : > { %v599_v46 = vadd.f32 -0.28449672, %v583_v24  ;;  %vm405_vm14 = vcmp.ge.f32.partialorder %v1792_v37, 0.0  ;;  %vm406_vm15 = vcmp.ge.f32.partialorder %v1814_v54, 0.0  ;;  %v415_v38 = vsel %vm399_vm12, 1.0, %v1370_v42 }
 0x14f   : > { %v646_v5 = vmul.f32 %v1871_v20, %v630_v53  ;;  %v735_v7 = vsub.f32 1.0, %v719_v62  ;;  %v749_v3 = vmul.f32 %v733_v9, %v413_v10  ;;  %v756_v59 = vmul.f32 %v740_v49, %v420_v19 }
 0x150   : > { %v615_v31 = vmul.f32 %v1887_v55, %v599_v46  ;;  %v741_v32 = vsub.f32 1.0, %v725_v29  ;;  %v365_v20 = vmul.f32 0.5, %v1580_v40  ;;  %v367_v16 = vmul.f32 0.5, %v1650_v23 }
 0x151   : > { %v726_v1 = vmul.f32 %v1358_v6, %v646_v5  ;;  %v751_v60 = vmul.f32 %v735_v7, %v415_v38  ;;  %v765_v8 = vadd.f32 1.0, %v749_v3  ;;  %v421_v54 = vsel %vm405_vm14, 1.0, %v1370_v42 }
 0x152   : > { %v631_v0 = vadd.f32 0.2548296, %v615_v31  ;;  %v422_v33 = vsel %vm406_vm15, 1.0, %v1370_v42  ;;  %v772_v57 = vadd.f32 1.0, %v756_v59  ;;  %v757_v6 = vmul.f32 %v741_v32, %v421_v54 }
 0x153   : > { %v742_v4 = vsub.f32 1.0, %v726_v1  ;;  %v767_v37 = vadd.f32 1.0, %v751_v60  ;;  %v781_v21 = vmul.f32 %v765_v8, %v365_v20  ;;  %vm407_vm0 = vcmp.ge.f32.partialorder %v1840_v12, 0.0 }
 0x154   : > { %v647_v17 = vmul.f32 %v1887_v55, %v631_v0  ;;  %v1360_v61 = vpop.eup %1359  ;;  %v372_v40 = vmul.f32 0.5, %v1762_v41  ;;  %v374_v23 = vmul.f32 0.5, %v1804_v45  ;;  %v423_v55 = vsel %vm407_vm0, 1.0, %v1370_v42  ;;  %v832_v42 = vld [vmem:[%s1979_s4] sm:$0x3] }
 0x155   : > { %v758_v48 = vmul.f32 %v742_v4, %v422_v33  ;;  %v783_v43 = vmul.f32 %v767_v37, %v367_v16  ;;  %v773_v35 = vadd.f32 1.0, %v757_v6  ;;  %v373_v41 = vmul.f32 0.5, %v1774_v44 }
 0x156   : > { %v727_v36 = vmul.f32 %v1360_v61, %v647_v17  ;;  %v788_v11 = vmul.f32 %v772_v57, %v372_v40  ;;  %v375_v45 = vmul.f32 0.5, %v1832_v27  ;;  %v1983_v25 = vsub.s32 0, %v1527_v50 }
 0x157   : > { %v774_v22 = vadd.f32 1.0, %v758_v48  ;;  %v795_v26 = vpack.c.bf16 %v783_v43, %v781_v21  ;;  %v789_v51 = vmul.f32 %v773_v35, %v373_v41  ;;  %v1984_v27 = vsub.s32 1, %v1527_v50 }
 0x158   : > { %v743_v18 = vsub.f32 1.0, %v727_v36  ;;  %v837_v44 = vrot.slane %v832_v42, %v1983_v25 }
 0x159   : > { %v790_v34 = vmul.f32 %v774_v22, %v374_v23  ;;  %1046 = vmatprep.mubr.bf16.mxu1 %v795_v26  ;;  %v841_v14 = vrot.slane %v832_v42, %v1984_v27 }
 0x15a   : > { %v759_v2 = vmul.f32 %v743_v18, %v423_v55  ;;  %1047 = vmatmul.mubr.bf16.vlgmr.msra.gmra.mrb[0].mxu1 %v794_v30 }
 0x15b   : > { %1056 = vmatprep.mubr.bf16.mxu1 %v797_v39  ;;  %v798_v12 = vpack.c.bf16 %v790_v34, %v788_v11 }
 0x15c   : > { %v775_v63 = vadd.f32 1.0, %v759_v2 }
 0x15e   : > { %v791_v13 = vmul.f32 %v775_v63, %v375_v45 }
 0x160   : > { %v799_v58 = vpack.c.bf16 %v791_v13, %v789_v51 }
 0x162   : > { %1057 = vmatmul.mubr.bf16.gmra.mrb[4].mxu1 %v796_v28 }
 0x163   : > { %1066 = vmatprep.mubr.bf16.mxu1 %v799_v58 }
 0x16a   : > { %1067 = vmatmul.mubr.bf16.gmra.mrb[8].mxu1 %v798_v12 }
 0x207   : > { %v1038_v52 = vpop.f32.mrb[16].mxu0 }
 0x208   : > { %v1039_v30 = vadd.f32 %v1038_v52, %v837_v44  ;;  %v1040_v47 = vpop.f32.mrb[17].mxu0 }
 0x209   : > { %v1041_v28 = vadd.f32 %v1040_v47, %v841_v14  ;;  %v1042_v56 = vpop.f32.mrb[18].mxu0 }
 0x20a   : > { %1077 = vst [vmem:[%s1954_s9] sm:$0xff] %v1039_v30  ;;  %v1043_v15 = vadd.f32 %v1042_v56, %v837_v44  ;;  %v1044_v50 = vpop.f32.mrb[19].mxu0 }
 0x20b   : > { %1078 = vst [vmem:[%s1954_s9 + $0x8] sm:$0xff] %v1041_v28  ;;  %v1045_v24 = vadd.f32 %v1044_v50, %v841_v14 }
 0x20c   : > { %1079 = vst [vmem:[%s1954_s9 + $0x10] sm:$0xff] %v1043_v15 }
 0x20d   : > { %1080 = vst [vmem:[%s1954_s9 + $0x18] sm:$0xff] %v1045_v24 }
 0x22d   : > { %v1048_v39 = vpop.f32.mrb[0].mxu1 }
 0x22e   : > { %v1049_v49 = vadd.f32 %v1048_v39, %v837_v44  ;;  %v1050_v53 = vpop.f32.mrb[1].mxu1 }
 0x22f   : > { %v1051_v62 = vadd.f32 %v1050_v53, %v841_v14  ;;  %v1052_v9 = vpop.f32.mrb[2].mxu1 }
 0x230   : > { %1081 = vst [vmem:[%s1954_s9 + $0x20] sm:$0xff] %v1049_v49  ;;  %v1053_v29 = vadd.f32 %v1052_v9, %v837_v44  ;;  %v1054_v46 = vpop.f32.mrb[3].mxu1 }
 0x231   : > { %1082 = vst [vmem:[%s1954_s9 + $0x28] sm:$0xff] %v1051_v62  ;;  %v1055_v10 = vadd.f32 %v1054_v46, %v841_v14 }
 0x232   : > { %1083 = vst [vmem:[%s1954_s9 + $0x30] sm:$0xff] %v1053_v29 }
 0x233   : > { %1084 = vst [vmem:[%s1954_s9 + $0x38] sm:$0xff] %v1055_v10 }
 0x235   : > { %v1058_v19 = vpop.f32.mrb[4].mxu1 }
 0x236   : > { %v1059_v5 = vadd.f32 %v1058_v19, %v837_v44  ;;  %v1060_v7 = vpop.f32.mrb[5].mxu1 }
 0x237   : > { %v1061_v3 = vadd.f32 %v1060_v7, %v841_v14  ;;  %v1062_v31 = vpop.f32.mrb[6].mxu1 }
 0x238   : > { %1085 = vst [vmem:[%s1954_s9 + $0x40] sm:$0xff] %v1059_v5  ;;  %v1063_v38 = vadd.f32 %v1062_v31, %v837_v44  ;;  %v1064_v59 = vpop.f32.mrb[7].mxu1 }
 0x239   : > { %1086 = vst [vmem:[%s1954_s9 + $0x48] sm:$0xff] %v1061_v3  ;;  %v1065_v1 = vadd.f32 %v1064_v59, %v841_v14 }
 0x23a   : > { %1087 = vst [vmem:[%s1954_s9 + $0x50] sm:$0xff] %v1063_v38 }
 0x23b   : > { %1088 = vst [vmem:[%s1954_s9 + $0x58] sm:$0xff] %v1065_v1 }
 0x23d   : > { %v1068_v60 = vpop.f32.mrb[8].mxu1 }
 0x23e   : > { %v1069_v8 = vadd.f32 %v1068_v60, %v837_v44  ;;  %v1070_v32 = vpop.f32.mrb[9].mxu1 }
 0x23f   : > { %v1071_v0 = vadd.f32 %v1070_v32, %v841_v14  ;;  %v1072_v20 = vpop.f32.mrb[10].mxu1 }
 0x240   : > { %1089 = vst [vmem:[%s1954_s9 + $0x60] sm:$0xff] %v1069_v8  ;;  %v1073_v16 = vadd.f32 %v1072_v20, %v837_v44  ;;  %v1074_v4 = vpop.f32.mrb[11].mxu1 }
 0x241   : > { %1090 = vst [vmem:[%s1954_s9 + $0x68] sm:$0xff] %v1071_v0  ;;  %v1075_v37 = vadd.f32 %v1074_v4, %v841_v14 }
 0x242   : > { %1091 = vst [vmem:[%s1954_s9 + $0x70] sm:$0xff] %v1073_v16 }
 0x243   : > { %1092 = vst [vmem:[%s1954_s9 + $0x78] sm:$0xff] %v1075_v37 }
 0x244 PF: > { %s15_s18 = sadd.s32 1, %s1367_s18  }
 0x245   : > { %p12_p4 = scmp.ge.s32.totalorder %s15_s18, 4  }
 0x247   :  { %14 = sbr.rel (!%p12_p4) target bundleno = 1 (0x1), region = 70 }

// kernel: simple_layer_net.9
= control target key start
LH: loop header
LB: loop body
LE: loop exit
PB: predicated region body
PF: predicated region fallthrough
CT: control target
= control target key end

     0   :  { %s1103_s21 = smov 0   ;;  %s1353_s0 = inlined_call_operand.vmem [shape: f32[2,64,256], index: 0, kind: input, shape index: {}]   ;;  %s1354_s1 = inlined_call_operand.vmem [shape: bf16[256,256], index: 1, kind: input, shape index: {}]   ;;  %s1355_s2 = inlined_call_operand.vmem [shape: f32[1,256], index: 2, kind: input, shape index: {}]   ;;  %s1356_s3 = inlined_call_operand.vmem [shape: bf16[256,32], index: 3, kind: input, shape index: {}]   ;;  %s1357_s4 = inlined_call_operand.vmem [shape: f32[1,32], index: 4, kind: input, shape index: {}]   ;;  %s1358_s5 = inlined_call_operand.vmem [shape: f32[1,256], index: 5, kind: input, shape index: {}]   ;;  %s1359_s6 = inlined_call_operand.vmem [shape: f32[2,64,32], index: 6, kind: output, shape index: {}]  }
   0x1 LB: > { %s886_s22 = sadd.s32 4294967295, %s1066_s21   ;;  %p890_p0 = scmp.ge.s32.totalorder %s1066_s21, 1  ;;  %s1066_s21 = sphi %s1103_s21, %s16_s21  }
   0x2   : > { %p212_p1 = scmp.lt.s32.totalorder %s1066_s21, 3 }
   0x4   : > { %p213_p2 = pnand %p890_p0, %p212_p1 }
   0x5   : > { %v996_v0 = vld [vmem:[%s1354_s1 + $0x4] ss:$8 sps:$4 sm:$0xff] (!%p213_p2)   ;;  %v998_v1 = vld [vmem:[%s1354_s1] ss:$8 sps:$4 sm:$0xff] (!%p213_p2)   ;;  %v999_v2 = vld [vmem:[%s1354_s1 + $0x14] ss:$8 sps:$4 sm:$0xff] (!%p213_p2)  }
   0x6   : > { %216 = sbr.rel (%p213_p2) target bundleno = 537 (0x219), region = 44  ;;  %481 = vmatprep.subr.bf16.mxu0 (!%p213_p2), %v996_v0  ;;  %v1001_v3 = vld [vmem:[%s1354_s1 + $0x10] ss:$8 sps:$4 sm:$0xff] (!%p213_p2)   ;;  %v1002_v4 = vld [vmem:[%s1354_s1 + $0x24] ss:$8 sps:$4 sm:$0xff] (!%p213_p2)   ;;  %p242_p3 = scmp.lt.s32.totalorder (!%p213_p2), %s886_s22, 1 }
   0x7   : > { %482 = vmatpush1.bf16.msra.mxu0 (!%p213_p2), %v998_v1  ;;  %v1004_v5 = vld [vmem:[%s1354_s1 + $0x20] ss:$8 sps:$4 sm:$0xff] (!%p213_p2)   ;;  %v1005_v6 = vld [vmem:[%s1354_s1 + $0x34] ss:$8 sps:$4 sm:$0xff] (!%p213_p2)   ;;  %v1007_v7 = vld [vmem:[%s1354_s1 + $0x30] ss:$8 sps:$4 sm:$0xff] (!%p213_p2)  }
   0x8   : > { %483 = vmatprep.subr.bf16.mxu0 (!%p213_p2), %v999_v2  ;;  %v1008_v8 = vld [vmem:[%s1354_s1 + $0x44] ss:$8 sps:$4 sm:$0xff] (!%p213_p2)   ;;  %v1010_v9 = vld [vmem:[%s1354_s1 + $0x40] ss:$8 sps:$4 sm:$0xff] (!%p213_p2)   ;;  %v1011_v10 = vld [vmem:[%s1354_s1 + $0x54] ss:$8 sps:$4 sm:$0xff] (!%p213_p2)  }
   0x9   : > { %v1013_v11 = vld [vmem:[%s1354_s1 + $0x50] ss:$8 sps:$4 sm:$0xff] (!%p213_p2)   ;;  %v1014_v12 = vld [vmem:[%s1354_s1 + $0x64] ss:$8 sps:$4 sm:$0xff] (!%p213_p2)   ;;  %v1016_v16 = vld [vmem:[%s1354_s1 + $0x60] ss:$8 sps:$4 sm:$0xff] (!%p213_p2)  }
   0xa   : > { %v1017_v17 = vld [vmem:[%s1354_s1 + $0x74] ss:$8 sps:$4 sm:$0xff] (!%p213_p2)   ;;  %v1019_v18 = vld [vmem:[%s1354_s1 + $0x70] ss:$8 sps:$4 sm:$0xff] (!%p213_p2)   ;;  %v1020_v19 = vld [vmem:[%s1354_s1 + $0x84] ss:$8 sps:$4 sm:$0xff] (!%p213_p2)  }
   0xb   : > { %484 = vmatpush1.bf16.msra.mxu0 (!%p213_p2), %v1001_v3  ;;  %v1044_v20 = vld [vmem:[%s1356_s3 + $0x40] sm:$0xff] (!%p213_p2)   ;;  %v1046_v23 = vld [vmem:[%s1356_s3 + $0x48] sm:$0xff] (!%p213_p2)   ;;  %v1048_v25 = vld [vmem:[%s1356_s3 + $0x50] sm:$0xff] (!%p213_p2)  }
   0xc   : > { %485 = vmatprep.subr.bf16.mxu0 (!%p213_p2), %v1002_v4  ;;  %v1045_v21 = vld [vmem:[%s1356_s3] sm:$0xff] (!%p213_p2)   ;;  %948 = vmatprep.subr.bf16.mxu1 (!%p213_p2), %v1044_v20  ;;  %v1047_v24 = vld [vmem:[%s1356_s3 + $0x8] sm:$0xff] (!%p213_p2)   ;;  %v1023_v26 = vld [vmem:[%s1354_s1 + $0x94] ss:$8 sps:$4 sm:$0xff] (!%p213_p2)  }
   0xd   : > { %s1361_s22 = smov (!%p242_p3, %s886_s22), 1  ;;  %v1022_v22 = vld [vmem:[%s1354_s1 + $0x80] ss:$8 sps:$4 sm:$0xff]   ;;  %949 = vmatpush3.bf16.msra.mxu1 %v1045_v21  ;;  %v1025_v27 = vld [vmem:[%s1354_s1 + $0x90] ss:$8 sps:$4 sm:$0xff]  }
   0xe   : > { %s946_s19 = sshll.u32 %s1361_s22, 7  ;;  %950 = vmatprep.subr.bf16.mxu1 %v1046_v23  ;;  %v1049_v28 = vld [vmem:[%s1356_s3 + $0x10] sm:$0xff]   ;;  %v1050_v29 = vld [vmem:[%s1356_s3 + $0x58] sm:$0xff]   ;;  %v1026_v30 = vld [vmem:[%s1354_s1 + $0xa4] ss:$8 sps:$4 sm:$0xff]   ;;  %s947_s17 = sshll.u32 %s1361_s22, 6 }
   0xf   : > { %486 = vmatpush1.bf16.msra.mxu0 %v1004_v5  ;;  %s1150_s26 = scalar_lea.vmem %s1353_s0, %s946_s19  ;;  %v1051_v31 = vld [vmem:[%s1356_s3 + $0x18] sm:$0xff]   ;;  %v1028_v32 = vld [vmem:[%s1354_s1 + $0xa0] ss:$8 sps:$4 sm:$0xff]   ;;  %v1032_v37 = vld [vmem:[%s1354_s1 + $0xc4] ss:$8 sps:$4 sm:$0xff]   ;;  %s1332_s24 = scalar_lea.vmem %s1359_s6, %s947_s17 }
  0x10   : > { %487 = vmatprep.subr.bf16.mxu0 %v1005_v6  ;;  %v254_v13 = vld [vmem:[%s1150_s26 + $0x8] sm:$0xff]  ;;  %v256_v14 = vld [vmem:[%s1150_s26 + $0x18] sm:$0xff]  ;;  %v1052_v33 = vld [vmem:[%s1356_s3 + $0x60] sm:$0xff]  }
  0x11   : > { %v270_v15 = vpack.c.bf16 %v256_v14, %v254_v13  ;;  %951 = vmatpush3.bf16.msra.mxu1 %v1047_v24  ;;  %v1029_v34 = vld [vmem:[%s1354_s1 + $0xb4] ss:$8 sps:$4 sm:$0xff]   ;;  %v1053_v35 = vld [vmem:[%s1356_s3 + $0x20] sm:$0xff]   ;;  %v1031_v36 = vld [vmem:[%s1354_s1 + $0xb0] ss:$8 sps:$4 sm:$0xff]  }
  0x12   : > { %952 = vmatprep.subr.bf16.mxu1 %v1048_v25  ;;  %v1034_v38 = vld [vmem:[%s1354_s1 + $0xc0] ss:$8 sps:$4 sm:$0xff]   ;;  %v1035_v39 = vld [vmem:[%s1354_s1 + $0xd4] ss:$8 sps:$4 sm:$0xff]   ;;  %v1037_v40 = vld [vmem:[%s1354_s1 + $0xd0] ss:$8 sps:$4 sm:$0xff]  }
  0x13   : > { %488 = vmatpush1.bf16.msra.mxu0 %v1007_v7  ;;  %513 = vmatprep.mubr.bf16.mxu0 %v270_v15  ;;  %v1038_v41 = vld [vmem:[%s1354_s1 + $0xe4] ss:$8 sps:$4 sm:$0xff]   ;;  %v1040_v42 = vld [vmem:[%s1354_s1 + $0xe0] ss:$8 sps:$4 sm:$0xff]   ;;  %v1041_v43 = vld [vmem:[%s1354_s1 + $0xf4] ss:$8 sps:$4 sm:$0xff]  }
  0x14   : > { %489 = vmatprep.subr.bf16.mxu0 %v1008_v8  ;;  %v1043_v44 = vld [vmem:[%s1354_s1 + $0xf0] ss:$8 sps:$4 sm:$0xff]   ;;  %v253_v45 = vld [vmem:[%s1150_s26] sm:$0xff]  ;;  %v258_v47 = vld [vmem:[%s1150_s26 + $0x28] sm:$0xff]  ;;  %v311_v8 = vlaneseq }
  0x15   : > { %953 = vmatpush3.bf16.msra.mxu1 %v1049_v28  ;;  %v255_v46 = vld [vmem:[%s1150_s26 + $0x10] sm:$0xff]  ;;  %v260_v48 = vld [vmem:[%s1150_s26 + $0x38] sm:$0xff]  ;;  %v257_v51 = vld [vmem:[%s1150_s26 + $0x20] sm:$0xff] }
  0x16   : > { %954 = vmatprep.subr.bf16.mxu1 %v1050_v29  ;;  %v269_v49 = vpack.c.bf16 %v255_v46, %v253_v45  ;;  %v272_v50 = vpack.c.bf16 %v260_v48, %v258_v47  ;;  %v259_v52 = vld [vmem:[%s1150_s26 + $0x30] sm:$0xff]  ;;  %v262_v53 = vld [vmem:[%s1150_s26 + $0x48] sm:$0xff]  ;;  %v264_v54 = vld [vmem:[%s1150_s26 + $0x58] sm:$0xff] }
  0x17   : > { %490 = vmatpush1.bf16.msra.mxu0 %v1010_v9  ;;  %v271_v55 = vpack.c.bf16 %v259_v52, %v257_v51  ;;  %v274_v56 = vpack.c.bf16 %v264_v54, %v262_v53  ;;  %v261_v57 = vld [vmem:[%s1150_s26 + $0x40] sm:$0xff]  ;;  %v263_v58 = vld [vmem:[%s1150_s26 + $0x50] sm:$0xff]  ;;  %v266_v59 = vld [vmem:[%s1150_s26 + $0x68] sm:$0xff]  ;;  %v312_v9 = vshrl.u32 %v311_v8, 7 }
  0x18   : > { %491 = vmatprep.subr.bf16.mxu0 %v1011_v10  ;;  %v268_v60 = vld [vmem:[%s1150_s26 + $0x78] sm:$0xff]  ;;  %v273_v61 = vpack.c.bf16 %v263_v58, %v261_v57  ;;  %v265_v63 = vld [vmem:[%s1150_s26 + $0x60] sm:$0xff]  ;;  %v267_v0 = vld [vmem:[%s1150_s26 + $0x70] sm:$0xff] }
  0x19   : > { %955 = vmatpush3.bf16.msra.mxu1 %v1051_v31  ;;  %v276_v62 = vpack.c.bf16 %v268_v60, %v266_v59  ;;  %v275_v1 = vpack.c.bf16 %v267_v0, %v265_v63  ;;  %v1054_v2 = vld [vmem:[%s1356_s3 + $0x68] sm:$0xff]   ;;  %v1056_v4 = vld [vmem:[%s1356_s3 + $0x70] sm:$0xff]   ;;  %v1058_v6 = vld [vmem:[%s1356_s3 + $0x78] sm:$0xff]   ;;  %v313_v10 = vsub.s32 0, %v312_v9 }
  0x1a   : > { %956 = vmatprep.subr.bf16.mxu1 %v1052_v33  ;;  %v1055_v3 = vld [vmem:[%s1356_s3 + $0x28] sm:$0xff]   ;;  %v1057_v5 = vld [vmem:[%s1356_s3 + $0x30] sm:$0xff]   ;;  %v1059_v7 = vld [vmem:[%s1356_s3 + $0x38] sm:$0xff]  }
  0x1b   : > { %492 = vmatpush1.bf16.msra.mxu0 %v1013_v11  ;;  %v309_v11 = vld [vmem:[%s1355_s2] sm:$0x3] }
  0x1c   : > { %493 = vmatprep.subr.bf16.mxu0 %v1014_v12  ;;  %v317_v12 = vsub.s32 1, %v312_v9  ;;  %v570_v13 = vld [vmem:[%s1358_s5] sm:$0x3]  ;;  %v1285_v14 = vrot.slane %v309_v11, %v313_v10 }
  0x1d   : > { %957 = vmatpush3.bf16.msra.mxu1 %v1053_v35 }
  0x1e   : > { %958 = vmatprep.subr.bf16.mxu1 %v1054_v2  ;;  %v1287_v15 = vrot.slane %v309_v11, %v317_v12 }
  0x1f   : > { %494 = vmatpush1.bf16.msra.mxu0 %v1016_v16  ;;  %v1289_v16 = vrot.slane %v570_v13, %v313_v10 }
  0x20   : > { %495 = vmatprep.subr.bf16.mxu0 %v1017_v17 }
  0x21   : > { %959 = vmatpush3.bf16.msra.mxu1 %v1055_v3 }
  0x22   : > { %960 = vmatprep.subr.bf16.mxu1 %v1056_v4 }
  0x23   : > { %496 = vmatpush1.bf16.msra.mxu0 %v1019_v18  ;;  %v1291_v18 = vrot.slane %v570_v13, %v317_v12 }
  0x24   : > { %497 = vmatprep.subr.bf16.mxu0 %v1020_v19 }
  0x25   : > { %961 = vmatpush3.bf16.msra.mxu1 %v1057_v5 }
  0x26   : > { %962 = vmatprep.subr.bf16.mxu1 %v1058_v6 }
  0x27   : > { %498 = vmatpush1.bf16.msra.mxu0 %v1022_v22 }
  0x28   : > { %499 = vmatprep.subr.bf16.mxu0 %v1023_v26 }
  0x29   : > { %963 = vmatpush3.bf16.msra.mxu1 %v1059_v7 }
  0x2b   : > { %500 = vmatpush1.bf16.msra.mxu0 %v1025_v27 }
  0x2c   : > { %501 = vmatprep.subr.bf16.mxu0 %v1026_v30 }
  0x2f   : > { %502 = vmatpush1.bf16.msra.mxu0 %v1028_v32 }
  0x30   : > { %503 = vmatprep.subr.bf16.mxu0 %v1029_v34 }
  0x33   : > { %504 = vmatpush1.bf16.msra.mxu0 %v1031_v36 }
  0x34   : > { %505 = vmatprep.subr.bf16.mxu0 %v1032_v37 }
  0x37   : > { %506 = vmatpush1.bf16.msra.mxu0 %v1034_v38 }
  0x38   : > { %507 = vmatprep.subr.bf16.mxu0 %v1035_v39 }
  0x3b   : > { %508 = vmatpush1.bf16.msra.mxu0 %v1037_v40 }
  0x3c   : > { %509 = vmatprep.subr.bf16.mxu0 %v1038_v41 }
  0x3f   : > { %510 = vmatpush1.bf16.msra.mxu0 %v1040_v42 }
  0x40   : > { %511 = vmatprep.subr.bf16.mxu0 %v1041_v43 }
  0x43   : > { %512 = vmatpush1.bf16.msra.mxu0 %v1043_v44 }
  0x46   : > { %514 = vmatmul.mubr.bf16.vlgmr.msra.gmra.mrb[0].mxu0 %v269_v49 }
  0x47   : > { %523 = vmatprep.mubr.bf16.mxu0 %v272_v50 }
  0x4e   : > { %524 = vmatmul.mubr.bf16.gmra.mrb[4].mxu0 %v271_v55 }
  0x4f   : > { %533 = vmatprep.mubr.bf16.mxu0 %v274_v56 }
  0x56   : > { %534 = vmatmul.mubr.bf16.gmra.mrb[8].mxu0 %v273_v61 }
  0x57   : > { %543 = vmatprep.mubr.bf16.mxu0 %v276_v62 }
  0x5e   : > { %544 = vmatmul.mubr.bf16.gmra.mrb[12].mxu0 %v275_v1 }
 0x119   : > { %v515_v17 = vpop.f32.mrb[0].mxu0 }
 0x11a   : > { %v516_v19 = vadd.f32 %v515_v17, %v1285_v14  ;;  %v517_v20 = vpop.f32.mrb[1].mxu0 }
 0x11b   : > { %v518_v21 = vadd.f32 %v517_v20, %v1287_v15  ;;  %v519_v22 = vpop.f32.mrb[2].mxu0 }
 0x11c   : > { %v582_v23 = vmul.f32 %v1289_v16, %v516_v19  ;;  %v520_v24 = vadd.f32 %v519_v22, %v1285_v14  ;;  %v521_v25 = vpop.f32.mrb[3].mxu0  ;;  %vm554_vm0 = vcmp.ge.f32.partialorder %v516_v19, 0.0 }
 0x11d   : > { %v583_v26 = vmul.f32 %v1291_v18, %v518_v21  ;;  %v522_v27 = vadd.f32 %v521_v25, %v1287_v15  ;;  %vm555_vm2 = vcmp.ge.f32.partialorder %v518_v21, 0.0 }
 0x11e   : > { %vm556_vm1 = vcmp.ge.f32.partialorder %v520_v24, 0.0  ;;  %v584_v28 = vmul.f32 %v1289_v16, %v520_v24  ;;  %v598_v30 = vsel %vm554_vm0, %v516_v19, %v582_v23  ;;  %vm822_vm0 = vcmask 261120  }
 0x11f   : > { %v585_v29 = vmul.f32 %v1291_v18, %v522_v27  ;;  %vm557_vm3 = vcmp.ge.f32.partialorder %v522_v27, 0.0  ;;  %v599_v33 = vsel %vm555_vm2, %v518_v21, %v583_v26 }
 0x120   : > { %v600_v31 = vsel %vm556_vm1, %v520_v24, %v584_v28 }
 0x121   : > { %v525_v32 = vpop.f32.mrb[4].mxu0  ;;  %v601_v34 = vsel %vm557_vm3, %v522_v27, %v585_v29  ;;  %v614_v35 = vpack.c.bf16 %v600_v31, %v598_v30 }
 0x122   : > { %v526_v36 = vadd.f32 %v525_v32, %v1285_v14  ;;  %v527_v37 = vpop.f32.mrb[5].mxu0  ;;  %v615_v38 = vpack.c.bf16 %v601_v34, %v599_v33 }
 0x123   : > { %v528_v39 = vadd.f32 %v527_v37, %v1287_v15  ;;  %v529_v40 = vpop.f32.mrb[6].mxu0 }
 0x124   : > { %v586_v41 = vmul.f32 %v1289_v16, %v526_v36  ;;  %v530_v42 = vadd.f32 %v529_v40, %v1285_v14  ;;  %v531_v43 = vpop.f32.mrb[7].mxu0  ;;  %789 = vmatprep.mubr.bf16.mxu1 %v615_v38  ;;  %vm558_vm4 = vcmp.ge.f32.partialorder %v526_v36, 0.0 }
 0x125   : > { %v587_v44 = vmul.f32 %v1291_v18, %v528_v39  ;;  %v532_v45 = vadd.f32 %v531_v43, %v1287_v15  ;;  %790 = vmatmul.mubr.bf16.vlgmr.msra.gmra.mrb[0].mxu1 %v614_v35  ;;  %vm559_vm5 = vcmp.ge.f32.partialorder %v528_v39, 0.0 }
 0x126   : > { %vm560_vm6 = vcmp.ge.f32.partialorder %v530_v42, 0.0  ;;  %v588_v46 = vmul.f32 %v1289_v16, %v530_v42  ;;  %v602_v48 = vsel %vm558_vm4, %v526_v36, %v586_v41 }
 0x127   : > { %vm561_vm7 = vcmp.ge.f32.partialorder %v532_v45, 0.0  ;;  %v589_v47 = vmul.f32 %v1291_v18, %v532_v45  ;;  %v603_v51 = vsel %vm559_vm5, %v528_v39, %v587_v44 }
 0x128   : > { %v604_v49 = vsel %vm560_vm6, %v530_v42, %v588_v46 }
 0x129   : > { %v535_v50 = vpop.f32.mrb[8].mxu0  ;;  %v605_v52 = vsel %vm561_vm7, %v532_v45, %v589_v47  ;;  %v616_v53 = vpack.c.bf16 %v604_v49, %v602_v48 }
 0x12a   : > { %v536_v54 = vadd.f32 %v535_v50, %v1285_v14  ;;  %v537_v55 = vpop.f32.mrb[9].mxu0  ;;  %v617_v56 = vpack.c.bf16 %v605_v52, %v603_v51 }
 0x12b   : > { %v538_v57 = vadd.f32 %v537_v55, %v1287_v15  ;;  %v539_v58 = vpop.f32.mrb[10].mxu0 }
 0x12c   : > { %v590_v59 = vmul.f32 %v1289_v16, %v536_v54  ;;  %v540_v60 = vadd.f32 %v539_v58, %v1285_v14  ;;  %v541_v61 = vpop.f32.mrb[11].mxu0  ;;  %797 = vmatprep.mubr.bf16.mxu1 %v617_v56  ;;  %vm562_vm8 = vcmp.ge.f32.partialorder %v536_v54, 0.0 }
 0x12d   : > { %v591_v62 = vmul.f32 %v1291_v18, %v538_v57  ;;  %v542_v63 = vadd.f32 %v541_v61, %v1287_v15  ;;  %798 = vmatmul.mubr.bf16.gmra.mrb[4].mxu1 %v616_v53  ;;  %vm563_vm9 = vcmp.ge.f32.partialorder %v538_v57, 0.0 }
 0x12e   : > { %vm564_vm10 = vcmp.ge.f32.partialorder %v540_v60, 0.0  ;;  %v592_v0 = vmul.f32 %v1289_v16, %v540_v60  ;;  %v606_v2 = vsel %vm562_vm8, %v536_v54, %v590_v59 }
 0x12f   : > { %vm565_vm11 = vcmp.ge.f32.partialorder %v542_v63, 0.0  ;;  %v593_v1 = vmul.f32 %v1291_v18, %v542_v63  ;;  %v607_v5 = vsel %vm563_vm9, %v538_v57, %v591_v62 }
 0x130   : > { %v608_v3 = vsel %vm564_vm10, %v540_v60, %v592_v0 }
 0x131   : > { %v545_v4 = vpop.f32.mrb[12].mxu0  ;;  %v609_v6 = vsel %vm565_vm11, %v542_v63, %v593_v1  ;;  %v618_v7 = vpack.c.bf16 %v608_v3, %v606_v2 }
 0x132   : > { %v546_v8 = vadd.f32 %v545_v4, %v1285_v14  ;;  %v547_v9 = vpop.f32.mrb[13].mxu0  ;;  %v619_v10 = vpack.c.bf16 %v609_v6, %v607_v5 }
 0x133   : > { %v548_v11 = vadd.f32 %v547_v9, %v1287_v15  ;;  %v549_v12 = vpop.f32.mrb[14].mxu0 }
 0x134   : > { %v594_v13 = vmul.f32 %v1289_v16, %v546_v8  ;;  %v550_v17 = vadd.f32 %v549_v12, %v1285_v14  ;;  %v551_v19 = vpop.f32.mrb[15].mxu0  ;;  %805 = vmatprep.mubr.bf16.mxu1 %v619_v10  ;;  %vm566_vm12 = vcmp.ge.f32.partialorder %v546_v8, 0.0 }
 0x135   : > { %v595_v20 = vmul.f32 %v1291_v18, %v548_v11  ;;  %v552_v21 = vadd.f32 %v551_v19, %v1287_v15  ;;  %806 = vmatmul.mubr.bf16.gmra.mrb[8].mxu1 %v618_v7  ;;  %vm567_vm13 = vcmp.ge.f32.partialorder %v548_v11, 0.0  ;;  %v927_v15 = vld [vmem:[%s1357_s4] ss:$0 sm:$0xff] }
 0x136   : > { %vm568_vm14 = vcmp.ge.f32.partialorder %v550_v17, 0.0  ;;  %v596_v22 = vmul.f32 %v1289_v16, %v550_v17  ;;  %v610_v24 = vsel %vm566_vm12, %v546_v8, %v594_v13 }
 0x137   : > { %vm569_vm15 = vcmp.ge.f32.partialorder %v552_v21, 0.0  ;;  %v597_v23 = vmul.f32 %v1291_v18, %v552_v21  ;;  %v611_v26 = vsel %vm567_vm13, %v548_v11, %v595_v20 }
 0x138   : > { %v612_v25 = vsel %vm568_vm14, %v550_v17, %v596_v22 }
 0x139   : > { %v613_v14 = vsel %vm569_vm15, %v552_v21, %v597_v23  ;;  %v620_v27 = vpack.c.bf16 %v612_v25, %v610_v24 }
 0x13a   : > { %v621_v28 = vpack.c.bf16 %v613_v14, %v611_v26 }
 0x13c   : > { %813 = vmatprep.mubr.bf16.mxu1 %v621_v28 }
 0x13d   : > { %814 = vmatmul.mubr.bf16.gmra.mrb[12].mxu1 %v620_v27 }
 0x1f8   : > { %v964_v29 = vpop.f32.mrb[0].mxu1 }
 0x1f9   : > { %v965_v30 = vpop.f32.mrb[1].mxu1 }
 0x1fa   : > { %v966_v31 = vadd.f32 %v965_v30, %v964_v29  ;;  %v967_v16 = vpop.f32.mrb[2].mxu1 }
 0x1fb   : > { %v968_v18 = vpop.f32.mrb[3].mxu1 }
 0x1fc   : > { %v792_v32 = vadd.f32 %v966_v31, %v927_v15  ;;  %v969_v33 = vadd.f32 %v968_v18, %v967_v16 }
 0x1fe   : > { %823 = vst.msk [vmem:[%s1332_s24] sm:$0xff] %vm822_vm0, %v792_v32  ;;  %v795_v34 = vadd.f32 %v969_v33, %v927_v15 }
 0x200   : > { %824 = vst.msk [vmem:[%s1332_s24 + $0x8] sm:$0xff] %vm822_vm0, %v795_v34  ;;  %v970_v35 = vpop.f32.mrb[4].mxu1 }
 0x201   : > { %v971_v36 = vpop.f32.mrb[5].mxu1 }
 0x202   : > { %v972_v37 = vadd.f32 %v971_v36, %v970_v35  ;;  %v973_v38 = vpop.f32.mrb[6].mxu1 }
 0x203   : > { %v974_v39 = vpop.f32.mrb[7].mxu1 }
 0x204   : > { %v800_v40 = vadd.f32 %v972_v37, %v927_v15  ;;  %v975_v41 = vadd.f32 %v974_v39, %v973_v38 }
 0x206   : > { %825 = vst.msk [vmem:[%s1332_s24 + $0x10] sm:$0xff] %vm822_vm0, %v800_v40  ;;  %v803_v42 = vadd.f32 %v975_v41, %v927_v15 }
 0x208   : > { %826 = vst.msk [vmem:[%s1332_s24 + $0x18] sm:$0xff] %vm822_vm0, %v803_v42  ;;  %v976_v43 = vpop.f32.mrb[8].mxu1 }
 0x209   : > { %v977_v44 = vpop.f32.mrb[9].mxu1 }
 0x20a   : > { %v978_v45 = vadd.f32 %v977_v44, %v976_v43  ;;  %v979_v46 = vpop.f32.mrb[10].mxu1 }
 0x20b   : > { %v980_v47 = vpop.f32.mrb[11].mxu1 }
 0x20c   : > { %v808_v48 = vadd.f32 %v978_v45, %v927_v15  ;;  %v981_v49 = vadd.f32 %v980_v47, %v979_v46 }
 0x20e   : > { %827 = vst.msk [vmem:[%s1332_s24 + $0x20] sm:$0xff] %vm822_vm0, %v808_v48  ;;  %v811_v50 = vadd.f32 %v981_v49, %v927_v15 }
 0x210   : > { %828 = vst.msk [vmem:[%s1332_s24 + $0x28] sm:$0xff] %vm822_vm0, %v811_v50  ;;  %v982_v51 = vpop.f32.mrb[12].mxu1 }
 0x211   : > { %v983_v52 = vpop.f32.mrb[13].mxu1 }
 0x212   : > { %v984_v53 = vadd.f32 %v983_v52, %v982_v51  ;;  %v985_v54 = vpop.f32.mrb[14].mxu1 }
 0x213   : > { %v986_v55 = vpop.f32.mrb[15].mxu1 }
 0x214   : > { %v816_v56 = vadd.f32 %v984_v53, %v927_v15  ;;  %v987_v57 = vadd.f32 %v986_v55, %v985_v54 }
 0x216   : > { %829 = vst.msk [vmem:[%s1332_s24 + $0x30] sm:$0xff] %vm822_vm0, %v816_v56  ;;  %v819_v58 = vadd.f32 %v987_v57, %v927_v15 }
 0x218   : > { %830 = vst.msk [vmem:[%s1332_s24 + $0x38] sm:$0xff] %vm822_vm0, %v819_v58 }
 0x219 PF: > { %s16_s21 = sadd.s32 1, %s1066_s21  }
 0x21a   : > { %p13_p4 = scmp.ge.s32.totalorder %s16_s21, 4  }
 0x21c   :  { %15 = sbr.rel (!%p13_p4) target bundleno = 1 (0x1), region = 74 }

// kernel: simple_layer_net.6
= control target key start
LH: loop header
LB: loop body
LE: loop exit
PB: predicated region body
PF: predicated region fallthrough
CT: control target
= control target key end

     0   :  { %s10759_s21 = smov 0   ;;  %s16598_s0 = inlined_call_operand.vmem [shape: f32[2,96,256], index: 0, kind: input, shape index: {}]   ;;  %s16599_s1 = inlined_call_operand.vmem [shape: f32[96,1], index: 1, kind: input, shape index: {}]   ;;  %s16600_s2 = inlined_call_operand.vmem [shape: bf16[256,128], index: 2, kind: input, shape index: {}]   ;;  %s16601_s3 = inlined_call_operand.vmem [shape: f32[1,128], index: 3, kind: input, shape index: {}]   ;;  %s16602_s4 = inlined_call_operand.vmem [shape: bf16[128,128], index: 4, kind: input, shape index: {}]   ;;  %s16603_s5 = inlined_call_operand.vmem [shape: f32[1,128], index: 5, kind: input, shape index: {}]   ;;  %s16604_s6 = inlined_call_operand.vmem [shape: bf16[1152,128], index: 6, kind: input, shape index: {}]   ;;  %s16605_s7 = inlined_call_operand.vmem [shape: f32[1,128], index: 7, kind: input, shape index: {}]   ;;  %s16606_s8 = inlined_call_operand.vmem [shape: bf16[3200,128], index: 8, kind: input, shape index: {}]   ;;  %s16607_s9 = inlined_call_operand.vmem [shape: f32[1,128], index: 9, kind: input, shape index: {}]   ;;  %s16608_s10 = inlined_call_operand.vmem [shape: bf16[384,256], index: 10, kind: input, shape index: {}]   ;;  %s16609_s11 = inlined_call_operand.vmem [shape: f32[1,256], index: 11, kind: input, shape index: {}]   ;;  %s16610_s12 = inlined_call_operand.vmem [shape: f32[2,96,256], index: 12, kind: output, shape index: {}]  }
   0x1 LB: > { %s8264_s22 = sadd.s32 4294967295, %s10689_s21   ;;  %p8268_p0 = scmp.ge.s32.totalorder %s10689_s21, 1  ;;  %s10689_s21 = sphi %s10759_s21, %s22_s21  }
   0x2   : > { %p362_p1 = scmp.lt.s32.totalorder %s10689_s21, 3 }
   0x4   : > { %p363_p2 = pnand %p8268_p0, %p362_p1 }
   0x6   : > { %366 = sbr.rel (%p363_p2) target bundleno = 2156 (0x86c), region = 68 }
   0xd   : > { %v441_v0 = vld [vmem:[%s16599_s1 + $0x10] sm:$0xff]  ;;  %v439_v1 = vld [vmem:[%s16599_s1] sm:$0xff]  ;;  %v451_v2 = vlaneseq  ;;  %v16656_v3 = vmov 0   ;;  %v442_v6 = vld [vmem:[%s16599_s1 + $0x18] sm:$0xff]  ;;  %v10692_v38 = vmov 1.0|1.0  }
   0xe   : > { %10012 = vset.pattern.permute.xlu1 %v16656_v3  ;;  %10011 = vset.pattern.permute.xlu0 %v16656_v3  ;;  %v440_v7 = vld [vmem:[%s16599_s1 + $0x8] sm:$0xff]  ;;  %v443_v13 = vld [vmem:[%s16599_s1 + $0x20] sm:$0xff]  ;;  %v446_v36 = vld [vmem:[%s16599_s1 + $0x38] sm:$0xff]  ;;  %p11111_p3 = scmp.lt.s32.totalorder %s8264_s22, 1  ;;  %v16895_v27 = vmov 0  ;;  %v16897_v28 = vmov 0 }
   0xf   : > { %725 = vperm.xlu1 %10012, %v441_v0   ;;  %715 = vperm.xlu0 %10011, %v439_v1   ;;  %v10775_v4 = vshrl.u32 %v451_v2, 7  ;;  %v485_v5 = vand.u32 127, %v451_v2  ;;  %v444_v12 = vld [vmem:[%s16599_s1 + $0x28] sm:$0xff]  ;;  %v445_v37 = vld [vmem:[%s16599_s1 + $0x30] sm:$0xff]  ;;  %v447_v48 = vld [vmem:[%s16599_s1 + $0x40] sm:$0xff]  ;;  %v16899_v31 = vmov 0 }
  0x10   : > { %v448_v47 = vld [vmem:[%s16599_s1 + $0x48] sm:$0xff]  ;;  %v450_v57 = vld [vmem:[%s16599_s1 + $0x58] sm:$0xff]  ;;  %v449_v58 = vld [vmem:[%s16599_s1 + $0x50] sm:$0xff]  ;;  %v16901_v32 = vmov 0  ;;  %s17435_s22 = smov (!%p11111_p3, %s8264_s22), 1  ;;  %v16934_v59 = vmov 0 }
  0x11   : > { %v453_v8 = vadd.s32 8, %v10775_v4  ;;  %v486_v9 = vadd.s32 128, %v485_v5  ;;  %v487_v10 = vand.u32 31, %v10775_v4  ;;  %v10785_v11 = vand.u32 31, %v485_v5  ;;  %s9999_s14 = smul.u32 192, %s17435_s22 }
  0x12   : > { %v454_v14 = vadd.s32 16, %v10775_v4  ;;  %v455_v15 = vadd.s32 24, %v10775_v4  ;;  %v456_v16 = vadd.s32 32, %v10775_v4  ;;  %v457_v17 = vadd.s32 40, %v10775_v4 }
  0x13   : > { %730 = vperm.xlu1 %10012, %v442_v6   ;;  %720 = vperm.xlu0 %10011, %v440_v7   ;;  %v488_v18 = vand.u32 31, %v453_v8  ;;  %v10797_v19 = vand.u32 31, %v486_v9  ;;  %vm10800_vm0 = vcmp.eq.s32.totalorder %v487_v10, %v10785_v11  ;;  %v458_v21 = vadd.s32 48, %v10775_v4  ;;  %s11669_s17 = scalar_lea.vmem %s16598_s0, %s9999_s14  ;;  %s16157_s30 = scalar_lea.vmem %s16610_s12, %s9999_s14 }
  0x14   : > { %v489_v22 = vand.u32 31, %v454_v14  ;;  %v490_v23 = vand.u32 31, %v455_v15  ;;  %v491_v24 = vand.u32 31, %v456_v16  ;;  %v492_v25 = vand.u32 31, %v457_v17  ;;  %v421_v35 = vld [vmem:[%s11669_s17 + $0x30] sm:$0xff] }
  0x15   : > { %vm10806_vm1 = vcmp.eq.s32.totalorder %v487_v10, %v10797_v19  ;;  %vm10811_vm2 = vcmp.eq.s32.totalorder %v488_v18, %v10797_v19  ;;  %vm10816_vm3 = vcmp.eq.s32.totalorder %v488_v18, %v10785_v11  ;;  %v459_v29 = vadd.s32 56, %v10775_v4 }
  0x16   : > { %vm9823_vm4 = vmpackc.low %vm10811_vm2, %vm10806_vm1  ;;  %vm10826_vm5 = vcmp.eq.s32.totalorder %v489_v22, %v10797_v19  ;;  %vm10831_vm6 = vcmp.eq.s32.totalorder %v490_v23, %v10797_v19  ;;  %vm10836_vm7 = vcmp.eq.s32.totalorder %v489_v22, %v10785_v11  ;;  %vm10845_vm9 = vcmp.eq.s32.totalorder %v490_v23, %v10785_v11 }
  0x17   : > { %740 = vperm.xlu1 %10012, %v444_v12   ;;  %735 = vperm.xlu0 %10011, %v443_v13   ;;  %vm9825_vm8 = vmpackc.low %vm10816_vm3, %vm10800_vm0  ;;  %vm10850_vm10 = vcmp.eq.s32.totalorder %v491_v24, %v10797_v19  ;;  %vm10855_vm11 = vcmp.eq.s32.totalorder %v492_v25, %v10797_v19  ;;  %v493_v39 = vand.u32 31, %v458_v21  ;;  %v494_v40 = vand.u32 31, %v459_v29 }
  0x18   : > { %9824 = vmatprep.subr.msk.bf16.mxu0 %vm9823_vm4, %v10692_v38  ;;  %vm9827_vm12 = vmpackc.low %vm10831_vm6, %vm10826_vm5  ;;  %v460_v41 = vadd.s32 64, %v10775_v4  ;;  %v461_v42 = vadd.s32 72, %v10775_v4  ;;  %9888 = vmatprep.subr.msk.bf16.mxu1 %vm9823_vm4, %v10692_v38  ;;  %vm10896_vm15 = vcmp.eq.s32.totalorder %v491_v24, %v10785_v11  ;;  %vm10901_vm0 = vcmp.eq.s32.totalorder %v492_v25, %v10785_v11 }
  0x19   : > { %9826 = vmatpush1.bf16.msk.msra.mxu0 %vm9825_vm8, %v10692_v38  ;;  %9890 = vmatpush1.bf16.msk.msra.mxu1 %vm9825_vm8, %v10692_v38  ;;  %vm9829_vm13 = vmpackc.low %vm10845_vm9, %vm10836_vm7  ;;  %v462_v45 = vadd.s32 80, %v10775_v4  ;;  %v463_v46 = vadd.s32 88, %v10775_v4  ;;  %vm10914_vm1 = vcmp.eq.s32.totalorder %v493_v39, %v10797_v19  ;;  %vm10919_vm2 = vcmp.eq.s32.totalorder %v494_v40, %v10797_v19 }
  0x1a   : > { %9828 = vmatprep.subr.msk.bf16.mxu0 %vm9827_vm12, %v10692_v38  ;;  %9892 = vmatprep.subr.msk.bf16.mxu1 %vm9827_vm12, %v10692_v38  ;;  %vm9831_vm14 = vmpackc.low %vm10855_vm11, %vm10850_vm10  ;;  %v495_v51 = vand.u32 31, %v460_v41  ;;  %v496_v52 = vand.u32 31, %v461_v42  ;;  %vm10950_vm5 = vcmp.eq.s32.totalorder %v493_v39, %v10785_v11  ;;  %vm10955_vm6 = vcmp.eq.s32.totalorder %v494_v40, %v10785_v11 }
  0x1b   : > { %750 = vperm.xlu1 %10012, %v446_v36   ;;  %745 = vperm.xlu0 %10011, %v445_v37   ;;  %vm9833_vm3 = vmpackc.low %vm10901_vm0, %vm10896_vm15  ;;  %v497_v55 = vand.u32 31, %v462_v45  ;;  %v498_v56 = vand.u32 31, %v463_v46  ;;  %v464_v61 = vadd.s32 96, %v10775_v4  ;;  %v465_v62 = vadd.s32 104, %v10775_v4  ;;  %v11687_v36 = vld [vmem:[%s11669_s17 + $0x38] sm:$0xff] }
  0x1c   : > { %vm9835_vm4 = vmpackc.low %vm10919_vm2, %vm10914_vm1  ;;  %vm10966_vm7 = vcmp.eq.s32.totalorder %v495_v51, %v10797_v19  ;;  %vm10971_vm8 = vcmp.eq.s32.totalorder %v496_v52, %v10797_v19  ;;  %vm11000_vm10 = vcmp.eq.s32.totalorder %v495_v51, %v10785_v11  ;;  %v466_v0 = vadd.s32 112, %v10775_v4 }
  0x1d   : > { %9830 = vmatpush1.bf16.msk.msra.mxu0 %vm9829_vm13, %v10692_v38  ;;  %9894 = vmatpush1.bf16.msk.msra.mxu1 %vm9829_vm13, %v10692_v38  ;;  %vm9837_vm9 = vmpackc.low %vm10955_vm6, %vm10950_vm5  ;;  %v467_v1 = vadd.s32 120, %v10775_v4  ;;  %vm11017_vm12 = vcmp.eq.s32.totalorder %v496_v52, %v10785_v11  ;;  %vm11022_vm13 = vcmp.eq.s32.totalorder %v497_v55, %v10797_v19  ;;  %v499_v7 = vand.u32 31, %v464_v61 }
  0x1e   : > { %9832 = vmatprep.subr.msk.bf16.mxu0 %vm9831_vm14, %v10692_v38  ;;  %9896 = vmatprep.subr.msk.bf16.mxu1 %vm9831_vm14, %v10692_v38  ;;  %vm9839_vm11 = vmpackc.low %vm10971_vm8, %vm10966_vm7  ;;  %vm11027_vm14 = vcmp.eq.s32.totalorder %v498_v56, %v10797_v19  ;;  %v500_v8 = vand.u32 31, %v465_v62  ;;  %v468_v9 = vadd.s32 128, %v10775_v4  ;;  %v469_v10 = vadd.s32 136, %v10775_v4 }
  0x1f   : > { %760 = vperm.xlu1 %10012, %v448_v47   ;;  %755 = vperm.xlu0 %10011, %v447_v48   ;;  %v470_v12 = vadd.s32 144, %v10775_v4  ;;  %v471_v13 = vadd.s32 152, %v10775_v4  ;;  %vm9841_vm15 = vmpackc.low %vm11017_vm12, %vm11000_vm10  ;;  %v501_v14 = vand.u32 31, %v466_v0  ;;  %v502_v15 = vand.u32 31, %v467_v1 }
  0x20   : > { %vm16611_vm0 = vmpackc.low %vm11027_vm14, %vm11022_vm13  ;;  %vm11068_vm1 = vcmp.eq.s32.totalorder %v497_v55, %v10785_v11  ;;  %vm11073_vm2 = vcmp.eq.s32.totalorder %v498_v56, %v10785_v11  ;;  %v503_v21 = vand.u32 31, %v468_v9  ;;  %v504_v22 = vand.u32 31, %v469_v10  ;;  %v11732_v10 = vld [vmem:[%s11669_s17 + $0x70] sm:$0xff] }
  0x21   : > { %9834 = vmatpush1.bf16.msk.msra.mxu0 %vm9833_vm3, %v10692_v38  ;;  %9898 = vmatpush1.bf16.msk.msra.mxu1 %vm9833_vm3, %v10692_v38  ;;  %vm11084_vm3 = vcmp.eq.s32.totalorder %v499_v7, %v10797_v19  ;;  %vm11100_vm5 = vcmp.eq.s32.totalorder %v499_v7, %v10785_v11  ;;  %vm11105_vm6 = vcmp.eq.s32.totalorder %v500_v8, %v10785_v11  ;;  %v505_v25 = vand.u32 31, %v470_v12  ;;  %vm16903_vm10 = vmpackc.low %vm11027_vm14, %vm11022_vm13 }
  0x22   : > { %9836 = vmatprep.subr.msk.bf16.mxu0 %vm9835_vm4, %v10692_v38  ;;  %9900 = vmatprep.subr.msk.bf16.mxu1 %vm9835_vm4, %v10692_v38  ;;  %vm11089_vm4 = vcmp.eq.s32.totalorder %v500_v8, %v10797_v19  ;;  %v506_v26 = vand.u32 31, %v471_v13  ;;  %vm11126_vm8 = vcmp.eq.s32.totalorder %v501_v14, %v10797_v19  ;;  %v472_v29 = vadd.s32 160, %v10775_v4  ;;  %vm16908_vm13 = vmpackc.low %vm11073_vm2, %vm11068_vm1 }
  0x23   : > { %770 = vperm.xlu1 %10012, %v450_v57   ;;  %765 = vperm.xlu0 %10011, %v449_v58   ;;  %v16896_v27 = vsel %vm11126_vm8, 4294967295, %v16895_v27  ;;  %v473_v30 = vadd.s32 168, %v10775_v4  ;;  %vm11148_vm7 = vcmp.eq.s32.totalorder %v501_v14, %v10785_v11  ;;  %v474_v33 = vadd.s32 176, %v10775_v4  ;;  %vm16918_vm14 = vmpackc.low %vm11073_vm2, %vm11068_vm1 }
  0x24   : > { %v16900_v31 = vsel %vm11148_vm7, 4294967295, %v16899_v31  ;;  %v475_v34 = vadd.s32 184, %v10775_v4  ;;  %v11180_v37 = vadd.s32 192, %v10775_v4  ;;  %v16909_v39 = vmov 0  ;;  %vm16923_vm1 = vmpackc.low %vm11089_vm4, %vm11084_vm3 }
  0x25   : > { %9838 = vmatpush1.bf16.msk.msra.mxu0 %vm9837_vm9, %v10692_v38  ;;  %9902 = vmatpush1.bf16.msk.msra.mxu1 %vm9837_vm9, %v10692_v38  ;;  %vm11131_vm9 = vcmp.eq.s32.totalorder %v502_v15, %v10797_v19  ;;  %vm11198_vm12 = vcmp.eq.s32.totalorder %v504_v22, %v10785_v11  ;;  %v16911_v40 = vmov 0  ;;  %vm11213_vm8 = vcmp.eq.s32.totalorder %v505_v25, %v10797_v19  ;;  %vm16924_vm2 = vmpackc.low %vm11105_vm6, %vm11100_vm5 }
  0x26   : > { %9840 = vmatprep.subr.msk.bf16.mxu0 %vm9839_vm11, %v10692_v38  ;;  %9904 = vmatprep.subr.msk.bf16.mxu1 %vm9839_vm11, %v10692_v38  ;;  %v16898_v28 = vsel %vm11131_vm9, 4294967295, %v16897_v28  ;;  %vm11175_vm11 = vcmp.eq.s32.totalorder %v504_v22, %v10797_v19  ;;  %v16912_v40 = vsel %vm11198_vm12, 4294967295, %v16911_v40  ;;  %v16914_v41 = vmov 0 }
  0x27   : > { %v16915_v41 = vsel %vm11213_vm8, 4294967295, %v16914_v41  ;;  %vm11218_vm9 = vcmp.eq.s32.totalorder %v506_v26, %v10797_v19  ;;  %v16916_v42 = vmov 0  ;;  %v507_v43 = vand.u32 31, %v472_v29  ;;  %v420_v29 = vld [vmem:[%s11669_s17 + $0x28] sm:$0xff] }
  0x28   : > { %v16917_v42 = vsel %vm11218_vm9, 4294967295, %v16916_v42  ;;  %v508_v44 = vand.u32 31, %v473_v30  ;;  %v509_v45 = vand.u32 31, %v474_v33  ;;  %v510_v46 = vand.u32 31, %v475_v34 }
  0x29   : > { %9842 = vmatpush1.bf16.msk.msra.mxu0 %vm9841_vm15, %v10692_v38  ;;  %9906 = vmatpush1.bf16.msk.msra.mxu1 %vm9841_vm15, %v10692_v38  ;;  %vm11170_vm15 = vcmp.eq.s32.totalorder %v503_v21, %v10797_v19  ;;  %v477_v47 = vadd.s32 200, %v10775_v4  ;;  %v16919_v48 = vmov 0  ;;  %v511_v50 = vand.u32 31, %v11180_v37 }
  0x2a   : > { %9844 = vmatprep.subr.msk.bf16.mxu0 %vm16611_vm0, %v10692_v38  ;;  %vm11153_vm0 = vcmp.eq.s32.totalorder %v502_v15, %v10785_v11  ;;  %9908 = vmatprep.subr.msk.bf16.mxu1 %vm16903_vm10, %v10692_v38  ;;  %vm11193_vm10 = vcmp.eq.s32.totalorder %v503_v21, %v10785_v11  ;;  %v478_v51 = vadd.s32 208, %v10775_v4  ;;  %v479_v52 = vadd.s32 216, %v10775_v4 }
  0x2b   : > { %v16902_v32 = vsel %vm11153_vm0, 4294967295, %v16901_v32  ;;  %v16910_v39 = vsel %vm11193_vm10, 4294967295, %v16909_v39  ;;  %vm11244_vm0 = vcmp.eq.s32.totalorder %v505_v25, %v10785_v11  ;;  %v480_v53 = vadd.s32 224, %v10775_v4 }
  0x2c   : > { %v16920_v48 = vsel %vm11244_vm0, 4294967295, %v16919_v48  ;;  %v481_v54 = vadd.s32 232, %v10775_v4  ;;  %v11275_v55 = vadd.s32 240, %v10775_v4  ;;  %vm11294_vm7 = vcmp.eq.s32.totalorder %v507_v43, %v10785_v11 }
  0x2d   : > { %9846 = vmatpush1.bf16.msk.msra.mxu0 %vm16908_vm13, %v10692_v38  ;;  %vm16913_vm13 = vmpackc.low %vm11089_vm4, %vm11084_vm3  ;;  %9910 = vmatpush1.bf16.msk.msra.mxu1 %vm16918_vm14, %v10692_v38  ;;  %vm16925_vm3 = vnez %v16898_v28  ;;  %vm16926_vm4 = vnez %v16896_v27  ;;  %vm11289_vm14 = vcmp.eq.s32.totalorder %v508_v44, %v10797_v19  ;;  %v16932_v58 = vmov 0  ;;  %v416_v27 = vld [vmem:[%s11669_s17 + $0x8] sm:$0xff] }
  0x2e   : > { %9848 = vmatprep.subr.msk.bf16.mxu0 %vm16913_vm13, %v10692_v38  ;;  %vm11249_vm13 = vcmp.eq.s32.totalorder %v506_v26, %v10785_v11  ;;  %9912 = vmatprep.subr.msk.bf16.mxu1 %vm16923_vm1, %v10692_v38  ;;  %vm16927_vm1 = vmpackc.low %vm16925_vm3, %vm16926_vm4  ;;  %v16933_v58 = vsel %vm11294_vm7, 4294967295, %v16932_v58  ;;  %vm11299_vm8 = vcmp.eq.s32.totalorder %v508_v44, %v10785_v11  ;;  %vm11314_vm10 = vcmp.eq.s32.totalorder %v509_v45, %v10797_v19  ;;  %v11699_v44 = vld [vmem:[%s11669_s17 + $0x40] sm:$0xff] }
  0x2f   : > { %v16935_v59 = vsel %vm11299_vm8, 4294967295, %v16934_v59  ;;  %v16937_v60 = vmov 0  ;;  %vm11319_vm12 = vcmp.eq.s32.totalorder %v510_v46, %v10797_v19  ;;  %v16939_v61 = vmov 0 }
  0x30   : > { %v16938_v60 = vsel %vm11314_vm10, 4294967295, %v16937_v60  ;;  %v16940_v61 = vsel %vm11319_vm12, 4294967295, %v16939_v61  ;;  %v512_v62 = vand.u32 31, %v477_v47  ;;  %v483_v63 = vadd.s32 248, %v10775_v4  ;;  %vm16955_vm10 = vmpackc.low %vm11175_vm11, %vm11170_vm15  ;;  %v11708_v47 = vld [vmem:[%s11669_s17 + $0x58] sm:$0xff] }
  0x31   : > { %9850 = vmatpush1.bf16.msk.msra.mxu0 %vm16924_vm2, %v10692_v38  ;;  %vm11284_vm2 = vcmp.eq.s32.totalorder %v507_v43, %v10797_v19  ;;  %v513_v0 = vand.u32 31, %v478_v51  ;;  %v514_v1 = vand.u32 31, %v479_v52  ;;  %v515_v2 = vand.u32 31, %v480_v53 }
  0x32   : > { %9852 = vmatprep.subr.msk.bf16.mxu0 %vm16927_vm1, %v10692_v38  ;;  %vm16936_vm1 = vmpackc.low %vm11105_vm6, %vm11100_vm5  ;;  %vm16942_vm6 = vnez %v16902_v32  ;;  %vm11361_vm0 = vcmp.eq.s32.totalorder %v510_v46, %v10785_v11  ;;  %v516_v7 = vand.u32 31, %v481_v54  ;;  %v517_v8 = vand.u32 31, %v11275_v55  ;;  %v11681_v32 = vld [vmem:[%s11669_s17 + $0x18] sm:$0xff]  ;;  %v11705_v46 = vld [vmem:[%s11669_s17 + $0x50] sm:$0xff] }
  0x33   : > { %9914 = vmatpush1.bf16.msk.msra.mxu1 %vm16936_vm1, %v10692_v38  ;;  %vm16941_vm5 = vmpackc.low %vm16925_vm3, %vm16926_vm4  ;;  %vm16943_vm1 = vnez %v16900_v31  ;;  %v16951_v9 = vmov 0  ;;  %vm11378_vm4 = vcmp.eq.s32.totalorder %v512_v62, %v10797_v19  ;;  %v518_v12 = vand.u32 31, %v483_v63  ;;  %v417_v31 = vld [vmem:[%s11669_s17 + $0x10] sm:$0xff]  ;;  %v11721_v63 = vld [vmem:[%s11669_s17 + $0x68] sm:$0xff] }
  0x34   : > { %9916 = vmatprep.subr.msk.bf16.mxu1 %vm16941_vm5, %v10692_v38  ;;  %vm16944_vm9 = vmpackc.low %vm16942_vm6, %vm16943_vm1  ;;  %vm11356_vm5 = vcmp.eq.s32.totalorder %v509_v45, %v10785_v11  ;;  %vm16956_vm6 = vnez %v16912_v40  ;;  %vm16957_vm1 = vnez %v16910_v39  ;;  %vm16959_vm12 = vnez %v16917_v42  ;;  %v11702_v45 = vld [vmem:[%s11669_s17 + $0x48] sm:$0xff] }
  0x35   : > { %9854 = vmatpush1.bf16.msk.msra.mxu0 %vm16944_vm9, %v10692_v38  ;;  %vm16945_vm3 = vmpackc.low %vm11175_vm11, %vm11170_vm15  ;;  %vm16960_vm7 = vnez %v16915_v41  ;;  %v16962_v13 = vmov 0  ;;  %v16964_v14 = vmov 0  ;;  %vm11425_vm11 = vcmp.eq.s32.totalorder %v513_v0, %v10797_v19 }
  0x36   : > { %9856 = vmatprep.subr.msk.bf16.mxu0 %vm16945_vm3, %v10692_v38  ;;  %vm16950_vm3 = vmmov %vm16944_vm9  ;;  %vm11373_vm9 = vcmp.eq.s32.totalorder %v511_v50, %v10797_v19  ;;  %v16967_v15 = vmov 0  ;;  %vm11430_vm15 = vcmp.eq.s32.totalorder %v514_v1, %v10797_v19  ;;  %v16969_v16 = vmov 0 }
  0x37   : > { %9918 = vmatpush1.bf16.msk.msra.mxu1 %vm16950_vm3, %v10692_v38  ;;  %v16952_v9 = vsel %vm11373_vm9, 4294967295, %v16951_v9  ;;  %vm16958_vm3 = vmpackc.low %vm16956_vm6, %vm16957_vm1  ;;  %v16968_v15 = vsel %vm11425_vm11, 4294967295, %v16967_v15  ;;  %v16970_v16 = vsel %vm11430_vm15, 4294967295, %v16969_v16  ;;  %v16980_v20 = vmov 0 }
  0x38   : > { %9920 = vmatprep.subr.msk.bf16.mxu1 %vm16955_vm10, %v10692_v38  ;;  %vm16961_vm8 = vmpackc.low %vm16959_vm12, %vm16960_vm7  ;;  %vm11409_vm10 = vcmp.eq.s32.totalorder %v511_v50, %v10785_v11  ;;  %vm16988_vm15 = vnez %v16940_v61  ;;  %v16991_v22 = vmov 0  ;;  %v16996_v24 = vmov 0 }
  0x39   : > { %9858 = vmatpush1.bf16.msk.msra.mxu0 %vm16958_vm3, %v10692_v38  ;;  %v16963_v13 = vsel %vm11409_vm10, 4294967295, %v16962_v13  ;;  %vm11414_vm3 = vcmp.eq.s32.totalorder %v512_v62, %v10785_v11  ;;  %vm16971_vm9 = vmpackc.low %vm16959_vm12, %vm16960_vm7  ;;  %vm11477_vm7 = vcmp.eq.s32.totalorder %v515_v2, %v10797_v19  ;;  %vm11482_vm12 = vcmp.eq.s32.totalorder %v516_v7, %v10797_v19  ;;  %v11718_v62 = vld [vmem:[%s11669_s17 + $0x60] sm:$0xff] }
  0x3a   : > { %9860 = vmatprep.subr.msk.bf16.mxu0 %vm16961_vm8, %v10692_v38  ;;  %v16965_v14 = vsel %vm11414_vm3, 4294967295, %v16964_v14  ;;  %vm16966_vm8 = vmpackc.low %vm16956_vm6, %vm16957_vm1  ;;  %vm16972_vm6 = vnez %v16920_v48  ;;  %v16981_v20 = vsel %vm11477_vm7, 4294967295, %v16980_v20  ;;  %vm16989_vm10 = vnez %v16938_v60 }
  0x3b   : > { %9922 = vmatpush1.bf16.msk.msra.mxu1 %vm16966_vm8, %v10692_v38  ;;  %vm16973_vm1 = vmpackc.low %vm11249_vm13, %vm16972_vm6  ;;  %v16998_v25 = vmov 0 }
  0x3c   : > { %9924 = vmatprep.subr.msk.bf16.mxu1 %vm16971_vm9, %v10692_v38  ;;  %vm16974_vm8 = vmpackc.low %vm11289_vm14, %vm11284_vm2  ;;  %vm11461_vm9 = vcmp.eq.s32.totalorder %v513_v0, %v10785_v11 }
  0x3d   : > { %9862 = vmatpush1.bf16.msk.msra.mxu0 %vm16973_vm1, %v10692_v38  ;;  %vm11466_vm1 = vcmp.eq.s32.totalorder %v514_v1, %v10785_v11  ;;  %vm16984_vm11 = vmpackc.low %vm11289_vm14, %vm11284_vm2  ;;  %vm11529_vm14 = vcmp.eq.s32.totalorder %v517_v8, %v10797_v19  ;;  %vm11534_vm2 = vcmp.eq.s32.totalorder %v518_v12, %v10797_v19 }
  0x3e   : > { %9864 = vmatprep.subr.msk.bf16.mxu0 %vm16974_vm8, %v10692_v38  ;;  %vm16979_vm8 = vmpackc.low %vm11249_vm13, %vm16972_vm6  ;;  %vm16985_vm13 = vnez %v16935_v59  ;;  %vm16986_vm6 = vnez %v16933_v58  ;;  %v16997_v24 = vsel %vm11529_vm14, 4294967295, %v16996_v24  ;;  %v16999_v25 = vsel %vm11534_vm2, 4294967295, %v16998_v25 }
  0x3f   : > { %9926 = vmatpush1.bf16.msk.msra.mxu1 %vm16979_vm8, %v10692_v38  ;;  %vm16987_vm8 = vmpackc.low %vm16985_vm13, %vm16986_vm6  ;;  %vm17011_vm14 = vnez %v16963_v13 }
  0x40   : > { %9928 = vmatprep.subr.msk.bf16.mxu1 %vm16984_vm11, %v10692_v38  ;;  %vm16990_vm3 = vmpackc.low %vm16988_vm15, %vm16989_vm10  ;;  %vm11513_vm11 = vcmp.eq.s32.totalorder %v515_v2, %v10785_v11 }
  0x41   : > { %9866 = vmatpush1.bf16.msk.msra.mxu0 %vm16987_vm8, %v10692_v38  ;;  %v16992_v22 = vsel %vm11513_vm11, 4294967295, %v16991_v22  ;;  %vm11518_vm8 = vcmp.eq.s32.totalorder %v516_v7, %v10785_v11  ;;  %vm17000_vm7 = vmpackc.low %vm16988_vm15, %vm16989_vm10  ;;  %vm17010_vm15 = vnez %v16965_v14  ;;  %vm17013_vm11 = vnez %v16970_v16 }
  0x42   : > { %9868 = vmatprep.subr.msk.bf16.mxu0 %vm16990_vm3, %v10692_v38  ;;  %vm16995_vm3 = vmpackc.low %vm16985_vm13, %vm16986_vm6  ;;  %vm17002_vm6 = vnez %v16952_v9 }
  0x43   : > { %9930 = vmatpush1.bf16.msk.msra.mxu1 %vm16995_vm3, %v10692_v38  ;;  %vm17001_vm13 = vmpackc.low %vm11361_vm0, %vm11356_vm5 }
  0x44   : > { %9932 = vmatprep.subr.msk.bf16.mxu1 %vm17000_vm7, %v10692_v38  ;;  %vm17003_vm3 = vmpackc.low %vm11378_vm4, %vm17002_vm6  ;;  %vm11565_vm7 = vcmp.eq.s32.totalorder %v517_v8, %v10785_v11 }
  0x45   : > { %9870 = vmatpush1.bf16.msk.msra.mxu0 %vm17001_vm13, %v10692_v38  ;;  %vm11570_vm13 = vcmp.eq.s32.totalorder %v518_v12, %v10785_v11  ;;  %vm17009_vm10 = vmpackc.low %vm11378_vm4, %vm17002_vm6  ;;  %v415_v11 = vld [vmem:[%s11669_s17] sm:$0xff]  ;;  %v11735_v12 = vld [vmem:[%s11669_s17 + $0x78] sm:$0xff] }
  0x46   : > { %9872 = vmatprep.subr.msk.bf16.mxu0 %vm17003_vm3, %v10692_v38  ;;  %vm17008_vm3 = vmpackc.low %vm11361_vm0, %vm11356_vm5  ;;  %vm17014_vm0 = vnez %v16968_v15 }
  0x47   : > { %9934 = vmatpush1.bf16.msk.msra.mxu1 %vm17008_vm3, %v10692_v38  ;;  %vm17012_vm2 = vmpackc.low %vm17010_vm15, %vm17011_vm14  ;;  %vm17019_vm14 = vnez %v16981_v20 }
  0x48   : > { %9936 = vmatprep.subr.msk.bf16.mxu1 %vm17009_vm10, %v10692_v38  ;;  %vm17015_vm5 = vmpackc.low %vm17013_vm11, %vm17014_vm0  ;;  %vm17025_vm0 = vnez %v16999_v25  ;;  %v11745_v25 = vld [vmem:[%s11669_s17 + $0x88] sm:$0xff] }
  0x49   : > { %9874 = vmatpush1.bf16.msk.msra.mxu0 %vm17012_vm2, %v10692_v38  ;;  %vm9885_vm4 = vmpackc.low %vm11570_vm13, %vm11565_vm7  ;;  %vm17023_vm13 = vnez %v16992_v22 }
  0x4a   : > { %9876 = vmatprep.subr.msk.bf16.mxu0 %vm17015_vm5, %v10692_v38  ;;  %vm17016_vm6 = vmmov %vm17012_vm2 }
  0x4b   : > { %9938 = vmatpush1.bf16.msk.msra.mxu1 %vm17016_vm6, %v10692_v38  ;;  %vm17017_vm2 = vmmov %vm17015_vm5 }
  0x4c   : > { %9940 = vmatprep.subr.msk.bf16.mxu1 %vm17017_vm2, %v10692_v38  ;;  %vm17018_vm10 = vmpackc.low %vm11466_vm1, %vm11461_vm9  ;;  %vm17026_vm9 = vnez %v16997_v24  ;;  %v11742_v24 = vld [vmem:[%s11669_s17 + $0x80] sm:$0xff] }
  0x4d   : > { %9878 = vmatpush1.bf16.msk.msra.mxu0 %vm17018_vm10, %v10692_v38  ;;  %vm17020_vm15 = vmpackc.low %vm11482_vm12, %vm17019_vm14 }
  0x4e   : > { %9880 = vmatprep.subr.msk.bf16.mxu0 %vm17020_vm15, %v10692_v38  ;;  %vm17021_vm11 = vmmov %vm17018_vm10 }
  0x4f   : > { %9942 = vmatpush1.bf16.msk.msra.mxu1 %vm17021_vm11, %v10692_v38  ;;  %vm17022_vm7 = vmmov %vm17020_vm15 }
  0x50   : > { %9944 = vmatprep.subr.msk.bf16.mxu1 %vm17022_vm7, %v10692_v38  ;;  %vm17024_vm3 = vmpackc.low %vm11518_vm8, %vm17023_vm13  ;;  %vm889_vm8 = vcmask 1040384  }
  0x51   : > { %9882 = vmatpush1.bf16.msk.msra.mxu0 %vm17024_vm3, %v10692_v38  ;;  %vm17027_vm1 = vmpackc.low %vm17025_vm0, %vm17026_vm9  ;;  %vm2348_vm0 = vcmask 1044480  }
  0x52   : > { %9884 = vmatprep.subr.msk.bf16.mxu0 %vm17027_vm1, %v10692_v38  ;;  %vm17028_vm12 = vmmov %vm17024_vm3 }
  0x53   : > { %9946 = vmatpush1.bf16.msk.msra.mxu1 %vm17028_vm12, %v10692_v38  ;;  %vm17029_vm5 = vmmov %vm17027_vm1  ;;  %vm2509_vm12 = vcmask 1046528  }
  0x54   : > { %9948 = vmatprep.subr.msk.bf16.mxu1 %vm17029_vm5, %v10692_v38  ;;  %vm2396_vm5 = vcmask 1043456  }
  0x55   : > { %9886 = vmatpush1.bf16.msk.msra.mxu0 %vm9885_vm4, %v10692_v38 }
  0x57   : > { %9950 = vmatpush1.bf16.msk.msra.mxu1 %vm9885_vm4, %v10692_v38  ;;  %v419_v38 = vld [vmem:[%s11669_s17 + $0x20] sm:$0xff] }
  0x8e   : > { %v11673_v28 = vpop.permute.xlu1 %725  ;;  %v11677_v30 = vpop.permute.xlu0 %715 }
  0x8f   : > { %v773_v33 = vmul.f32 %v11677_v30, %v415_v11  ;;  %v774_v34 = vmul.f32 %v11677_v30, %v416_v27  ;;  %v777_v40 = vmul.f32 %v11673_v28, %v419_v38  ;;  %v778_v41 = vmul.f32 %v11673_v28, %v420_v29  ;;  %v11752_v38 = vld [vmem:[%s11669_s17 + $0x90] sm:$0xff]  ;;  %v11755_v29 = vld [vmem:[%s11669_s17 + $0x98] sm:$0xff] }
  0x91   : > { %v831_v48 = vmul.f32 %v773_v33, %v773_v33  ;;  %v832_v49 = vmul.f32 %v774_v34, %v774_v34  ;;  %v835_v58 = vmul.f32 %v777_v40, %v777_v40  ;;  %v836_v59 = vmul.f32 %v778_v41, %v778_v41 }
  0x92   : > { %v11689_v37 = vpop.permute.xlu1 %730  ;;  %v11691_v39 = vpop.permute.xlu0 %720 }
  0x93   : > { %v775_v42 = vmul.f32 %v11691_v39, %v417_v31  ;;  %v776_v43 = vmul.f32 %v11691_v39, %v11681_v32  ;;  %v779_v52 = vmul.f32 %v11689_v37, %v421_v35  ;;  %v780_v53 = vmul.f32 %v11689_v37, %v11687_v36 }
  0x95   : > { %v797_v50 = vadd.f32 %v775_v42, %v773_v33  ;;  %v814_v51 = vadd.f32 %v776_v43, %v774_v34  ;;  %v833_v54 = vmul.f32 %v775_v42, %v775_v42  ;;  %v834_v55 = vmul.f32 %v776_v43, %v776_v43 }
  0x96   : > { %v11713_v56 = vpop.permute.xlu1 %740  ;;  %v11715_v57 = vpop.permute.xlu0 %735  ;;  %v837_v13 = vmul.f32 %v779_v52, %v779_v52  ;;  %v838_v14 = vmul.f32 %v780_v53, %v780_v53 }
  0x97   : > { %v798_v60 = vadd.f32 %v797_v50, %v777_v40  ;;  %v815_v61 = vadd.f32 %v814_v51, %v778_v41  ;;  %v855_v0 = vadd.f32 %v833_v54, %v831_v48  ;;  %v872_v1 = vadd.f32 %v834_v55, %v832_v49  ;;  %v11766_v54 = vld [vmem:[%s11669_s17 + $0xa0] sm:$0xff]  ;;  %v11769_v55 = vld [vmem:[%s11669_s17 + $0xa8] sm:$0xff] }
  0x98   : > { %v781_v2 = vmul.f32 %v11715_v57, %v11699_v44  ;;  %v782_v5 = vmul.f32 %v11715_v57, %v11702_v45  ;;  %v783_v6 = vmul.f32 %v11713_v56, %v11705_v46  ;;  %v784_v7 = vmul.f32 %v11713_v56, %v11708_v47 }
  0x99   : > { %v799_v8 = vadd.f32 %v798_v60, %v779_v52  ;;  %v816_v9 = vadd.f32 %v815_v61, %v780_v53  ;;  %v856_v15 = vadd.f32 %v855_v0, %v835_v58  ;;  %v873_v16 = vadd.f32 %v872_v1, %v836_v59 }
  0x9a   : > { %v11737_v17 = vpop.permute.xlu1 %750  ;;  %v11739_v18 = vpop.permute.xlu0 %745  ;;  %v839_v22 = vmul.f32 %v781_v2, %v781_v2  ;;  %v840_v23 = vmul.f32 %v782_v5, %v782_v5  ;;  %v841_v31 = vmul.f32 %v783_v6, %v783_v6  ;;  %v842_v33 = vmul.f32 %v784_v7, %v784_v7 }
  0x9b   : > { %v800_v20 = vadd.f32 %v799_v8, %v781_v2  ;;  %v817_v21 = vadd.f32 %v816_v9, %v782_v5  ;;  %v857_v19 = vadd.f32 %v856_v15, %v837_v13  ;;  %v874_v26 = vadd.f32 %v873_v16, %v838_v14 }
  0x9c   : > { %v785_v11 = vmul.f32 %v11739_v18, %v11718_v62  ;;  %v786_v27 = vmul.f32 %v11739_v18, %v11721_v63  ;;  %v787_v42 = vmul.f32 %v11737_v17, %v11732_v10  ;;  %v788_v43 = vmul.f32 %v11737_v17, %v11735_v12 }
  0x9d   : > { %v801_v34 = vadd.f32 %v800_v20, %v783_v6  ;;  %v818_v35 = vadd.f32 %v817_v21, %v784_v7  ;;  %v858_v40 = vadd.f32 %v857_v19, %v839_v22  ;;  %v875_v41 = vadd.f32 %v874_v26, %v840_v23  ;;  %v11780_v6 = vld [vmem:[%s11669_s17 + $0xb0] sm:$0xff]  ;;  %v11783_v7 = vld [vmem:[%s11669_s17 + $0xb8] sm:$0xff] }
  0x9e   : > { %v11761_v48 = vpop.permute.xlu1 %760  ;;  %v11763_v49 = vpop.permute.xlu0 %755  ;;  %v843_v52 = vmul.f32 %v785_v11, %v785_v11  ;;  %v844_v53 = vmul.f32 %v786_v27, %v786_v27  ;;  %v845_v8 = vmul.f32 %v787_v42, %v787_v42  ;;  %v846_v9 = vmul.f32 %v788_v43, %v788_v43 }
  0x9f   : > { %v802_v50 = vadd.f32 %v801_v34, %v785_v11  ;;  %v819_v51 = vadd.f32 %v818_v35, %v786_v27  ;;  %v859_v58 = vadd.f32 %v858_v40, %v841_v31  ;;  %v876_v59 = vadd.f32 %v875_v41, %v842_v33 }
  0xa0   : > { %v789_v60 = vmul.f32 %v11763_v49, %v11742_v24  ;;  %v790_v61 = vmul.f32 %v11763_v49, %v11745_v25  ;;  %v791_v0 = vmul.f32 %v11761_v48, %v11752_v38  ;;  %v792_v1 = vmul.f32 %v11761_v48, %v11755_v29 }
  0xa1   : > { %v803_v2 = vadd.f32 %v802_v50, %v787_v42  ;;  %v820_v5 = vadd.f32 %v819_v51, %v788_v43  ;;  %v860_v13 = vadd.f32 %v859_v58, %v843_v52  ;;  %v877_v14 = vadd.f32 %v876_v59, %v844_v53 }
  0xa2   : > { %v11785_v15 = vpop.permute.xlu0 %765  ;;  %v847_v21 = vmul.f32 %v789_v60, %v789_v60  ;;  %v848_v22 = vmul.f32 %v790_v61, %v790_v61  ;;  %v11787_v23 = vpop.permute.xlu1 %770  ;;  %v849_v31 = vmul.f32 %v791_v0, %v791_v0  ;;  %v850_v33 = vmul.f32 %v792_v1, %v792_v1 }
  0xa3   : > { %v804_v16 = vadd.f32 %v803_v2, %v789_v60  ;;  %v821_v20 = vadd.f32 %v820_v5, %v790_v61  ;;  %v861_v19 = vadd.f32 %v860_v13, %v845_v8  ;;  %v878_v26 = vadd.f32 %v877_v14, %v846_v9 }
  0xa4   : > { %v793_v11 = vmul.f32 %v11785_v15, %v11766_v54  ;;  %v794_v27 = vmul.f32 %v11785_v15, %v11769_v55  ;;  %v795_v42 = vmul.f32 %v11787_v23, %v11780_v6  ;;  %v796_v43 = vmul.f32 %v11787_v23, %v11783_v7 }
  0xa5   : > { %v805_v34 = vadd.f32 %v804_v16, %v791_v0  ;;  %v822_v35 = vadd.f32 %v821_v20, %v792_v1  ;;  %v862_v40 = vadd.f32 %v861_v19, %v847_v21  ;;  %v879_v41 = vadd.f32 %v878_v26, %v848_v22 }
  0xa6   : > { %v851_v52 = vmul.f32 %v793_v11, %v793_v11  ;;  %v852_v53 = vmul.f32 %v794_v27, %v794_v27  ;;  %v853_v2 = vmul.f32 %v795_v42, %v795_v42  ;;  %v854_v5 = vmul.f32 %v796_v43, %v796_v43 }
  0xa7   : > { %v806_v50 = vadd.f32 %v805_v34, %v793_v11  ;;  %v823_v51 = vadd.f32 %v822_v35, %v794_v27  ;;  %v863_v58 = vadd.f32 %v862_v40, %v849_v31  ;;  %v880_v59 = vadd.f32 %v879_v41, %v850_v33 }
  0xa9   : > { %v807_v60 = vadd.f32 %v806_v50, %v795_v42  ;;  %v824_v61 = vadd.f32 %v823_v51, %v796_v43  ;;  %v864_v0 = vadd.f32 %v863_v58, %v851_v52  ;;  %v881_v1 = vadd.f32 %v880_v59, %v852_v53 }
  0xab   : > { %v808_v8 = vrot.slane %v807_v60, 4  ;;  %v825_v9 = vrot.slane %v824_v61, 4  ;;  %v865_v13 = vadd.f32 %v864_v0, %v853_v2  ;;  %v882_v14 = vadd.f32 %v881_v1, %v854_v5  ;;  %v10013_v2 = vld [vmem:[%s16600_s2 + $0x40] sm:$0xff]  }
  0xac   : > { %v10014_v5 = vld [vmem:[%s16600_s2] sm:$0xff]   ;;  %8813 = vmatprep.subr.bf16.mxu0 %v10013_v2 }
  0xad   : > { %v809_v16 = vadd.f32 %v808_v8, %v807_v60  ;;  %v826_v20 = vadd.f32 %v825_v9, %v824_v61  ;;  %v866_v21 = vrot.slane %v865_v13, 4  ;;  %v883_v22 = vrot.slane %v882_v14, 4 }
  0xaf   : > { %v827_v19 = vrot.slane %v826_v20, 2  ;;  %v810_v26 = vrot.slane %v809_v16, 2  ;;  %v884_v11 = vadd.f32 %v883_v22, %v882_v14  ;;  %v867_v27 = vadd.f32 %v866_v21, %v865_v13 }
  0xb1   : > { %v828_v31 = vadd.f32 %v827_v19, %v826_v20  ;;  %v811_v33 = vadd.f32 %v810_v26, %v809_v16  ;;  %v885_v34 = vrot.slane %v884_v11, 2  ;;  %v868_v35 = vrot.slane %v867_v27, 2 }
  0xb3   : > { %v829_v40 = vrot.slane %v828_v31, 1  ;;  %v812_v41 = vrot.slane %v811_v33, 1  ;;  %v886_v42 = vadd.f32 %v885_v34, %v884_v11  ;;  %v869_v43 = vadd.f32 %v868_v35, %v867_v27 }
  0xb4   : > { %v11806_v11 = vsub.s32 0, %v10775_v4  ;;  %v11809_v27 = vsub.s32 1, %v10775_v4 }
  0xb5   : > { %v887_v50 = vrot.slane %v886_v42, 1  ;;  %v870_v51 = vrot.slane %v869_v43, 1  ;;  %v830_v52 = vadd.f32 %v829_v40, %v828_v31  ;;  %v813_v58 = vadd.f32 %v812_v41, %v811_v33  ;;  %v10677_v40 = vld [vmem:[%s11669_s17 + $0x8] sm:$0xff] }
  0xb6   : > { %17030 = vst [vmem:[#allocation2_spill] sm:$0xff] %v11806_v11  ;;  %17031 = vst [vmem:[#allocation3_spill] sm:$0xff] %v11809_v27 }
  0xb7   : > { %v888_v53 = vadd.f32 %v887_v50, %v886_v42  ;;  %v871_v59 = vadd.f32 %v870_v51, %v869_v43  ;;  %v10678_v43 = vld [vmem:[%s11669_s17 + $0x28] sm:$0xff]  ;;  %v10679_v50 = vld [vmem:[%s11669_s17] sm:$0xff] }
  0xb9   : > { %v891_v60 = vsel %vm889_vm8, %v830_v52, %v888_v53  ;;  %v890_v61 = vsel %vm889_vm8, %v813_v58, %v871_v59  ;;  %v10680_v58 = vld [vmem:[%s11669_s17 + $0x10] sm:$0xff] }
  0xba   : > { %956 = vmatprep.mubr.f32.mxu0 %v891_v60  ;;  %v10681_v60 = vld [vmem:[%s11669_s17 + $0x20] sm:$0xff] }
  0xbb   : > { %957 = vmatmul.mubr.f32.vlgmr.msra.gmra.mrb[0].mxu0 %v890_v61 }
  0xbc   : > { %8814 = vmatpush3.bf16.msra.mxu0 %v10014_v5 }
 0x18e   : > { %v958_v0 = vpop.f32.mrb[0].mxu0 }
 0x18f   : > { %v963_v1 = vmul.f32 0.001953125, %v958_v0  ;;  %v960_v8 = vpop.f32.mrb[1].mxu0 }
 0x190   : > { %v964_v9 = vmul.f32 0.001953125, %v960_v8 }
 0x191   : > { %v965_v13 = vmul.f32 %v963_v1, %v963_v1  ;;  %v11815_v33 = vrot.slane %v963_v1, %v11806_v11 }
 0x192   : > { %v966_v14 = vmul.f32 %v964_v9, %v964_v9  ;;  %v11812_v31 = vrot.slane %v964_v9, %v11806_v11 }
 0x193   : > { %v969_v16 = vrot.slane %v965_v13, 7  ;;  %v983_v51 = vsub.f32 %v10679_v50, %v11815_v33  ;;  %v985_v59 = vsub.f32 %v10680_v58, %v11815_v33  ;;  %v987_v61 = vsub.f32 %v10681_v60, %v11815_v33 }
 0x194   : > { %v970_v20 = vrot.slane %v966_v14, 7  ;;  %v984_v41 = vsub.f32 %v10677_v40, %v11812_v31  ;;  %v986_v42 = vsub.f32 %v11681_v32, %v11812_v31  ;;  %v988_v4 = vsub.f32 %v10678_v43, %v11812_v31 }
 0x195   : > { %v973_v21 = vsub.f32 %v963_v1, %v969_v16  ;;  %v990_v2 = vsub.f32 %v11687_v36, %v11812_v31  ;;  %v992_v5 = vsub.f32 %v11702_v45, %v11812_v31  ;;  %v994_v0 = vsub.f32 %v11708_v47, %v11812_v31  ;;  %v10682_v16 = vld [vmem:[%s11669_s17 + $0x30] sm:$0xff] }
 0x196   : > { %v974_v22 = vsub.f32 %v964_v9, %v970_v20  ;;  %v996_v8 = vsub.f32 %v11721_v63, %v11812_v31  ;;  %v998_v9 = vsub.f32 %v11735_v12, %v11812_v31  ;;  %v1000_v13 = vsub.f32 %v11745_v25, %v11812_v31 }
 0x197   : > { %v1007_v26 = vadd.f32 1e-05, %v973_v21  ;;  %v1002_v36 = vsub.f32 %v11755_v29, %v11812_v31  ;;  %v1004_v45 = vsub.f32 %v11769_v55, %v11812_v31  ;;  %v1006_v25 = vsub.f32 %v11783_v7, %v11812_v31 }
 0x198   : > { %v1008_v19 = vadd.f32 1e-05, %v974_v22  ;;  %v989_v29 = vsub.f32 %v10682_v16, %v11815_v33  ;;  %v991_v55 = vsub.f32 %v11699_v44, %v11815_v33  ;;  %v993_v22 = vsub.f32 %v11705_v46, %v11815_v33 }
 0x19a   : > { %10381 = vrsqrt.f32 %v1008_v19  ;;  %v995_v19 = vsub.f32 %v11718_v62, %v11815_v33 }
 0x19b   : > { %10383 = vrsqrt.f32 %v1007_v26 }
 0x1a4   : > { %v10382_v34 = vpop.eup %10381 }
 0x1a5   : > { %v11818_v35 = vrot.slane %v10382_v34, %v11809_v27  ;;  %v10384_v32 = vpop.eup %10383  ;;  %v997_v34 = vsub.f32 %v11732_v10, %v11815_v33 }
 0x1a6   : > { %v11865_v12 = vrot.slane %v10384_v32, %v11809_v27 }
 0x1a7   : > { %v11829_v52 = vmul.f32 %v11818_v35, %v984_v41  ;;  %v11832_v53 = vmul.f32 %v11818_v35, %v986_v42  ;;  %v11845_v1 = vmul.f32 %v11818_v35, %v988_v4  ;;  %v11858_v47 = vmul.f32 %v11818_v35, %v990_v2 }
 0x1a8   : > { %v11874_v20 = vmul.f32 %v11818_v35, %v992_v5  ;;  %v11885_v44 = vmul.f32 %v11818_v35, %v994_v0  ;;  %v999_v41 = vsub.f32 %v11742_v24, %v11815_v33  ;;  %v11896_v43 = vmul.f32 %v11865_v12, %v983_v51 }
 0x1a9   : > { %17032 = vst [vmem:[#allocation4_spill] sm:$0xff] %v11829_v52  ;;  %17033 = vst [vmem:[#allocation5_spill] sm:$0xff] %v11832_v53  ;;  %v1044_v14 = vmul.f32 %v11829_v52, %v11677_v30  ;;  %v1046_v63 = vmul.f32 %v11832_v53, %v11691_v39  ;;  %v1048_v21 = vmul.f32 %v11845_v1, %v11673_v28 }
 0x1aa   : > { %17034 = vst [vmem:[#allocation6_spill] sm:$0xff] %v11845_v1  ;;  %17035 = vst [vmem:[#allocation7_spill] sm:$0xff] %v11858_v47  ;;  %v1050_v40 = vmul.f32 %v11858_v47, %v11689_v37  ;;  %v11899_v10 = vmul.f32 %v11865_v12, %v985_v59  ;;  %v11902_v4 = vmul.f32 %v11818_v35, %v996_v8 }
 0x1ab   : > { %17036 = vst [vmem:[#allocation8_spill] sm:$0xff] %v11874_v20  ;;  %v1084_v26 = vadd.f32 %v1046_v63, %v1044_v14  ;;  %v1102_v7 = vmul.f32 %v1044_v14, %v1044_v14  ;;  %v1104_v31 = vmul.f32 %v1046_v63, %v1046_v63  ;;  %17037 = vst [vmem:[#allocation9_spill] sm:$0xff] %v11885_v44 }
 0x1ac   : > { %17038 = vst [vmem:[#allocation10_spill] sm:$0xff] %v11896_v43  ;;  %17039 = vst [vmem:[#allocation11_spill] sm:$0xff] %v11899_v10  ;;  %v1052_v50 = vmul.f32 %v11874_v20, %v11715_v57  ;;  %v1106_v58 = vmul.f32 %v1048_v21, %v1048_v21  ;;  %v11907_v32 = vmul.f32 %v11818_v35, %v998_v9 }
 0x1ad   : > { %v1085_v42 = vadd.f32 %v1084_v26, %v1048_v21  ;;  %17040 = vst [vmem:[#allocation12_spill] sm:$0xff] %v11902_v4  ;;  %v1142_v60 = vadd.f32 %v1104_v31, %v1102_v7  ;;  %v11910_v2 = vmul.f32 %v11818_v35, %v1000_v13  ;;  %v11915_v59 = vmul.f32 %v11818_v35, %v1002_v36 }
 0x1ae   : > { %17041 = vst [vmem:[#allocation13_spill] sm:$0xff] %v11907_v32  ;;  %v1054_v0 = vmul.f32 %v11885_v44, %v11713_v56  ;;  %v1108_v8 = vmul.f32 %v1050_v40, %v1050_v40  ;;  %v11920_v16 = vmul.f32 %v11865_v12, %v987_v61  ;;  %v1043_v9 = vmul.f32 %v11896_v43, %v11677_v30 }
 0x1af   : > { %17042 = vst [vmem:[#allocation14_spill] sm:$0xff] %v11910_v2  ;;  %v1086_v5 = vadd.f32 %v1085_v42, %v1050_v40  ;;  %17043 = vst [vmem:[#allocation15_spill] sm:$0xff] %v11915_v59  ;;  %v1143_v14 = vadd.f32 %v1142_v60, %v1106_v58  ;;  %v1045_v13 = vmul.f32 %v11899_v10, %v11691_v39 }
 0x1b0   : > { %17044 = vst [vmem:[#allocation16_spill] sm:$0xff] %v11920_v16  ;;  %v1056_v21 = vmul.f32 %v11902_v4, %v11739_v18  ;;  %v1110_v36 = vmul.f32 %v1052_v50, %v1052_v50  ;;  %v11929_v7 = vmul.f32 %v11865_v12, %v989_v29  ;;  %v11932_v31 = vmul.f32 %v11818_v35, %v1004_v45 }
 0x1b1   : > { %v1087_v63 = vadd.f32 %v1086_v5, %v1052_v50  ;;  %v1144_v26 = vadd.f32 %v1143_v14, %v1108_v8  ;;  %v11935_v61 = vmul.f32 %v11818_v35, %v1006_v25  ;;  %v1058_v30 = vmul.f32 %v11907_v32, %v11737_v17 }
 0x1b2   : > { %17045 = vst [vmem:[#allocation17_spill] sm:$0xff] %v11929_v7  ;;  %17046 = vst [vmem:[#allocation18_spill] sm:$0xff] %v11932_v31  ;;  %v1060_v39 = vmul.f32 %v11910_v2, %v11763_v49  ;;  %v1062_v42 = vmul.f32 %v11915_v59, %v11761_v48  ;;  %v1112_v50 = vmul.f32 %v1054_v0, %v1054_v0 }
 0x1b3   : > { %17047 = vst [vmem:[#allocation19_spill] sm:$0xff] %v11935_v61  ;;  %v1088_v40 = vadd.f32 %v1087_v63, %v1054_v0  ;;  %v1145_v58 = vadd.f32 %v1144_v26, %v1110_v36  ;;  %v11944_v60 = vmul.f32 %v11865_v12, %v991_v55  ;;  %v1047_v35 = vmul.f32 %v11920_v16, %v11673_v28 }
 0x1b4   : > { %v1067_v45 = vadd.f32 %v1045_v13, %v1043_v9  ;;  %v1114_v25 = vmul.f32 %v1056_v21, %v1056_v21  ;;  %v1101_v8 = vmul.f32 %v1043_v9, %v1043_v9  ;;  %v1103_v14 = vmul.f32 %v1045_v13, %v1045_v13 }
 0x1b5   : > { %v1089_v29 = vadd.f32 %v1088_v40, %v1056_v21  ;;  %17048 = vst [vmem:[#allocation20_spill] sm:$0xff] %v11944_v60  ;;  %v1146_v5 = vadd.f32 %v1145_v58, %v1112_v50  ;;  %v11949_v3 = vmul.f32 %v11865_v12, %v993_v22  ;;  %v1049_v0 = vmul.f32 %v11929_v7, %v11689_v37 }
 0x1b6   : > { %v1068_v36 = vadd.f32 %v1067_v45, %v1047_v35  ;;  %v1064_v55 = vmul.f32 %v11932_v31, %v11785_v15  ;;  %v1066_v26 = vmul.f32 %v11935_v61, %v11787_v23  ;;  %v1116_v28 = vmul.f32 %v1058_v30, %v1058_v30 }
 0x1b7   : > { %v1090_v63 = vadd.f32 %v1089_v29, %v1058_v30  ;;  %17049 = vst [vmem:[#allocation21_spill] sm:$0xff] %v11949_v3  ;;  %v1147_v40 = vadd.f32 %v1146_v5, %v1114_v25  ;;  %v11958_v9 = vmul.f32 %v11865_v12, %v995_v19  ;;  %v1051_v22 = vmul.f32 %v11944_v60, %v11715_v57 }
 0x1b8   : > { %v1069_v13 = vadd.f32 %v1068_v36, %v1049_v0  ;;  %v1118_v50 = vmul.f32 %v1060_v39, %v1060_v39  ;;  %v1105_v37 = vmul.f32 %v1047_v35, %v1047_v35  ;;  %v1125_v29 = vadd.f32 %v1103_v14, %v1101_v8 }
 0x1b9   : > { %v1091_v21 = vadd.f32 %v1090_v63, %v1060_v39  ;;  %17050 = vst [vmem:[#allocation22_spill] sm:$0xff] %v11958_v9  ;;  %v1148_v58 = vadd.f32 %v1147_v40, %v1116_v28  ;;  %v11963_v51 = vmul.f32 %v11865_v12, %v997_v34  ;;  %v1053_v30 = vmul.f32 %v11949_v3, %v11713_v56 }
 0x1ba   : > { %v1070_v25 = vadd.f32 %v1069_v13, %v1051_v22  ;;  %v1120_v5 = vmul.f32 %v1062_v42, %v1062_v42  ;;  %v1107_v19 = vmul.f32 %v1049_v0, %v1049_v0  ;;  %v1126_v62 = vadd.f32 %v1125_v29, %v1105_v37 }
 0x1bb   : > { %v1092_v45 = vadd.f32 %v1091_v21, %v1062_v42  ;;  %17051 = vst [vmem:[#allocation23_spill] sm:$0xff] %v11963_v51  ;;  %v1149_v63 = vadd.f32 %v1148_v58, %v1118_v50  ;;  %v11971_v57 = vmul.f32 %v11865_v12, %v999_v41  ;;  %v1055_v39 = vmul.f32 %v11958_v9, %v11739_v18 }
 0x1bc   : > { %v1071_v34 = vadd.f32 %v1070_v25, %v1053_v30  ;;  %v1122_v35 = vmul.f32 %v1064_v55, %v1064_v55  ;;  %v1109_v14 = vmul.f32 %v1051_v22, %v1051_v22  ;;  %v1127_v56 = vadd.f32 %v1126_v62, %v1107_v19 }
 0x1bd   : > { %v1093_v46 = vadd.f32 %v1092_v45, %v1064_v55  ;;  %17052 = vst [vmem:[#allocation24_spill] sm:$0xff] %v11971_v57  ;;  %v1150_v8 = vadd.f32 %v1149_v63, %v1120_v5  ;;  %v17053_v42 = vsub.f32 %v11752_v38, %v11815_v33  ;;  %v1057_v24 = vmul.f32 %v11963_v51, %v11737_v17 }
 0x1be   : > { %v1072_v41 = vadd.f32 %v1071_v34, %v1055_v39  ;;  %v1124_v28 = vmul.f32 %v1066_v26, %v1066_v26  ;;  %v1111_v21 = vmul.f32 %v1053_v30, %v1053_v30  ;;  %v1128_v18 = vadd.f32 %v1127_v56, %v1109_v14 }
 0x1bf   : > { %v1094_v36 = vadd.f32 %v1093_v46, %v1066_v26  ;;  %v11979_v0 = vmul.f32 %v11865_v12, %v17053_v42  ;;  %v1151_v40 = vadd.f32 %v1150_v8, %v1122_v35  ;;  %v17055_v55 = vsub.f32 %v11766_v54, %v11815_v33 }
 0x1c0   : > { %v1059_v38 = vmul.f32 %v11971_v57, %v11763_v49  ;;  %v1073_v62 = vadd.f32 %v1072_v41, %v1057_v24  ;;  %v1113_v50 = vmul.f32 %v1055_v39, %v1055_v39  ;;  %v1129_v58 = vadd.f32 %v1128_v18, %v1111_v21 }
 0x1c1   : > { %17054 = vst [vmem:[#allocation25_spill] sm:$0xff] %v11979_v0  ;;  %v1095_v13 = vrot.slane %v1094_v36, 4  ;;  %v11987_v46 = vmul.f32 %v11865_v12, %v17055_v55  ;;  %v1152_v22 = vadd.f32 %v1151_v40, %v1124_v28  ;;  %v17057_v26 = vsub.f32 %v11780_v6, %v11815_v33 }
 0x1c2   : > { %v1061_v54 = vmul.f32 %v11979_v0, %v11761_v48  ;;  %v1074_v29 = vadd.f32 %v1073_v62, %v1059_v38  ;;  %v1115_v30 = vmul.f32 %v1057_v24, %v1057_v24  ;;  %v1130_v25 = vadd.f32 %v1129_v58, %v1113_v50 }
 0x1c3   : > { %17056 = vst [vmem:[#allocation26_spill] sm:$0xff] %v11987_v46  ;;  %v1096_v17 = vadd.f32 %v1095_v13, %v1094_v36  ;;  %v11995_v37 = vmul.f32 %v11865_v12, %v17057_v26  ;;  %v1153_v45 = vrot.slane %v1152_v22, 4  ;;  %v1063_v49 = vmul.f32 %v11987_v46, %v11785_v15 }
 0x1c4   : > { %v1075_v63 = vadd.f32 %v1074_v29, %v1061_v54  ;;  %v1117_v39 = vmul.f32 %v1059_v38, %v1059_v38  ;;  %v1131_v34 = vadd.f32 %v1130_v25, %v1115_v30  ;;  %v1119_v8 = vmul.f32 %v1061_v54, %v1061_v54  ;;  %v10015_v25 = vld [vmem:[%s16600_s2 + $0x48] sm:$0xff]  }
 0x1c5   : > { %17058 = vst [vmem:[#allocation27_spill] sm:$0xff] %v11995_v37  ;;  %v1097_v5 = vrot.slane %v1096_v17, 2  ;;  %v1154_v19 = vadd.f32 %v1153_v45, %v1152_v22  ;;  %v1065_v6 = vmul.f32 %v11995_v37, %v11787_v23  ;;  %v1121_v42 = vmul.f32 %v1063_v49, %v1063_v49  ;;  %8815 = vmatprep.subr.bf16.mxu0 %v10015_v25 }
 0x1c6   : > { %v1076_v33 = vadd.f32 %v1075_v63, %v1063_v49  ;;  %v1132_v48 = vadd.f32 %v1131_v34, %v1117_v39  ;;  %v10017_v49 = vld [vmem:[%s16600_s2 + $0x50] sm:$0xff]   ;;  %v10020_v39 = vld [vmem:[%s16600_s2 + $0x18] sm:$0xff]   ;;  %v10021_v34 = vld [vmem:[%s16600_s2 + $0x60] sm:$0xff]  }
 0x1c7   : > { %v1098_v35 = vadd.f32 %v1097_v5, %v1096_v17  ;;  %v1155_v12 = vrot.slane %v1154_v19, 2  ;;  %v1123_v15 = vmul.f32 %v1065_v6, %v1065_v6  ;;  %v10016_v5 = vld [vmem:[%s16600_s2 + $0x8] sm:$0xff]   ;;  %v10018_v63 = vld [vmem:[%s16600_s2 + $0x10] sm:$0xff]  }
 0x1c8   : > { %v1077_v14 = vadd.f32 %v1076_v33, %v1065_v6  ;;  %v1133_v24 = vadd.f32 %v1132_v48, %v1119_v8  ;;  %8816 = vmatpush3.bf16.msra.mxu0 %v10016_v5  ;;  %v10023_v6 = vld [vmem:[%s16600_s2 + $0x68] sm:$0xff]   ;;  %v10026_v8 = vld [vmem:[%s16600_s2 + $0x30] sm:$0xff]   ;;  %v10027_v48 = vld [vmem:[%s16600_s2 + $0x78] sm:$0xff]  }
 0x1c9   : > { %v1099_v56 = vrot.slane %v1098_v35, 1  ;;  %v1156_v36 = vadd.f32 %v1155_v12, %v1154_v19  ;;  %8817 = vmatprep.subr.bf16.mxu0 %v10017_v49  ;;  %v10019_v19 = vld [vmem:[%s16600_s2 + $0x58] sm:$0xff]   ;;  %v10024_v33 = vld [vmem:[%s16600_s2 + $0x28] sm:$0xff]   ;;  %v10025_v12 = vld [vmem:[%s16600_s2 + $0x70] sm:$0xff]  }
 0x1ca   : > { %v1078_v41 = vrot.slane %v1077_v14, 4  ;;  %v1134_v40 = vadd.f32 %v1133_v24, %v1121_v42 }
 0x1cb   : > { %v1157_v28 = vrot.slane %v1156_v36, 1  ;;  %v1100_v18 = vadd.f32 %v1099_v56, %v1098_v35  ;;  %v10022_v35 = vld [vmem:[%s16600_s2 + $0x20] sm:$0xff]  }
 0x1cc   : > { %v1079_v21 = vadd.f32 %v1078_v41, %v1077_v14  ;;  %v1135_v55 = vadd.f32 %v1134_v40, %v1123_v15  ;;  %8818 = vmatpush3.bf16.msra.mxu0 %v10018_v63  ;;  %v10028_v14 = vld [vmem:[%s16600_s2 + $0x38] sm:$0xff]  }
 0x1cd   : > { %v1158_v13 = vadd.f32 %v1157_v28, %v1156_v36  ;;  %8819 = vmatprep.subr.bf16.mxu0 %v10019_v19 }
 0x1ce   : > { %v1080_v38 = vrot.slane %v1079_v21, 2  ;;  %v1136_v62 = vrot.slane %v1135_v55, 4 }
 0x1cf   : > { %v1160_v23 = vsel %vm889_vm8, %v1100_v18, %v1158_v13 }
 0x1d0   : > { %1225 = vmatprep.mubr.f32.mxu1 %v1160_v23  ;;  %v1081_v22 = vadd.f32 %v1080_v38, %v1079_v21  ;;  %v1137_v50 = vadd.f32 %v1136_v62, %v1135_v55  ;;  %8820 = vmatpush3.bf16.msra.mxu0 %v10020_v39 }
 0x1d1   : > { %8821 = vmatprep.subr.bf16.mxu0 %v10021_v34 }
 0x1d2   : > { %v1138_v58 = vrot.slane %v1137_v50, 2  ;;  %v1082_v17 = vrot.slane %v1081_v22, 1 }
 0x1d4   : > { %v1139_v26 = vadd.f32 %v1138_v58, %v1137_v50  ;;  %v1083_v29 = vadd.f32 %v1082_v17, %v1081_v22  ;;  %8822 = vmatpush3.bf16.msra.mxu0 %v10022_v35 }
 0x1d5   : > { %8823 = vmatprep.subr.bf16.mxu0 %v10023_v6 }
 0x1d6   : > { %v1140_v54 = vrot.slane %v1139_v26, 1 }
 0x1d8   : > { %v1141_v45 = vadd.f32 %v1140_v54, %v1139_v26  ;;  %8824 = vmatpush3.bf16.msra.mxu0 %v10024_v33 }
 0x1d9   : > { %8825 = vmatprep.subr.bf16.mxu0 %v10025_v12 }
 0x1da   : > { %v1159_v30 = vsel %vm889_vm8, %v1083_v29, %v1141_v45 }
 0x1db   : > { %1226 = vmatmul.mubr.f32.vlgmr.msra.gmra.mrb[0].mxu1 %v1159_v30 }
 0x1dc   : > { %8826 = vmatpush3.bf16.msra.mxu0 %v10026_v8 }
 0x1dd   : > { %8827 = vmatprep.subr.bf16.mxu0 %v10027_v48 }
 0x1e0   : > { %8828 = vmatpush3.bf16.msra.mxu0 %v10028_v14 }
 0x2ae   : > { %v1227_v56 = vpop.f32.mrb[0].mxu1 }
 0x2af   : > { %v1232_v36 = vmul.f32 0.001953125, %v1227_v56  ;;  %v1229_v42 = vpop.f32.mrb[1].mxu1 }
 0x2b0   : > { %v1233_v24 = vmul.f32 0.001953125, %v1229_v42 }
 0x2b1   : > { %v1234_v41 = vmul.f32 %v1232_v36, %v1232_v36  ;;  %v12048_v38 = vrot.slane %v1232_v36, %v11806_v11 }
 0x2b2   : > { %v1235_v28 = vmul.f32 %v1233_v24, %v1233_v24  ;;  %v12051_v23 = vrot.slane %v1233_v24, %v11806_v11 }
 0x2b3   : > { %v1238_v15 = vrot.slane %v1234_v41, 7  ;;  %v1252_v17 = vsub.f32 %v11896_v43, %v12048_v38  ;;  %v1254_v26 = vsub.f32 %v11899_v10, %v12048_v38  ;;  %v1256_v33 = vsub.f32 %v11920_v16, %v12048_v38 }
 0x2b4   : > { %v1239_v40 = vrot.slane %v1235_v28, 7  ;;  %v1253_v58 = vsub.f32 %v11829_v52, %v12051_v23  ;;  %v1255_v29 = vsub.f32 %v11832_v53, %v12051_v23  ;;  %v1257_v45 = vsub.f32 %v11845_v1, %v12051_v23 }
 0x2b5   : > { %v1242_v21 = vsub.f32 %v1232_v36, %v1238_v15  ;;  %v1259_v30 = vsub.f32 %v11858_v47, %v12051_v23  ;;  %v1258_v12 = vsub.f32 %v11929_v7, %v12048_v38  ;;  %v1261_v8 = vsub.f32 %v11874_v20, %v12051_v23 }
 0x2b6   : > { %v1243_v18 = vsub.f32 %v1233_v24, %v1239_v40  ;;  %v1263_v48 = vsub.f32 %v11885_v44, %v12051_v23  ;;  %v1260_v28 = vsub.f32 %v11944_v60, %v12048_v38  ;;  %v1262_v15 = vsub.f32 %v11949_v3, %v12048_v38 }
 0x2b7   : > { %v1276_v13 = vadd.f32 1e-05, %v1242_v21  ;;  %v1265_v40 = vsub.f32 %v11902_v4, %v12051_v23  ;;  %v1267_v21 = vsub.f32 %v11907_v32, %v12051_v23 }
 0x2b8   : > { %v1277_v55 = vadd.f32 1e-05, %v1243_v18 }
 0x2b9   : > { %10385 = vrsqrt.f32 %v1276_v13 }
 0x2ba   : > { %10387 = vrsqrt.f32 %v1277_v55 }
 0x2c3   : > { %v10386_v62 = vpop.eup %10385 }
 0x2c4   : > { %v10388_v22 = vpop.eup %10387  ;;  %v12054_v50 = vrot.slane %v10386_v62, %v11809_v27 }
 0x2c5   : > { %v1287_v54 = vrot.slane %v10388_v22, %v11809_v27 }
 0x2c6   : > { %v1288_v25 = vmul.f32 %v12054_v50, %v1252_v17  ;;  %v1290_v5 = vmul.f32 %v12054_v50, %v1254_v26  ;;  %v1292_v14 = vmul.f32 %v12054_v50, %v1256_v33  ;;  %v1294_v56 = vmul.f32 %v12054_v50, %v1258_v12 }
 0x2c7   : > { %v1289_v49 = vmul.f32 %v1287_v54, %v1253_v58  ;;  %v1291_v63 = vmul.f32 %v1287_v54, %v1255_v29  ;;  %v1293_v19 = vmul.f32 %v1287_v54, %v1257_v45  ;;  %v1295_v39 = vmul.f32 %v1287_v54, %v1259_v30 }
 0x2c8   : > { %v1312_v35 = vpack.c.bf16 %v1290_v5, %v1288_v25  ;;  %v1297_v36 = vmul.f32 %v1287_v54, %v1261_v8  ;;  %v1299_v42 = vmul.f32 %v1287_v54, %v1263_v48  ;;  %v1314_v24 = vpack.c.bf16 %v1294_v56, %v1292_v14 }
 0x2c9   : > { %v1313_v34 = vpack.c.bf16 %v1291_v63, %v1289_v49  ;;  %v1315_v6 = vpack.c.bf16 %v1295_v39, %v1293_v19  ;;  %v1296_v18 = vmul.f32 %v12054_v50, %v1260_v28  ;;  %v1298_v13 = vmul.f32 %v12054_v50, %v1262_v15  ;;  %v10030_v28 = vld [vmem:[%s16602_s4 + $0x8] sm:$0xff]   ;;  %v10033_v15 = vld [vmem:[%s16602_s4 + $0x20] sm:$0xff]  }
 0x2ca   : > { %v1317_v41 = vpack.c.bf16 %v1299_v42, %v1297_v36  ;;  %v1301_v55 = vmul.f32 %v1287_v54, %v1265_v40  ;;  %v1303_v62 = vmul.f32 %v1287_v54, %v1267_v21  ;;  %v1264_v17 = vsub.f32 %v11958_v9, %v12048_v38  ;;  %v10035_v40 = vld [vmem:[%s16602_s4 + $0x28] sm:$0xff]   ;;  %v10037_v21 = vld [vmem:[%s16602_s4 + $0x30] sm:$0xff]  }
 0x2cb   : > { %1491 = vmatprep.mubr.bf16.mxu0 %v1313_v34  ;;  %v1316_v22 = vpack.c.bf16 %v1298_v13, %v1296_v18  ;;  %v1266_v26 = vsub.f32 %v11963_v51, %v12048_v38  ;;  %v1269_v29 = vsub.f32 %v11910_v2, %v12051_v23  ;;  %v1271_v45 = vsub.f32 %v11915_v59, %v12051_v23  ;;  %v10040_v18 = vld [vmem:[%s16602_s4 + $0x38] sm:$0xff]   ;;  %v10034_v13 = vld [vmem:[%s16604_s6 + $0x40] sm:$0xff]  }
 0x2cc   : > { %1492 = vmatmul.mubr.bf16.vlgmr.msra.gmra.mrb[4].mxu0 %v1312_v35  ;;  %v1319_v58 = vpack.c.bf16 %v1303_v62, %v1301_v55  ;;  %v1300_v30 = vmul.f32 %v12054_v50, %v1264_v17  ;;  %v1268_v39 = vsub.f32 %v11971_v57, %v12048_v38  ;;  %v1270_v34 = vsub.f32 %v11979_v0, %v12048_v38  ;;  %v10036_v55 = vld [vmem:[%s16604_s6] sm:$0xff]   ;;  %v10038_v62 = vld [vmem:[%s16604_s6 + $0x48] sm:$0xff]   ;;  %v10041_v17 = vld [vmem:[%s16604_s6 + $0x50] sm:$0xff]  }
 0x2cd   : > { %1499 = vmatprep.mubr.bf16.mxu0 %v1315_v6  ;;  %v1302_v25 = vmul.f32 %v12054_v50, %v1266_v26  ;;  %v1305_v5 = vmul.f32 %v1287_v54, %v1269_v29  ;;  %v1307_v49 = vmul.f32 %v1287_v54, %v1271_v45  ;;  %v1273_v35 = vsub.f32 %v11932_v31, %v12051_v23  ;;  %v10042_v26 = vld [vmem:[%s16604_s6 + $0x10] sm:$0xff]   ;;  %v10043_v29 = vld [vmem:[%s16604_s6 + $0x58] sm:$0xff]  }
 0x2ce   : > { %v1275_v6 = vsub.f32 %v11935_v61, %v12051_v23  ;;  %v1304_v33 = vmul.f32 %v12054_v50, %v1268_v39  ;;  %v1306_v12 = vmul.f32 %v12054_v50, %v1270_v34  ;;  %v1272_v36 = vsub.f32 %v11987_v46, %v12048_v38  ;;  %8879 = vmatprep.subr.bf16.mxu0 %v10034_v13  ;;  %v10044_v45 = vld [vmem:[%s16604_s6 + $0x18] sm:$0xff]  }
 0x2cf   : > { %v1318_v63 = vpack.c.bf16 %v1302_v25, %v1300_v30  ;;  %v1321_v19 = vpack.c.bf16 %v1307_v49, %v1305_v5  ;;  %v1309_v8 = vmul.f32 %v1287_v54, %v1273_v35  ;;  %v1274_v42 = vsub.f32 %v11995_v37, %v12048_v38  ;;  %v10031_v38 = vld [vmem:[%s16602_s4 + $0x10] sm:$0xff]   ;;  %8880 = vmatpush3.bf16.msra.mxu0 %v10036_v55  ;;  %v10047_v30 = vld [vmem:[%s16604_s6 + $0x60] sm:$0xff]   ;;  %v10052_v5 = vld [vmem:[%s16604_s6 + $0x68] sm:$0xff]  }
 0x2d0   : > { %v1311_v48 = vmul.f32 %v1287_v54, %v1275_v6  ;;  %v1320_v14 = vpack.c.bf16 %v1306_v12, %v1304_v33  ;;  %v10029_v54 = vld [vmem:[%s16602_s4] sm:$0xff]   ;;  %8881 = vmatprep.subr.bf16.mxu0 %v10038_v62  ;;  %v10054_v49 = vld [vmem:[%s16604_s6 + $0x28] sm:$0xff]   ;;  %v10062_v39 = vld [vmem:[%s16604_s6 + $0x78] sm:$0xff]  }
 0x2d1   : > { %v1310_v23 = vmul.f32 %v12054_v50, %v1274_v42  ;;  %9739 = vmatprep.subr.bf16.mxu1 %v10029_v54  ;;  %v10048_v25 = vld [vmem:[%s16604_s6 + $0x20] sm:$0xff]   ;;  %v10064_v34 = vld [vmem:[%s16604_s6 + $0x38] sm:$0xff]  }
 0x2d2   : > { %v1323_v56 = vpack.c.bf16 %v1311_v48, %v1309_v8  ;;  %9740 = vmatpush3.bf16.msra.mxu1 %v10029_v54  ;;  %v10067_v35 = vld [vmem:[%s16604_s6 + $0xc0] sm:$0xff]  }
 0x2d3   : > { %9741 = vmatprep.subr.bf16.mxu1 %v10030_v28  ;;  %v12198_v33 = vld [vmem:[%s16601_s3] ss:$0 sm:$0xff] }
 0x2d4   : > { %1500 = vmatmul.mubr.bf16.gmra.mrb[8].mxu0 %v1314_v24  ;;  %v1308_v24 = vmul.f32 %v12054_v50, %v1272_v36  ;;  %v10032_v50 = vld [vmem:[%s16602_s4 + $0x18] sm:$0xff]  }
 0x2d5   : > { %1507 = vmatprep.mubr.bf16.mxu0 %v1317_v41 }
 0x2d6   : > { %v1322_v41 = vpack.c.bf16 %v1310_v23, %v1308_v24  ;;  %9742 = vmatpush3.bf16.msra.mxu1 %v10030_v28 }
 0x2d7   : > { %9743 = vmatprep.subr.bf16.mxu1 %v10031_v38 }
 0x2da   : > { %9744 = vmatpush3.bf16.msra.mxu1 %v10031_v38 }
 0x2db   : > { %9745 = vmatprep.subr.bf16.mxu1 %v10032_v50 }
 0x2dc   : > { %1508 = vmatmul.mubr.bf16.gmra.mrb[12].mxu0 %v1316_v22  ;;  %v10045_v22 = vld [vmem:[%s16604_s6 + $0x140] sm:$0xff]  }
 0x2dd   : > { %1515 = vmatprep.mubr.bf16.mxu0 %v1319_v58  ;;  %v10039_v58 = vld [vmem:[%s16604_s6 + $0x8] sm:$0xff]  }
 0x2de   : > { %9746 = vmatpush3.bf16.msra.mxu1 %v10032_v50  ;;  %8882 = vmatpush3.bf16.msra.mxu0 %v10039_v58 }
 0x2df   : > { %9747 = vmatprep.subr.bf16.mxu1 %v10033_v15  ;;  %8883 = vmatprep.subr.bf16.mxu0 %v10041_v17 }
 0x2e2   : > { %9748 = vmatpush3.bf16.msra.mxu1 %v10033_v15  ;;  %8884 = vmatpush3.bf16.msra.mxu0 %v10042_v26 }
 0x2e3   : > { %9749 = vmatprep.subr.bf16.mxu1 %v10035_v40  ;;  %8885 = vmatprep.subr.bf16.mxu0 %v10043_v29 }
 0x2e4   : > { %1516 = vmatmul.mubr.bf16.gmra.mrb[16].mxu0 %v1318_v63  ;;  %v10057_v63 = vld [vmem:[%s16604_s6 + $0x70] sm:$0xff]  }
 0x2e5   : > { %1523 = vmatprep.mubr.bf16.mxu0 %v1321_v19  ;;  %v10058_v19 = vld [vmem:[%s16604_s6 + $0x30] sm:$0xff]  }
 0x2e6   : > { %9750 = vmatpush3.bf16.msra.mxu1 %v10035_v40  ;;  %8886 = vmatpush3.bf16.msra.mxu0 %v10044_v45 }
 0x2e7   : > { %9751 = vmatprep.subr.bf16.mxu1 %v10037_v21  ;;  %8887 = vmatprep.subr.bf16.mxu0 %v10047_v30 }
 0x2ea   : > { %9752 = vmatpush3.bf16.msra.mxu1 %v10037_v21  ;;  %8888 = vmatpush3.bf16.msra.mxu0 %v10048_v25 }
 0x2eb   : > { %9753 = vmatprep.subr.bf16.mxu1 %v10040_v18  ;;  %8889 = vmatprep.subr.bf16.mxu0 %v10052_v5 }
 0x2ec   : > { %1524 = vmatmul.mubr.bf16.gmra.mrb[20].mxu0 %v1320_v14 }
 0x2ed   : > { %1531 = vmatprep.mubr.bf16.mxu0 %v1323_v56 }
 0x2ee   : > { %9754 = vmatpush3.bf16.msra.mxu1 %v10040_v18  ;;  %8890 = vmatpush3.bf16.msra.mxu0 %v10054_v49 }
 0x2ef   : > { %8983 = vmatprep.subr.bf16.mxu1 %v10045_v22  ;;  %8891 = vmatprep.subr.bf16.mxu0 %v10057_v63 }
 0x2f2   : > { %8892 = vmatpush3.bf16.msra.mxu0 %v10058_v19 }
 0x2f3   : > { %8893 = vmatprep.subr.bf16.mxu0 %v10062_v39 }
 0x2f4   : > { %1532 = vmatmul.mubr.bf16.gmra.mrb[24].mxu0 %v1322_v41 }
 0x2f6   : > { %8894 = vmatpush3.bf16.msra.mxu0 %v10064_v34 }
 0x2f7   : > { %8931 = vmatprep.subr.bf16.mxu0 %v10067_v35 }
 0x39f   : > { %v8829_v6 = vpop.f32.mrb[4].mxu0 }
 0x3a0   : > { %v8830_v12 = vpop.f32.mrb[5].mxu0 }
 0x3a1   : > { %v8831_v8 = vadd.f32 %v8830_v12, %v8829_v6  ;;  %v8832_v48 = vpop.f32.mrb[6].mxu0 }
 0x3a2   : > { %v8833_v14 = vpop.f32.mrb[7].mxu0 }
 0x3a3   : > { %v1494_v56 = vadd.f32 %v8831_v8, %v12198_v33  ;;  %v8834_v36 = vadd.f32 %v8833_v14, %v8832_v48 }
 0x3a5   : > { %v1552_v42 = vmul.f32 0.70710677, %v1494_v56  ;;  %v1497_v24 = vadd.f32 %v8834_v36, %v12198_v33 }
 0x3a7   : > { %v1588_v23 = vand.u32 2147483647, %v1552_v42  ;;  %v1553_v41 = vmul.f32 0.70710677, %v1497_v24  ;;  %v8835_v54 = vpop.f32.mrb[8].mxu0  ;;  %vm1564_vm4 = vcmp.ge.f32.partialorder %v1552_v42, 0.0 }
 0x3a8   : > { %v8836_v50 = vpop.f32.mrb[9].mxu0 }
 0x3a9   : > { %v1600_v28 = vmul.f32 0.3275911, %v1588_v23  ;;  %v1589_v38 = vand.u32 2147483647, %v1553_v41  ;;  %v8838_v21 = vpop.f32.mrb[10].mxu0  ;;  %v8837_v18 = vadd.f32 %v8836_v50, %v8835_v54  ;;  %v1756_v34 = vsub.f32 0.0, %v1588_v23 }
 0x3aa   : > { %v8839_v13 = vpop.f32.mrb[11].mxu0  ;;  %vm1565_vm6 = vcmp.ge.f32.partialorder %v1553_v41, 0.0 }
 0x3ab   : > { %v1612_v15 = vadd.f32 1.0, %v1600_v28  ;;  %v1601_v40 = vmul.f32 0.3275911, %v1589_v38  ;;  %v1502_v62 = vadd.f32 %v8837_v18, %v12198_v33  ;;  %v8840_v22 = vadd.f32 %v8839_v13, %v8838_v21 }
 0x3ac   : > { %v1757_v35 = vsub.f32 0.0, %v1589_v38  ;;  %v1768_v21 = vmul.f32 %v1756_v34, %v1588_v23  ;;  %v16659_v34 = vmov -1.0  }
 0x3ad   : > { %10389 = vrcp.f32 %v1612_v15  ;;  %v1613_v55 = vadd.f32 1.0, %v1601_v40  ;;  %v12203_v17 = vmul.f32 0.70710677, %v1502_v62  ;;  %v12206_v26 = vadd.f32 %v8840_v22, %v12198_v33 }
 0x3ae   : > { %v1769_v18 = vmul.f32 %v1757_v35, %v1589_v38  ;;  %v12247_v38 = vsel %vm1564_vm4, 1.0, %v16659_v34  ;;  %vm2434_vm4 = vcmask 1042432  }
 0x3af   : > { %v8841_v58 = vpop.f32.mrb[12].mxu0  ;;  %10391 = vrcp.f32 %v1613_v55  ;;  %v12209_v25 = vand.u32 2147483647, %v12203_v17  ;;  %v12212_v5 = vmul.f32 0.70710677, %v12206_v26  ;;  %vm1566_vm2 = vcmp.ge.f32.partialorder %v12203_v17, 0.0 }
 0x3b0   : > { %v8842_v29 = vpop.f32.mrb[13].mxu0 }
 0x3b1   : > { %v8843_v45 = vadd.f32 %v8842_v29, %v8841_v58  ;;  %v8844_v30 = vpop.f32.mrb[14].mxu0  ;;  %v1602_v19 = vmul.f32 0.3275911, %v12209_v25  ;;  %v12219_v39 = vand.u32 2147483647, %v12212_v5  ;;  %v12237_v58 = vmul.f32 0.5, %v1494_v56 }
 0x3b2   : > { %v8845_v63 = vpop.f32.mrb[15].mxu0  ;;  %v12252_v56 = vsel %vm1565_vm6, 1.0, %v16659_v34  ;;  %vm1567_vm10 = vcmp.ge.f32.partialorder %v12212_v5, 0.0  ;;  %v17059_v5 = vmov -1.0   ;;  %vm3907_vm6 = vcmask 1041408  }
 0x3b3   : > { %v12215_v49 = vadd.f32 %v8843_v45, %v12198_v33  ;;  %v8846_v12 = vadd.f32 %v8845_v63, %v8844_v30  ;;  %v1614_v8 = vadd.f32 1.0, %v1602_v19  ;;  %v1603_v48 = vmul.f32 0.3275911, %v12219_v39 }
 0x3b4   : > { %v12242_v63 = vmul.f32 0.5, %v1497_v24  ;;  %v1780_v24 = vmul.f32 1.442695, %v1768_v21 }
 0x3b5   : > { %v12222_v6 = vmul.f32 0.70710677, %v12215_v49  ;;  %v12231_v54 = vadd.f32 %v8846_v12, %v12198_v33  ;;  %10393 = vrcp.f32 %v1614_v8  ;;  %v1615_v15 = vadd.f32 1.0, %v1603_v48 }
 0x3b6   : > { %v1782_v48 = vmul.f32 1.442695, %v1769_v18  ;;  %v12302_v17 = vmul.f32 0.5, %v12215_v49 }
 0x3b7   : > { %v12225_v14 = vpop.eup %10389  ;;  %v12228_v36 = vand.u32 2147483647, %v12222_v6  ;;  %v8847_v28 = vpop.f32.mrb[16].mxu0  ;;  %v12240_v45 = vmul.f32 0.70710677, %v12231_v54  ;;  %10395 = vrcp.f32 %v1615_v15  ;;  %vm1568_vm14 = vcmp.ge.f32.partialorder %v12222_v6, 0.0 }
 0x3b8   : > { %v1648_v50 = vmul.f32 1.0614054, %v12225_v14  ;;  %v8848_v40 = vpop.f32.mrb[17].mxu0 }
 0x3b9   : > { %v1604_v13 = vmul.f32 0.3275911, %v12228_v36  ;;  %v8850_v55 = vpop.f32.mrb[18].mxu0  ;;  %v12235_v22 = vpop.eup %10391  ;;  %v12255_v12 = vand.u32 2147483647, %v12240_v45  ;;  %v1760_v46 = vsub.f32 0.0, %v12228_v36 }
 0x3ba   : > { %v1660_v29 = vadd.f32 -1.4531521, %v1648_v50  ;;  %v8851_v30 = vpop.f32.mrb[19].mxu0  ;;  %v1649_v19 = vmul.f32 1.0614054, %v12235_v22  ;;  %v8849_v50 = vadd.f32 %v8848_v40, %v8847_v28  ;;  %v1759_v28 = vsub.f32 0.0, %v12219_v39 }
 0x3bb   : > { %v1616_v23 = vadd.f32 1.0, %v1604_v13  ;;  %v12257_v13 = vmul.f32 0.5, %v1502_v62  ;;  %v1605_v42 = vmul.f32 0.3275911, %v12255_v12  ;;  %v8852_v34 = vadd.f32 %v8851_v30, %v8850_v55 }
 0x3bc   : > { %v1672_v35 = vmul.f32 %v12225_v14, %v1660_v29  ;;  %v1661_v8 = vadd.f32 -1.4531521, %v1649_v19  ;;  %v1758_v29 = vsub.f32 0.0, %v12209_v25  ;;  %v12263_v41 = vadd.f32 %v8849_v50, %v12198_v33 }
 0x3bd   : > { %10397 = vrcp.f32 %v1616_v23  ;;  %v1617_v62 = vadd.f32 1.0, %v1605_v42  ;;  %v12277_v55 = vmul.f32 0.5, %v12206_v26  ;;  %v12280_v30 = vadd.f32 %v8852_v34, %v12198_v33 }
 0x3be   : > { %v1684_v15 = vadd.f32 1.4214138, %v1672_v35  ;;  %v1673_v61 = vmul.f32 %v12235_v22, %v1661_v8  ;;  %10399 = vpow2.f32 %v1780_v24  ;;  %v12270_v19 = vmul.f32 0.70710677, %v12263_v41 }
 0x3bf   : > { %v8853_v37 = vpop.f32.mrb[20].mxu0  ;;  %v12274_v35 = vpop.eup %10393  ;;  %10401 = vrcp.f32 %v1617_v62  ;;  %v12290_v50 = vsel %vm1566_vm2, 1.0, %v17059_v5  ;;  %v1770_v26 = vmul.f32 %v1758_v29, %v12209_v25  ;;  %v12295_v62 = vsel %vm1567_vm10, 1.0, %v17059_v5 }
 0x3c0   : > { %v1696_v21 = vmul.f32 %v12225_v14, %v1684_v15  ;;  %v8854_v40 = vpop.f32.mrb[21].mxu0  ;;  %v1685_v18 = vadd.f32 1.4214138, %v1673_v61  ;;  %v1650_v15 = vmul.f32 1.0614054, %v12274_v35  ;;  %10403 = vpow2.f32 %v1782_v48 }
 0x3c1   : > { %v12272_v23 = vpop.f32.mrb[22].mxu0  ;;  %v12282_v8 = vadd.f32 %v8854_v40, %v8853_v37  ;;  %v1771_v37 = vmul.f32 %v1759_v28, %v12219_v39  ;;  %v1594_v34 = vand.u32 2147483647, %v12270_v19  ;;  %v12299_v40 = vpop.eup %10395  ;;  %v1784_v59 = vmul.f32 1.442695, %v1770_v26 }
 0x3c2   : > { %v12284_v24 = vpop.f32.mrb[23].mxu0  ;;  %v1697_v61 = vmul.f32 %v12235_v22, %v1685_v18  ;;  %v1708_v42 = vadd.f32 -0.28449672, %v1696_v21  ;;  %v1662_v31 = vadd.f32 -1.4531521, %v1650_v15  ;;  %vm1569_vm15 = vcmp.ge.f32.partialorder %v12240_v45, 0.0 }
 0x3c3   : > { %v1651_v25 = vmul.f32 1.0614054, %v12299_v40  ;;  %v1606_v29 = vmul.f32 0.3275911, %v1594_v34  ;;  %v12307_v21 = vmul.f32 0.70710677, %v12280_v30 }
 0x3c4   : > { %v1709_v18 = vadd.f32 -0.28449672, %v1697_v61  ;;  %v1674_v28 = vmul.f32 %v12274_v35, %v1662_v31  ;;  %v1761_v61 = vsub.f32 0.0, %v12255_v12  ;;  %v1720_v0 = vmul.f32 %v12225_v14, %v1708_v42 }
 0x3c5   : > { %v1663_v48 = vadd.f32 -1.4531521, %v1651_v25  ;;  %v1786_v2 = vmul.f32 1.442695, %v1771_v37  ;;  %v1618_v57 = vadd.f32 1.0, %v1606_v29  ;;  %v1772_v31 = vmul.f32 %v1760_v46, %v12228_v36 }
 0x3c6   : > { %v1721_v39 = vmul.f32 %v12235_v22, %v1709_v18  ;;  %v1686_v51 = vadd.f32 1.4214138, %v1674_v28  ;;  %v12324_v9 = vand.u32 2147483647, %v12307_v21  ;;  %v1773_v28 = vmul.f32 %v1761_v61, %v12255_v12 }
 0x3c7   : > { %v12312_v15 = vpop.f32.mrb[24].mxu0  ;;  %v12314_v49 = vpop.eup %10397  ;;  %v1675_v4 = vmul.f32 %v12299_v40, %v1663_v48  ;;  %10405 = vrcp.f32 %v1618_v57  ;;  %v1732_v46 = vadd.f32 0.2548296, %v1720_v0  ;;  %v1762_v60 = vsub.f32 0.0, %v1594_v34 }
 0x3c8   : > { %v12317_v32 = vpop.f32.mrb[25].mxu0  ;;  %v1652_v18 = vmul.f32 1.0614054, %v12314_v49  ;;  %v1733_v26 = vadd.f32 0.2548296, %v1721_v39  ;;  %v10400_v37 = vpop.eup %10399  ;;  %v1698_v25 = vmul.f32 %v12274_v35, %v1686_v51  ;;  %10407 = vpow2.f32 %v1784_v59 }
 0x3c9   : > { %v12326_v42 = vpop.f32.mrb[26].mxu0  ;;  %v12332_v3 = vpop.eup %10401  ;;  %v1687_v36 = vadd.f32 1.4214138, %v1675_v4  ;;  %10409 = vpow2.f32 %v1786_v2  ;;  %v1607_v57 = vmul.f32 0.3275911, %v12324_v9  ;;  %v1744_v7 = vmul.f32 %v12225_v14, %v1732_v46 }
 0x3ca   : > { %v1664_v29 = vadd.f32 -1.4531521, %v1652_v18  ;;  %v12330_v44 = vpop.f32.mrb[27].mxu0  ;;  %v1710_v39 = vadd.f32 -0.28449672, %v1698_v25  ;;  %v1745_v51 = vmul.f32 %v12235_v22, %v1733_v26  ;;  %v10404_v2 = vpop.eup %10403  ;;  %v12348_v22 = vsel %vm1568_vm14, 1.0, %v17059_v5 }
 0x3cb   : > { %v1653_v20 = vmul.f32 1.0614054, %v12332_v3  ;;  %v1699_v59 = vmul.f32 %v12299_v40, %v1687_v36  ;;  %v1788_v12 = vmul.f32 1.442695, %v1772_v31  ;;  %v1619_v61 = vadd.f32 1.0, %v1607_v57 }
 0x3cc   : > { %v1676_v48 = vmul.f32 %v12314_v49, %v1664_v29  ;;  %v1722_v18 = vmul.f32 %v12274_v35, %v1710_v39  ;;  %v1790_v4 = vmul.f32 1.442695, %v1773_v28  ;;  %v12343_v29 = vadd.f32 %v12282_v8, %v12198_v33 }
 0x3cd   : > { %v1665_v0 = vadd.f32 -1.4531521, %v1653_v20  ;;  %v1711_v25 = vadd.f32 -0.28449672, %v1699_v59  ;;  %10411 = vrcp.f32 %v1619_v61  ;;  %v1774_v20 = vmul.f32 %v1762_v60, %v1594_v34 }
 0x3ce   : > { %v1688_v47 = vadd.f32 1.4214138, %v1676_v48  ;;  %v1805_v28 = vmul.f32 %v10404_v2, %v1745_v51  ;;  %10413 = vpow2.f32 %v1788_v12  ;;  %v12354_v14 = vmul.f32 0.5, %v12231_v54 }
 0x3cf   : > { %v1677_v26 = vmul.f32 %v12332_v3, %v1665_v0  ;;  %v1723_v36 = vmul.f32 %v12299_v40, %v1711_v25  ;;  %v1734_v46 = vadd.f32 0.2548296, %v1722_v18  ;;  %10415 = vpow2.f32 %v1790_v4 }
 0x3d0   : > { %v1700_v31 = vmul.f32 %v12314_v49, %v1688_v47  ;;  %v1804_v6 = vmul.f32 %v10400_v37, %v1744_v7  ;;  %v12359_v47 = vmul.f32 0.70710677, %v12343_v29  ;;  %v8858_v60 = vadd.f32 %v12284_v24, %v12272_v23 }
 0x3d1   : > { %v1689_v57 = vadd.f32 1.4214138, %v1677_v26  ;;  %v12356_v39 = vpop.eup %10405  ;;  %v1735_v48 = vadd.f32 0.2548296, %v1723_v36  ;;  %v1792_v59 = vmul.f32 1.442695, %v1774_v20  ;;  %v1746_v4 = vmul.f32 %v12274_v35, %v1734_v46 }
 0x3d2   : > { %v1712_v8 = vadd.f32 -0.28449672, %v1700_v31  ;;  %v10408_v34 = vpop.eup %10407  ;;  %v1763_v12 = vsub.f32 0.0, %v12324_v9  ;;  %v1817_v18 = vsub.f32 1.0, %v1805_v28  ;;  %v1654_v7 = vmul.f32 1.0614054, %v12356_v39 }
 0x3d3   : > { %v1701_v54 = vmul.f32 %v12332_v3, %v1689_v57  ;;  %v10410_v61 = vpop.eup %10409  ;;  %v1747_v0 = vmul.f32 %v12299_v40, %v1735_v48  ;;  %v1596_v37 = vand.u32 2147483647, %v12359_v47  ;;  %v1816_v24 = vsub.f32 1.0, %v1804_v6 }
 0x3d4   : > { %v1724_v51 = vmul.f32 %v12314_v49, %v1712_v8  ;;  %vm1570_vm11 = vcmp.ge.f32.partialorder %v12270_v19, 0.0  ;;  %v1666_v25 = vadd.f32 -1.4531521, %v1654_v7  ;;  %10417 = vpow2.f32 %v1792_v59 }
 0x3d5   : > { %v1713_v23 = vadd.f32 -0.28449672, %v1701_v54  ;;  %v1608_v31 = vmul.f32 0.3275911, %v1596_v37  ;;  %v1807_v26 = vmul.f32 %v10410_v61, %v1747_v0  ;;  %v1775_v40 = vmul.f32 %v1763_v12, %v12324_v9 }
 0x3d6   : > { %v1736_v2 = vadd.f32 0.2548296, %v1724_v51  ;;  %v1829_v36 = vmul.f32 %v1817_v18, %v12252_v56  ;;  %v1678_v46 = vmul.f32 %v12356_v39, %v1666_v25  ;;  %v1806_v57 = vmul.f32 %v10408_v34, %v1746_v4 }
 0x3d7   : > { %v1725_v20 = vmul.f32 %v12332_v3, %v1713_v23  ;;  %v12374_v28 = vpop.eup %10411  ;;  %v1620_v8 = vadd.f32 1.0, %v1608_v31  ;;  %v12381_v51 = vadd.f32 %v8858_v60, %v12198_v33  ;;  %v1581_v9 = vsel %vm1569_vm15, 1.0, %v17059_v5 }
 0x3d8   : > { %v1748_v35 = vmul.f32 %v12314_v49, %v1736_v2  ;;  %v1655_v48 = vmul.f32 1.0614054, %v12374_v28  ;;  %v10414_v54 = vpop.eup %10413  ;;  %v12389_v56 = vsel %vm1570_vm11, 1.0, %v17059_v5  ;;  %v1690_v49 = vadd.f32 1.4214138, %v1678_v46 }
 0x3d9   : > { %v1737_v6 = vadd.f32 0.2548296, %v1725_v20  ;;  %10419 = vrcp.f32 %v1620_v8  ;;  %v10416_v59 = vpop.eup %10415  ;;  %v1819_v34 = vsub.f32 1.0, %v1807_v26  ;;  %v1794_v18 = vmul.f32 1.442695, %v1775_v40 }
 0x3da   : > { %v1667_v61 = vadd.f32 -1.4531521, %v1655_v48  ;;  %v1828_v60 = vmul.f32 %v1816_v24, %v12247_v38  ;;  %v1841_v0 = vadd.f32 1.0, %v1829_v36  ;;  %v1808_v7 = vmul.f32 %v10414_v54, %v1748_v35 }
 0x3db   : > { %v1749_v12 = vmul.f32 %v12332_v3, %v1737_v6  ;;  %v1702_v45 = vmul.f32 %v12356_v39, %v1690_v49  ;;  %v1818_v4 = vsub.f32 1.0, %v1806_v57  ;;  %v12396_v23 = vmul.f32 0.70710677, %v12381_v51 }
 0x3dc   : > { %v1679_v19 = vmul.f32 %v12374_v28, %v1667_v61  ;;  %v1764_v31 = vsub.f32 0.0, %v1596_v37  ;;  %v8861_v3 = vadd.f32 %v12317_v32, %v12312_v15  ;;  %v8864_v26 = vadd.f32 %v12330_v44, %v12326_v42 }
 0x3dd   : > { %v1809_v2 = vmul.f32 %v10416_v59, %v1749_v12  ;;  %v1714_v25 = vadd.f32 -0.28449672, %v1702_v45  ;;  %v1831_v38 = vmul.f32 %v1819_v34, %v12295_v62  ;;  %10421 = vpow2.f32 %v1794_v18 }
 0x3de   : > { %v1691_v20 = vadd.f32 1.4214138, %v1679_v19  ;;  %v1820_v40 = vsub.f32 1.0, %v1808_v7  ;;  %v12405_v35 = vand.u32 2147483647, %v12396_v23  ;;  %v12408_v46 = vadd.f32 %v8861_v3, %v12198_v33  ;;  %v10418_v8 = vpop.eup %10417 }
 0x3df   : > { %v1821_v24 = vsub.f32 1.0, %v1809_v2  ;;  %v1726_v36 = vmul.f32 %v12356_v39, %v1714_v25  ;;  %v1840_v57 = vadd.f32 1.0, %v1828_v60  ;;  %v1830_v32 = vmul.f32 %v1818_v4, %v12290_v50 }
 0x3e0   : > { %v1703_v44 = vmul.f32 %v12374_v28, %v1691_v20  ;;  %v12413_v62 = vadd.f32 %v8864_v26, %v12198_v33  ;;  %v1776_v6 = vmul.f32 %v1764_v31, %v1596_v37  ;;  %v1609_v48 = vmul.f32 0.3275911, %v12405_v35 }
 0x3e1   : > { %v1833_v15 = vmul.f32 %v1821_v24, %v1581_v9  ;;  %v1738_v42 = vadd.f32 0.2548296, %v1726_v36  ;;  %v12417_v54 = vmul.f32 %v1841_v0, %v12242_v63  ;;  %v1843_v49 = vadd.f32 1.0, %v1831_v38 }
 0x3e2   : > { %v1715_v59 = vadd.f32 -0.28449672, %v1703_v44  ;;  %v12420_v34 = vmul.f32 0.70710677, %v12408_v46  ;;  %v1832_v50 = vmul.f32 %v1820_v40, %v12348_v22  ;;  %v1621_v61 = vadd.f32 1.0, %v1609_v48 }
 0x3e3   : > { %17060 = vst [vmem:[#allocation28_spill] sm:$0xff] %v12417_v54  ;;  %v12422_v12 = vpop.eup %10419  ;;  %v1750_v33 = vmul.f32 %v12356_v39, %v1738_v42  ;;  %v12427_v9 = vmul.f32 0.70710677, %v12413_v62  ;;  %v12430_v37 = vmul.f32 %v1840_v57, %v12237_v58  ;;  %v1842_v63 = vadd.f32 1.0, %v1830_v32 }
 0x3e4   : > { %v1727_v18 = vmul.f32 %v12374_v28, %v1715_v59  ;;  %v1656_v60 = vmul.f32 1.0614054, %v12422_v12  ;;  %v1845_v0 = vadd.f32 1.0, %v1833_v15  ;;  %v1796_v45 = vmul.f32 1.442695, %v1776_v6 }
 0x3e5   : > { %17061 = vst [vmem:[#allocation29_spill] sm:$0xff] %v12430_v37  ;;  %v1810_v7 = vmul.f32 %v10418_v8, %v1750_v33  ;;  %10423 = vrcp.f32 %v1621_v61  ;;  %v12435_v39 = vand.u32 2147483647, %v12420_v34  ;;  %v12439_v2 = vpack.c.bf16 %v12417_v54, %v12430_v37  ;;  %v10050_v33 = vld [vmem:[%s16604_s6 + $0x108] sm:$0xff]  }
 0x3e6   : > { %v1739_v4 = vadd.f32 0.2548296, %v1727_v18  ;;  %v1668_v22 = vadd.f32 -1.4531521, %v1656_v60  ;;  %v12442_v58 = vmul.f32 %v1843_v49, %v12277_v55  ;;  %v1844_v19 = vadd.f32 1.0, %v1832_v50  ;;  %v10051_v18 = vld [vmem:[%s16604_s6 + $0x150] sm:$0xff]  }
 0x3e7   : > { %17062 = vst [vmem:[#allocation30_spill] sm:$0xff] %v12439_v2  ;;  %v1822_v25 = vsub.f32 1.0, %v1810_v7  ;;  %v1599_v31 = vand.u32 2147483647, %v12427_v9  ;;  %v10422_v3 = vpop.eup %10421  ;;  %vm1571_vm7 = vcmp.ge.f32.partialorder %v12307_v21, 0.0  ;;  %9755 = vmatprep.mubr.bf16.mxu1 %v12439_v2  ;;  %v12451_v20 = vmul.f32 %v1842_v63, %v12257_v13 }
 0x3e8   : > { %17063 = vst [vmem:[#allocation31_spill] sm:$0xff] %v12442_v58  ;;  %v1751_v26 = vmul.f32 %v12374_v28, %v1739_v4  ;;  %v1680_v38 = vmul.f32 %v12422_v12, %v1668_v22  ;;  %v1610_v24 = vmul.f32 0.3275911, %v12435_v39  ;;  %v12454_v55 = vmul.f32 %v1845_v0, %v12354_v14  ;;  %v10046_v28 = vld [vmem:[%s16604_s6 + $0x100] sm:$0xff]  }
 0x3e9   : > { %17064 = vst [vmem:[#allocation32_spill] sm:$0xff] %v12451_v20  ;;  %10425 = vpow2.f32 %v1796_v45  ;;  %v1611_v40 = vmul.f32 0.3275911, %v1599_v31  ;;  %v1834_v36 = vmul.f32 %v1822_v25, %v12389_v56  ;;  %v12461_v44 = vmul.f32 %v1844_v19, %v12302_v17  ;;  %v10049_v56 = vld [vmem:[%s16604_s6 + $0x148] sm:$0xff]  }
 0x3ea   : > { %v1811_v8 = vmul.f32 %v10422_v3, %v1751_v26  ;;  %v1692_v57 = vadd.f32 1.4214138, %v1680_v38  ;;  %v1622_v32 = vadd.f32 1.0, %v1610_v24  ;;  %v1765_v13 = vsub.f32 0.0, %v12405_v35  ;;  %v10053_v26 = vld [vmem:[%s16604_s6 + $0x110] sm:$0xff]  }
 0x3eb   : > { %v1623_v15 = vadd.f32 1.0, %v1611_v40  ;;  %v12466_v14 = vpack.c.bf16 %v12442_v58, %v12451_v20  ;;  %v1583_v17 = vsel %vm1571_vm7, 1.0, %v17059_v5  ;;  %v12478_v48 = vpack.c.bf16 %v12454_v55, %v12461_v44 }
 0x3ec   : > { %v1823_v42 = vsub.f32 1.0, %v1811_v8  ;;  %v1704_v6 = vmul.f32 %v12422_v12, %v1692_v57  ;;  %10427 = vrcp.f32 %v1622_v32  ;;  %v1846_v49 = vadd.f32 1.0, %v1834_v36 }
 0x3ed   : > { %17065 = vst [vmem:[#allocation33_spill] sm:$0xff] %v12466_v14  ;;  %10429 = vrcp.f32 %v1623_v15  ;;  %9756 = vmatmul.mubr.bf16.vlgmr.msra.gmra.mrb[4].mxu1 %v12466_v14  ;;  %17066 = vst [vmem:[#allocation34_spill] sm:$0xff] %v12478_v48  ;;  %v1546_v21 = vmul.f32 0.5, %v12263_v41  ;;  %v1777_v63 = vmul.f32 %v1765_v13, %v12405_v35  ;;  %v1547_v60 = vmul.f32 0.5, %v12280_v30 }
 0x3ee   : > { %v1835_v59 = vmul.f32 %v1823_v42, %v1583_v17  ;;  %v1716_v50 = vadd.f32 -0.28449672, %v1704_v6  ;;  %8984 = vmatpush3.bf16.msra.mxu1 %v10046_v28  ;;  %9759 = vmatprep.mubr.bf16.mxu1 %v12478_v48  ;;  %v1766_v4 = vsub.f32 0.0, %v12435_v39  ;;  %v1767_v22 = vsub.f32 0.0, %v1599_v31 }
 0x3ef   : > { %v12483_v61 = vpop.eup %10423  ;;  %8985 = vmatprep.subr.bf16.mxu1 %v10049_v56  ;;  %v12495_v41 = vmul.f32 %v1846_v49, %v1546_v21  ;;  %vm1572_vm13 = vcmp.ge.f32.partialorder %v12359_v47, 0.0  ;;  %vm1573_vm3 = vcmp.ge.f32.partialorder %v12396_v23, 0.0  ;;  %v1798_v30 = vmul.f32 1.442695, %v1777_v63  ;;  %v10055_v47 = vld [vmem:[%s16604_s6 + $0x158] sm:$0xff]  }
 0x3f0   : > { %v1847_v0 = vadd.f32 1.0, %v1835_v59  ;;  %v1728_v7 = vmul.f32 %v12422_v12, %v1716_v50  ;;  %v1657_v45 = vmul.f32 1.0614054, %v12483_v61  ;;  %v12514_v23 = vmul.f32 0.5, %v12343_v29 }
 0x3f1   : > { %v1778_v36 = vmul.f32 %v1766_v4, %v12435_v39  ;;  %v1779_v8 = vmul.f32 %v1767_v22, %v1599_v31  ;;  %v12521_v32 = vmul.f32 0.5, %v12381_v51  ;;  %v12524_v28 = vsel %vm1573_vm3, 1.0, %v17059_v5  ;;  %v10056_v51 = vld [vmem:[%s16604_s6 + $0x118] sm:$0xff]   ;;  %v10061_v4 = vld [vmem:[%s16604_s6 + $0x168] sm:$0xff]  }
 0x3f2   : > { %v12497_v35 = vmul.f32 %v1847_v0, %v1547_v60  ;;  %v1740_v19 = vadd.f32 0.2548296, %v1728_v7  ;;  %v1669_v25 = vadd.f32 -1.4531521, %v1657_v45  ;;  %8986 = vmatpush3.bf16.msra.mxu1 %v10050_v33  ;;  %10431 = vpow2.f32 %v1798_v30  ;;  %v10060_v60 = vld [vmem:[%s16604_s6 + $0x120] sm:$0xff]  }
 0x3f3   : > { %v10426_v3 = vpop.eup %10425  ;;  %8987 = vmatprep.subr.bf16.mxu1 %v10051_v18  ;;  %v12530_v39 = vmul.f32 0.5, %v12408_v46  ;;  %vm1574_vm9 = vcmp.ge.f32.partialorder %v12420_v34, 0.0  ;;  %vm1575_vm1 = vcmp.ge.f32.partialorder %v12427_v9, 0.0  ;;  %v10059_v46 = vld [vmem:[%s16604_s6 + $0x160] sm:$0xff]   ;;  %v1800_v17 = vmul.f32 1.442695, %v1778_v36 }
 0x3f4   : > { %v1752_v38 = vmul.f32 %v12422_v12, %v1740_v19  ;;  %v1681_v24 = vmul.f32 %v12483_v61, %v1669_v25  ;;  %v12508_v40 = vpack.c.bf16 %v12497_v35, %v12495_v41  ;;  %v1584_v12 = vsel %vm1572_vm13, 1.0, %v17059_v5 }
 0x3f5   : > { %v1802_v49 = vmul.f32 1.442695, %v1779_v8  ;;  %v12544_v50 = vmul.f32 0.5, %v12413_v62  ;;  %v2367_v34 = vrot.slane %v12451_v20, 3  ;;  %v12548_v63 = vsel %vm1574_vm9, 1.0, %v17059_v5 }
 0x3f6   : > { %17067 = vst [vmem:[#allocation35_spill] sm:$0xff] %v12508_v40  ;;  %v12517_v57 = vpop.eup %10427  ;;  %v1693_v13 = vadd.f32 1.4214138, %v1681_v24  ;;  %9760 = vmatmul.mubr.bf16.gmra.mrb[8].mxu1 %v12508_v40  ;;  %v1812_v29 = vmul.f32 %v10426_v3, %v1752_v38  ;;  %v2369_v0 = vrot.slane %v12442_v58, 3  ;;  %v12559_v7 = vsel %vm1575_vm1, 1.0, %v17059_v5 }
 0x3f7   : > { %v12527_v15 = vpop.eup %10429  ;;  %v1658_v31 = vmul.f32 1.0614054, %v12517_v57  ;;  %8988 = vmatpush3.bf16.msra.mxu1 %v10053_v26  ;;  %v2365_v22 = vrot.slane %v12417_v54, 3  ;;  %10433 = vpow2.f32 %v1800_v17  ;;  %v2513_v25 = vrot.slane %v12451_v20, 1 }
 0x3f8   : > { %v1705_v56 = vmul.f32 %v12483_v61, %v1693_v13  ;;  %v1659_v42 = vmul.f32 1.0614054, %v12527_v15  ;;  %8989 = vmatprep.subr.bf16.mxu1 %v10055_v47  ;;  %v1824_v21 = vsub.f32 1.0, %v1812_v29  ;;  %v12570_v3 = vsel %vm2348_vm0, %v2367_v34, %v2369_v0  ;;  %v10063_v47 = vld [vmem:[%s16604_s6 + $0x128] sm:$0xff]  }
 0x3f9   : > { %v1670_v6 = vadd.f32 -1.4531521, %v1658_v31  ;;  %10435 = vpow2.f32 %v1802_v49  ;;  %v12575_v26 = vsel %vm2348_vm0, %v2365_v22, %v2367_v34  ;;  %v2511_v36 = vrot.slane %v12417_v54, 1 }
 0x3fa   : > { %v1717_v59 = vadd.f32 -0.28449672, %v1705_v56  ;;  %v1671_v33 = vadd.f32 -1.4531521, %v1659_v42  ;;  %v1836_v38 = vmul.f32 %v1824_v21, %v1584_v12  ;;  %v12584_v8 = vpack.c.bf16 %v12570_v3, %v12575_v26  ;;  %v10065_v12 = vld [vmem:[%s16604_s6 + $0x170] sm:$0xff]  }
 0x3fb   : > { %v1682_v18 = vmul.f32 %v12517_v57, %v1670_v6  ;;  %8990 = vmatpush3.bf16.msra.mxu1 %v10056_v51  ;;  %v16678_v31 = vrot.slane %v12430_v37, 1  ;;  %v2405_v51 = vrot.slane %v12451_v20, 4  ;;  %v16680_v6 = vrot.slane %v12430_v37, 4 }
 0x3fc   : > { %v1729_v62 = vmul.f32 %v12483_v61, %v1717_v59  ;;  %v1683_v45 = vmul.f32 %v12527_v15, %v1671_v33  ;;  %8991 = vmatprep.subr.bf16.mxu1 %v10059_v46  ;;  %17068 = vst [vmem:[#allocation36_spill] sm:$0xff] %v12584_v8  ;;  %v10432_v56 = vpop.eup %10431  ;;  %v12594_v46 = vsel %vm2509_vm12, %v2511_v36, %v2513_v25  ;;  %v16679_v59 = vrot.slane %v12430_v37, 3 }
 0x3fd   : > { %v1694_v19 = vadd.f32 1.4214138, %v1682_v18  ;;  %v2403_v33 = vrot.slane %v12417_v54, 4  ;;  %v1848_v34 = vadd.f32 1.0, %v1836_v38  ;;  %v10066_v18 = vld [vmem:[%s16604_s6 + $0x130] sm:$0xff]   ;;  %v2415_v43 = vrot.slane %v12497_v35, 4 }
 0x3fe   : > { %v1741_v9 = vadd.f32 0.2548296, %v1729_v62  ;;  %v1695_v30 = vadd.f32 1.4214138, %v1683_v45  ;;  %v2515_v62 = vrot.slane %v12442_v58, 1  ;;  %v17081_v8 = vrot.slane %v12430_v37, 4 }
 0x3ff   : > { %v1706_v24 = vmul.f32 %v12517_v57, %v1694_v19  ;;  %8992 = vmatpush3.bf16.msra.mxu1 %v10060_v60  ;;  %v12607_v60 = vsel %vm2509_vm12, %v16678_v31, %v2511_v36  ;;  %v2409_v36 = vrot.slane %v12461_v44, 4 }
 0x400   : > { %v1753_v13 = vmul.f32 %v12483_v61, %v1741_v9  ;;  %v1707_v29 = vmul.f32 %v12527_v15, %v1695_v30  ;;  %8993 = vmatprep.subr.bf16.mxu1 %v10061_v4  ;;  %v16681_v61 = vrot.slane %v12461_v44, 1  ;;  %v12613_v19 = vpack.c.bf16 %v12594_v46, %v12607_v60  ;;  %v10069_v9 = vld [vmem:[%s16604_s6 + $0x178] sm:$0xff]  }
 0x401   : > { %v1718_v42 = vadd.f32 -0.28449672, %v1706_v24  ;;  %v12619_v30 = vsel %vm2396_vm5, %v2403_v33, %v2405_v51 }
 0x402   : > { %v1813_v17 = vmul.f32 %v10432_v56, %v1753_v13  ;;  %v1719_v49 = vadd.f32 -0.28449672, %v1707_v29  ;;  %17069 = vst [vmem:[#allocation37_spill] sm:$0xff] %v12613_v19  ;;  %v12624_v24 = vsel %vm2509_vm12, %v2515_v62, %v16681_v61  ;;  %v2521_v56 = vrot.slane %v12495_v41, 1 }
 0x403   : > { %v1730_v21 = vmul.f32 %v12517_v57, %v1718_v42  ;;  %8994 = vmatpush3.bf16.msra.mxu1 %v10063_v47  ;;  %v2407_v47 = vrot.slane %v12442_v58, 4  ;;  %v10434_v42 = vpop.eup %10433 }
 0x404   : > { %v1825_v45 = vsub.f32 1.0, %v1813_v17  ;;  %v1731_v4 = vmul.f32 %v12527_v15, %v1719_v49  ;;  %8995 = vmatprep.subr.bf16.mxu1 %v10065_v12  ;;  %v12632_v12 = vsel %vm2396_vm5, %v16680_v6, %v2403_v33  ;;  %v12636_v17 = vmul.f32 %v1848_v34, %v12514_v23  ;;  %v12658_v34 = vld [vmem:[%s16604_s6 + $0x200] sm:$0xff]  }
 0x405   : > { %v1742_v38 = vadd.f32 0.2548296, %v1730_v21  ;;  %17070 = vst [vmem:[#allocation38_spill] sm:$0xff] %v12632_v12  ;;  %v12641_v21 = vpack.c.bf16 %v12619_v30, %v12632_v12  ;;  %v12647_v33 = vsel %vm2509_vm12, %v2513_v25, %v2515_v62  ;;  %v12665_v25 = vsel %vm2348_vm0, %v16679_v59, %v2365_v22  ;;  %v10079_v12 = vld [vmem:[%s16604_s6 + $0x208] sm:$0xff]  }
 0x406   : > { %v1837_v13 = vmul.f32 %v1825_v45, %v12524_v28  ;;  %v1743_v29 = vadd.f32 0.2548296, %v1731_v4  ;;  %v10070_v28 = vld [vmem:[%s16604_s6 + $0x138] sm:$0xff]   ;;  %v10436_v45 = vpop.eup %10435  ;;  %v12652_v23 = vpack.c.bf16 %v12624_v24, %v12647_v33  ;;  %17073 = vst [vmem:[#allocation41_spill] sm:$0xff] %v12665_v25  ;;  %v12671_v62 = vsel %vm2396_vm5, %v2407_v47, %v2409_v36 }
 0x407   : > { %v1754_v49 = vmul.f32 %v12517_v57, %v1742_v38  ;;  %8996 = vmatpush3.bf16.msra.mxu1 %v10066_v18  ;;  %17071 = vst [vmem:[#allocation39_spill] sm:$0xff] %v12641_v21  ;;  %v2519_v57 = vrot.slane %v12454_v55, 1  ;;  %v16685_v22 = vrot.slane %v12495_v41, 4  ;;  %v12724_v1 = vpack.c.bf16 %v12575_v26, %v12665_v25 }
 0x408   : > { %v1849_v4 = vadd.f32 1.0, %v1837_v13  ;;  %v1755_v31 = vmul.f32 %v12527_v15, %v1743_v29  ;;  %8997 = vmatprep.subr.bf16.mxu1 %v10069_v9  ;;  %17072 = vst [vmem:[#allocation40_spill] sm:$0xff] %v12652_v23  ;;  %v12668_v15 = vsel %vm2396_vm5, %v2405_v51, %v2407_v47  ;;  %v16682_v29 = vrot.slane %v12461_v44, 3 }
 0x409   : > { %v1814_v18 = vmul.f32 %v10434_v42, %v1754_v49  ;;  %v12677_v13 = vsel %vm2509_vm12, %v2519_v57, %v2521_v56  ;;  %v2525_v49 = vrot.slane %v12636_v17, 1  ;;  %v16684_v51 = vrot.slane %v12636_v17, 4  ;;  %17075 = vst [vmem:[#allocation43_spill] sm:$0xff] %v12724_v1 }
 0x40a   : > { %v12674_v9 = vmul.f32 %v1849_v4, %v12521_v32  ;;  %v1815_v38 = vmul.f32 %v10436_v45, %v1755_v31  ;;  %v16687_v4 = vrot.slane %v12636_v17, 3  ;;  %v12701_v6 = vsel %vm2348_vm0, %v2369_v0, %v16682_v29 }
 0x40b   : > { %v1826_v42 = vsub.f32 1.0, %v1814_v18  ;;  %8998 = vmatpush3.bf16.msra.mxu1 %v10070_v28  ;;  %v2411_v28 = vrot.slane %v12454_v55, 4  ;;  %v12744_v26 = vpack.c.bf16 %v12701_v6, %v12570_v3 }
 0x40c   : > { %v1827_v59 = vsub.f32 1.0, %v1815_v38  ;;  %v12685_v47 = vpack.c.bf16 %v12674_v9, %v12636_v17  ;;  %9767 = vmatprep.subr.bf16.mxu1 %v12658_v34  ;;  %v2527_v32 = vrot.slane %v12674_v9, 1  ;;  %v2419_v31 = vrot.slane %v12674_v9, 4 }
 0x40d   : > { %v1838_v45 = vmul.f32 %v1826_v42, %v12548_v63  ;;  %v2381_v18 = vrot.slane %v12674_v9, 3 }
 0x40e   : > { %17074 = vst [vmem:[#allocation42_spill] sm:$0xff] %v12685_v47  ;;  %v1839_v38 = vmul.f32 %v1827_v59, %v12559_v7  ;;  %9763 = vmatprep.mubr.bf16.mxu1 %v12685_v47  ;;  %v12704_v61 = vsel %vm2509_vm12, %v2525_v49, %v2527_v32  ;;  %v12709_v63 = vsel %vm2396_vm5, %v16684_v51, %v2419_v31  ;;  %v2523_v59 = vrot.slane %v12497_v35, 1 }
 0x40f   : > { %v1850_v42 = vadd.f32 1.0, %v1838_v45  ;;  %v12714_v7 = vsel %vm2396_vm5, %v2411_v28, %v16685_v22  ;;  %v12720_v0 = vsel %vm2348_vm0, %v16687_v4, %v2381_v18  ;;  %v12728_v45 = vpack.c.bf16 %v12671_v62, %v12668_v15 }
 0x410   : > { %v1851_v29 = vadd.f32 1.0, %v1839_v38  ;;  %v17077_v51 = vrot.slane %v12461_v44, 1  ;;  %v12747_v38 = vsel %vm2396_vm5, %v2409_v36, %v2411_v28  ;;  %v12761_v10 = vsel %vm2509_vm12, %v2521_v56, %v2523_v59 }
 0x411   : > { %17076 = vst [vmem:[#allocation44_spill] sm:$0xff] %v12728_v45  ;;  %v12736_v16 = vmul.f32 %v1850_v42, %v12530_v39  ;;  %v2373_v39 = vrot.slane %v12454_v55, 3 }
 0x412   : > { %v12733_v22 = vsel %vm2509_vm12, %v17077_v51, %v2519_v57  ;;  %v12750_v53 = vmul.f32 %v1851_v29, %v12544_v50  ;;  %v12754_v57 = vpack.c.bf16 %v12714_v7, %v12747_v38  ;;  %v2375_v51 = vrot.slane %v12495_v41, 3 }
 0x413   : > { %v12740_v4 = vpack.c.bf16 %v12677_v13, %v12733_v22  ;;  %v2397_v42 = vrot.slane %v12736_v16, 4  ;;  %v2349_v3 = vrot.slane %v12736_v16, 3  ;;  %v2529_v36 = vrot.slane %v12736_v16, 1 }
 0x414   : > { %17079 = vst [vmem:[#allocation46_spill] sm:$0xff] %v12754_v57  ;;  %v12766_v50 = vpack.c.bf16 %v12750_v53, %v12736_v16  ;;  %v2398_v29 = vrot.slane %v12750_v53, 4  ;;  %v2350_v28 = vrot.slane %v12750_v53, 3  ;;  %v2531_v52 = vrot.slane %v12750_v53, 1 }
 0x415   : > { %17078 = vst [vmem:[#allocation45_spill] sm:$0xff] %v12740_v4  ;;  %v12773_v27 = vsel %vm2509_vm12, %v2527_v32, %v2529_v36  ;;  %v12776_v56 = vsel %vm2396_vm5, %v2419_v31, %v2397_v42  ;;  %v12779_v11 = vsel %vm2348_vm0, %v2381_v18, %v2349_v3  ;;  %v17084_v32 = vrot.slane %v12430_v37, 3 }
 0x416   : > { %17080 = vst [vmem:[#allocation47_spill] sm:$0xff] %v12766_v50  ;;  %9764 = vmatmul.mubr.bf16.gmra.mrb[12].mxu1 %v12766_v50  ;;  %v12783_v5 = vsel %vm2396_vm5, %v2397_v42, %v2398_v29  ;;  %v12788_v47 = vsel %vm2396_vm5, %v2398_v29, %v17081_v8  ;;  %v12791_v40 = vsel %vm2348_vm0, %v2349_v3, %v2350_v28  ;;  %v10068_v8 = vld [vmem:[%s16604_s6 + $0x80] sm:$0xff]   ;;  %v17090_v50 = vrot.slane %v12430_v37, 1 }
 0x417   : > { %17082 = vst [vmem:[#allocation48_spill] sm:$0xff] %v12788_v47  ;;  %17083 = vst [vmem:[#allocation49_spill] sm:$0xff] %v12791_v40  ;;  %v12796_v31 = vsel %vm2348_vm0, %v2350_v28, %v17084_v32  ;;  %3372 = vmatprep.mubr.bf16.mxu1 %v12613_v19  ;;  %v12801_v18 = vpack.c.bf16 %v12788_v47, %v12783_v5  ;;  %v12812_v3 = vpack.c.bf16 %v12773_v27, %v12704_v61  ;;  %v10071_v28 = vld [vmem:[%s16604_s6 + $0xc8] sm:$0xff]  }
 0x418   : > { %17085 = vst [vmem:[#allocation50_spill] sm:$0xff] %v12796_v31  ;;  %v12805_v42 = vpack.c.bf16 %v12796_v31, %v12791_v40  ;;  %v12816_v29 = vpack.c.bf16 %v12776_v56, %v12709_v63  ;;  %v12822_v32 = vsel %vm2509_vm12, %v2523_v59, %v2525_v49  ;;  %v2532_v19 = vsel %vm2509_vm12, %v2529_v36, %v2531_v52  ;;  %v10072_v59 = vld [vmem:[%s16604_s6 + $0x88] sm:$0xff]  }
 0x419   : > { %17086 = vst [vmem:[#allocation51_spill] sm:$0xff] %v12801_v18  ;;  %17088 = vst [vmem:[#allocation53_spill] sm:$0xff] %v12812_v3  ;;  %v12828_v48 = vsel %vm2509_vm12, %v2531_v52, %v17090_v50  ;;  %v12832_v3 = vpack.c.bf16 %v12779_v11, %v12720_v0  ;;  %3210 = vmatprep.mubr.bf16.mxu0 %v12801_v18  ;;  %v2435_v57 = vrot.slane %v12736_v16, 5  ;;  %v2436_v49 = vrot.slane %v12750_v53, 5 }
 0x41a   : > { %17087 = vst [vmem:[#allocation52_spill] sm:$0xff] %v12805_v42  ;;  %17089 = vst [vmem:[#allocation54_spill] sm:$0xff] %v12816_v29  ;;  %v12836_v29 = vpack.c.bf16 %v12828_v48, %v2532_v19  ;;  %3211 = vmatmul.mubr.bf16.vlgmr.msra.gmra.mrb[28].mxu0 %v12805_v42  ;;  %v17093_v52 = vrot.slane %v12461_v44, 3  ;;  %v12848_v50 = vsel %vm2348_vm0, %v2373_v39, %v2375_v51  ;;  %v2377_v18 = vrot.slane %v12497_v35, 3 }
 0x41b   : > { %17091 = vst [vmem:[#allocation55_spill] sm:$0xff] %v12832_v3  ;;  %v2475_v3 = vrot.slane %v12417_v54, 7  ;;  %8932 = vmatpush3.bf16.msra.mxu0 %v10068_v8  ;;  %3218 = vmatprep.mubr.bf16.mxu0 %v12641_v21  ;;  %v17094_v42 = vrot.slane %v12495_v41, 4  ;;  %v10073_v8 = vld [vmem:[%s16604_s6 + $0xd0] sm:$0xff]   ;;  %v2474_v21 = vrot.slane %v12430_v37, 7  ;;  %v2455_v31 = vrot.slane %v12636_v17, 5 }
 0x41c   : > { %17092 = vst [vmem:[#allocation56_spill] sm:$0xff] %v12836_v29  ;;  %v12845_v36 = vsel %vm2348_vm0, %v17093_v52, %v2373_v39  ;;  %v2437_v52 = vsel %vm2434_vm4, %v2435_v57, %v2436_v49  ;;  %v17095_v39 = vrot.slane %v12430_v37, 5  ;;  %8933 = vmatprep.subr.bf16.mxu0 %v10071_v28  ;;  %v2479_v28 = vrot.slane %v12442_v58, 7 }
 0x41d   : > { %v12859_v29 = vsel %vm2396_vm5, %v17094_v42, %v2415_v43  ;;  %v2477_v42 = vrot.slane %v12451_v20, 7  ;;  %v2457_v47 = vrot.slane %v12674_v9, 5  ;;  %v12890_v20 = vsel %vm2348_vm0, %v2375_v51, %v2377_v18 }
 0x41e   : > { %v12865_v25 = vsel %vm2434_vm4, %v2436_v49, %v17095_v39  ;;  %v2472_v49 = vrot.slane %v12750_v53, 7  ;;  %3373 = vmatmul.mubr.bf16.vlgmr.msra.gmra.mrb[16].mxu1 %v12439_v2  ;;  %v17099_v37 = vrot.slane %v12636_v17, 3  ;;  %v12898_v58 = vsel %vm889_vm8, %v2474_v21, %v2475_v3  ;;  %v10074_v39 = vld [vmem:[%s16604_s6 + $0x90] sm:$0xff]  }
 0x41f   : > { %17096 = vst [vmem:[#allocation57_spill] sm:$0xff] %v12865_v25  ;;  %v12872_v54 = vpack.c.bf16 %v12865_v25, %v2437_v52  ;;  %v17098_v25 = vrot.slane %v12636_v17, 4  ;;  %3380 = vmatprep.mubr.bf16.mxu1 %v12652_v23  ;;  %8934 = vmatpush3.bf16.msra.mxu0 %v10072_v59  ;;  %v2458_v51 = vsel %vm2434_vm4, %v2455_v31, %v2457_v47  ;;  %v10075_v59 = vld [vmem:[%s16604_s6 + $0xd8] sm:$0xff]  }
 0x420   : > { %v12895_v40 = vsel %vm2348_vm0, %v2377_v18, %v17099_v37  ;;  %v2459_v37 = vsel %vm2434_vm4, %v2457_v47, %v2435_v57  ;;  %v2489_v18 = vrot.slane %v12636_v17, 7  ;;  %8935 = vmatprep.subr.bf16.mxu0 %v10073_v8  ;;  %9768 = vmatpush3.bf16.msra.mxu1 %v12658_v34  ;;  %v10081_v47 = vld [vmem:[%s16604_s6 + $0x210] sm:$0xff]   ;;  %v12927_v57 = vsel %vm889_vm8, %v2472_v49, %v2474_v21 }
 0x421   : > { %17097 = vst [vmem:[#allocation58_spill] sm:$0xff] %v12872_v54  ;;  %v12887_v54 = vsel %vm2396_vm5, %v2415_v43, %v17098_v25  ;;  %v17100_v43 = vrot.slane %v12497_v35, 5  ;;  %v12919_v2 = vpack.c.bf16 %v2437_v52, %v2459_v37  ;;  %9769 = vmatprep.subr.bf16.mxu1 %v10079_v12  ;;  %v12930_v8 = vsel %vm889_vm8, %v2475_v3, %v2477_v42 }
 0x422   : > { %v12933_v34 = vsel %vm889_vm8, %v2477_v42, %v2479_v28  ;;  %v12936_v52 = vpack.c.bf16 %v2532_v19, %v12773_v27  ;;  %3219 = vmatmul.mubr.bf16.gmra.mrb[32].mxu0 %v12724_v1  ;;  %v2493_v3 = vrot.slane %v12736_v16, 7  ;;  %v10076_v27 = vld [vmem:[%s16604_s6 + $0x98] sm:$0xff]   ;;  %v12956_v42 = vpack.c.bf16 %v12736_v16, %v12674_v9 }
 0x423   : > { %v12907_v25 = vsel %vm2434_vm4, %v17100_v43, %v2455_v31  ;;  %17103 = vst [vmem:[#allocation61_spill] sm:$0xff] %v12919_v2  ;;  %v2491_v31 = vrot.slane %v12674_v9, 7  ;;  %3226 = vmatprep.mubr.bf16.mxu0 %v12728_v45  ;;  %8936 = vmatpush3.bf16.msra.mxu0 %v10074_v39  ;;  %v10078_v39 = vld [vmem:[%s16604_s6 + $0xe0] sm:$0xff]   ;;  %v12968_v1 = vpack.c.bf16 %v2459_v37, %v2458_v51 }
 0x424   : > { %17101 = vst [vmem:[#allocation59_spill] sm:$0xff] %v12907_v25  ;;  %v12917_v23 = vpack.c.bf16 %v2458_v51, %v12907_v25  ;;  %17104 = vst [vmem:[#allocation62_spill] sm:$0xff] %v12936_v52  ;;  %v17105_v25 = vrot.slane %v12497_v35, 7  ;;  %8937 = vmatprep.subr.bf16.mxu0 %v10075_v59  ;;  %9770 = vmatpush3.bf16.msra.mxu1 %v10079_v12  ;;  %v2495_v45 = vsel %vm889_vm8, %v2493_v3, %v2472_v49 }
 0x425   : > { %v2492_v21 = vsel %vm889_vm8, %v2489_v18, %v2491_v31  ;;  %17106 = vst [vmem:[#allocation63_spill] sm:$0xff] %v12956_v42  ;;  %v2494_v43 = vsel %vm889_vm8, %v2491_v31, %v2493_v3  ;;  %17108 = vst [vmem:[#allocation65_spill] sm:$0xff] %v12968_v1  ;;  %9771 = vmatprep.subr.bf16.mxu1 %v10081_v47  ;;  %v12978_v12 = vpack.c.bf16 %v12668_v15, %v12619_v30 }
 0x426   : > { %17102 = vst [vmem:[#allocation60_spill] sm:$0xff] %v12917_v23  ;;  %v12943_v2 = vsel %vm889_vm8, %v17105_v25, %v2489_v18  ;;  %v12960_v25 = vpack.c.bf16 %v12607_v60, %v12828_v48  ;;  %v16734_v18 = vrot.slane %v12495_v41, 7  ;;  %v10084_v48 = vld [vmem:[%s16604_s6 + $0x218] sm:$0xff]   ;;  %v2483_v60 = vrot.slane %v12454_v55, 7  ;;  %3381 = vmatmul.mubr.bf16.gmra.mrb[20].mxu1 %v12466_v14  ;;  %v17125_v14 = vld [vmem:[#allocation38_spill] sm:$0xff] }
 0x427   : > { %v12952_v19 = vpack.c.bf16 %v2492_v21, %v12943_v2  ;;  %v12974_v59 = vpack.c.bf16 %v2495_v45, %v2494_v43  ;;  %17109 = vst [vmem:[#allocation66_spill] sm:$0xff] %v12978_v12  ;;  %v12982_v31 = vpack.c.bf16 %v12647_v33, %v12594_v46  ;;  %v17111_v49 = vrot.slane %v12461_v44, 7  ;;  %3388 = vmatprep.mubr.bf16.mxu1 %v12740_v4  ;;  %v10080_v46 = vld [vmem:[%s16604_s6 + $0xa0] sm:$0xff]   ;;  %v17124_v4 = vld [vmem:[#allocation48_spill] sm:$0xff] }
 0x428   : > { %17107 = vst [vmem:[#allocation64_spill] sm:$0xff] %v12960_v25  ;;  %v12992_v37 = vpack.c.bf16 %v12747_v38, %v12671_v62  ;;  %v12996_v3 = vpack.c.bf16 %v12733_v22, %v12624_v24  ;;  %v13000_v30 = vpack.c.bf16 %v12845_v36, %v12701_v6  ;;  %8938 = vmatpush3.bf16.msra.mxu0 %v10076_v27  ;;  %v3909_v24 = vrot.slane %v12674_v9, 6  ;;  %v10082_v62 = vld [vmem:[%s16604_s6 + $0xe8] sm:$0xff]  }
 0x429   : > { %17110 = vst [vmem:[#allocation67_spill] sm:$0xff] %v12982_v31  ;;  %v12988_v51 = vsel %vm889_vm8, %v2479_v28, %v17111_v49  ;;  %v13008_v33 = vpack.c.bf16 %v12859_v29, %v12714_v7  ;;  %v13012_v15 = vpack.c.bf16 %v12761_v10, %v12677_v13  ;;  %v3911_v6 = vrot.slane %v12736_v16, 6  ;;  %8939 = vmatprep.subr.bf16.mxu0 %v10078_v39  ;;  %v10086_v28 = vld [vmem:[%s16604_s6 + $0x220] sm:$0xff]   ;;  %v17122_v49 = vld [vmem:[#allocation49_spill] sm:$0xff] }
 0x42a   : > { %17112 = vst [vmem:[#allocation68_spill] sm:$0xff] %v12992_v37  ;;  %17113 = vst [vmem:[#allocation69_spill] sm:$0xff] %v12996_v3  ;;  %9772 = vmatpush3.bf16.msra.mxu1 %v10081_v47  ;;  %v13022_v22 = vsel %vm889_vm8, %v2483_v60, %v16734_v18  ;;  %v13026_v7 = vpack.c.bf16 %v12890_v20, %v12848_v50  ;;  %v13030_v13 = vpack.c.bf16 %v12709_v63, %v12887_v54 }
 0x42b   : > { %17114 = vst [vmem:[#allocation70_spill] sm:$0xff] %v13000_v30  ;;  %17115 = vst [vmem:[#allocation71_spill] sm:$0xff] %v13008_v33  ;;  %v3913_v38 = vrot.slane %v12750_v53, 6  ;;  %9773 = vmatprep.subr.bf16.mxu1 %v10084_v48  ;;  %v13038_v47 = vpack.c.bf16 %v12704_v61, %v12822_v32  ;;  %v13042_v27 = vpack.c.bf16 %v12720_v0, %v12895_v40  ;;  %v16740_v63 = vrot.slane %v12636_v17, 6 }
 0x42c   : > { %17116 = vst [vmem:[#allocation72_spill] sm:$0xff] %v13012_v15  ;;  %17117 = vst [vmem:[#allocation73_spill] sm:$0xff] %v13026_v7  ;;  %v13046_v39 = vpack.c.bf16 %v12783_v5, %v12776_v56  ;;  %3227 = vmatmul.mubr.bf16.gmra.mrb[36].mxu0 %v12744_v26  ;;  %v13052_v18 = vpack.c.bf16 %v17122_v49, %v12779_v11  ;;  %v13056_v61 = vpack.c.bf16 %v17125_v14, %v17124_v4  ;;  %v17131_v5 = vld [vmem:[#allocation46_spill] sm:$0xff]  ;;  %v10083_v56 = vld [vmem:[%s16604_s6 + $0xa8] sm:$0xff]  }
 0x42d   : > { %17118 = vst [vmem:[#allocation74_spill] sm:$0xff] %v13030_v13  ;;  %17119 = vst [vmem:[#allocation75_spill] sm:$0xff] %v13038_v47  ;;  %v17127_v47 = vld [vmem:[#allocation50_spill] sm:$0xff]  ;;  %v17128_v13 = vld [vmem:[#allocation41_spill] sm:$0xff]  ;;  %3234 = vmatprep.mubr.bf16.mxu0 %v17131_v5  ;;  %8940 = vmatpush3.bf16.msra.mxu0 %v10080_v46  ;;  %v3910_v11 = vsel %vm3907_vm6, %v16740_v63, %v3909_v24  ;;  %v3912_v14 = vsel %vm3907_vm6, %v3909_v24, %v3911_v6  ;;  %v17137_v24 = vrot.slane %v12461_v44, 7 }
 0x42e   : > { %17120 = vst [vmem:[#allocation76_spill] sm:$0xff] %v13042_v27  ;;  %17121 = vst [vmem:[#allocation77_spill] sm:$0xff] %v13046_v39  ;;  %v13060_v0 = vpack.c.bf16 %v17128_v13, %v17127_v47  ;;  %v13062_v27 = vpack.c.bf16 %v2494_v43, %v2492_v21  ;;  %v13073_v4 = vpack.c.bf16 %v12927_v57, %v2495_v45  ;;  %v17133_v13 = vld [vmem:[#allocation29_spill] sm:$0xff]  ;;  %8941 = vmatprep.subr.bf16.mxu0 %v10082_v62  ;;  %v10085_v43 = vld [vmem:[%s16604_s6 + $0xf0] sm:$0xff]  }
 0x42f   : > { %17123 = vst [vmem:[#allocation49_spill] sm:$0xff] %v13052_v18  ;;  %17126 = vst [vmem:[#allocation48_spill] sm:$0xff] %v13056_v61  ;;  %v16742_v47 = vrot.slane %v17133_v13, 6  ;;  %9774 = vmatpush3.bf16.msra.mxu1 %v10084_v48  ;;  %v13079_v21 = vpack.c.bf16 %v3912_v14, %v3910_v11  ;;  %v3914_v46 = vsel %vm3907_vm6, %v3911_v6, %v3913_v38  ;;  %v10088_v48 = vld [vmem:[%s16604_s6 + $0x228] sm:$0xff]  }
 0x430   : > { %17129 = vst [vmem:[#allocation38_spill] sm:$0xff] %v13060_v0  ;;  %17130 = vst [vmem:[#allocation50_spill] sm:$0xff] %v13062_v27  ;;  %v13084_v49 = vpack.c.bf16 %v12930_v8, %v12898_v58  ;;  %v13088_v45 = vpack.c.bf16 %v12822_v32, %v12761_v10  ;;  %9775 = vmatprep.subr.bf16.mxu1 %v10086_v28  ;;  %v13096_v62 = vsel %vm889_vm8, %v17137_v24, %v2483_v60  ;;  %v17140_v10 = vld [vmem:[#allocation34_spill] sm:$0xff]  ;;  %v10087_v60 = vld [vmem:[%s16604_s6 + $0xb0] sm:$0xff]  }
 0x431   : > { %17132 = vst [vmem:[#allocation41_spill] sm:$0xff] %v13073_v4  ;;  %17134 = vst [vmem:[#allocation46_spill] sm:$0xff] %v13079_v21  ;;  %v13101_v6 = vsel %vm3907_vm6, %v3913_v38, %v16742_v47  ;;  %v13105_v63 = vpack.c.bf16 %v12988_v51, %v12933_v34  ;;  %3389 = vmatmul.mubr.bf16.gmra.mrb[24].mxu1 %v17140_v10  ;;  %8942 = vmatpush3.bf16.msra.mxu0 %v10083_v56  ;;  %v17143_v38 = vrot.slane %v12497_v35, 7  ;;  %v10089_v56 = vld [vmem:[%s16604_s6 + $0xf8] sm:$0xff]  }
 0x432   : > { %17135 = vst [vmem:[#allocation29_spill] sm:$0xff] %v13084_v49  ;;  %17136 = vst [vmem:[#allocation78_spill] sm:$0xff] %v13088_v45  ;;  %v13109_v32 = vpack.c.bf16 %v13101_v6, %v3914_v46  ;;  %v13113_v49 = vpack.c.bf16 %v13022_v22, %v13096_v62  ;;  %3396 = vmatprep.mubr.bf16.mxu1 %v13088_v45  ;;  %v17144_v24 = vrot.slane %v12495_v41, 7  ;;  %8943 = vmatprep.subr.bf16.mxu0 %v10085_v43 }
 0x433   : > { %17138 = vst [vmem:[#allocation79_spill] sm:$0xff] %v13101_v6  ;;  %17139 = vst [vmem:[#allocation80_spill] sm:$0xff] %v13105_v63  ;;  %v13128_v10 = vpack.c.bf16 %v12848_v50, %v12845_v36  ;;  %9776 = vmatpush3.bf16.msra.mxu1 %v10086_v28  ;;  %v13139_v6 = vpack.c.bf16 %v12887_v54, %v12859_v29  ;;  %v10091_v36 = vld [vmem:[%s16604_s6 + $0x230] sm:$0xff]   ;;  %v3946_v50 = vrot.slane %v12674_v9, 2  ;;  %v3947_v28 = vrot.slane %v12736_v16, 2  ;;  %v10090_v54 = vld [vmem:[%s16604_s6 + $0xb8] sm:$0xff]  }
 0x434   : > { %17141 = vst [vmem:[#allocation81_spill] sm:$0xff] %v13109_v32  ;;  %17142 = vst [vmem:[#allocation82_spill] sm:$0xff] %v13113_v49  ;;  %v13124_v47 = vsel %vm889_vm8, %v17144_v24, %v17143_v38  ;;  %9777 = vmatprep.subr.bf16.mxu1 %v10088_v48  ;;  %v3949_v43 = vrot.slane %v12750_v53, 2  ;;  %vm3945_vm8 = vcmask 1045504   ;;  %v10092_v9 = vld [vmem:[%s16604_s6 + $0x1c0] sm:$0xff]   ;;  %v16749_v38 = vrot.slane %v12497_v35, 6 }
 0x435   : > { %v13135_v45 = vpack.c.bf16 %v12943_v2, %v13124_v47  ;;  %3235 = vmatmul.mubr.bf16.gmra.mrb[40].mxu0 %v13128_v10  ;;  %v16748_v2 = vrot.slane %v17133_v13, 2  ;;  %v3948_v16 = vsel %vm3945_vm8, %v3946_v50, %v3947_v28  ;;  %v17151_v49 = vrot.slane %v12636_v17, 6 }
 0x436   : > { %3242 = vmatprep.mubr.bf16.mxu0 %v13139_v6  ;;  %8944 = vmatpush3.bf16.msra.mxu0 %v10087_v60  ;;  %v3950_v29 = vsel %vm3945_vm8, %v3947_v28, %v3949_v43  ;;  %v10093_v60 = vld [vmem:[%s16604_s6 + $0x238] sm:$0xff]  }
 0x437   : > { %17145 = vst [vmem:[#allocation83_spill] sm:$0xff] %v13135_v45  ;;  %9778 = vmatpush3.bf16.msra.mxu1 %v10088_v48  ;;  %8945 = vmatprep.subr.bf16.mxu0 %v10089_v56  ;;  %v13165_v48 = vsel %vm3945_vm8, %v3949_v43, %v16748_v2  ;;  %v13167_v24 = vpack.c.bf16 %v3950_v29, %v3948_v16  ;;  %v17148_v56 = vld [vmem:[#allocation35_spill] sm:$0xff]  ;;  %v17150_v28 = vld [vmem:[#allocation53_spill] sm:$0xff] }
 0x438   : > { %9779 = vmatprep.subr.bf16.mxu1 %v10091_v36  ;;  %17146 = vst [vmem:[#allocation84_spill] sm:$0xff] %v13165_v48  ;;  %v13171_v45 = vpack.c.bf16 %v13165_v48, %v3950_v29  ;;  %v13179_v63 = vsel %vm3907_vm6, %v16749_v38, %v17151_v49  ;;  %v13183_v43 = vpack.c.bf16 %v12895_v40, %v12890_v20  ;;  %v3969_v29 = vrot.slane %v12636_v17, 2  ;;  %v17154_v20 = vld [vmem:[#allocation54_spill] sm:$0xff]  ;;  %v10102_v48 = vld [vmem:[%s16606_s8 + $0xd0] sm:$0xff]  }
 0x439   : > { %17147 = vst [vmem:[#allocation85_spill] sm:$0xff] %v13167_v24  ;;  %3397 = vmatmul.mubr.bf16.gmra.mrb[28].mxu1 %v17148_v56  ;;  %v13186_v2 = vpack.c.bf16 %v3910_v11, %v13179_v63  ;;  %v16751_v49 = vrot.slane %v12497_v35, 2  ;;  %v17160_v56 = vld [vmem:[#allocation56_spill] sm:$0xff]  ;;  %v17168_v24 = vrot.slane %v12497_v35, 5 }
 0x43a   : > { %17149 = vst [vmem:[#allocation86_spill] sm:$0xff] %v13171_v45  ;;  %3404 = vmatprep.mubr.bf16.mxu1 %v17150_v28  ;;  %8946 = vmatpush3.bf16.msra.mxu0 %v10090_v54  ;;  %v10095_v54 = vld [vmem:[%s16606_s8 + $0xc0] sm:$0xff]   ;;  %v13192_v28 = vpack.c.bf16 %v3914_v46, %v3912_v14  ;;  %v3971_v11 = vsel %vm3945_vm8, %v3969_v29, %v3946_v50  ;;  %v17163_v50 = vld [vmem:[#allocation28_spill] sm:$0xff] }
 0x43b   : > { %9780 = vmatpush3.bf16.msra.mxu1 %v10091_v36  ;;  %9035 = vmatprep.subr.bf16.mxu0 %v10092_v9  ;;  %17152 = vst [vmem:[#allocation87_spill] sm:$0xff] %v13186_v2  ;;  %v13200_v40 = vsel %vm3945_vm8, %v16751_v49, %v3969_v29  ;;  %v13203_v36 = vpack.c.bf16 %v3948_v16, %v3971_v11  ;;  %v17158_v46 = vld [vmem:[#allocation42_spill] sm:$0xff]  ;;  %v17159_v9 = vld [vmem:[#allocation31_spill] sm:$0xff]  ;;  %v2441_v16 = vrot.slane %v17163_v50, 5 }
 0x43c   : > { %9781 = vmatprep.subr.bf16.mxu1 %v10093_v60  ;;  %17153 = vst [vmem:[#allocation88_spill] sm:$0xff] %v13192_v28  ;;  %17155 = vst [vmem:[#allocation54_spill] sm:$0xff] %v13200_v40  ;;  %v13206_v14 = vpack.c.bf16 %v3971_v11, %v13200_v40  ;;  %v2445_v38 = vrot.slane %v17159_v9, 5  ;;  %v13214_v49 = vpack.c.bf16 %v12898_v58, %v12927_v57  ;;  %v17162_v2 = vld [vmem:[#allocation55_spill] sm:$0xff]  ;;  %v10094_v58 = vld [vmem:[%s16604_s6 + $0x180] sm:$0xff]   ;;  %v2447_v57 = vrot.slane %v12461_v44, 5 }
 0x43d   : > { %3243 = vmatmul.mubr.bf16.gmra.mrb[44].mxu0 %v13183_v43  ;;  %17156 = vst [vmem:[#allocation89_spill] sm:$0xff] %v13203_v36  ;;  %v13236_v36 = vpack.c.bf16 %v12933_v34, %v12930_v8  ;;  %v10096_v8 = vld [vmem:[%s16606_s8 + $0x80] sm:$0xff]  }
 0x43e   : > { %3250 = vmatprep.mubr.bf16.mxu0 %v17154_v20  ;;  %17157 = vst [vmem:[#allocation90_spill] sm:$0xff] %v13206_v14  ;;  %v10097_v14 = vld [vmem:[%s16604_s6 + $0x1c8] sm:$0xff]   ;;  %v2448_v45 = vsel %vm2434_vm4, %v2445_v38, %v2447_v57 }
 0x43f   : > { %9782 = vmatpush3.bf16.msra.mxu1 %v10093_v60  ;;  %v17161_v60 = vld [vmem:[#allocation32_spill] sm:$0xff] }
 0x440   : > { %9153 = vmatprep.subr.bf16.mxu1 %v10095_v54  ;;  %v2443_v28 = vrot.slane %v17161_v60, 5  ;;  %17166 = vst [vmem:[#allocation32_spill] sm:$0xff] %v13236_v36 }
 0x441   : > { %3405 = vmatmul.mubr.bf16.gmra.mrb[32].mxu1 %v17158_v46  ;;  %v17165_v46 = vld [vmem:[#allocation47_spill] sm:$0xff] }
 0x442   : > { %3412 = vmatprep.mubr.bf16.mxu1 %v17160_v56  ;;  %v2446_v54 = vsel %vm2434_vm4, %v2443_v28, %v2445_v38  ;;  %v2444_v29 = vsel %vm2434_vm4, %v2441_v16, %v2443_v28  ;;  %v2449_v56 = vrot.slane %v12454_v55, 5  ;;  %v2451_v28 = vrot.slane %v12495_v41, 5 }
 0x443   : > { %v13221_v11 = vpack.c.bf16 %v2446_v54, %v2444_v29 }
 0x444   : > { %v13245_v40 = vsel %vm2434_vm4, %v2451_v28, %v17168_v24  ;;  %v10098_v24 = vld [vmem:[%s16604_s6 + $0x188] sm:$0xff]  }
 0x445   : > { %3251 = vmatmul.mubr.bf16.gmra.mrb[48].mxu0 %v17162_v2  ;;  %17164 = vst [vmem:[#allocation31_spill] sm:$0xff] %v13221_v11 }
 0x446   : > { %3291 = vmatprep.mubr.bf16.mxu0 %v13214_v49 }
 0x449   : > { %3413 = vmatmul.mubr.bf16.gmra.mrb[36].mxu1 %v17165_v46  ;;  %v13239_v46 = vsel %vm2434_vm4, %v2447_v57, %v2449_v56  ;;  %v10101_v57 = vld [vmem:[%s16604_s6 + $0x1d0] sm:$0xff]  }
 0x44a   : > { %9783 = vmatprep.mubr.bf16.mxu1 %v13221_v11  ;;  %v17167_v11 = vld [vmem:[#allocation58_spill] sm:$0xff]  ;;  %v13253_v34 = vpack.c.bf16 %v13239_v46, %v2448_v45 }
 0x44c   : > { %17169 = vst [vmem:[#allocation55_spill] sm:$0xff] %v13253_v34 }
 0x44d   : > { %3292 = vmatmul.mubr.bf16.vlgmr.msra.gmra.mrb[52].mxu0 %v17167_v11  ;;  %v2452_v11 = vsel %vm2434_vm4, %v2449_v56, %v2451_v28  ;;  %v17171_v56 = vrot.slane %v17133_v13, 5  ;;  %v10100_v28 = vld [vmem:[%s16606_s8 + $0x88] sm:$0xff]  }
 0x44e   : > { %9036 = vmatpush3.bf16.msra.mxu0 %v10094_v58  ;;  %3299 = vmatprep.mubr.bf16.mxu0 %v13236_v36  ;;  %v10099_v58 = vld [vmem:[%s16606_s8 + $0xc8] sm:$0xff]   ;;  %v13263_v38 = vpack.c.bf16 %v13245_v40, %v2452_v11 }
 0x44f   : > { %9037 = vmatprep.subr.bf16.mxu0 %v10097_v14  ;;  %v2442_v14 = vsel %vm2434_vm4, %v17171_v56, %v2441_v16  ;;  %v10107_v16 = vld [vmem:[%s16604_s6 + $0x1d8] sm:$0xff]   ;;  %v10109_v56 = vld [vmem:[%s16606_s8 + $0xe0] sm:$0xff]  }
 0x450   : > { %17170 = vst [vmem:[#allocation28_spill] sm:$0xff] %v13263_v38  ;;  %v13276_v36 = vpack.c.bf16 %v2444_v29, %v2442_v14  ;;  %v10104_v29 = vld [vmem:[%s16606_s8 + $0x90] sm:$0xff]  }
 0x451   : > { %9784 = vmatmul.mubr.bf16.vlgmr.msra.gmra.mrb[40].mxu1 %v13253_v34 }
 0x452   : > { %9154 = vmatpush3.bf16.msra.mxu1 %v10096_v8  ;;  %9787 = vmatprep.mubr.bf16.mxu1 %v13263_v38  ;;  %17172 = vst [vmem:[#allocation91_spill] sm:$0xff] %v13276_v36  ;;  %v10103_v8 = vld [vmem:[%s16604_s6 + $0x190] sm:$0xff]   ;;  %v13286_v38 = vpack.c.bf16 %v13096_v62, %v12988_v51  ;;  %v10105_v51 = vld [vmem:[%s16606_s8 + $0xd8] sm:$0xff]  }
 0x453   : > { %9038 = vmatpush3.bf16.msra.mxu0 %v10098_v24  ;;  %9155 = vmatprep.subr.bf16.mxu1 %v10099_v58  ;;  %v10108_v62 = vld [vmem:[%s16604_s6 + $0x198] sm:$0xff]   ;;  %v10111_v24 = vld [vmem:[%s16604_s6 + $0x1e0] sm:$0xff]  }
 0x454   : > { %9039 = vmatprep.subr.bf16.mxu0 %v10101_v57  ;;  %v17173_v58 = vld [vmem:[#allocation61_spill] sm:$0xff]  ;;  %v13310_v57 = vpack.c.bf16 %v2448_v45, %v2446_v54  ;;  %v10110_v45 = vld [vmem:[%s16606_s8 + $0xa0] sm:$0xff]  }
 0x455   : > { %3300 = vmatmul.mubr.bf16.gmra.mrb[56].mxu0 %v13276_v36  ;;  %v17175_v54 = vld [vmem:[#allocation57_spill] sm:$0xff] }
 0x456   : > { %9156 = vmatpush3.bf16.msra.mxu1 %v10100_v28  ;;  %3307 = vmatprep.mubr.bf16.mxu0 %v13286_v38  ;;  %17174 = vst [vmem:[#allocation92_spill] sm:$0xff] %v13310_v57  ;;  %v10113_v28 = vld [vmem:[%s16604_s6 + $0x1a0] sm:$0xff]  }
 0x457   : > { %9157 = vmatprep.subr.bf16.mxu1 %v10102_v48  ;;  %9040 = vmatpush3.bf16.msra.mxu0 %v10103_v8  ;;  %v10106_v48 = vld [vmem:[%s16606_s8 + $0x98] sm:$0xff]   ;;  %v13320_v8 = vpack.c.bf16 %v13124_v47, %v13022_v22  ;;  %v10112_v22 = vld [vmem:[%s16606_s8 + $0xe8] sm:$0xff]  }
 0x458   : > { %9041 = vmatprep.subr.bf16.mxu0 %v10107_v16  ;;  %v10117_v16 = vld [vmem:[%s16604_s6 + $0x1e8] sm:$0xff]  }
 0x459   : > { %9788 = vmatmul.mubr.bf16.gmra.mrb[44].mxu1 %v12917_v23  ;;  %v10118_v47 = vld [vmem:[%s16604_s6 + $0x1a8] sm:$0xff]  }
 0x45a   : > { %9158 = vmatpush3.bf16.msra.mxu1 %v10104_v29  ;;  %9791 = vmatprep.mubr.bf16.mxu1 %v17173_v58  ;;  %v13331_v29 = vpack.c.bf16 %v2442_v14, %v17175_v54  ;;  %v10114_v14 = vld [vmem:[%s16606_s8 + $0xa8] sm:$0xff]  }
 0x45b   : > { %9159 = vmatprep.subr.bf16.mxu1 %v10105_v51  ;;  %9042 = vmatpush3.bf16.msra.mxu0 %v10108_v62  ;;  %v10121_v51 = vld [vmem:[%s16604_s6 + $0x1f0] sm:$0xff]   ;;  %v13348_v62 = vpack.c.bf16 %v2452_v11, %v13239_v46  ;;  %v10119_v11 = vld [vmem:[%s16606_s8 + $0xf8] sm:$0xff]   ;;  %v17178_v54 = vld [vmem:[#allocation59_spill] sm:$0xff] }
 0x45c   : > { %9043 = vmatprep.subr.bf16.mxu0 %v10111_v24  ;;  %17176 = vst [vmem:[#allocation57_spill] sm:$0xff] %v13331_v29  ;;  %v10115_v24 = vld [vmem:[%s16606_s8 + $0xf0] sm:$0xff]  }
 0x45d   : > { %3308 = vmatmul.mubr.bf16.gmra.mrb[60].mxu0 %v13310_v57  ;;  %17177 = vst [vmem:[#allocation93_spill] sm:$0xff] %v13348_v62  ;;  %v10116_v46 = vld [vmem:[%s16606_s8 + $0xb0] sm:$0xff]  }
 0x45e   : > { %9160 = vmatpush3.bf16.msra.mxu1 %v10106_v48  ;;  %3315 = vmatprep.mubr.bf16.mxu0 %v13320_v8  ;;  %v10122_v48 = vld [vmem:[%s16604_s6 + $0x1b0] sm:$0xff]  }
 0x45f   : > { %9161 = vmatprep.subr.bf16.mxu1 %v10109_v56  ;;  %9044 = vmatpush3.bf16.msra.mxu0 %v10113_v28  ;;  %v10123_v56 = vld [vmem:[%s16604_s6 + $0x1f8] sm:$0xff]  }
 0x460   : > { %9045 = vmatprep.subr.bf16.mxu0 %v10117_v16  ;;  %v10124_v28 = vld [vmem:[%s16604_s6 + $0x1b8] sm:$0xff]   ;;  %v10125_v16 = vld [vmem:[%s16606_s8 + $0x40] sm:$0xff]  }
 0x461   : > { %9792 = vmatmul.mubr.bf16.gmra.mrb[48].mxu1 %v13331_v29 }
 0x462   : > { %9162 = vmatpush3.bf16.msra.mxu1 %v10110_v45  ;;  %5745 = vmatprep.mubr.bf16.mxu1 %v12936_v52  ;;  %v10120_v45 = vld [vmem:[%s16606_s8 + $0xb8] sm:$0xff]   ;;  %v17201_v52 = vrot.slane %v12497_v35, 6 }
 0x463   : > { %9163 = vmatprep.subr.bf16.mxu1 %v10112_v22  ;;  %9046 = vmatpush3.bf16.msra.mxu0 %v10118_v47  ;;  %v13378_v22 = vpack.c.bf16 %v17178_v54, %v13245_v40  ;;  %v10127_v47 = vld [vmem:[%s16606_s8 + $0x1c0] sm:$0xff]   ;;  %v10131_v40 = vld [vmem:[%s16606_s8 + $0x1c8] sm:$0xff]  }
 0x464   : > { %9047 = vmatprep.subr.bf16.mxu0 %v10121_v51  ;;  %v10128_v51 = vld [vmem:[%s16606_s8 + $0x180] sm:$0xff]   ;;  %v10130_v54 = vld [vmem:[%s16606_s8 + $0x8] sm:$0xff]  }
 0x465   : > { %3316 = vmatmul.mubr.bf16.gmra.mrb[64].mxu0 %v13348_v62  ;;  %17179 = vst [vmem:[#allocation59_spill] sm:$0xff] %v13378_v22 }
 0x466   : > { %9164 = vmatpush3.bf16.msra.mxu1 %v10114_v14  ;;  %3323 = vmatprep.mubr.bf16.mxu0 %v12952_v19  ;;  %v10132_v14 = vld [vmem:[%s16606_s8 + $0x188] sm:$0xff]  }
 0x467   : > { %9165 = vmatprep.subr.bf16.mxu1 %v10115_v24  ;;  %9048 = vmatpush3.bf16.msra.mxu0 %v10122_v48  ;;  %v10134_v24 = vld [vmem:[%s16606_s8 + $0x1d0] sm:$0xff]  }
 0x468   : > { %9049 = vmatprep.subr.bf16.mxu0 %v10123_v56  ;;  %v10136_v48 = vld [vmem:[%s16606_s8 + $0x190] sm:$0xff]   ;;  %v13406_v56 = vpack.c.bf16 %v17133_v13, %v12750_v53  ;;  %v10138_v53 = vld [vmem:[%s16606_s8 + $0x198] sm:$0xff]  }
 0x46a   : > { %9166 = vmatpush3.bf16.msra.mxu1 %v10116_v46  ;;  %17180 = vst [vmem:[#allocation94_spill] sm:$0xff] %v13406_v56  ;;  %v10137_v46 = vld [vmem:[%s16606_s8 + $0x1d8] sm:$0xff]  }
 0x46b   : > { %9167 = vmatprep.subr.bf16.mxu1 %v10119_v11  ;;  %9050 = vmatpush3.bf16.msra.mxu0 %v10124_v28  ;;  %v10126_v11 = vld [vmem:[%s16606_s8] sm:$0xff]   ;;  %v10129_v28 = vld [vmem:[%s16606_s8 + $0x48] sm:$0xff]  }
 0x46c   : > { %9101 = vmatprep.subr.bf16.mxu0 %v10125_v16  ;;  %v10141_v16 = vld [vmem:[%s16606_s8 + $0x1e0] sm:$0xff]  }
 0x46d   : > { %3324 = vmatmul.mubr.bf16.gmra.mrb[68].mxu0 %v13378_v22 }
 0x46e   : > { %9168 = vmatpush3.bf16.msra.mxu1 %v10120_v45  ;;  %3331 = vmatprep.mubr.bf16.mxu0 %v12974_v59  ;;  %v17181_v45 = vld [vmem:[#allocation36_spill] sm:$0xff] }
 0x46f   : > { %9257 = vmatprep.subr.bf16.mxu1 %v10127_v47  ;;  %v13432_v47 = vpack.c.bf16 %v17161_v60, %v17163_v50 }
 0x471   : > { %5746 = vmatmul.mubr.bf16.vlgmr.msra.gmra.mrb[52].mxu1 %v12956_v42  ;;  %17182 = vst [vmem:[#allocation95_spill] sm:$0xff] %v13432_v47  ;;  %v3955_v42 = vrot.slane %v17163_v50, 2 }
 0x472   : > { %5753 = vmatprep.mubr.bf16.mxu1 %v12960_v25  ;;  %9258 = vmatpush3.bf16.msra.mxu1 %v10128_v51  ;;  %v10133_v51 = vld [vmem:[%s16606_s8 + $0x50] sm:$0xff]  }
 0x473   : > { %9259 = vmatprep.subr.bf16.mxu1 %v10131_v40  ;;  %v10142_v40 = vld [vmem:[%s16606_s8 + $0x1a0] sm:$0xff]  }
 0x475   : > { %3332 = vmatmul.mubr.bf16.gmra.mrb[72].mxu0 %v12968_v1 }
 0x476   : > { %3453 = vmatprep.mubr.bf16.mxu0 %v12978_v12  ;;  %9260 = vmatpush3.bf16.msra.mxu1 %v10132_v14  ;;  %v10144_v14 = vld [vmem:[%s16606_s8 + $0x1e8] sm:$0xff]  }
 0x477   : > { %9261 = vmatprep.subr.bf16.mxu1 %v10134_v24  ;;  %v10135_v24 = vld [vmem:[%s16606_s8 + $0x10] sm:$0xff]  }
 0x479   : > { %5754 = vmatmul.mubr.bf16.gmra.mrb[56].mxu1 %v13406_v56 }
 0x47a   : > { %5761 = vmatprep.mubr.bf16.mxu1 %v12982_v31  ;;  %9262 = vmatpush3.bf16.msra.mxu1 %v10136_v48  ;;  %v10139_v48 = vld [vmem:[%s16606_s8 + $0x58] sm:$0xff]  }
 0x47b   : > { %9263 = vmatprep.subr.bf16.mxu1 %v10137_v46  ;;  %v10146_v46 = vld [vmem:[%s16606_s8 + $0x1a8] sm:$0xff]   ;;  %v10188_v31 = vld [vmem:[%s16606_s8 + $0x138] sm:$0xff]  }
 0x47d   : > { %3454 = vmatmul.mubr.bf16.vlgmr.msra.gmra.mrb[76].mxu0 %v17181_v45 }
 0x47e   : > { %9102 = vmatpush3.bf16.msra.mxu0 %v10126_v11  ;;  %3461 = vmatprep.mubr.bf16.mxu0 %v12992_v37  ;;  %v10147_v11 = vld [vmem:[%s16606_s8 + $0x1f0] sm:$0xff]  }
 0x47f   : > { %9103 = vmatprep.subr.bf16.mxu0 %v10129_v28  ;;  %9264 = vmatpush3.bf16.msra.mxu1 %v10138_v53  ;;  %v10140_v28 = vld [vmem:[%s16606_s8 + $0x18] sm:$0xff]   ;;  %v13464_v53 = vpack.c.bf16 %v12461_v44, %v17159_v9 }
 0x480   : > { %9265 = vmatprep.subr.bf16.mxu1 %v10141_v16  ;;  %v10143_v16 = vld [vmem:[%s16606_s8 + $0x60] sm:$0xff]  }
 0x481   : > { %5762 = vmatmul.mubr.bf16.gmra.mrb[60].mxu1 %v13432_v47  ;;  %17183 = vst [vmem:[#allocation96_spill] sm:$0xff] %v13464_v53  ;;  %v17191_v47 = vld [vmem:[#allocation39_spill] sm:$0xff] }
 0x482   : > { %5769 = vmatprep.mubr.bf16.mxu1 %v12996_v3  ;;  %9104 = vmatpush3.bf16.msra.mxu0 %v10130_v54  ;;  %v10148_v54 = vld [vmem:[%s16606_s8 + $0x1b0] sm:$0xff]  }
 0x483   : > { %9105 = vmatprep.subr.bf16.mxu0 %v10133_v51  ;;  %9266 = vmatpush3.bf16.msra.mxu1 %v10142_v40  ;;  %v10151_v51 = vld [vmem:[%s16606_s8 + $0x1f8] sm:$0xff]   ;;  %v10145_v40 = vld [vmem:[%s16606_s8 + $0x20] sm:$0xff]  }
 0x484   : > { %9267 = vmatprep.subr.bf16.mxu1 %v10144_v14  ;;  %v10149_v14 = vld [vmem:[%s16606_s8 + $0x68] sm:$0xff]  }
 0x485   : > { %3462 = vmatmul.mubr.bf16.gmra.mrb[80].mxu0 %v13000_v30 }
 0x486   : > { %3469 = vmatprep.mubr.bf16.mxu0 %v13008_v33  ;;  %9106 = vmatpush3.bf16.msra.mxu0 %v10135_v24  ;;  %v10152_v24 = vld [vmem:[%s16606_s8 + $0x1b8] sm:$0xff]   ;;  %v3957_v33 = vrot.slane %v17161_v60, 2 }
 0x487   : > { %9107 = vmatprep.subr.bf16.mxu0 %v10139_v48  ;;  %9268 = vmatpush3.bf16.msra.mxu1 %v10146_v46  ;;  %v10159_v48 = vld [vmem:[%s16606_s8 + $0x2c0] sm:$0xff]  }
 0x488   : > { %9269 = vmatprep.subr.bf16.mxu1 %v10147_v11  ;;  %v17184_v46 = vld [vmem:[#allocation74_spill] sm:$0xff]  ;;  %v10150_v11 = vld [vmem:[%s16606_s8 + $0x28] sm:$0xff]  }
 0x489   : > { %5770 = vmatmul.mubr.bf16.gmra.mrb[64].mxu1 %v13464_v53 }
 0x48a   : > { %5777 = vmatprep.mubr.bf16.mxu1 %v13012_v15  ;;  %9108 = vmatpush3.bf16.msra.mxu0 %v10140_v28  ;;  %v13496_v28 = vpack.c.bf16 %v12495_v41, %v12454_v55 }
 0x48b   : > { %9109 = vmatprep.subr.bf16.mxu0 %v10143_v16  ;;  %9270 = vmatpush3.bf16.msra.mxu1 %v10148_v54  ;;  %v10153_v16 = vld [vmem:[%s16606_s8 + $0x70] sm:$0xff]   ;;  %v17186_v54 = vld [vmem:[#allocation75_spill] sm:$0xff] }
 0x48c   : > { %9271 = vmatprep.subr.bf16.mxu1 %v10151_v51  ;;  %17185 = vst [vmem:[#allocation97_spill] sm:$0xff] %v13496_v28  ;;  %v10154_v51 = vld [vmem:[%s16606_s8 + $0x30] sm:$0xff]  }
 0x48d   : > { %3470 = vmatmul.mubr.bf16.gmra.mrb[84].mxu0 %v13026_v7 }
 0x48e   : > { %3477 = vmatprep.mubr.bf16.mxu0 %v17184_v46  ;;  %9110 = vmatpush3.bf16.msra.mxu0 %v10145_v40  ;;  %v10155_v40 = vld [vmem:[%s16606_s8 + $0x78] sm:$0xff]  }
 0x48f   : > { %9111 = vmatprep.subr.bf16.mxu0 %v10149_v14  ;;  %9272 = vmatpush3.bf16.msra.mxu1 %v10152_v24  ;;  %v17187_v14 = vld [vmem:[#allocation76_spill] sm:$0xff]  ;;  %v10156_v24 = vld [vmem:[%s16606_s8 + $0x38] sm:$0xff]  }
 0x490   : > { %9361 = vmatprep.subr.bf16.mxu1 %v10159_v48  ;;  %v13516_v48 = vpack.c.bf16 %v12636_v17, %v12497_v35  ;;  %v10160_v17 = vld [vmem:[%s16606_s8 + $0x280] sm:$0xff]  }
 0x491   : > { %5778 = vmatmul.mubr.bf16.gmra.mrb[68].mxu1 %v13496_v28  ;;  %v10192_v28 = vld [vmem:[%s16606_s8 + $0x380] sm:$0xff]  }
 0x492   : > { %5785 = vmatprep.mubr.bf16.mxu1 %v17186_v54  ;;  %9112 = vmatpush3.bf16.msra.mxu0 %v10150_v11  ;;  %17188 = vst [vmem:[#allocation98_spill] sm:$0xff] %v13516_v48  ;;  %v10157_v11 = vld [vmem:[%s16606_s8 + $0x140] sm:$0xff]  }
 0x493   : > { %9113 = vmatprep.subr.bf16.mxu0 %v10153_v16  ;;  %v17189_v16 = vld [vmem:[#allocation51_spill] sm:$0xff] }
 0x495   : > { %3478 = vmatmul.mubr.bf16.gmra.mrb[88].mxu0 %v17187_v14 }
 0x496   : > { %3485 = vmatprep.mubr.bf16.mxu0 %v13046_v39  ;;  %9114 = vmatpush3.bf16.msra.mxu0 %v10154_v51  ;;  %v10163_v51 = vld [vmem:[%s16606_s8 + $0x2c8] sm:$0xff]   ;;  %v3928_v39 = vrot.slane %v12454_v55, 6 }
 0x497   : > { %9115 = vmatprep.subr.bf16.mxu0 %v10155_v40  ;;  %v17190_v40 = vld [vmem:[#allocation52_spill] sm:$0xff] }
 0x499   : > { %5786 = vmatmul.mubr.bf16.gmra.mrb[72].mxu1 %v13516_v48  ;;  %v17202_v48 = vld [vmem:[#allocation79_spill] sm:$0xff] }
 0x49a   : > { %5907 = vmatprep.mubr.bf16.mxu1 %v17189_v16  ;;  %9116 = vmatpush3.bf16.msra.mxu0 %v10156_v24  ;;  %v10164_v24 = vld [vmem:[%s16606_s8 + $0x288] sm:$0xff]   ;;  %v10168_v16 = vld [vmem:[%s16606_s8 + $0x290] sm:$0xff]  }
 0x49b   : > { %9205 = vmatprep.subr.bf16.mxu0 %v10157_v11  ;;  %v10166_v11 = vld [vmem:[%s16606_s8 + $0x2d0] sm:$0xff]  }
 0x49d   : > { %3486 = vmatmul.mubr.bf16.gmra.mrb[92].mxu0 %v13052_v18  ;;  %v17199_v18 = vld [vmem:[#allocation82_spill] sm:$0xff] }
 0x49e   : > { %3493 = vmatprep.mubr.bf16.mxu0 %v13056_v61 }
 0x4a1   : > { %5908 = vmatmul.mubr.bf16.vlgmr.msra.gmra.mrb[76].mxu1 %v17190_v40  ;;  %v10158_v40 = vld [vmem:[%s16606_s8 + $0x100] sm:$0xff]  }
 0x4a2   : > { %5915 = vmatprep.mubr.bf16.mxu1 %v17191_v47  ;;  %9362 = vmatpush3.bf16.msra.mxu1 %v10160_v17  ;;  %v10169_v47 = vld [vmem:[%s16606_s8 + $0x2d8] sm:$0xff]   ;;  %v17192_v17 = vld [vmem:[#allocation43_spill] sm:$0xff] }
 0x4a3   : > { %9363 = vmatprep.subr.bf16.mxu1 %v10163_v51  ;;  %v17193_v51 = vld [vmem:[#allocation44_spill] sm:$0xff] }
 0x4a5   : > { %3494 = vmatmul.mubr.bf16.gmra.mrb[96].mxu0 %v13060_v0 }
 0x4a6   : > { %5664 = vmatprep.mubr.bf16.mxu0 %v13062_v27  ;;  %9364 = vmatpush3.bf16.msra.mxu1 %v10164_v24  ;;  %v10161_v24 = vld [vmem:[%s16606_s8 + $0x148] sm:$0xff]  }
 0x4a7   : > { %9365 = vmatprep.subr.bf16.mxu1 %v10166_v11  ;;  %v10170_v11 = vld [vmem:[%s16606_s8 + $0x298] sm:$0xff]  }
 0x4a9   : > { %5916 = vmatmul.mubr.bf16.gmra.mrb[80].mxu1 %v17192_v17  ;;  %v10173_v17 = vld [vmem:[%s16606_s8 + $0x2e0] sm:$0xff]  }
 0x4aa   : > { %5923 = vmatprep.mubr.bf16.mxu1 %v17193_v51  ;;  %9366 = vmatpush3.bf16.msra.mxu1 %v10168_v16  ;;  %v10162_v16 = vld [vmem:[%s16606_s8 + $0x108] sm:$0xff]   ;;  %v10174_v51 = vld [vmem:[%s16606_s8 + $0x2a0] sm:$0xff]  }
 0x4ab   : > { %9367 = vmatprep.subr.bf16.mxu1 %v10169_v47  ;;  %v10165_v47 = vld [vmem:[%s16606_s8 + $0x150] sm:$0xff]  }
 0x4ad   : > { %5665 = vmatmul.mubr.bf16.vlgmr.msra.gmra.mrb[100].mxu0 %v13079_v21  ;;  %v10190_v21 = vld [vmem:[%s16606_s8 + $0x200] sm:$0xff]  }
 0x4ae   : > { %9206 = vmatpush3.bf16.msra.mxu0 %v10158_v40  ;;  %5672 = vmatprep.mubr.bf16.mxu0 %v13073_v4  ;;  %v10176_v40 = vld [vmem:[%s16606_s8 + $0x2e8] sm:$0xff]   ;;  %v3922_v4 = vrot.slane %v17161_v60, 6 }
 0x4af   : > { %9207 = vmatprep.subr.bf16.mxu0 %v10161_v24  ;;  %9368 = vmatpush3.bf16.msra.mxu1 %v10170_v11  ;;  %v10167_v24 = vld [vmem:[%s16606_s8 + $0x110] sm:$0xff]   ;;  %v10171_v11 = vld [vmem:[%s16606_s8 + $0x158] sm:$0xff]  }
 0x4b0   : > { %9369 = vmatprep.subr.bf16.mxu1 %v10173_v17  ;;  %v10178_v17 = vld [vmem:[%s16606_s8 + $0x2a8] sm:$0xff]  }
 0x4b1   : > { %5924 = vmatmul.mubr.bf16.gmra.mrb[84].mxu1 %v12744_v26  ;;  %v10179_v26 = vld [vmem:[%s16606_s8 + $0x2f0] sm:$0xff]  }
 0x4b2   : > { %5931 = vmatprep.mubr.bf16.mxu1 %v17131_v5  ;;  %9208 = vmatpush3.bf16.msra.mxu0 %v10162_v16  ;;  %v17194_v5 = vld [vmem:[#allocation29_spill] sm:$0xff]  ;;  %v3920_v16 = vrot.slane %v17163_v50, 6 }
 0x4b3   : > { %9209 = vmatprep.subr.bf16.mxu0 %v10165_v47  ;;  %9370 = vmatpush3.bf16.msra.mxu1 %v10174_v51  ;;  %v10172_v47 = vld [vmem:[%s16606_s8 + $0x118] sm:$0xff]   ;;  %v10175_v51 = vld [vmem:[%s16606_s8 + $0x160] sm:$0xff]  }
 0x4b4   : > { %9371 = vmatprep.subr.bf16.mxu1 %v10176_v40  ;;  %v10180_v40 = vld [vmem:[%s16606_s8 + $0x2b0] sm:$0xff]   ;;  %v13603_v27 = vsel %vm3907_vm6, %v3920_v16, %v3922_v4 }
 0x4b5   : > { %5673 = vmatmul.mubr.bf16.gmra.mrb[104].mxu0 %v13109_v32 }
 0x4b6   : > { %5680 = vmatprep.mubr.bf16.mxu0 %v17194_v5  ;;  %9210 = vmatpush3.bf16.msra.mxu0 %v10167_v24  ;;  %v10183_v24 = vld [vmem:[%s16606_s8 + $0x2f8] sm:$0xff]   ;;  %v10177_v5 = vld [vmem:[%s16606_s8 + $0x120] sm:$0xff]  }
 0x4b7   : > { %9211 = vmatprep.subr.bf16.mxu0 %v10171_v11  ;;  %9372 = vmatpush3.bf16.msra.mxu1 %v10178_v17  ;;  %v17195_v11 = vrot.slane %v17133_v13, 6 }
 0x4b8   : > { %9373 = vmatprep.subr.bf16.mxu1 %v10179_v26 }
 0x4b9   : > { %5932 = vmatmul.mubr.bf16.gmra.mrb[88].mxu1 %v13128_v10  ;;  %v13613_v17 = vsel %vm3907_vm6, %v17195_v11, %v3920_v16  ;;  %v10184_v10 = vld [vmem:[%s16606_s8 + $0x2b8] sm:$0xff]   ;;  %v3926_v16 = vrot.slane %v12461_v44, 6  ;;  %v17197_v11 = vld [vmem:[#allocation80_spill] sm:$0xff] }
 0x4ba   : > { %5939 = vmatprep.mubr.bf16.mxu1 %v13139_v6  ;;  %9212 = vmatpush3.bf16.msra.mxu0 %v10172_v47  ;;  %v13620_v26 = vpack.c.bf16 %v13603_v27, %v13613_v17  ;;  %v10181_v6 = vld [vmem:[%s16606_s8 + $0x168] sm:$0xff]   ;;  %v10191_v47 = vld [vmem:[%s16606_s8 + $0x3c0] sm:$0xff]  }
 0x4bb   : > { %9213 = vmatprep.subr.bf16.mxu0 %v10175_v51  ;;  %9374 = vmatpush3.bf16.msra.mxu1 %v10180_v40  ;;  %v3924_v51 = vrot.slane %v17159_v9, 6  ;;  %v10182_v40 = vld [vmem:[%s16606_s8 + $0x128] sm:$0xff]   ;;  %v3929_v25 = vsel %vm3907_vm6, %v3926_v16, %v3928_v39 }
 0x4bc   : > { %17196 = vst [vmem:[#allocation51_spill] sm:$0xff] %v13620_v26  ;;  %9375 = vmatprep.subr.bf16.mxu1 %v10183_v24  ;;  %v10185_v24 = vld [vmem:[%s16606_s8 + $0x170] sm:$0xff]  }
 0x4bd   : > { %5681 = vmatmul.mubr.bf16.gmra.mrb[108].mxu0 %v13620_v26  ;;  %v13642_v0 = vsel %vm3907_vm6, %v3924_v51, %v3926_v16  ;;  %v10208_v26 = vld [vmem:[%s16606_s8 + $0x3e8] sm:$0xff]  }
 0x4be   : > { %5688 = vmatprep.mubr.bf16.mxu0 %v17197_v11  ;;  %9214 = vmatpush3.bf16.msra.mxu0 %v10177_v5  ;;  %v13648_v5 = vld [vmem:[%s16603_s5] ss:$0 sm:$0xff]  ;;  %v10187_v11 = vld [vmem:[%s16606_s8 + $0x178] sm:$0xff]   ;;  %v13755_v12 = vpack.c.bf16 %v3929_v25, %v13642_v0 }
 0x4bf   : > { %9215 = vmatprep.subr.bf16.mxu0 %v10181_v6  ;;  %9376 = vmatpush3.bf16.msra.mxu1 %v10184_v10  ;;  %v13652_v6 = vsel %vm3907_vm6, %v3922_v4, %v3924_v51  ;;  %v10186_v10 = vld [vmem:[%s16606_s8 + $0x130] sm:$0xff]   ;;  %v3930_v51 = vrot.slane %v12495_v41, 6 }
 0x4c0   : > { %9465 = vmatprep.subr.bf16.mxu1 %v10191_v47  ;;  %v13659_v47 = vpack.c.bf16 %v13642_v0, %v13652_v6  ;;  %17208 = vst [vmem:[#allocation99_spill] sm:$0xff] %v13755_v12 }
 0x4c1   : > { %5940 = vmatmul.mubr.bf16.gmra.mrb[92].mxu1 %v13183_v43  ;;  %v9757_v43 = vpop.f32.mrb[4].mxu1 }
 0x4c2   : > { %5947 = vmatprep.mubr.bf16.mxu1 %v17154_v20  ;;  %9216 = vmatpush3.bf16.msra.mxu0 %v10182_v40  ;;  %17198 = vst [vmem:[#allocation52_spill] sm:$0xff] %v13659_v47  ;;  %v13665_v20 = vadd.f32 %v9757_v43, %v13648_v5  ;;  %v1975_v4 = vpop.f32.mrb[5].mxu1 }
 0x4c3   : > { %9217 = vmatprep.subr.bf16.mxu0 %v10185_v24  ;;  %v13670_v40 = vadd.f32 %v13648_v5, %v1975_v4  ;;  %v9758_v61 = vpop.f32.mrb[6].mxu1 }
 0x4c4   : > { %v13674_v24 = vmul.f32 0.70710677, %v13665_v20  ;;  %v13678_v14 = vadd.f32 %v9758_v61, %v13648_v5  ;;  %v1978_v43 = vpop.f32.mrb[7].mxu1  ;;  %v3931_v61 = vsel %vm3907_vm6, %v3928_v39, %v3930_v51  ;;  %v13719_v39 = vpack.c.bf16 %v13613_v17, %v17202_v48  ;;  %v17205_v48 = vld [vmem:[#allocation83_spill] sm:$0xff] }
 0x4c5   : > { %5689 = vmatmul.mubr.bf16.gmra.mrb[112].mxu0 %v13659_v47  ;;  %v13684_v4 = vmul.f32 0.70710677, %v13670_v40  ;;  %v13824_v3 = vmul.f32 0.5, %v13665_v20  ;;  %v13827_v29 = vmul.f32 0.5, %v13670_v40 }
 0x4c6   : > { %5696 = vmatprep.mubr.bf16.mxu0 %v17199_v18  ;;  %9218 = vmatpush3.bf16.msra.mxu0 %v10186_v10  ;;  %v10189_v18 = vld [vmem:[%s16606_s8 + $0x240] sm:$0xff]   ;;  %v13690_v56 = vand.u32 2147483647, %v13674_v24  ;;  %v13694_v46 = vmul.f32 0.70710677, %v13678_v14  ;;  %v13697_v10 = vadd.f32 %v13648_v5, %v1978_v43  ;;  %v13709_v43 = vpack.c.bf16 %v3931_v61, %v3929_v25  ;;  %17203 = vst [vmem:[#allocation43_spill] sm:$0xff] %v13719_v39 }
 0x4c7   : > { %9219 = vmatprep.subr.bf16.mxu0 %v10187_v11  ;;  %v13701_v7 = vand.u32 2147483647, %v13684_v4  ;;  %vm2048_vm2 = vcmp.ge.f32.partialorder %v13674_v24, 0.0  ;;  %v13845_v40 = vmul.f32 0.5, %v13678_v14  ;;  %vm2046_vm10 = vcmp.ge.f32.partialorder %v13684_v4, 0.0 }
 0x4c8   : > { %v2084_v11 = vmul.f32 0.3275911, %v13690_v56  ;;  %17200 = vst [vmem:[#allocation39_spill] sm:$0xff] %v13709_v43  ;;  %v13722_v50 = vmul.f32 0.70710677, %v13697_v10  ;;  %vm2049_vm14 = vcmp.ge.f32.partialorder %v13694_v46, 0.0 }
 0x4c9   : > { %5948 = vmatmul.mubr.bf16.gmra.mrb[96].mxu1 %v17162_v2  ;;  %v2082_v30 = vmul.f32 0.3275911, %v13701_v7  ;;  %v13712_v2 = vand.u32 2147483647, %v13694_v46  ;;  %v9761_v16 = vpop.f32.mrb[8].mxu1  ;;  %v10203_v46 = vld [vmem:[%s16606_s8 + $0x258] sm:$0xff]  }
 0x4ca   : > { %6069 = vmatprep.mubr.bf16.mxu1 %v13214_v49  ;;  %9220 = vmatpush3.bf16.msra.mxu0 %v10188_v31  ;;  %v3933_v49 = vsel %vm3907_vm6, %v3930_v51, %v17201_v52  ;;  %v2096_v31 = vadd.f32 1.0, %v2084_v11  ;;  %v1991_v54 = vpop.f32.mrb[9].mxu1  ;;  %v3959_v52 = vrot.slane %v17159_v9, 2  ;;  %v13733_v17 = vand.u32 2147483647, %v13722_v50 }
 0x4cb   : > { %9309 = vmatprep.subr.bf16.mxu0 %v10189_v18  ;;  %v13725_v60 = vpack.c.bf16 %v13179_v63, %v3933_v49  ;;  %v2094_v37 = vadd.f32 1.0, %v2082_v30  ;;  %v2085_v45 = vmul.f32 0.3275911, %v13712_v2  ;;  %v3961_v18 = vrot.slane %v12461_v44, 2  ;;  %v9762_v51 = vpop.f32.mrb[10].mxu1 }
 0x4cc   : > { %10437 = vrcp.f32 %v2096_v31  ;;  %v17206_v63 = vrot.slane %v17133_v13, 2  ;;  %v3958_v11 = vsel %vm3945_vm8, %v3955_v42, %v3957_v33  ;;  %v13742_v44 = vpop.f32.mrb[11].mxu1  ;;  %v10195_v31 = vld [vmem:[%s16606_s8 + $0x3c8] sm:$0xff]   ;;  %v3965_v13 = vrot.slane %v12495_v41, 2 }
 0x4cd   : > { %17204 = vst [vmem:[#allocation44_spill] sm:$0xff] %v13725_v60  ;;  %5697 = vmatmul.mubr.bf16.gmra.mrb[116].mxu0 %v13709_v43  ;;  %10439 = vrcp.f32 %v2094_v37  ;;  %v2097_v9 = vadd.f32 1.0, %v2085_v45  ;;  %v17209_v37 = vld [vmem:[#allocation84_spill] sm:$0xff]  ;;  %v13762_v15 = vadd.f32 %v9761_v16, %v13648_v5  ;;  %v3960_v41 = vsel %vm3945_vm8, %v3957_v33, %v3959_v52  ;;  %v10196_v16 = vld [vmem:[%s16606_s8 + $0x388] sm:$0xff]   ;;  %v17221_v43 = vld [vmem:[#allocation85_spill] sm:$0xff] }
 0x4ce   : > { %5704 = vmatprep.mubr.bf16.mxu0 %v17205_v48  ;;  %v3956_v30 = vsel %vm3945_vm8, %v17206_v63, %v3955_v42  ;;  %v3963_v48 = vrot.slane %v12454_v55, 2  ;;  %v2083_v63 = vmul.f32 0.3275911, %v13733_v17  ;;  %v13752_v42 = vpack.c.bf16 %v13652_v6, %v13603_v27  ;;  %v17211_v6 = vld [vmem:[#allocation32_spill] sm:$0xff] }
 0x4cf   : > { %v13758_v45 = vpack.c.bf16 %v3956_v30, %v17209_v37  ;;  %v13765_v55 = vadd.f32 %v13648_v5, %v1991_v54  ;;  %v3962_v53 = vsel %vm3945_vm8, %v3959_v52, %v3961_v18  ;;  %10441 = vrcp.f32 %v2097_v9  ;;  %v10198_v52 = vld [vmem:[%s16606_s8 + $0x3d0] sm:$0xff]  }
 0x4d0   : > { %17207 = vst [vmem:[#allocation79_spill] sm:$0xff] %v13752_v42  ;;  %v2095_v27 = vadd.f32 1.0, %v2083_v63  ;;  %v13771_v25 = vadd.f32 %v9762_v51, %v13648_v5  ;;  %v13773_v0 = vpack.c.bf16 %v3958_v11, %v3956_v30  ;;  %v13779_v54 = vmul.f32 0.70710677, %v13762_v15 }
 0x4d1   : > { %17210 = vst [vmem:[#allocation84_spill] sm:$0xff] %v13758_v45  ;;  %6070 = vmatmul.mubr.bf16.vlgmr.msra.gmra.mrb[100].mxu1 %v13719_v39  ;;  %v13781_v33 = vpack.c.bf16 %v3933_v49, %v3931_v61  ;;  %v3964_v51 = vsel %vm3945_vm8, %v3961_v18, %v3963_v48  ;;  %v13788_v30 = vsel %vm3945_vm8, %v3963_v48, %v3965_v13  ;;  %v2238_v61 = vsub.f32 0.0, %v13701_v7  ;;  %v17214_v48 = vld [vmem:[#allocation86_spill] sm:$0xff]  ;;  %v10201_v39 = vld [vmem:[%s16606_s8 + $0x3d8] sm:$0xff]  }
 0x4d2   : > { %6077 = vmatprep.mubr.bf16.mxu1 %v17211_v6  ;;  %9466 = vmatpush3.bf16.msra.mxu1 %v10192_v28  ;;  %10443 = vrcp.f32 %v2095_v27  ;;  %v13791_v28 = vmul.f32 0.70710677, %v13765_v55  ;;  %v13793_v9 = vpack.c.bf16 %v3962_v53, %v3960_v41  ;;  %v13795_v63 = vpack.c.bf16 %v3960_v41, %v3958_v11  ;;  %v10200_v11 = vld [vmem:[%s16606_s8 + $0x390] sm:$0xff]  }
 0x4d3   : > { %9467 = vmatprep.subr.bf16.mxu1 %v10195_v31  ;;  %17212 = vst [vmem:[#allocation32_spill] sm:$0xff] %v13781_v33  ;;  %v13801_v49 = vand.u32 2147483647, %v13779_v54  ;;  %v13804_v18 = vmul.f32 0.70710677, %v13771_v25  ;;  %v13814_v37 = vpack.c.bf16 %v13788_v30, %v3964_v51  ;;  %v13816_v41 = vpack.c.bf16 %v3964_v51, %v3962_v53  ;;  %v17218_v53 = vld [vmem:[#allocation54_spill] sm:$0xff] }
 0x4d4   : > { %17213 = vst [vmem:[#allocation100_spill] sm:$0xff] %v13795_v63  ;;  %v13808_v31 = vand.u32 2147483647, %v13791_v28  ;;  %v17217_v27 = vrot.slane %v12497_v35, 2  ;;  %17220 = vst [vmem:[#allocation54_spill] sm:$0xff] %v13845_v40  ;;  %v2250_v23 = vmul.f32 %v2238_v61, %v13701_v7  ;;  %v2239_v34 = vsub.f32 0.0, %v13733_v17 }
 0x4d5   : > { %5705 = vmatmul.mubr.bf16.gmra.mrb[120].mxu0 %v13725_v60  ;;  %17215 = vst [vmem:[#allocation101_spill] sm:$0xff] %v13814_v37  ;;  %17216 = vst [vmem:[#allocation102_spill] sm:$0xff] %v13816_v41  ;;  %v2240_v61 = vsub.f32 0.0, %v13690_v56  ;;  %v2244_v36 = vsub.f32 0.0, %v13801_v49  ;;  %vm2047_vm15 = vcmp.ge.f32.partialorder %v13722_v50, 0.0  ;;  %v14033_v50 = vmul.f32 0.5, %v13762_v15 }
 0x4d6   : > { %5826 = vmatprep.mubr.bf16.mxu0 %v17214_v48  ;;  %9468 = vmatpush3.bf16.msra.mxu1 %v10196_v16  ;;  %v13821_v6 = vsel %vm3945_vm8, %v3965_v13, %v17217_v27  ;;  %v2088_v16 = vmul.f32 0.3275911, %v13801_v49  ;;  %v13837_v35 = vpop.eup %10437  ;;  %v17219_v13 = vmov -1.0   ;;  %v13849_v27 = vand.u32 2147483647, %v13804_v18 }
 0x4d7   : > { %9469 = vmatprep.subr.bf16.mxu1 %v10198_v52  ;;  %v13835_v51 = vpack.c.bf16 %v17218_v53, %v13821_v6  ;;  %v13842_v20 = vsel %vm2048_vm2, 1.0, %v17219_v13  ;;  %v2086_v52 = vmul.f32 0.3275911, %v13808_v31  ;;  %v13851_v58 = vpop.eup %10439  ;;  %v2132_v53 = vmul.f32 1.0614054, %v13837_v35 }
 0x4d8   : > { %v2100_v24 = vadd.f32 1.0, %v2088_v16  ;;  %v2130_v1 = vmul.f32 1.0614054, %v13851_v58  ;;  %v2089_v22 = vmul.f32 0.3275911, %v13849_v27  ;;  %v13865_v48 = vadd.f32 %v13648_v5, %v13742_v44  ;;  %v10202_v16 = vld [vmem:[%s16606_s8 + $0x398] sm:$0xff]  }
 0x4d9   : > { %6078 = vmatmul.mubr.bf16.gmra.mrb[104].mxu1 %v13752_v42  ;;  %v2098_v14 = vadd.f32 1.0, %v2086_v52  ;;  %v2144_v7 = vadd.f32 -1.4531521, %v2132_v53  ;;  %v13875_v52 = vpop.eup %10441  ;;  %v2262_v60 = vmul.f32 1.442695, %v2250_v23  ;;  %v2251_v62 = vmul.f32 %v2239_v34, %v13733_v17  ;;  %v10197_v34 = vld [vmem:[%s16606_s8 + $0x250] sm:$0xff]  }
 0x4da   : > { %6085 = vmatprep.mubr.bf16.mxu1 %v13286_v38  ;;  %9470 = vmatpush3.bf16.msra.mxu1 %v10200_v11  ;;  %10445 = vrcp.f32 %v2100_v24  ;;  %v10193_v38 = vld [vmem:[%s16606_s8 + $0x248] sm:$0xff]   ;;  %v2142_v44 = vadd.f32 -1.4531521, %v2130_v1  ;;  %v2241_v11 = vsub.f32 0.0, %v13712_v2  ;;  %v2101_v53 = vadd.f32 1.0, %v2089_v22  ;;  %v10205_v24 = vld [vmem:[%s16606_s8 + $0x3e0] sm:$0xff]  }
 0x4db   : > { %9471 = vmatprep.subr.bf16.mxu1 %v10201_v39  ;;  %10447 = vrcp.f32 %v2098_v14  ;;  %v2156_v42 = vmul.f32 %v13837_v35, %v2144_v7  ;;  %v2133_v39 = vmul.f32 1.0614054, %v13875_v52  ;;  %v10194_v1 = vld [vmem:[%s16606_s8 + $0x208] sm:$0xff]   ;;  %v13893_v14 = vmul.f32 0.5, %v13697_v10  ;;  %v10206_v17 = vld [vmem:[%s16606_s8 + $0x3a0] sm:$0xff]  }
 0x4dc   : > { %v13888_v57 = vpop.eup %10443  ;;  %v2154_v22 = vmul.f32 %v13851_v58, %v2142_v44  ;;  %v13897_v23 = vmul.f32 0.70710677, %v13865_v48  ;;  %10449 = vrcp.f32 %v2101_v53  ;;  %v2253_v47 = vmul.f32 %v2241_v11, %v13712_v2  ;;  %v10211_v11 = vld [vmem:[%s16606_s8 + $0x3f0] sm:$0xff]  }
 0x4dd   : > { %5827 = vmatmul.mubr.bf16.vlgmr.msra.gmra.mrb[124].mxu0 %v17221_v43  ;;  %v2168_v7 = vadd.f32 1.4214138, %v2156_v42  ;;  %v2145_v44 = vadd.f32 -1.4531521, %v2133_v39  ;;  %v2131_v43 = vmul.f32 1.0614054, %v13888_v57  ;;  %10451 = vpow2.f32 %v2262_v60 }
 0x4de   : > { %9310 = vmatpush3.bf16.msra.mxu0 %v10190_v21  ;;  %5834 = vmatprep.mubr.bf16.mxu0 %v13773_v0  ;;  %v2252_v21 = vmul.f32 %v2240_v61, %v13690_v56  ;;  %v2166_v10 = vadd.f32 1.4214138, %v2154_v22  ;;  %v2264_v40 = vmul.f32 1.442695, %v2251_v62  ;;  %v13917_v56 = vsel %vm2046_vm10, 1.0, %v17219_v13  ;;  %v10199_v62 = vld [vmem:[%s16606_s8 + $0x210] sm:$0xff]  }
 0x4df   : > { %9311 = vmatprep.subr.bf16.mxu0 %v10193_v38  ;;  %9472 = vmatpush3.bf16.msra.mxu1 %v10202_v16  ;;  %v2157_v42 = vmul.f32 %v13875_v52, %v2145_v44  ;;  %v2143_v39 = vadd.f32 -1.4531521, %v2131_v43  ;;  %v13923_v61 = vsel %vm2049_vm14, 1.0, %v17219_v13  ;;  %v13926_v60 = vand.u32 2147483647, %v13897_v23 }
 0x4e0   : > { %9473 = vmatprep.subr.bf16.mxu1 %v10205_v24  ;;  %v2178_v2 = vmul.f32 %v13851_v58, %v2166_v10  ;;  %v2180_v4 = vmul.f32 %v13837_v35, %v2168_v7  ;;  %v2242_v16 = vsub.f32 0.0, %v13808_v31  ;;  %v2266_v53 = vmul.f32 1.442695, %v2252_v21 }
 0x4e1   : > { %6086 = vmatmul.mubr.bf16.gmra.mrb[108].mxu1 %v13755_v12  ;;  %v2169_v43 = vadd.f32 1.4214138, %v2157_v42  ;;  %v2155_v38 = vmul.f32 %v13888_v57, %v2143_v39  ;;  %v2087_v22 = vmul.f32 0.3275911, %v13926_v60  ;;  %10453 = vpow2.f32 %v2264_v40  ;;  %v10207_v40 = vld [vmem:[%s16606_s8 + $0x260] sm:$0xff]  }
 0x4e2   : > { %6093 = vmatprep.mubr.bf16.mxu1 %v13320_v8  ;;  %9312 = vmatpush3.bf16.msra.mxu0 %v10194_v1  ;;  %v10210_v8 = vld [vmem:[%s16606_s8 + $0x3a8] sm:$0xff]   ;;  %v2190_v24 = vadd.f32 -0.28449672, %v2178_v2  ;;  %v2256_v1 = vmul.f32 %v2244_v36, %v13801_v49  ;;  %v2245_v49 = vsub.f32 0.0, %v13849_v27  ;;  %v2192_v42 = vadd.f32 -0.28449672, %v2180_v4 }
 0x4e3   : > { %9313 = vmatprep.subr.bf16.mxu0 %v10197_v34  ;;  %9474 = vmatpush3.bf16.msra.mxu1 %v10206_v17  ;;  %v2181_v7 = vmul.f32 %v13875_v52, %v2169_v43  ;;  %v2268_v17 = vmul.f32 1.442695, %v2253_v47  ;;  %v2167_v44 = vadd.f32 1.4214138, %v2155_v38  ;;  %v10204_v47 = vld [vmem:[%s16606_s8 + $0x218] sm:$0xff]   ;;  %v2254_v43 = vmul.f32 %v2242_v16, %v13808_v31 }
 0x4e4   : > { %9475 = vmatprep.subr.bf16.mxu1 %v10208_v26  ;;  %v13946_v34 = vpop.eup %10445  ;;  %v2202_v21 = vmul.f32 %v13851_v58, %v2190_v24  ;;  %v2099_v26 = vadd.f32 1.0, %v2087_v22  ;;  %v10215_v38 = vld [vmem:[%s16606_s8 + $0x3f8] sm:$0xff]   ;;  %v13972_v12 = vmul.f32 1.442695, %v2256_v1  ;;  %v2204_v1 = vmul.f32 %v13837_v35, %v2192_v42 }
 0x4e5   : > { %5835 = vmatmul.mubr.bf16.gmra.mrb[128].mxu0 %v13758_v45  ;;  %v13951_v10 = vpop.eup %10447  ;;  %v2136_v36 = vmul.f32 1.0614054, %v13946_v34  ;;  %v2179_v39 = vmul.f32 %v13888_v57, %v2167_v44  ;;  %v2193_v31 = vadd.f32 -0.28449672, %v2181_v7  ;;  %v2243_v42 = vsub.f32 0.0, %v13926_v60 }
 0x4e6   : > { %5842 = vmatprep.mubr.bf16.mxu0 %v13793_v9  ;;  %9314 = vmatpush3.bf16.msra.mxu0 %v10199_v62  ;;  %v2134_v2 = vmul.f32 1.0614054, %v13951_v10  ;;  %v10212_v62 = vld [vmem:[%s16606_s8 + $0x3b0] sm:$0xff]   ;;  %v2214_v24 = vadd.f32 0.2548296, %v2202_v21  ;;  %10455 = vrcp.f32 %v2099_v26  ;;  %v13974_v4 = vpop.eup %10449  ;;  %v2257_v21 = vmul.f32 %v2245_v49, %v13849_v27  ;;  %v10213_v27 = vld [vmem:[%s16606_s8 + $0x268] sm:$0xff]  }
 0x4e7   : > { %9315 = vmatprep.subr.bf16.mxu0 %v10203_v46  ;;  %9476 = vmatpush3.bf16.msra.mxu1 %v10210_v8  ;;  %v2148_v22 = vadd.f32 -1.4531521, %v2136_v36  ;;  %10457 = vpow2.f32 %v2266_v53  ;;  %v2191_v16 = vadd.f32 -0.28449672, %v2179_v39  ;;  %v2137_v45 = vmul.f32 1.0614054, %v13974_v4  ;;  %v10452_v53 = vpop.eup %10451 }
 0x4e8   : > { %9477 = vmatprep.subr.bf16.mxu1 %v10211_v11  ;;  %v2146_v46 = vadd.f32 -1.4531521, %v2134_v2  ;;  %v2226_v8 = vmul.f32 %v13851_v58, %v2214_v24  ;;  %v10209_v11 = vld [vmem:[%s16606_s8 + $0x220] sm:$0xff]   ;;  %v2270_v36 = vmul.f32 1.442695, %v2254_v43  ;;  %v2205_v2 = vmul.f32 %v13875_v52, %v2193_v31 }
 0x4e9   : > { %6094 = vmatmul.mubr.bf16.gmra.mrb[112].mxu1 %v13781_v33  ;;  %v2160_v44 = vmul.f32 %v13946_v34, %v2148_v22  ;;  %v2203_v7 = vmul.f32 %v13888_v57, %v2191_v16  ;;  %v9765_v39 = vpop.f32.mrb[12].mxu1  ;;  %10459 = vpow2.f32 %v2268_v17  ;;  %v10223_v24 = vld [vmem:[%s16606_s8 + $0x4c0] sm:$0xff]   ;;  %v10214_v17 = vld [vmem:[%s16606_s8 + $0x228] sm:$0xff]   ;;  %vm2052_vm11 = vcmp.ge.f32.partialorder %v13779_v54, 0.0 }
 0x4ea   : > { %6101 = vmatprep.mubr.bf16.mxu1 %v12952_v19  ;;  %9316 = vmatpush3.bf16.msra.mxu0 %v10204_v47  ;;  %v2158_v58 = vmul.f32 %v13951_v10, %v2146_v46  ;;  %v10216_v19 = vld [vmem:[%s16606_s8 + $0x3b8] sm:$0xff]   ;;  %v2286_v49 = vmul.f32 %v10452_v53, %v2226_v8  ;;  %v2149_v47 = vadd.f32 -1.4531521, %v2137_v45  ;;  %v2276_v46 = vmul.f32 1.442695, %v2257_v21  ;;  %v10217_v21 = vld [vmem:[%s16606_s8 + $0x270] sm:$0xff]  }
 0x4eb   : > { %9317 = vmatprep.subr.bf16.mxu0 %v10207_v40  ;;  %9478 = vmatpush3.bf16.msra.mxu1 %v10212_v62  ;;  %v2172_v26 = vadd.f32 1.4214138, %v2160_v44  ;;  %v2215_v40 = vadd.f32 0.2548296, %v2203_v7  ;;  %v13996_v62 = vpop.f32.mrb[13].mxu1  ;;  %v10454_v31 = vpop.eup %10453  ;;  %v14013_v7 = vadd.f32 %v9765_v39, %v13648_v5  ;;  %10461 = vpow2.f32 %v13972_v12 }
 0x4ec   : > { %9479 = vmatprep.subr.bf16.mxu1 %v10215_v38  ;;  %v2170_v43 = vadd.f32 1.4214138, %v2158_v58  ;;  %v2298_v22 = vsub.f32 1.0, %v2286_v49  ;;  %v2161_v16 = vmul.f32 %v13974_v4, %v2149_v47  ;;  %v14004_v38 = vpop.f32.mrb[14].mxu1  ;;  %v2216_v8 = vadd.f32 0.2548296, %v2204_v1 }
 0x4ed   : > { %5843 = vmatmul.mubr.bf16.gmra.mrb[132].mxu0 %v13795_v63  ;;  %v2184_v45 = vmul.f32 %v13946_v34, %v2172_v26  ;;  %v2227_v44 = vmul.f32 %v13888_v57, %v2215_v40  ;;  %v14015_v58 = vpop.f32.mrb[15].mxu1  ;;  %v2255_v57 = vmul.f32 %v2243_v42, %v13926_v60  ;;  %v14024_v26 = vpop.f32.mrb[28].mxu0  ;;  %v2217_v39 = vadd.f32 0.2548296, %v2205_v2  ;;  %v10218_v42 = vld [vmem:[%s16606_s8 + $0x230] sm:$0xff]  }
 0x4ee   : > { %5850 = vmatprep.mubr.bf16.mxu0 %v13814_v37  ;;  %9318 = vmatpush3.bf16.msra.mxu0 %v10209_v11  ;;  %v2182_v53 = vmul.f32 %v13951_v10, %v2170_v43  ;;  %v2059_v11 = vsel %vm2047_vm15, 1.0, %v17219_v13  ;;  %v2173_v1 = vadd.f32 1.4214138, %v2161_v16  ;;  %v2310_v47 = vmul.f32 %v2298_v22, %v13917_v56  ;;  %v17222_v43 = vld [vmem:[#allocation87_spill] sm:$0xff]  ;;  %v14028_v33 = vpop.f32.mrb[29].mxu0 }
 0x4ef   : > { %9319 = vmatprep.subr.bf16.mxu0 %v10213_v27  ;;  %v2196_v49 = vadd.f32 -0.28449672, %v2184_v45  ;;  %9480 = vmatpush3.bf16.msra.mxu1 %v10216_v19  ;;  %v2287_v40 = vmul.f32 %v10454_v31, %v2227_v44  ;;  %v14039_v56 = vpop.f32.mrb[30].mxu0  ;;  %10463 = vpow2.f32 %v2270_v36  ;;  %v14046_v22 = vmul.f32 0.70710677, %v14013_v7 }
 0x4f0   : > { %v2194_v27 = vadd.f32 -0.28449672, %v2182_v53  ;;  %9569 = vmatprep.subr.bf16.mxu1 %v10223_v24  ;;  %v14030_v37 = vpop.eup %10455  ;;  %v2185_v19 = vmul.f32 %v13974_v4, %v2173_v1  ;;  %v14048_v12 = vpop.f32.mrb[31].mxu0  ;;  %v2228_v45 = vmul.f32 %v13837_v35, %v2216_v8  ;;  %10465 = vpow2.f32 %v2276_v46  ;;  %v10221_v35 = vld [vmem:[%s16606_s8 + $0x340] sm:$0xff]  }
 0x4f1   : > { %6102 = vmatmul.mubr.bf16.gmra.mrb[116].mxu1 %v17222_v43  ;;  %v2208_v60 = vmul.f32 %v13946_v34, %v2196_v49  ;;  %v10458_v2 = vpop.eup %10457  ;;  %v2299_v24 = vsub.f32 1.0, %v2287_v40  ;;  %v2322_v31 = vadd.f32 1.0, %v2310_v47  ;;  %v2229_v44 = vmul.f32 %v13875_v52, %v2217_v39  ;;  %v14056_v49 = vpop.f32.mrb[16].mxu1 }
 0x4f2   : > { %6109 = vmatprep.mubr.bf16.mxu1 %v12974_v59  ;;  %9320 = vmatpush3.bf16.msra.mxu0 %v10214_v17  ;;  %v2206_v15 = vmul.f32 %v13951_v10, %v2194_v27  ;;  %v10219_v59 = vld [vmem:[%s16606_s8 + $0x278] sm:$0xff]   ;;  %v2197_v16 = vadd.f32 -0.28449672, %v2185_v19  ;;  %v2135_v17 = vmul.f32 1.0614054, %v14030_v37  ;;  %v14066_v8 = vmul.f32 0.5, %v13765_v55 }
 0x4f3   : > { %9321 = vmatprep.subr.bf16.mxu0 %v10217_v21  ;;  %v2311_v36 = vmul.f32 %v2299_v24, %v2059_v11  ;;  %v2272_v53 = vmul.f32 1.442695, %v2255_v57  ;;  %v10220_v21 = vld [vmem:[%s16606_s8 + $0x238] sm:$0xff]   ;;  %v2220_v46 = vadd.f32 0.2548296, %v2208_v60  ;;  %v14069_v1 = vpop.f32.mrb[17].mxu1  ;;  %v10460_v57 = vpop.eup %10459  ;;  %v14079_v55 = vpack.c.bf16 %v13821_v6, %v13788_v30 }
 0x4f4   : > { %v2209_v52 = vmul.f32 %v13974_v4, %v2197_v16  ;;  %v2147_v11 = vadd.f32 -1.4531521, %v2135_v17  ;;  %v2218_v39 = vadd.f32 0.2548296, %v2206_v15  ;;  %v14073_v40 = vand.u32 2147483647, %v14046_v22 }
 0x4f5   : > { %5851 = vmatmul.mubr.bf16.gmra.mrb[136].mxu0 %v13816_v41  ;;  %v2323_v47 = vadd.f32 1.0, %v2311_v36  ;;  %v14075_v27 = vpop.f32.mrb[18].mxu1  ;;  %17223 = vst [vmem:[#allocation103_spill] sm:$0xff] %v14079_v55  ;;  %v2288_v60 = vmul.f32 %v10458_v2, %v2228_v45  ;;  %v14088_v15 = vpop.f32.mrb[32].mxu0  ;;  %v14091_v17 = vmul.f32 %v2322_v31, %v13827_v29  ;;  %v2289_v36 = vmul.f32 %v10460_v57, %v2229_v44  ;;  %v17227_v2 = vld [vmem:[#allocation88_spill] sm:$0xff] }
 0x4f6   : > { %5858 = vmatprep.mubr.bf16.mxu0 %v13835_v51  ;;  %9322 = vmatpush3.bf16.msra.mxu0 %v10218_v42  ;;  %v2221_v19 = vadd.f32 0.2548296, %v2209_v52  ;;  %v2159_v24 = vmul.f32 %v14030_v37, %v2147_v11  ;;  %v14084_v42 = vadd.f32 %v13648_v5, %v13996_v62  ;;  %v14086_v16 = vpop.f32.mrb[19].mxu1  ;;  %v2092_v6 = vmul.f32 0.3275911, %v14073_v40  ;;  %v10462_v11 = vpop.eup %10461 }
 0x4f7   : > { %9323 = vmatprep.subr.bf16.mxu0 %v10219_v59  ;;  %17225 = vst [vmem:[#allocation105_spill] sm:$0xff] %v14091_v17  ;;  %v14094_v30 = vmul.f32 %v2323_v47, %v13893_v14  ;;  %v14098_v59 = vpop.f32.mrb[33].mxu0  ;;  %v2232_v62 = vmul.f32 %v13946_v34, %v2220_v46  ;;  %vm2050_vm7 = vcmp.ge.f32.partialorder %v13791_v28, 0.0  ;;  %v2230_v31 = vmul.f32 %v13951_v10, %v2218_v39 }
 0x4f8   : > { %17224 = vst [vmem:[#allocation104_spill] sm:$0xff] %v14084_v42  ;;  %v2171_v45 = vadd.f32 1.4214138, %v2159_v24  ;;  %v14104_v29 = vpop.f32.mrb[34].mxu0  ;;  %10467 = vpow2.f32 %v2272_v53  ;;  %v2104_v44 = vadd.f32 1.0, %v2092_v6  ;;  %vm2053_vm13 = vcmp.ge.f32.partialorder %v13804_v18, 0.0 }
 0x4f9   : > { %17226 = vst [vmem:[#allocation106_spill] sm:$0xff] %v14094_v30  ;;  %6110 = vmatmul.mubr.bf16.gmra.mrb[120].mxu1 %v17227_v2  ;;  %v14109_v52 = vpop.f32.mrb[35].mxu0  ;;  %v2233_v34 = vmul.f32 %v13974_v4, %v2221_v19  ;;  %v14115_v57 = vmul.f32 0.70710677, %v14084_v42  ;;  %v10464_v47 = vpop.eup %10463  ;;  %v2300_v24 = vsub.f32 1.0, %v2288_v60  ;;  %v2301_v10 = vsub.f32 1.0, %v2289_v36 }
 0x4fa   : > { %6231 = vmatprep.mubr.bf16.mxu1 %v13795_v63  ;;  %9324 = vmatpush3.bf16.msra.mxu0 %v10220_v21  ;;  %v2183_v46 = vmul.f32 %v14030_v37, %v2171_v45  ;;  %v14117_v21 = vpop.f32.mrb[20].mxu1  ;;  %10469 = vrcp.f32 %v2104_v44  ;;  %v14121_v53 = vadd.f32 %v14004_v38, %v13648_v5  ;;  %v10466_v4 = vpop.eup %10465  ;;  %v2064_v39 = vsel %vm2052_vm11, 1.0, %v17219_v13  ;;  %v17229_v45 = vld [vmem:[#allocation89_spill] sm:$0xff]  ;;  %v10224_v38 = vld [vmem:[%s16606_s8 + $0x480] sm:$0xff]  }
 0x4fb   : > { %9413 = vmatprep.subr.bf16.mxu0 %v10221_v35  ;;  %v14123_v35 = vpop.f32.mrb[21].mxu1  ;;  %v2292_v19 = vmul.f32 %v10462_v11, %v2232_v62  ;;  %v14130_v6 = vmul.f32 0.5, %v13771_v25  ;;  %v2062_v44 = vsel %vm2050_vm7, 1.0, %v17219_v13  ;;  %v2290_v14 = vmul.f32 %v10464_v47, %v2230_v31  ;;  %v10227_v11 = vld [vmem:[%s16606_s8 + $0x4c8] sm:$0xff]  }
 0x4fc   : > { %17228 = vst [vmem:[#allocation107_spill] sm:$0xff] %v14121_v53  ;;  %v2195_v60 = vadd.f32 -0.28449672, %v2183_v46  ;;  %v14132_v36 = vpop.f32.mrb[22].mxu1  ;;  %v2248_v54 = vsub.f32 0.0, %v14073_v40  ;;  %v2065_v46 = vsel %vm2053_vm13, 1.0, %v17219_v13  ;;  %v2293_v63 = vmul.f32 %v10466_v4, %v2233_v34 }
 0x4fd   : > { %5859 = vmatmul.mubr.bf16.gmra.mrb[140].mxu0 %v14079_v55  ;;  %v14143_v62 = vand.u32 2147483647, %v14115_v57  ;;  %v14145_v25 = vpop.f32.mrb[23].mxu1  ;;  %vm2051_vm3 = vcmp.ge.f32.partialorder %v13897_v23, 0.0  ;;  %v2312_v47 = vmul.f32 %v2300_v24, %v13842_v20  ;;  %v2313_v17 = vmul.f32 %v2301_v10, %v13923_v61 }
 0x4fe   : > { %5866 = vmatprep.mubr.bf16.mxu0 %v17229_v45  ;;  %v2207_v28 = vmul.f32 %v14030_v37, %v2195_v60  ;;  %v14161_v2 = vmul.f32 0.70710677, %v14121_v53  ;;  %v2304_v34 = vsub.f32 1.0, %v2292_v19  ;;  %v14168_v60 = vadd.f32 %v13648_v5, %v14015_v58 }
 0x4ff   : > { %v14155_v31 = vpop.f32.mrb[36].mxu0  ;;  %v2090_v30 = vmul.f32 0.3275911, %v14143_v62  ;;  %v14172_v20 = vadd.f32 %v14028_v33, %v14024_v26  ;;  %v2302_v24 = vsub.f32 1.0, %v2290_v14  ;;  %v2260_v10 = vmul.f32 %v2248_v54, %v14073_v40  ;;  %v10230_v33 = vld [vmem:[%s16606_s8 + $0x4d0] sm:$0xff]  }
 0x500   : > { %v14164_v18 = vpop.f32.mrb[37].mxu0  ;;  %v2219_v4 = vadd.f32 0.2548296, %v2207_v28  ;;  %v14182_v5 = vand.u32 2147483647, %v14161_v2  ;;  %v2305_v26 = vsub.f32 1.0, %v2293_v63 }
 0x501   : > { %6232 = vmatmul.mubr.bf16.vlgmr.msra.gmra.mrb[124].mxu1 %v13773_v0  ;;  %v14175_v61 = vpop.f32.mrb[38].mxu0  ;;  %v10228_v0 = vld [vmem:[%s16606_s8 + $0x488] sm:$0xff]   ;;  %v2102_v19 = vadd.f32 1.0, %v2090_v30  ;;  %v2063_v14 = vsel %vm2051_vm3, 1.0, %v17219_v13  ;;  %v2324_v28 = vadd.f32 1.0, %v2312_v47  ;;  %v17230_v63 = vld [vmem:[#allocation90_spill] sm:$0xff] }
 0x502   : > { %6239 = vmatprep.mubr.bf16.mxu1 %v13816_v41  ;;  %9570 = vmatpush3.bf16.msra.mxu1 %v10224_v38  ;;  %v14184_v58 = vpop.f32.mrb[39].mxu0  ;;  %v14190_v38 = vmul.f32 0.5, %v13865_v48  ;;  %v2231_v40 = vmul.f32 %v14030_v37, %v2219_v4  ;;  %v10468_v54 = vpop.eup %10467  ;;  %v2325_v41 = vadd.f32 1.0, %v2313_v17  ;;  %v2316_v48 = vmul.f32 %v2304_v34, %v2064_v39  ;;  %v10232_v17 = vld [vmem:[%s16606_s8 + $0x490] sm:$0xff]  }
 0x503   : > { %9571 = vmatprep.subr.bf16.mxu1 %v10227_v11  ;;  %10471 = vrcp.f32 %v2102_v19  ;;  %v2093_v11 = vmul.f32 0.3275911, %v14182_v5  ;;  %v14203_v53 = vmul.f32 0.70710677, %v14168_v60  ;;  %v14207_v37 = vadd.f32 %v14048_v12, %v14039_v56  ;;  %v10233_v56 = vld [vmem:[%s16606_s8 + $0x4d8] sm:$0xff]  }
 0x504   : > { %v14196_v30 = vpop.f32.mrb[24].mxu1  ;;  %v2291_v42 = vmul.f32 %v10468_v54, %v2231_v40  ;;  %v14213_v47 = vpop.eup %10469  ;;  %v2314_v4 = vmul.f32 %v2302_v24, %v2062_v44  ;;  %v2282_v39 = vmul.f32 1.442695, %v2260_v10  ;;  %v14217_v19 = vadd.f32 %v14069_v1, %v14056_v49  ;;  %v17232_v24 = vld [vmem:[#allocation54_spill] sm:$0xff] }
 0x505   : > { %v14199_v43 = vpop.f32.mrb[25].mxu1  ;;  %5867 = vmatmul.mubr.bf16.gmra.mrb[144].mxu0 %v17230_v63  ;;  %v2105_v34 = vadd.f32 1.0, %v2093_v11  ;;  %v2317_v12 = vmul.f32 %v2305_v26, %v2065_v46  ;;  %v2140_v54 = vmul.f32 1.0614054, %v14213_v47  ;;  %v14227_v44 = vmul.f32 %v2324_v28, %v13824_v3 }
 0x506   : > { %v9014_v23 = vpop.f32.mrb[26].mxu1  ;;  %5988 = vmatprep.mubr.bf16.mxu0 %v13109_v32  ;;  %9572 = vmatpush3.bf16.msra.mxu1 %v10228_v0  ;;  %v2303_v0 = vsub.f32 1.0, %v2291_v42  ;;  %v14224_v32 = vand.u32 2147483647, %v14203_v53  ;;  %v14230_v10 = vmul.f32 %v2325_v41, %v17232_v24  ;;  %v2246_v49 = vsub.f32 0.0, %v14143_v62  ;;  %v10222_v42 = vld [vmem:[%s16606_s8 + $0x300] sm:$0xff]  }
 0x507   : > { %v9015_v40 = vpop.f32.mrb[27].mxu1  ;;  %9573 = vmatprep.subr.bf16.mxu1 %v10230_v33  ;;  %17231 = vst [vmem:[#allocation89_spill] sm:$0xff] %v14227_v44  ;;  %10473 = vrcp.f32 %v2105_v34  ;;  %v2328_v46 = vadd.f32 1.0, %v2316_v48  ;;  %v2152_v26 = vadd.f32 -1.4531521, %v2140_v54  ;;  %v2326_v41 = vadd.f32 1.0, %v2314_v4 }
 0x508   : > { %17233 = vst [vmem:[#allocation54_spill] sm:$0xff] %v14230_v10  ;;  %v8913_v1 = vpop.f32.mrb[40].mxu0  ;;  %v2315_v33 = vmul.f32 %v2303_v0, %v2063_v14  ;;  %v2091_v11 = vmul.f32 0.3275911, %v14224_v32  ;;  %v14241_v28 = vadd.f32 %v14086_v16, %v14075_v27  ;;  %v14249_v48 = vadd.f32 %v14109_v52, %v14104_v29  ;;  %v10225_v34 = vld [vmem:[%s16606_s8 + $0x348] sm:$0xff]  }
 0x509   : > { %6240 = vmatmul.mubr.bf16.gmra.mrb[128].mxu1 %v13793_v9  ;;  %v8914_v3 = vpop.f32.mrb[41].mxu0  ;;  %v14245_v9 = vadd.f32 %v14098_v59, %v14088_v15  ;;  %v2164_v4 = vmul.f32 %v14213_v47, %v2152_v26  ;;  %10475 = vpow2.f32 %v2282_v39  ;;  %v10234_v15 = vld [vmem:[%s16606_s8 + $0x498] sm:$0xff]   ;;  %v2258_v29 = vmul.f32 %v2246_v49, %v14143_v62  ;;  %v17234_v39 = vld [vmem:[#allocation58_spill] sm:$0xff]  ;;  %v17236_v49 = vld [vmem:[#allocation51_spill] sm:$0xff] }
 0x50a   : > { %6247 = vmatprep.mubr.bf16.mxu1 %v14079_v55  ;;  %9574 = vmatpush3.bf16.msra.mxu1 %v10232_v17  ;;  %v8916_v14 = vpop.f32.mrb[42].mxu0  ;;  %v2329_v17 = vadd.f32 1.0, %v2317_v12  ;;  %v2103_v27 = vadd.f32 1.0, %v2091_v11  ;;  %v2327_v59 = vadd.f32 1.0, %v2315_v33  ;;  %v14261_v52 = vadd.f32 %v14123_v35, %v14117_v21  ;;  %v10226_v21 = vld [vmem:[%s16606_s8 + $0x308] sm:$0xff]   ;;  %v10229_v33 = vld [vmem:[%s16606_s8 + $0x350] sm:$0xff]  }
 0x50b   : > { %9575 = vmatprep.subr.bf16.mxu1 %v10233_v56  ;;  %v8917_v16 = vpop.f32.mrb[43].mxu0  ;;  %v14265_v56 = vadd.f32 %v14145_v25, %v14132_v36  ;;  %v14269_v54 = vmul.f32 %v2328_v46, %v14033_v50  ;;  %v2176_v24 = vadd.f32 1.4214138, %v2164_v4  ;;  %v2249_v26 = vsub.f32 0.0, %v14182_v5  ;;  %v17245_v55 = vld [vmem:[#allocation39_spill] sm:$0xff] }
 0x50c   : > { %v9017_v0 = vpop.f32.mrb[28].mxu1  ;;  %10477 = vrcp.f32 %v2103_v27  ;;  %v14280_v36 = vadd.f32 %v14164_v18, %v14155_v31  ;;  %v14284_v50 = vadd.f32 %v14184_v58, %v14175_v61  ;;  %v14288_v25 = vadd.f32 %v14199_v43, %v14196_v30  ;;  %v10237_v31 = vld [vmem:[%s16606_s8 + $0x4e0] sm:$0xff]  }
 0x50d   : > { %v9018_v12 = vpop.f32.mrb[29].mxu1  ;;  %5989 = vmatmul.mubr.bf16.vlgmr.msra.gmra.mrb[148].mxu0 %v17234_v39  ;;  %17235 = vst [vmem:[#allocation58_spill] sm:$0xff] %v14269_v54  ;;  %v14276_v35 = vpop.eup %10471  ;;  %v14299_v18 = vmul.f32 %v2329_v17, %v14130_v6  ;;  %v2188_v61 = vmul.f32 %v14213_v47, %v2176_v24  ;;  %v14303_v58 = vadd.f32 %v8914_v3, %v8913_v1  ;;  %v2278_v11 = vmul.f32 1.442695, %v2258_v29  ;;  %v17239_v17 = vld [vmem:[#allocation101_spill] sm:$0xff]  ;;  %v10240_v1 = vld [vmem:[%s16606_s8 + $0x4e8] sm:$0xff]  }
 0x50e   : > { %9414 = vmatpush3.bf16.msra.mxu0 %v10222_v42  ;;  %v9020_v62 = vpop.f32.mrb[30].mxu1  ;;  %5996 = vmatprep.mubr.bf16.mxu0 %v17236_v49  ;;  %v14290_v42 = vadd.f32 %v9015_v40, %v9014_v23  ;;  %v2138_v43 = vmul.f32 1.0614054, %v14276_v35  ;;  %v10238_v23 = vld [vmem:[%s16606_s8 + $0x4a0] sm:$0xff]   ;;  %v14309_v40 = vmul.f32 %v2327_v59, %v14190_v38  ;;  %v14313_v6 = vadd.f32 %v9018_v12, %v9017_v0  ;;  %v10235_v29 = vld [vmem:[%s16606_s8 + $0x358] sm:$0xff]  }
 0x50f   : > { %v9021_v46 = vpop.f32.mrb[31].mxu1  ;;  %9415 = vmatprep.subr.bf16.mxu0 %v10225_v34  ;;  %17237 = vst [vmem:[#allocation108_spill] sm:$0xff] %v14299_v18  ;;  %9576 = vmatpush3.bf16.msra.mxu1 %v10234_v15  ;;  %v14311_v34 = vadd.f32 %v8917_v16, %v8916_v14  ;;  %v14320_v3 = vmul.f32 %v2326_v41, %v14066_v8  ;;  %v2200_v27 = vadd.f32 -0.28449672, %v2188_v61  ;;  %v10231_v14 = vld [vmem:[%s16606_s8 + $0x310] sm:$0xff]   ;;  %v2247_v59 = vsub.f32 0.0, %v14224_v32 }
 0x510   : > { %v8919_v30 = vpop.f32.mrb[44].mxu0  ;;  %17238 = vst [vmem:[#allocation109_spill] sm:$0xff] %v14309_v40  ;;  %v2150_v15 = vadd.f32 -1.4531521, %v2138_v43  ;;  %v14322_v39 = vadd.f32 %v9021_v46, %v9020_v62  ;;  %v2261_v0 = vmul.f32 %v2249_v26, %v14182_v5  ;;  %9577 = vmatprep.subr.bf16.mxu1 %v10237_v31  ;;  %v10242_v46 = vld [vmem:[%s16606_s8 + $0x4a8] sm:$0xff]   ;;  %v10236_v31 = vld [vmem:[%s16606_s8 + $0x318] sm:$0xff]   ;;  %10479 = vpow2.f32 %v2278_v11 }
 0x511   : > { %6248 = vmatmul.mubr.bf16.gmra.mrb[132].mxu1 %v17239_v17  ;;  %v8920_v4 = vpop.f32.mrb[45].mxu0  ;;  %17240 = vst [vmem:[#allocation101_spill] sm:$0xff] %v14320_v3  ;;  %v14328_v16 = vpop.eup %10473  ;;  %v2212_v24 = vmul.f32 %v14213_v47, %v2200_v27  ;;  %v17241_v61 = vld [vmem:[#allocation91_spill] sm:$0xff]  ;;  %v10243_v43 = vld [vmem:[%s16606_s8 + $0x4f0] sm:$0xff]   ;;  %v10239_v12 = vld [vmem:[%s16606_s8 + $0x360] sm:$0xff]   ;;  %vm2056_vm0 = vcmp.ge.f32.partialorder %v14046_v22, 0.0 }
 0x512   : > { %6255 = vmatprep.mubr.bf16.mxu1 %v17230_v63  ;;  %v8922_v38 = vpop.f32.mrb[46].mxu0  ;;  %9416 = vmatpush3.bf16.msra.mxu0 %v10226_v21  ;;  %v14332_v8 = vadd.f32 %v8920_v4, %v8919_v30  ;;  %v2162_v62 = vmul.f32 %v14276_v35, %v2150_v15  ;;  %v2141_v5 = vmul.f32 1.0614054, %v14328_v16  ;;  %v10247_v11 = vld [vmem:[%s16606_s8 + $0x4f8] sm:$0xff]   ;;  %vm2054_vm9 = vcmp.ge.f32.partialorder %v14115_v57, 0.0  ;;  %v17250_v57 = vld [vmem:[#allocation79_spill] sm:$0xff] }
 0x513   : > { %v8923_v41 = vpop.f32.mrb[47].mxu0  ;;  %9417 = vmatprep.subr.bf16.mxu0 %v10229_v33  ;;  %9578 = vmatpush3.bf16.msra.mxu1 %v10238_v23  ;;  %v10476_v17 = vpop.eup %10475  ;;  %v2224_v4 = vadd.f32 0.2548296, %v2212_v24  ;;  %vm2057_vm1 = vcmp.ge.f32.partialorder %v14161_v2, 0.0  ;;  %v10252_v22 = vld [vmem:[%s16606_s8 + $0x338] sm:$0xff]   ;;  %vm2055_vm12 = vcmp.ge.f32.partialorder %v14203_v53, 0.0 }
 0x514   : > { %v14342_v26 = vadd.f32 %v8923_v41, %v8922_v38  ;;  %v9023_v21 = vpop.f32.mrb[32].mxu1  ;;  %9579 = vmatprep.subr.bf16.mxu1 %v10240_v1  ;;  %v2174_v27 = vadd.f32 1.4214138, %v2162_v62  ;;  %v2153_v15 = vadd.f32 -1.4531521, %v2141_v5  ;;  %v17242_v38 = vld [vmem:[#allocation52_spill] sm:$0xff]  ;;  %v2259_v62 = vmul.f32 %v2247_v59, %v14224_v32 }
 0x515   : > { %v9024_v33 = vpop.f32.mrb[33].mxu1  ;;  %5997 = vmatmul.mubr.bf16.gmra.mrb[152].mxu0 %v17241_v61  ;;  %v2284_v41 = vmul.f32 1.442695, %v2261_v0  ;;  %v10244_v0 = vld [vmem:[%s16606_s8 + $0x4b0] sm:$0xff]   ;;  %v2236_v32 = vmul.f32 %v14213_v47, %v2224_v4  ;;  %v10245_v47 = vld [vmem:[%s16606_s8 + $0x368] sm:$0xff]   ;;  %v2032_v2 = vmul.f32 0.5, %v14013_v7 }
 0x516   : > { %6004 = vmatprep.mubr.bf16.mxu0 %v17242_v38  ;;  %9418 = vmatpush3.bf16.msra.mxu0 %v10231_v14  ;;  %v14359_v61 = vadd.f32 %v9024_v33, %v9023_v21  ;;  %v9026_v1 = vpop.f32.mrb[34].mxu1  ;;  %v14364_v30 = vpop.eup %10477  ;;  %v2186_v23 = vmul.f32 %v14276_v35, %v2174_v27  ;;  %v2165_v24 = vmul.f32 %v14328_v16, %v2153_v15  ;;  %v17243_v15 = vld [vmem:[#allocation85_spill] sm:$0xff]  ;;  %v17299_v3 = vld [vmem:[#allocation68_spill] sm:$0xff] }
 0x517   : > { %9419 = vmatprep.subr.bf16.mxu0 %v10235_v29  ;;  %v9027_v5 = vpop.f32.mrb[35].mxu1  ;;  %9580 = vmatpush3.bf16.msra.mxu1 %v10242_v46  ;;  %v2139_v29 = vmul.f32 1.0614054, %v14364_v30  ;;  %10481 = vpow2.f32 %v2284_v41 }
 0x518   : > { %v8925_v14 = vpop.f32.mrb[48].mxu0  ;;  %v14373_v21 = vadd.f32 %v9027_v5, %v9026_v1  ;;  %9581 = vmatprep.subr.bf16.mxu1 %v10243_v43  ;;  %v2198_v59 = vadd.f32 -0.28449672, %v2186_v23  ;;  %v2177_v46 = vadd.f32 1.4214138, %v2165_v24 }
 0x519   : > { %6256 = vmatmul.mubr.bf16.gmra.mrb[136].mxu1 %v13835_v51  ;;  %v8926_v33 = vpop.f32.mrb[49].mxu0  ;;  %v10241_v51 = vld [vmem:[%s16606_s8 + $0x320] sm:$0xff]   ;;  %v2151_v43 = vadd.f32 -1.4531521, %v2139_v29  ;;  %v2280_v24 = vmul.f32 1.442695, %v2259_v62 }
 0x51a   : > { %v14380_v27 = vadd.f32 %v8926_v33, %v8925_v14  ;;  %6263 = vmatprep.mubr.bf16.mxu1 %v17243_v15  ;;  %v8928_v63 = vpop.f32.mrb[50].mxu0  ;;  %9420 = vmatpush3.bf16.msra.mxu0 %v10236_v31  ;;  %v2210_v23 = vmul.f32 %v14276_v35, %v2198_v59  ;;  %v2189_v4 = vmul.f32 %v14328_v16, %v2177_v46  ;;  %v10248_v31 = vld [vmem:[%s16606_s8 + $0x4b8] sm:$0xff]   ;;  %v17244_v29 = vld [vmem:[#allocation92_spill] sm:$0xff]  ;;  %v10255_v33 = vld [vmem:[%s16606_s8 + $0x5c0] sm:$0xff]  }
 0x51b   : > { %v8929_v1 = vpop.f32.mrb[51].mxu0  ;;  %9421 = vmatprep.subr.bf16.mxu0 %v10239_v12  ;;  %9582 = vmatpush3.bf16.msra.mxu1 %v10244_v0  ;;  %v2163_v41 = vmul.f32 %v14364_v30, %v2151_v43  ;;  %v2296_v59 = vmul.f32 %v10476_v17, %v2236_v32  ;;  %v10249_v17 = vld [vmem:[%s16606_s8 + $0x370] sm:$0xff]   ;;  %10483 = vpow2.f32 %v2280_v24 }
 0x51c   : > { %v9029_v5 = vpop.f32.mrb[36].mxu1  ;;  %v14395_v14 = vadd.f32 %v8929_v1, %v8928_v63  ;;  %9583 = vmatprep.subr.bf16.mxu1 %v10247_v11  ;;  %v2222_v62 = vadd.f32 0.2548296, %v2210_v23  ;;  %v2201_v46 = vadd.f32 -0.28449672, %v2189_v4  ;;  %v10246_v63 = vld [vmem:[%s16606_s8 + $0x328] sm:$0xff]  }
 0x51d   : > { %v9030_v12 = vpop.f32.mrb[37].mxu1  ;;  %6005 = vmatmul.mubr.bf16.gmra.mrb[156].mxu0 %v17244_v29  ;;  %v2175_v43 = vadd.f32 1.4214138, %v2163_v41  ;;  %v14410_v11 = vld [vmem:[%s16605_s7] ss:$0 sm:$0xff]  ;;  %v10480_v41 = vpop.eup %10479  ;;  %v17246_v24 = vld [vmem:[#allocation84_spill] sm:$0xff] }
 0x51e   : > { %v14401_v0 = vadd.f32 %v9030_v12, %v9029_v5  ;;  %v9032_v15 = vpop.f32.mrb[38].mxu1  ;;  %6012 = vmatprep.mubr.bf16.mxu0 %v17245_v55  ;;  %9422 = vmatpush3.bf16.msra.mxu0 %v10241_v51  ;;  %v2234_v32 = vmul.f32 %v14276_v35, %v2222_v62  ;;  %v2213_v51 = vmul.f32 %v14328_v16, %v2201_v46  ;;  %v2308_v12 = vsub.f32 1.0, %v2296_v59 }
 0x51f   : > { %v9033_v1 = vpop.f32.mrb[39].mxu1  ;;  %9423 = vmatprep.subr.bf16.mxu0 %v10245_v47  ;;  %9584 = vmatpush3.bf16.msra.mxu1 %v10248_v31  ;;  %v2187_v5 = vmul.f32 %v14364_v30, %v2175_v43  ;;  %v3213_v35 = vadd.f32 %v14172_v20, %v14410_v11  ;;  %v10250_v31 = vld [vmem:[%s16606_s8 + $0x330] sm:$0xff]   ;;  %v3216_v20 = vadd.f32 %v14207_v37, %v14410_v11 }
 0x520   : > { %v14417_v23 = vadd.f32 %v9033_v1, %v9032_v15  ;;  %v8947_v4 = vpop.f32.mrb[52].mxu0  ;;  %9673 = vmatprep.subr.bf16.mxu1 %v10255_v33  ;;  %v2225_v29 = vadd.f32 0.2548296, %v2213_v51  ;;  %v2294_v46 = vmul.f32 %v10480_v41, %v2234_v32  ;;  %v10251_v33 = vld [vmem:[%s16606_s8 + $0x378] sm:$0xff]   ;;  %v2068_v32 = vsel %vm2056_vm0, 1.0, %v17219_v13 }
 0x521   : > { %6264 = vmatmul.mubr.bf16.gmra.mrb[140].mxu1 %v17229_v45  ;;  %v8948_v47 = vpop.f32.mrb[53].mxu0  ;;  %v2199_v43 = vadd.f32 -0.28449672, %v2187_v5 }
 0x522   : > { %v8949_v62 = vadd.f32 %v8948_v47, %v8947_v4  ;;  %6271 = vmatprep.mubr.bf16.mxu1 %v17246_v24  ;;  %v8950_v15 = vpop.f32.mrb[54].mxu0  ;;  %9424 = vmatpush3.bf16.msra.mxu0 %v10246_v63  ;;  %v2237_v59 = vmul.f32 %v14328_v16, %v2225_v29  ;;  %v10482_v4 = vpop.eup %10481  ;;  %v17247_v47 = vld [vmem:[#allocation93_spill] sm:$0xff]  ;;  %v2320_v16 = vmul.f32 %v2308_v12, %v2068_v32  ;;  %v10253_v12 = vld [vmem:[%s16606_s8 + $0x440] sm:$0xff]   ;;  %v17251_v24 = vld [vmem:[#allocation107_spill] sm:$0xff] }
 0x523   : > { %v8951_v45 = vpop.f32.mrb[55].mxu0  ;;  %9425 = vmatprep.subr.bf16.mxu0 %v10249_v17  ;;  %v2211_v17 = vmul.f32 %v14364_v30, %v2199_v43  ;;  %v2033_v49 = vmul.f32 0.5, %v17251_v24 }
 0x524   : > { %v3294_v1 = vadd.f32 %v8949_v62, %v3213_v35  ;;  %v8952_v51 = vadd.f32 %v8951_v45, %v8950_v15  ;;  %v14434_v63 = vpop.f32.mrb[40].mxu1  ;;  %v2297_v37 = vmul.f32 %v10482_v4, %v2237_v59  ;;  %v17248_v35 = vld [vmem:[#allocation44_spill] sm:$0xff]  ;;  %v2306_v62 = vsub.f32 1.0, %v2294_v46  ;;  %v17249_v4 = vld [vmem:[#allocation86_spill] sm:$0xff] }
 0x525   : > { %v14441_v5 = vpop.f32.mrb[41].mxu1  ;;  %6013 = vmatmul.mubr.bf16.gmra.mrb[160].mxu0 %v17247_v47  ;;  %v2223_v15 = vadd.f32 0.2548296, %v2211_v17  ;;  %v2066_v46 = vsel %vm2054_vm9, 1.0, %v17219_v13  ;;  %v2332_v32 = vadd.f32 1.0, %v2320_v16  ;;  %v3224_v16 = vadd.f32 %v14249_v48, %v14410_v11  ;;  %v17255_v48 = vld [vmem:[#allocation46_spill] sm:$0xff] }
 0x526   : > { %v3297_v41 = vadd.f32 %v8952_v51, %v3216_v20  ;;  %v14445_v29 = vpop.f32.mrb[42].mxu1  ;;  %6020 = vmatprep.mubr.bf16.mxu0 %v17248_v35  ;;  %9426 = vmatpush3.bf16.msra.mxu0 %v10250_v31  ;;  %v14457_v45 = vadd.f32 %v14217_v19, %v3294_v1  ;;  %v2309_v59 = vsub.f32 1.0, %v2297_v37  ;;  %v10484_v1 = vpop.eup %10483  ;;  %v17314_v35 = vld [vmem:[#allocation73_spill] sm:$0xff] }
 0x527   : > { %v14451_v43 = vpop.f32.mrb[43].mxu1  ;;  %9427 = vmatprep.subr.bf16.mxu0 %v10251_v33  ;;  %v2069_v33 = vsel %vm2057_vm1, 1.0, %v17219_v13  ;;  %v2235_v51 = vmul.f32 %v14364_v30, %v2223_v15  ;;  %v14486_v24 = vmul.f32 %v2332_v32, %v2032_v2 }
 0x528   : > { %v8953_v20 = vpop.f32.mrb[56].mxu0  ;;  %v14460_v31 = vadd.f32 %v14241_v28, %v3297_v41  ;;  %v2321_v17 = vmul.f32 %v2309_v59, %v2069_v33  ;;  %v3221_v28 = vadd.f32 %v14245_v9, %v14410_v11  ;;  %v2318_v41 = vmul.f32 %v2306_v62, %v2066_v46  ;;  %v17252_v62 = vld [vmem:[#allocation59_spill] sm:$0xff] }
 0x529   : > { %6272 = vmatmul.mubr.bf16.gmra.mrb[144].mxu1 %v17249_v4  ;;  %v8954_v19 = vpop.f32.mrb[57].mxu0  ;;  %v2295_v30 = vmul.f32 %v10484_v1, %v2235_v51  ;;  %17253 = vst [vmem:[#allocation91_spill] sm:$0xff] %v14486_v24 }
 0x52a   : > { %v8955_v47 = vadd.f32 %v8954_v19, %v8953_v20  ;;  %6393 = vmatprep.mubr.bf16.mxu1 %v17250_v57  ;;  %v8956_v37 = vpop.f32.mrb[58].mxu0  ;;  %9428 = vmatpush3.bf16.msra.mxu0 %v10252_v22  ;;  %v2333_v4 = vadd.f32 1.0, %v2321_v17  ;;  %v2067_v22 = vsel %vm2055_vm12, 1.0, %v17219_v13  ;;  %v10256_v19 = vld [vmem:[%s16606_s8 + $0x580] sm:$0xff]   ;;  %v2330_v1 = vadd.f32 1.0, %v2318_v41  ;;  %v17257_v41 = vld [vmem:[#allocation31_spill] sm:$0xff] }
 0x52b   : > { %v8957_v15 = vpop.f32.mrb[59].mxu0  ;;  %9517 = vmatprep.subr.bf16.mxu0 %v10253_v12  ;;  %v2307_v20 = vsub.f32 1.0, %v2295_v30 }
 0x52c   : > { %v3302_v59 = vadd.f32 %v8955_v47, %v3221_v28  ;;  %v8958_v33 = vadd.f32 %v8957_v15, %v8956_v37  ;;  %v14478_v9 = vpop.f32.mrb[44].mxu1  ;;  %v14488_v12 = vmul.f32 %v2333_v4, %v2033_v49  ;;  %v10259_v49 = vld [vmem:[%s16606_s8 + $0x5c8] sm:$0xff]   ;;  %v17256_v37 = vld [vmem:[#allocation104_spill] sm:$0xff]  ;;  %v3229_v4 = vadd.f32 %v14280_v36, %v14410_v11 }
 0x52d   : > { %v14483_v7 = vpop.f32.mrb[45].mxu1  ;;  %6021 = vmatmul.mubr.bf16.gmra.mrb[164].mxu0 %v17252_v62  ;;  %v2319_v17 = vmul.f32 %v2307_v20, %v2067_v22  ;;  %v2030_v2 = vmul.f32 0.5, %v17256_v37  ;;  %v10261_v62 = vld [vmem:[%s16606_s8 + $0x5d0] sm:$0xff]   ;;  %v3232_v36 = vadd.f32 %v14284_v50, %v14410_v11  ;;  %v17261_v37 = vld [vmem:[#allocation65_spill] sm:$0xff] }
 0x52e   : > { %17254 = vst [vmem:[#allocation52_spill] sm:$0xff] %v14488_v12  ;;  %v3305_v46 = vadd.f32 %v8958_v33, %v3224_v16  ;;  %v14490_v51 = vpop.f32.mrb[46].mxu1  ;;  %6028 = vmatprep.mubr.bf16.mxu0 %v17255_v48  ;;  %v14497_v53 = vadd.f32 %v14261_v52, %v3302_v59  ;;  %v2031_v52 = vmul.f32 0.5, %v14168_v60  ;;  %v17258_v59 = vld [vmem:[#allocation99_spill] sm:$0xff]  ;;  %v10263_v50 = vld [vmem:[%s16606_s8 + $0x590] sm:$0xff]  }
 0x52f   : > { %v14499_v28 = vpop.f32.mrb[47].mxu1  ;;  %v2331_v30 = vadd.f32 1.0, %v2319_v17  ;;  %v14518_v22 = vmul.f32 %v2330_v1, %v2030_v2  ;;  %v10286_v12 = vld [vmem:[%s16608_s10 + $0x10] ss:$8 sps:$4 sm:$0xff]  }
 0x530   : > { %v8959_v32 = vpop.f32.mrb[60].mxu0  ;;  %v14505_v47 = vadd.f32 %v14265_v56, %v3305_v46  ;;  %v10260_v56 = vld [vmem:[%s16606_s8 + $0x588] sm:$0xff]  }
 0x531   : > { %6394 = vmatmul.mubr.bf16.vlgmr.msra.gmra.mrb[148].mxu1 %v17257_v41  ;;  %v8960_v15 = vpop.f32.mrb[61].mxu0  ;;  %17259 = vst [vmem:[#allocation92_spill] sm:$0xff] %v14518_v22  ;;  %v14520_v20 = vmul.f32 %v2331_v30, %v2031_v52  ;;  %v17262_v52 = vld [vmem:[#allocation37_spill] sm:$0xff] }
 0x532   : > { %v8961_v16 = vadd.f32 %v8960_v15, %v8959_v32  ;;  %6401 = vmatprep.mubr.bf16.mxu1 %v17258_v59  ;;  %v8962_v33 = vpop.f32.mrb[62].mxu0  ;;  %9674 = vmatpush3.bf16.msra.mxu1 %v10256_v19  ;;  %v10265_v15 = vld [vmem:[%s16606_s8 + $0x5d8] sm:$0xff]   ;;  %v17263_v59 = vld [vmem:[#allocation55_spill] sm:$0xff] }
 0x533   : > { %17260 = vst [vmem:[#allocation39_spill] sm:$0xff] %v14520_v20  ;;  %v8963_v60 = vpop.f32.mrb[63].mxu0  ;;  %9675 = vmatprep.subr.bf16.mxu1 %v10259_v49 }
 0x534   : > { %v3310_v46 = vadd.f32 %v8961_v16, %v3229_v4  ;;  %v8964_v17 = vadd.f32 %v8963_v60, %v8962_v33  ;;  %v14527_v19 = vpop.f32.mrb[48].mxu1 }
 0x535   : > { %v14529_v32 = vpop.f32.mrb[49].mxu1  ;;  %6029 = vmatmul.mubr.bf16.gmra.mrb[168].mxu0 %v17261_v37 }
 0x536   : > { %v3313_v2 = vadd.f32 %v8964_v17, %v3232_v36  ;;  %v14534_v49 = vpop.f32.mrb[50].mxu1  ;;  %6150 = vmatprep.mubr.bf16.mxu0 %v17262_v52  ;;  %9676 = vmatpush3.bf16.msra.mxu1 %v10260_v56  ;;  %v14541_v30 = vadd.f32 %v14288_v25, %v3310_v46  ;;  %v3237_v56 = vadd.f32 %v14303_v58, %v14410_v11  ;;  %v17264_v25 = vld [vmem:[#allocation32_spill] sm:$0xff]  ;;  %v10266_v17 = vld [vmem:[%s16606_s8 + $0x598] sm:$0xff]   ;;  %v10269_v52 = vld [vmem:[%s16606_s8 + $0x5e0] sm:$0xff]  }
 0x537   : > { %v14543_v41 = vpop.f32.mrb[51].mxu1  ;;  %9677 = vmatprep.subr.bf16.mxu1 %v10261_v62  ;;  %v10254_v62 = vld [vmem:[%s16606_s8 + $0x400] sm:$0xff]   ;;  %v3240_v58 = vadd.f32 %v14311_v34, %v14410_v11  ;;  %v10262_v34 = vld [vmem:[%s16606_s8 + $0x450] sm:$0xff]  }
 0x538   : > { %v8965_v4 = vpop.f32.mrb[64].mxu0  ;;  %v14549_v16 = vadd.f32 %v14290_v42, %v3313_v2  ;;  %v10257_v42 = vld [vmem:[%s16606_s8 + $0x448] sm:$0xff]  }
 0x539   : > { %6402 = vmatmul.mubr.bf16.gmra.mrb[152].mxu1 %v17263_v59  ;;  %v8966_v33 = vpop.f32.mrb[65].mxu0  ;;  %v17266_v59 = vld [vmem:[#allocation40_spill] sm:$0xff] }
 0x53a   : > { %v8967_v60 = vadd.f32 %v8966_v33, %v8965_v4  ;;  %6409 = vmatprep.mubr.bf16.mxu1 %v17264_v25  ;;  %v8968_v36 = vpop.f32.mrb[66].mxu0  ;;  %9678 = vmatpush3.bf16.msra.mxu1 %v10263_v50  ;;  %v17265_v50 = vld [vmem:[#allocation30_spill] sm:$0xff]  ;;  %v10271_v25 = vld [vmem:[%s16606_s8 + $0x5e8] sm:$0xff]  }
 0x53b   : > { %v8969_v46 = vpop.f32.mrb[67].mxu0  ;;  %9679 = vmatprep.subr.bf16.mxu1 %v10265_v15  ;;  %v10258_v15 = vld [vmem:[%s16606_s8 + $0x408] sm:$0xff]  }
 0x53c   : > { %v3318_v37 = vadd.f32 %v8967_v60, %v3237_v56  ;;  %v8970_v2 = vadd.f32 %v8969_v46, %v8968_v36  ;;  %v10270_v56 = vld [vmem:[%s16606_s8 + $0x5a0] sm:$0xff]   ;;  %v3245_v46 = vadd.f32 %v14332_v8, %v14410_v11  ;;  %v10273_v8 = vld [vmem:[%s16606_s8 + $0x5a8] sm:$0xff]  }
 0x53d   : > { %6151 = vmatmul.mubr.bf16.vlgmr.msra.gmra.mrb[172].mxu0 %v17265_v50 }
 0x53e   : > { %v3321_v4 = vadd.f32 %v8970_v2, %v3240_v58  ;;  %9518 = vmatpush3.bf16.msra.mxu0 %v10254_v62  ;;  %6158 = vmatprep.mubr.bf16.mxu0 %v17266_v59  ;;  %v14575_v33 = vadd.f32 %v14313_v6, %v3318_v37  ;;  %v17267_v6 = vld [vmem:[#allocation28_spill] sm:$0xff] }
 0x53f   : > { %9519 = vmatprep.subr.bf16.mxu0 %v10257_v42  ;;  %9680 = vmatpush3.bf16.msra.mxu1 %v10266_v17  ;;  %v17268_v17 = vld [vmem:[#allocation87_spill] sm:$0xff]  ;;  %v10264_v37 = vld [vmem:[%s16606_s8 + $0x410] sm:$0xff]  }
 0x540   : > { %v8971_v60 = vpop.f32.mrb[68].mxu0  ;;  %9681 = vmatprep.subr.bf16.mxu1 %v10269_v52  ;;  %v14587_v36 = vadd.f32 %v14322_v39, %v3321_v4  ;;  %v10267_v39 = vld [vmem:[%s16606_s8 + $0x458] sm:$0xff]   ;;  %v3248_v52 = vadd.f32 %v14342_v26, %v14410_v11 }
 0x541   : > { %6410 = vmatmul.mubr.bf16.gmra.mrb[156].mxu1 %v17267_v6  ;;  %v8972_v62 = vpop.f32.mrb[69].mxu0  ;;  %v10268_v26 = vld [vmem:[%s16606_s8 + $0x418] sm:$0xff]  }
 0x542   : > { %v8973_v42 = vadd.f32 %v8972_v62, %v8971_v60  ;;  %6417 = vmatprep.mubr.bf16.mxu1 %v17268_v17  ;;  %v8974_v58 = vpop.f32.mrb[70].mxu0  ;;  %9520 = vmatpush3.bf16.msra.mxu0 %v10258_v15  ;;  %v10275_v15 = vld [vmem:[%s16606_s8 + $0x5f0] sm:$0xff]   ;;  %v17269_v60 = vld [vmem:[#allocation33_spill] sm:$0xff] }
 0x543   : > { %v8975_v2 = vpop.f32.mrb[71].mxu0  ;;  %9521 = vmatprep.subr.bf16.mxu0 %v10262_v34  ;;  %9682 = vmatpush3.bf16.msra.mxu1 %v10270_v56  ;;  %v17270_v17 = vld [vmem:[#allocation45_spill] sm:$0xff] }
 0x544   : > { %v3326_v50 = vadd.f32 %v8973_v42, %v3245_v46  ;;  %v8976_v4 = vadd.f32 %v8975_v2, %v8974_v58  ;;  %v9169_v59 = vpop.f32.mrb[52].mxu1  ;;  %9683 = vmatprep.subr.bf16.mxu1 %v10271_v25  ;;  %v10272_v42 = vld [vmem:[%s16606_s8 + $0x460] sm:$0xff]   ;;  %v10276_v58 = vld [vmem:[%s16606_s8 + $0x5b0] sm:$0xff]  }
 0x545   : > { %v9170_v34 = vpop.f32.mrb[53].mxu1  ;;  %6159 = vmatmul.mubr.bf16.gmra.mrb[176].mxu0 %v17269_v60 }
 0x546   : > { %v3329_v6 = vadd.f32 %v8976_v4, %v3248_v52  ;;  %v14608_v56 = vadd.f32 %v9170_v34, %v9169_v59  ;;  %v9172_v62 = vpop.f32.mrb[54].mxu1  ;;  %6166 = vmatprep.mubr.bf16.mxu0 %v17270_v17  ;;  %9522 = vmatpush3.bf16.msra.mxu0 %v10264_v37  ;;  %v14615_v25 = vadd.f32 %v14359_v61, %v3326_v50  ;;  %v10279_v61 = vld [vmem:[%s16606_s8 + $0x5f8] sm:$0xff]   ;;  %v17272_v59 = vld [vmem:[#allocation88_spill] sm:$0xff] }
 0x547   : > { %v9173_v46 = vpop.f32.mrb[55].mxu1  ;;  %9523 = vmatprep.subr.bf16.mxu0 %v10267_v39  ;;  %9684 = vmatpush3.bf16.msra.mxu1 %v10273_v8  ;;  %v17271_v39 = vld [vmem:[#allocation60_spill] sm:$0xff]  ;;  %v3253_v8 = vadd.f32 %v14380_v27, %v14410_v11  ;;  %v10280_v27 = vld [vmem:[%s16606_s8 + $0x5b8] sm:$0xff]  }
 0x548   : > { %v14623_v2 = vadd.f32 %v9173_v46, %v9172_v62  ;;  %v8977_v37 = vpop.f32.mrb[72].mxu0  ;;  %9685 = vmatprep.subr.bf16.mxu1 %v10275_v15  ;;  %v14629_v52 = vadd.f32 %v14373_v21, %v3329_v6  ;;  %v10274_v15 = vld [vmem:[%s16606_s8 + $0x420] sm:$0xff]   ;;  %v10277_v21 = vld [vmem:[%s16606_s8 + $0x468] sm:$0xff]   ;;  %v3256_v6 = vadd.f32 %v14395_v14, %v14410_v11 }
 0x549   : > { %6418 = vmatmul.mubr.bf16.gmra.mrb[160].mxu1 %v17271_v39  ;;  %v8978_v50 = vpop.f32.mrb[73].mxu0  ;;  %v10283_v46 = vld [vmem:[%s16608_s10 + $0x4] ss:$8 sps:$4 sm:$0xff]  }
 0x54a   : > { %v8979_v4 = vadd.f32 %v8978_v50, %v8977_v37  ;;  %6425 = vmatprep.mubr.bf16.mxu1 %v17272_v59  ;;  %v8980_v34 = vpop.f32.mrb[74].mxu0  ;;  %9524 = vmatpush3.bf16.msra.mxu0 %v10268_v26  ;;  %v17275_v59 = vld [vmem:[#allocation78_spill] sm:$0xff]  ;;  %v10278_v14 = vld [vmem:[%s16606_s8 + $0x428] sm:$0xff]  }
 0x54b   : > { %v8981_v60 = vpop.f32.mrb[75].mxu0  ;;  %9525 = vmatprep.subr.bf16.mxu0 %v10272_v42  ;;  %9686 = vmatpush3.bf16.msra.mxu1 %v10276_v58  ;;  %v17273_v58 = vld [vmem:[#allocation34_spill] sm:$0xff] }
 0x54c   : > { %v3334_v62 = vadd.f32 %v8979_v4, %v3253_v8  ;;  %v8982_v17 = vadd.f32 %v8981_v60, %v8980_v34  ;;  %v9175_v26 = vpop.f32.mrb[56].mxu1  ;;  %9687 = vmatprep.subr.bf16.mxu1 %v10279_v61  ;;  %v10284_v8 = vld [vmem:[%s16606_s8 + $0x470] sm:$0xff]   ;;  %v17277_v60 = vld [vmem:[#allocation61_spill] sm:$0xff] }
 0x54d   : > { %v9176_v42 = vpop.f32.mrb[57].mxu1  ;;  %6167 = vmatmul.mubr.bf16.gmra.mrb[180].mxu0 %v17273_v58 }
 0x54e   : > { %v3337_v37 = vadd.f32 %v8982_v17, %v3256_v6  ;;  %v14650_v39 = vadd.f32 %v9176_v42, %v9175_v26  ;;  %v9178_v50 = vpop.f32.mrb[58].mxu1  ;;  %6174 = vmatprep.mubr.bf16.mxu0 %v17275_v59  ;;  %9526 = vmatpush3.bf16.msra.mxu0 %v10274_v15  ;;  %v14657_v11 = vadd.f32 %v14401_v0, %v3334_v62  ;;  %v17278_v0 = vld [vmem:[#allocation43_spill] sm:$0xff]  ;;  %v10289_v26 = vld [vmem:[%s16606_s8 + $0x478] sm:$0xff]  }
 0x54f   : > { %v9179_v61 = vpop.f32.mrb[59].mxu1  ;;  %9527 = vmatprep.subr.bf16.mxu0 %v10277_v21  ;;  %9688 = vmatpush3.bf16.msra.mxu1 %v10280_v27  ;;  %v10285_v21 = vld [vmem:[%s16606_s8 + $0x430] sm:$0xff]  }
 0x550   : > { %17274 = vst [vmem:[#allocation93_spill] sm:$0xff] %v14650_v39  ;;  %v14662_v4 = vadd.f32 %v9179_v61, %v9178_v50  ;;  %v9051_v34 = vpop.f32.mrb[76].mxu0  ;;  %7327 = vmatprep.subr.bf16.mxu1 %v10283_v46  ;;  %v14665_v15 = vadd.f32 %v14417_v23, %v3337_v37  ;;  %v17279_v37 = vld [vmem:[#allocation35_spill] sm:$0xff] }
 0x551   : > { %6426 = vmatmul.mubr.bf16.gmra.mrb[164].mxu1 %v17277_v60  ;;  %v9052_v6 = vpop.f32.mrb[77].mxu0  ;;  %v10297_v60 = vld [vmem:[%s16606_s8 + $0x540] sm:$0xff]  }
 0x552   : > { %17276 = vst [vmem:[#allocation86_spill] sm:$0xff] %v14662_v4  ;;  %v9053_v17 = vadd.f32 %v9052_v6, %v9051_v34  ;;  %6433 = vmatprep.mubr.bf16.mxu1 %v17278_v0  ;;  %v9054_v62 = vpop.f32.mrb[78].mxu0  ;;  %9528 = vmatpush3.bf16.msra.mxu0 %v10278_v14  ;;  %v17283_v0 = vld [vmem:[#allocation57_spill] sm:$0xff] }
 0x553   : > { %v9055_v27 = vpop.f32.mrb[79].mxu0  ;;  %9529 = vmatprep.subr.bf16.mxu0 %v10284_v8  ;;  %v17281_v8 = vld [vmem:[#allocation53_spill] sm:$0xff] }
 0x554   : > { %v3456_v23 = vadd.f32 %v9053_v17, %v14457_v45  ;;  %v9056_v46 = vadd.f32 %v9055_v27, %v9054_v62  ;;  %v9181_v42 = vpop.f32.mrb[60].mxu1  ;;  %v10290_v45 = vld [vmem:[%s16606_s8 + $0x438] sm:$0xff]  }
 0x555   : > { %v9182_v58 = vpop.f32.mrb[61].mxu1  ;;  %6175 = vmatmul.mubr.bf16.gmra.mrb[184].mxu0 %v17279_v37  ;;  %v17284_v27 = vld [vmem:[#allocation69_spill] sm:$0xff] }
 0x556   : > { %v14678_v50 = vadd.f32 %v14441_v5, %v3456_v23  ;;  %v3459_v59 = vadd.f32 %v9056_v46, %v14460_v31  ;;  %v14681_v14 = vadd.f32 %v9182_v58, %v9181_v42  ;;  %v9184_v61 = vpop.f32.mrb[62].mxu1  ;;  %6182 = vmatprep.mubr.bf16.mxu0 %v17281_v8  ;;  %9530 = vmatpush3.bf16.msra.mxu0 %v10285_v21  ;;  %v17286_v8 = vld [vmem:[#allocation56_spill] sm:$0xff] }
 0x557   : > { %v9185_v34 = vpop.f32.mrb[63].mxu1  ;;  %9531 = vmatprep.subr.bf16.mxu0 %v10289_v26 }
 0x558   : > { %17280 = vst [vmem:[#allocation79_spill] sm:$0xff] %v14681_v14  ;;  %v14691_v5 = vmul.f32 0.70710677, %v14678_v50  ;;  %v14694_v31 = vadd.f32 %v14451_v43, %v3459_v59  ;;  %v14696_v6 = vadd.f32 %v9185_v34, %v9184_v61  ;;  %v9057_v17 = vpop.f32.mrb[80].mxu0  ;;  %v17285_v59 = vld [vmem:[#allocation42_spill] sm:$0xff] }
 0x559   : > { %6434 = vmatmul.mubr.bf16.gmra.mrb[168].mxu1 %v17283_v0  ;;  %v9058_v62 = vpop.f32.mrb[81].mxu0 }
 0x55a   : > { %17282 = vst [vmem:[#allocation107_spill] sm:$0xff] %v14696_v6  ;;  %v14700_v21 = vmul.f32 0.70710677, %v14694_v31  ;;  %6555 = vmatprep.mubr.bf16.mxu1 %v17284_v27  ;;  %9532 = vmatpush3.bf16.msra.mxu0 %v10290_v45  ;;  %v3631_v26 = vand.u32 2147483647, %v14691_v5  ;;  %v9059_v23 = vadd.f32 %v9058_v62, %v9057_v17  ;;  %v9060_v46 = vpop.f32.mrb[82].mxu0 }
 0x55b   : > { %9621 = vmatprep.subr.bf16.mxu0 %v10297_v60  ;;  %v9061_v58 = vpop.f32.mrb[83].mxu0  ;;  %v10281_v45 = vld [vmem:[%s16608_s10] ss:$8 sps:$4 sm:$0xff]   ;;  %vm3607_vm5 = vcmp.ge.f32.partialorder %v14691_v5, 0.0 }
 0x55c   : > { %v3632_v43 = vand.u32 2147483647, %v14700_v21  ;;  %v3464_v42 = vadd.f32 %v9059_v23, %v14497_v53  ;;  %v9187_v37 = vpop.f32.mrb[64].mxu1  ;;  %v3643_v34 = vmul.f32 0.3275911, %v3631_v26  ;;  %v9062_v60 = vadd.f32 %v9061_v58, %v9060_v46  ;;  %v17289_v46 = vld [vmem:[#allocation96_spill] sm:$0xff] }
 0x55d   : > { %6183 = vmatmul.mubr.bf16.gmra.mrb[188].mxu0 %v17285_v59  ;;  %v9188_v61 = vpop.f32.mrb[65].mxu1  ;;  %v10288_v53 = vld [vmem:[%s16608_s10 + $0x14] ss:$8 sps:$4 sm:$0xff]   ;;  %v3799_v27 = vsub.f32 0.0, %v3631_v26  ;;  %vm3608_vm4 = vcmp.ge.f32.partialorder %v14700_v21, 0.0 }
 0x55e   : > { %6190 = vmatprep.mubr.bf16.mxu0 %v17286_v8  ;;  %v14712_v17 = vadd.f32 %v14434_v63, %v3464_v42  ;;  %v14714_v0 = vadd.f32 %v9188_v61, %v9187_v37  ;;  %v9190_v62 = vpop.f32.mrb[66].mxu1  ;;  %v3644_v23 = vmul.f32 0.3275911, %v3632_v43  ;;  %v3800_v57 = vsub.f32 0.0, %v3632_v43  ;;  %v17290_v37 = vld [vmem:[#allocation72_spill] sm:$0xff] }
 0x55f   : > { %v9191_v59 = vpop.f32.mrb[67].mxu1  ;;  %v3467_v24 = vadd.f32 %v9062_v60, %v14505_v47  ;;  %v3655_v22 = vadd.f32 1.0, %v3643_v34 }
 0x560   : > { %17287 = vst [vmem:[#allocation59_spill] sm:$0xff] %v14714_v0  ;;  %v9063_v8 = vpop.f32.mrb[84].mxu0  ;;  %v14720_v1 = vmul.f32 0.70710677, %v14712_v17  ;;  %v14723_v63 = vadd.f32 %v9191_v59, %v9190_v62 }
 0x561   : > { %6556 = vmatmul.mubr.bf16.vlgmr.msra.gmra.mrb[172].mxu1 %v17289_v46  ;;  %v9064_v42 = vpop.f32.mrb[85].mxu0  ;;  %v14732_v54 = vadd.f32 %v14445_v29, %v3467_v24  ;;  %v3656_v46 = vadd.f32 1.0, %v3644_v23  ;;  %v10291_v29 = vld [vmem:[%s16608_s10 + $0x20] ss:$8 sps:$4 sm:$0xff]   ;;  %v14746_v24 = vmul.f32 0.5, %v14678_v50  ;;  %10485 = vrcp.f32 %v3655_v22 }
 0x562   : > { %17288 = vst [vmem:[#allocation104_spill] sm:$0xff] %v14723_v63  ;;  %7328 = vmatpush1.bf16.msra.mxu1 %v10281_v45  ;;  %v9065_v58 = vadd.f32 %v9064_v42, %v9063_v8  ;;  %6563 = vmatprep.mubr.bf16.mxu1 %v17290_v37  ;;  %v9066_v61 = vpop.f32.mrb[86].mxu0  ;;  %v3633_v20 = vand.u32 2147483647, %v14720_v1  ;;  %v10293_v45 = vld [vmem:[%s16608_s10 + $0x24] ss:$8 sps:$4 sm:$0xff]   ;;  %v3811_v8 = vmul.f32 %v3799_v27, %v3631_v26 }
 0x563   : > { %v9067_v47 = vpop.f32.mrb[87].mxu0  ;;  %7329 = vmatprep.subr.bf16.mxu1 %v10288_v53  ;;  %v3812_v42 = vmul.f32 %v3800_v57, %v3632_v43  ;;  %v14739_v34 = vmul.f32 0.70710677, %v14732_v54  ;;  %v17291_v37 = vld [vmem:[#allocation47_spill] sm:$0xff]  ;;  %v17292_v57 = vld [vmem:[#allocation66_spill] sm:$0xff]  ;;  %10487 = vrcp.f32 %v3656_v46  ;;  %v14780_v63 = vmul.f32 0.5, %v14694_v31 }
 0x564   : > { %v3472_v60 = vadd.f32 %v9065_v58, %v14541_v30  ;;  %v9068_v62 = vadd.f32 %v9067_v47, %v9066_v61  ;;  %v9193_v59 = vpop.f32.mrb[68].mxu1  ;;  %v3801_v53 = vsub.f32 0.0, %v3633_v20  ;;  %v10296_v43 = vld [vmem:[%s16608_s10 + $0x34] ss:$8 sps:$4 sm:$0xff]   ;;  %v10294_v22 = vld [vmem:[%s16608_s10 + $0x30] ss:$8 sps:$4 sm:$0xff]  }
 0x565   : > { %6191 = vmatmul.mubr.bf16.gmra.mrb[192].mxu0 %v17291_v37  ;;  %v9194_v27 = vpop.f32.mrb[69].mxu1  ;;  %v3634_v50 = vand.u32 2147483647, %v14739_v34  ;;  %vm3609_vm6 = vcmp.ge.f32.partialorder %v14720_v1, 0.0  ;;  %vm3610_vm8 = vcmp.ge.f32.partialorder %v14739_v34, 0.0  ;;  %v10342_v34 = vld [vmem:[%s16606_s8 + $0x538] sm:$0xff]  }
 0x566   : > { %v14749_v30 = vadd.f32 %v14483_v7, %v3472_v60  ;;  %v3475_v26 = vadd.f32 %v9068_v62, %v14549_v16  ;;  %7330 = vmatpush1.bf16.msra.mxu1 %v10286_v12  ;;  %6312 = vmatprep.mubr.bf16.mxu0 %v17292_v57  ;;  %v9196_v23 = vpop.f32.mrb[70].mxu1  ;;  %v3645_v7 = vmul.f32 0.3275911, %v3633_v20  ;;  %v14765_v58 = vadd.f32 %v9194_v27, %v9193_v59  ;;  %v10298_v60 = vld [vmem:[%s16606_s8 + $0x500] sm:$0xff]   ;;  %v17294_v57 = vld [vmem:[#allocation97_spill] sm:$0xff] }
 0x567   : > { %7331 = vmatprep.subr.bf16.mxu1 %v10293_v45  ;;  %v9197_v61 = vpop.f32.mrb[71].mxu1  ;;  %v3823_v45 = vmul.f32 1.442695, %v3811_v8  ;;  %v3825_v62 = vmul.f32 1.442695, %v3812_v42  ;;  %v3802_v37 = vsub.f32 0.0, %v3634_v50 }
 0x568   : > { %v14760_v16 = vmul.f32 0.70710677, %v14749_v30  ;;  %v14763_v12 = vadd.f32 %v14499_v28, %v3475_v26  ;;  %17293 = vst [vmem:[#allocation31_spill] sm:$0xff] %v14765_v58  ;;  %v9069_v47 = vpop.f32.mrb[88].mxu0  ;;  %v3813_v26 = vmul.f32 %v3801_v53, %v3633_v20  ;;  %v3646_v59 = vmul.f32 0.3275911, %v3634_v50 }
 0x569   : > { %6564 = vmatmul.mubr.bf16.gmra.mrb[176].mxu1 %v17294_v57  ;;  %v9070_v28 = vpop.f32.mrb[89].mxu0  ;;  %v17295_v58 = vld [vmem:[#allocation75_spill] sm:$0xff]  ;;  %v14782_v8 = vadd.f32 %v9197_v61, %v9196_v23  ;;  %v14790_v42 = vsel %vm3607_vm5, 1.0, %v17219_v13  ;;  %v3657_v31 = vadd.f32 1.0, %v3645_v7  ;;  %v3814_v53 = vmul.f32 %v3802_v37, %v3634_v50 }
 0x56a   : > { %v3635_v27 = vand.u32 2147483647, %v14760_v16  ;;  %v14776_v18 = vmul.f32 0.70710677, %v14763_v12  ;;  %7332 = vmatpush1.bf16.msra.mxu1 %v10291_v29  ;;  %6571 = vmatprep.mubr.bf16.mxu1 %v17295_v58  ;;  %v9072_v46 = vpop.f32.mrb[90].mxu0  ;;  %v14795_v29 = vsel %vm3608_vm4, 1.0, %v17219_v13  ;;  %10489 = vpow2.f32 %v3823_v45 }
 0x56b   : > { %17296 = vst [vmem:[#allocation99_spill] sm:$0xff] %v14782_v8  ;;  %7333 = vmatprep.subr.bf16.mxu1 %v10296_v43  ;;  %v10301_v20 = vld [vmem:[%s16608_s10 + $0x44] ss:$8 sps:$4 sm:$0xff]   ;;  %v14802_v61 = vmul.f32 0.5, %v14712_v17  ;;  %v9071_v5 = vadd.f32 %v9070_v28, %v9069_v47  ;;  %v9073_v57 = vpop.f32.mrb[91].mxu0  ;;  %v17297_v8 = vld [vmem:[#allocation36_spill] sm:$0xff]  ;;  %10491 = vpow2.f32 %v3825_v62 }
 0x56c   : > { %v3803_v23 = vsub.f32 0.0, %v3635_v27  ;;  %v3636_v58 = vand.u32 2147483647, %v14776_v18  ;;  %v10302_v43 = vld [vmem:[%s16606_s8 + $0x548] sm:$0xff]   ;;  %v9199_v21 = vpop.f32.mrb[72].mxu1  ;;  %v3658_v37 = vadd.f32 1.0, %v3646_v59  ;;  %v9074_v48 = vadd.f32 %v9073_v57, %v9072_v46 }
 0x56d   : > { %6313 = vmatmul.mubr.bf16.vlgmr.msra.gmra.mrb[196].mxu0 %v17297_v8  ;;  %v10299_v50 = vld [vmem:[%s16608_s10 + $0x40] ss:$8 sps:$4 sm:$0xff]   ;;  %v3827_v7 = vmul.f32 1.442695, %v3813_v26  ;;  %v9200_v6 = vpop.f32.mrb[73].mxu1  ;;  %v3480_v45 = vadd.f32 %v9071_v5, %v14575_v33  ;;  %10493 = vrcp.f32 %v3657_v31  ;;  %v14827_v8 = vpop.eup %10485  ;;  %vm3611_vm2 = vcmp.ge.f32.partialorder %v14760_v16, 0.0 }
 0x56e   : > { %v3804_v0 = vsub.f32 0.0, %v3636_v58  ;;  %7334 = vmatpush1.bf16.msra.mxu1 %v10294_v22  ;;  %9622 = vmatpush3.bf16.msra.mxu0 %v10298_v60  ;;  %v3647_v17 = vmul.f32 0.3275911, %v3635_v27  ;;  %v14810_v47 = vadd.f32 %v9200_v6, %v9199_v21  ;;  %v9202_v28 = vpop.f32.mrb[74].mxu1  ;;  %v10303_v62 = vld [vmem:[%s16606_s8 + $0x508] sm:$0xff]   ;;  %v3815_v60 = vmul.f32 %v3803_v23, %v3635_v27  ;;  %v10310_v6 = vld [vmem:[%s16606_s8 + $0x550] sm:$0xff]  }
 0x56f   : > { %6320 = vmatprep.mubr.bf16.mxu0 %v17299_v3  ;;  %7335 = vmatprep.subr.bf16.mxu1 %v10301_v20  ;;  %v10306_v26 = vld [vmem:[%s16608_s10 + $0x54] ss:$8 sps:$4 sm:$0xff]   ;;  %v3829_v22 = vmul.f32 1.442695, %v3814_v53  ;;  %v9203_v59 = vpop.f32.mrb[75].mxu1  ;;  %v14825_v3 = vsel %vm3609_vm6, 1.0, %v17219_v13  ;;  %v14830_v20 = vadd.f32 %v14478_v9, %v3480_v45  ;;  %v3483_v27 = vadd.f32 %v9074_v48, %v14587_v36  ;;  %v14846_v36 = vpop.eup %10487 }
 0x570   : > { %17298 = vst [vmem:[#allocation65_spill] sm:$0xff] %v14810_v47  ;;  %v9075_v33 = vpop.f32.mrb[92].mxu0  ;;  %9623 = vmatprep.subr.bf16.mxu0 %v10302_v43  ;;  %v3648_v46 = vmul.f32 0.3275911, %v3636_v58  ;;  %v14833_v31 = vadd.f32 %v9203_v59, %v9202_v28  ;;  %v17301_v53 = vld [vmem:[#allocation98_spill] sm:$0xff]  ;;  %10495 = vpow2.f32 %v3827_v7  ;;  %v14837_v43 = vmul.f32 0.5, %v14732_v54 }
 0x571   : > { %6572 = vmatmul.mubr.bf16.gmra.mrb[180].mxu1 %v17301_v53  ;;  %v9076_v23 = vpop.f32.mrb[93].mxu0  ;;  %v3816_v1 = vmul.f32 %v3804_v0, %v3636_v58  ;;  %v17302_v57 = vld [vmem:[#allocation62_spill] sm:$0xff]  ;;  %v10304_v9 = vld [vmem:[%s16608_s10 + $0x50] ss:$8 sps:$4 sm:$0xff]   ;;  %10497 = vrcp.f32 %v3658_v37  ;;  %v3659_v7 = vadd.f32 1.0, %v3647_v17  ;;  %v14852_v0 = vadd.f32 %v14490_v51, %v3483_v27 }
 0x572   : > { %17300 = vst [vmem:[#allocation37_spill] sm:$0xff] %v14833_v31  ;;  %7336 = vmatpush1.bf16.msra.mxu1 %v10299_v50  ;;  %v9077_v5 = vadd.f32 %v9076_v23, %v9075_v33  ;;  %6579 = vmatprep.mubr.bf16.mxu1 %v17302_v57  ;;  %v9078_v21 = vpop.f32.mrb[94].mxu0  ;;  %v10309_v48 = vld [vmem:[%s16608_s10 + $0x64] ss:$8 sps:$4 sm:$0xff]   ;;  %v14849_v54 = vmul.f32 0.70710677, %v14830_v20  ;;  %10499 = vpow2.f32 %v3829_v22 }
 0x573   : > { %v9079_v58 = vpop.f32.mrb[95].mxu0  ;;  %9624 = vmatpush3.bf16.msra.mxu0 %v10303_v62  ;;  %7337 = vmatprep.subr.bf16.mxu1 %v10306_v26  ;;  %v10311_v50 = vld [vmem:[%s16606_s8 + $0x510] sm:$0xff]   ;;  %v3831_v45 = vmul.f32 1.442695, %v3815_v60  ;;  %v10307_v37 = vld [vmem:[%s16608_s10 + $0x60] ss:$8 sps:$4 sm:$0xff]   ;;  %10501 = vrcp.f32 %v3659_v7 }
 0x574   : > { %v3488_v28 = vadd.f32 %v9077_v5, %v14615_v25  ;;  %v9080_v59 = vadd.f32 %v9079_v58, %v9078_v21  ;;  %v9273_v33 = vpop.f32.mrb[76].mxu1  ;;  %9625 = vmatprep.subr.bf16.mxu0 %v10310_v6  ;;  %v10315_v51 = vld [vmem:[%s16606_s8 + $0x558] sm:$0xff]   ;;  %v3691_v17 = vmul.f32 1.0614054, %v14827_v8  ;;  %v3660_v62 = vadd.f32 1.0, %v3648_v46  ;;  %v17303_v25 = vld [vmem:[#allocation70_spill] sm:$0xff]  ;;  %v14881_v57 = vpop.eup %10489 }
 0x575   : > { %v3637_v26 = vand.u32 2147483647, %v14849_v54  ;;  %v14867_v60 = vmul.f32 0.70710677, %v14852_v0  ;;  %6321 = vmatmul.mubr.bf16.gmra.mrb[200].mxu0 %v17303_v25  ;;  %v10314_v27 = vld [vmem:[%s16608_s10 + $0x74] ss:$8 sps:$4 sm:$0xff]   ;;  %10503 = vpow2.f32 %v3831_v45 }
 0x576   : > { %v3833_v6 = vmul.f32 1.442695, %v3816_v1  ;;  %v14874_v53 = vadd.f32 %v14529_v32, %v3488_v28  ;;  %v3491_v23 = vadd.f32 %v9080_v59, %v14629_v52  ;;  %v9274_v5 = vpop.f32.mrb[77].mxu1  ;;  %7338 = vmatpush1.bf16.msra.mxu1 %v10304_v9  ;;  %v17305_v22 = vld [vmem:[#allocation71_spill] sm:$0xff]  ;;  %v14879_v46 = vmul.f32 1.0614054, %v14846_v36  ;;  %v14887_v52 = vpop.eup %10491 }
 0x577   : > { %6328 = vmatprep.mubr.bf16.mxu0 %v17305_v22  ;;  %v3649_v21 = vmul.f32 0.3275911, %v3637_v26  ;;  %v3805_v58 = vsub.f32 0.0, %v3637_v26  ;;  %v3638_v25 = vand.u32 2147483647, %v14867_v60  ;;  %7339 = vmatprep.subr.bf16.mxu1 %v10309_v48  ;;  %v10316_v32 = vld [vmem:[%s16606_s8 + $0x518] sm:$0xff]   ;;  %v14895_v7 = vadd.f32 %v9274_v5, %v9273_v33  ;;  %v14907_v5 = vpop.eup %10493 }
 0x578   : > { %17304 = vst [vmem:[#allocation55_spill] sm:$0xff] %v14874_v53  ;;  %9626 = vmatpush3.bf16.msra.mxu0 %v10311_v50  ;;  %v14890_v1 = vmul.f32 0.70710677, %v14874_v53  ;;  %v14893_v9 = vadd.f32 %v14543_v41, %v3491_v23  ;;  %v9276_v28 = vpop.f32.mrb[78].mxu1  ;;  %v9081_v59 = vpop.f32.mrb[96].mxu0  ;;  %v10323_v50 = vld [vmem:[%s16606_s8 + $0x560] sm:$0xff]   ;;  %10505 = vrcp.f32 %v3660_v62 }
 0x579   : > { %17307 = vst [vmem:[#allocation30_spill] sm:$0xff] %v14895_v7  ;;  %v10312_v48 = vld [vmem:[%s16608_s10 + $0x70] ss:$8 sps:$4 sm:$0xff]   ;;  %9627 = vmatprep.subr.bf16.mxu0 %v10315_v51  ;;  %v3661_v45 = vadd.f32 1.0, %v3649_v21  ;;  %v3817_v22 = vmul.f32 %v3805_v58, %v3637_v26  ;;  %v3650_v53 = vmul.f32 0.3275911, %v3638_v25  ;;  %10507 = vpow2.f32 %v3833_v6 }
 0x57a   : > { %17306 = vst [vmem:[#allocation32_spill] sm:$0xff] %v14893_v9  ;;  %v3806_v31 = vsub.f32 0.0, %v3638_v25  ;;  %v9277_v47 = vpop.f32.mrb[79].mxu1  ;;  %v17308_v41 = vld [vmem:[#allocation63_spill] sm:$0xff]  ;;  %v9082_v33 = vpop.f32.mrb[97].mxu0  ;;  %7340 = vmatpush1.bf16.msra.mxu1 %v10307_v37  ;;  %v17310_v26 = vld [vmem:[#allocation64_spill] sm:$0xff] }
 0x57b   : > { %6580 = vmatmul.mubr.bf16.gmra.mrb[184].mxu1 %v17308_v41  ;;  %v10319_v23 = vld [vmem:[%s16608_s10 + $0x84] ss:$8 sps:$4 sm:$0xff]   ;;  %v3639_v51 = vand.u32 2147483647, %v14890_v1  ;;  %v14912_v21 = vmul.f32 0.70710677, %v14893_v9  ;;  %7341 = vmatprep.subr.bf16.mxu1 %v10314_v27  ;;  %v14924_v9 = vpop.eup %10495  ;;  %10509 = vrcp.f32 %v3661_v45 }
 0x57c   : > { %6587 = vmatprep.mubr.bf16.mxu1 %v17310_v26  ;;  %v3703_v58 = vadd.f32 -1.4531521, %v3691_v17  ;;  %v14916_v41 = vmul.f32 0.5, %v14749_v30  ;;  %v3835_v7 = vmul.f32 1.442695, %v3817_v22  ;;  %v3818_v40 = vmul.f32 %v3806_v31, %v3638_v25  ;;  %v9084_v14 = vpop.f32.mrb[98].mxu0  ;;  %9628 = vmatpush3.bf16.msra.mxu0 %v10316_v32  ;;  %v14927_v31 = vpop.eup %10497 }
 0x57d   : > { %17309 = vst [vmem:[#allocation40_spill] sm:$0xff] %v14912_v21  ;;  %v10324_v62 = vld [vmem:[%s16606_s8 + $0x520] sm:$0xff]   ;;  %v10328_v37 = vld [vmem:[%s16606_s8 + $0x568] sm:$0xff]   ;;  %v3662_v17 = vadd.f32 1.0, %v3650_v53  ;;  %v3651_v26 = vmul.f32 0.3275911, %v3639_v51  ;;  %9629 = vmatprep.subr.bf16.mxu0 %v10323_v50  ;;  %v14932_v25 = vadd.f32 %v9277_v47, %v9276_v28  ;;  %v9083_v32 = vadd.f32 %v9082_v33, %v9081_v59  ;;  %6329 = vmatmul.mubr.bf16.gmra.mrb[204].mxu0 %v17314_v35  ;;  %v14944_v59 = vpop.eup %10499 }
 0x57e   : > { %17311 = vst [vmem:[#allocation28_spill] sm:$0xff] %v14916_v41  ;;  %v3807_v30 = vsub.f32 0.0, %v3639_v51  ;;  %v3640_v6 = vand.u32 2147483647, %v14912_v21  ;;  %v14930_v27 = vmul.f32 0.5, %v14763_v12  ;;  %v9085_v22 = vpop.f32.mrb[99].mxu0  ;;  %10511 = vpow2.f32 %v3835_v7  ;;  %7342 = vmatpush1.bf16.msra.mxu1 %v10312_v48 }
 0x57f   : > { %17313 = vst [vmem:[#allocation33_spill] sm:$0xff] %v14932_v25  ;;  %v9279_v4 = vpop.f32.mrb[80].mxu1  ;;  %v10317_v53 = vld [vmem:[%s16608_s10 + $0x80] ss:$8 sps:$4 sm:$0xff]   ;;  %v10322_v12 = vld [vmem:[%s16608_s10 + $0x94] ss:$8 sps:$4 sm:$0xff]   ;;  %v3715_v28 = vmul.f32 %v14827_v8, %v3703_v58  ;;  %v3496_v33 = vadd.f32 %v9083_v32, %v14657_v11  ;;  %v9086_v7 = vadd.f32 %v9085_v22, %v9084_v14  ;;  %7343 = vmatprep.subr.bf16.mxu1 %v10319_v23  ;;  %10513 = vrcp.f32 %v3662_v17  ;;  %v14955_v11 = vpop.eup %10501 }
 0x580   : > { %17312 = vst [vmem:[#allocation87_spill] sm:$0xff] %v14930_v27  ;;  %v3819_v21 = vmul.f32 %v3807_v30, %v3639_v51  ;;  %v9280_v50 = vpop.f32.mrb[81].mxu1  ;;  %v17315_v41 = vld [vmem:[#allocation74_spill] sm:$0xff]  ;;  %v3704_v47 = vadd.f32 -1.4531521, %v14879_v46  ;;  %v3808_v45 = vsub.f32 0.0, %v3640_v6  ;;  %9630 = vmatpush3.bf16.msra.mxu0 %v10324_v62  ;;  %v14967_v32 = vpop.eup %10503 }
 0x581   : > { %6336 = vmatprep.mubr.bf16.mxu0 %v17315_v41  ;;  %v3837_v35 = vmul.f32 1.442695, %v3818_v40  ;;  %v9282_v51 = vpop.f32.mrb[82].mxu1  ;;  %v10329_v48 = vld [vmem:[%s16606_s8 + $0x528] sm:$0xff]   ;;  %v3663_v41 = vadd.f32 1.0, %v3651_v26  ;;  %v14950_v46 = vadd.f32 %v9280_v50, %v9279_v4  ;;  %v9117_v25 = vpop.f32.mrb[100].mxu0  ;;  %9631 = vmatprep.subr.bf16.mxu0 %v10328_v37  ;;  %v14958_v23 = vadd.f32 %v14527_v19, %v3496_v33 }
 0x582   : > { %v3652_v30 = vmul.f32 0.3275911, %v3640_v6  ;;  %v9283_v58 = vpop.f32.mrb[83].mxu1  ;;  %v10336_v40 = vld [vmem:[%s16606_s8 + $0x570] sm:$0xff]   ;;  %v3839_v14 = vmul.f32 1.442695, %v3819_v21  ;;  %v3499_v62 = vadd.f32 %v9086_v7, %v14665_v15  ;;  %v3820_v22 = vmul.f32 %v3808_v45, %v3640_v6  ;;  %7344 = vmatpush1.bf16.msra.mxu1 %v10317_v53  ;;  %v14988_v45 = vpop.eup %10505 }
 0x583   : > { %17316 = vst [vmem:[#allocation45_spill] sm:$0xff] %v14950_v46  ;;  %17317 = vst [vmem:[#allocation60_spill] sm:$0xff] %v14958_v23  ;;  %v14961_v17 = vadd.f32 %v9283_v58, %v9282_v51  ;;  %v17319_v26 = vld [vmem:[#allocation94_spill] sm:$0xff]  ;;  %v9118_v4 = vpop.f32.mrb[101].mxu0  ;;  %v10320_v37 = vld [vmem:[%s16608_s10 + $0x90] ss:$8 sps:$4 sm:$0xff]   ;;  %v3716_v33 = vmul.f32 %v14846_v36, %v3704_v47  ;;  %10515 = vpow2.f32 %v3837_v35  ;;  %7345 = vmatprep.subr.bf16.mxu1 %v10322_v12 }
 0x584   : > { %6588 = vmatmul.mubr.bf16.gmra.mrb[188].mxu1 %v17319_v26  ;;  %v14969_v50 = vadd.f32 %v9118_v4, %v9117_v25  ;;  %v17320_v21 = vld [vmem:[#allocation67_spill] sm:$0xff]  ;;  %v9120_v19 = vpop.f32.mrb[102].mxu0  ;;  %v3727_v7 = vadd.f32 1.4214138, %v3715_v28  ;;  %v14977_v51 = vmul.f32 0.5, %v14830_v20  ;;  %v14980_v58 = vmul.f32 0.5, %v14852_v0  ;;  %9632 = vmatpush3.bf16.msra.mxu0 %v10329_v48  ;;  %v15001_v48 = vpop.eup %10507 }
 0x585   : > { %17318 = vst [vmem:[#allocation88_spill] sm:$0xff] %v14961_v17  ;;  %6595 = vmatprep.mubr.bf16.mxu1 %v17320_v21  ;;  %v10327_v15 = vld [vmem:[%s16608_s10 + $0xa4] ss:$8 sps:$4 sm:$0xff]   ;;  %v14983_v6 = vmul.f32 0.70710677, %v14958_v23  ;;  %v9121_v25 = vpop.f32.mrb[103].mxu0  ;;  %v14991_v20 = vadd.f32 %v14534_v49, %v3499_v62  ;;  %9633 = vmatprep.subr.bf16.mxu0 %v10336_v40  ;;  %10517 = vrcp.f32 %v3663_v41 }
 0x586   : > { %17321 = vst [vmem:[#allocation34_spill] sm:$0xff] %v14977_v51  ;;  %17322 = vst [vmem:[#allocation78_spill] sm:$0xff] %v14980_v58  ;;  %v10337_v53 = vld [vmem:[%s16606_s8 + $0x530] sm:$0xff]   ;;  %v3664_v47 = vadd.f32 1.0, %v3652_v30  ;;  %v14993_v28 = vadd.f32 %v9121_v25, %v9120_v19  ;;  %v9285_v0 = vpop.f32.mrb[84].mxu1  ;;  %v10341_v12 = vld [vmem:[%s16606_s8 + $0x578] sm:$0xff]   ;;  %v3739_v21 = vmul.f32 %v14827_v8, %v3727_v7  ;;  %10519 = vpow2.f32 %v3839_v14  ;;  %7346 = vmatpush1.bf16.msra.mxu1 %v10320_v37  ;;  %v15028_v14 = vpop.eup %10509 }
 0x587   : > { %17323 = vst [vmem:[#allocation61_spill] sm:$0xff] %v14983_v6  ;;  %17324 = vst [vmem:[#allocation43_spill] sm:$0xff] %v14991_v20  ;;  %v10325_v35 = vld [vmem:[%s16608_s10 + $0xa0] ss:$8 sps:$4 sm:$0xff]   ;;  %v3728_v26 = vadd.f32 1.4214138, %v3716_v33  ;;  %7347 = vmatprep.subr.bf16.mxu1 %v10327_v15 }
 0x588   : > { %v3641_v30 = vand.u32 2147483647, %v14983_v6  ;;  %v9286_v49 = vpop.f32.mrb[85].mxu1  ;;  %v17325_v62 = vld [vmem:[#allocation76_spill] sm:$0xff]  ;;  %v15012_v40 = vsel %vm3610_vm8, 1.0, %v17219_v13  ;;  %v17328_v7 = vld [vmem:[#allocation77_spill] sm:$0xff]  ;;  %9634 = vmatpush3.bf16.msra.mxu0 %v10337_v53  ;;  %10521 = vrcp.f32 %v3664_v47 }
 0x589   : > { %6337 = vmatmul.mubr.bf16.gmra.mrb[208].mxu0 %v17325_v62  ;;  %v10332_v4 = vld [vmem:[%s16608_s10 + $0xb4] ss:$8 sps:$4 sm:$0xff]   ;;  %v3841_v19 = vmul.f32 1.442695, %v3820_v22  ;;  %v15015_v41 = vmul.f32 0.70710677, %v14991_v20  ;;  %v15022_v25 = vadd.f32 %v9286_v49, %v9285_v0  ;;  %v3740_v6 = vmul.f32 %v14846_v36, %v3728_v26  ;;  %v15031_v0 = vpop.eup %10511  ;;  %9635 = vmatprep.subr.bf16.mxu0 %v10341_v12 }
 0x58a   : > { %v15020_v33 = vld [vmem:[%s16607_s9] ss:$0 sm:$0xff]  ;;  %v9288_v62 = vpop.f32.mrb[86].mxu1  ;;  %6344 = vmatprep.mubr.bf16.mxu0 %v17328_v7  ;;  %v3653_v22 = vmul.f32 0.3275911, %v3641_v30  ;;  %v3809_v20 = vsub.f32 0.0, %v3641_v30  ;;  %7348 = vmatpush1.bf16.msra.mxu1 %v10325_v35 }
 0x58b   : > { %17326 = vst [vmem:[#allocation35_spill] sm:$0xff] %v15015_v41  ;;  %17327 = vst [vmem:[#allocation53_spill] sm:$0xff] %v15022_v25  ;;  %v9289_v23 = vpop.f32.mrb[87].mxu1  ;;  %v3751_v17 = vadd.f32 -0.28449672, %v3739_v21  ;;  %v9123_v7 = vpop.f32.mrb[104].mxu0  ;;  %7349 = vmatprep.subr.bf16.mxu1 %v10332_v4  ;;  %10523 = vpow2.f32 %v3841_v19 }
 0x58c   : > { %17329 = vst [vmem:[#allocation57_spill] sm:$0xff] %v15031_v0  ;;  %v3642_v37 = vand.u32 2147483647, %v15015_v41  ;;  %v15034_v49 = vadd.f32 %v9289_v23, %v9288_v62  ;;  %v10330_v25 = vld [vmem:[%s16608_s10 + $0xb0] ss:$8 sps:$4 sm:$0xff]   ;;  %v15042_v15 = vld [vmem:[%s16606_s8 + $0x600] sm:$0xff]   ;;  %v3821_v26 = vmul.f32 %v3809_v20, %v3641_v30  ;;  %v15051_v41 = vpop.eup %10513  ;;  %9636 = vmatpush3.bf16.msra.mxu0 %v10342_v34 }
 0x58d   : > { %v3693_v53 = vmul.f32 1.0614054, %v14907_v5  ;;  %v3665_v47 = vadd.f32 1.0, %v3653_v22  ;;  %v17331_v21 = vld [vmem:[#allocation95_spill] sm:$0xff]  ;;  %v9124_v23 = vpop.f32.mrb[105].mxu0  ;;  %vm3612_vm10 = vcmp.ge.f32.partialorder %v14776_v18, 0.0  ;;  %9795 = vmatprep.subr.bf16.mxu0 %v15042_v15  ;;  %v15061_v10 = vpop.eup %10515 }
 0x58e   : > { %17330 = vst [vmem:[#allocation69_spill] sm:$0xff] %v15034_v49  ;;  %6596 = vmatmul.mubr.bf16.gmra.mrb[192].mxu1 %v17331_v21  ;;  %v3752_v62 = vadd.f32 -0.28449672, %v3740_v6  ;;  %v3763_v49 = vmul.f32 %v14827_v8, %v3751_v17  ;;  %v10335_v12 = vld [vmem:[%s16608_s10 + $0xc4] ss:$8 sps:$4 sm:$0xff]   ;;  %v3810_v58 = vsub.f32 0.0, %v3642_v37  ;;  %v9125_v51 = vadd.f32 %v9124_v23, %v9123_v7 }
 0x58f   : > { %v3654_v46 = vmul.f32 0.3275911, %v3642_v37  ;;  %v9126_v27 = vpop.f32.mrb[106].mxu0  ;;  %v3694_v22 = vmul.f32 1.0614054, %v14927_v31  ;;  %v15057_v6 = vadd.f32 %v14969_v50, %v15020_v33  ;;  %v9291_v23 = vpop.f32.mrb[88].mxu1  ;;  %10525 = vrcp.f32 %v3665_v47  ;;  %7350 = vmatpush1.bf16.msra.mxu1 %v10330_v25 }
 0x590   : > { %v3843_v20 = vmul.f32 1.442695, %v3821_v26  ;;  %v9127_v17 = vpop.f32.mrb[107].mxu0  ;;  %v3764_v30 = vmul.f32 %v14846_v36, %v3752_v62  ;;  %v3775_v21 = vadd.f32 0.2548296, %v3763_v49  ;;  %v3822_v35 = vmul.f32 %v3810_v58, %v3642_v37  ;;  %v9292_v39 = vpop.f32.mrb[89].mxu1  ;;  %7351 = vmatprep.subr.bf16.mxu1 %v10335_v12 }
 0x591   : > { %v3666_v44 = vadd.f32 1.0, %v3654_v46  ;;  %v9128_v7 = vadd.f32 %v9127_v17, %v9126_v27  ;;  %v17332_v0 = vld [vmem:[#allocation49_spill] sm:$0xff]  ;;  %v3705_v4 = vadd.f32 -1.4531521, %v3693_v53  ;;  %v15067_v46 = vadd.f32 %v14993_v28, %v15020_v33  ;;  %v9294_v58 = vpop.f32.mrb[90].mxu1  ;;  %v17334_v19 = vld [vmem:[#allocation48_spill] sm:$0xff]  ;;  %v15075_v34 = vpop.eup %10517 }
 0x592   : > { %v3776_v26 = vadd.f32 0.2548296, %v3764_v30  ;;  %v3787_v50 = vmul.f32 %v14827_v8, %v3775_v21  ;;  %6345 = vmatmul.mubr.bf16.gmra.mrb[212].mxu0 %v17332_v0  ;;  %10527 = vpow2.f32 %v3843_v20  ;;  %v3845_v49 = vmul.f32 1.442695, %v3822_v35  ;;  %v10333_v8 = vld [vmem:[%s16608_s10 + $0xc0] ss:$8 sps:$4 sm:$0xff]   ;;  %v15083_v47 = vpop.eup %10519 }
 0x593   : > { %v15069_v27 = vadd.f32 %v9292_v39, %v9291_v23  ;;  %6352 = vmatprep.mubr.bf16.mxu0 %v17334_v19  ;;  %v9295_v53 = vpop.f32.mrb[91].mxu1  ;;  %v10340_v39 = vld [vmem:[%s16608_s10 + $0xd4] ss:$8 sps:$4 sm:$0xff]   ;;  %v3706_v28 = vadd.f32 -1.4531521, %v3694_v22  ;;  %v3717_v25 = vmul.f32 %v14907_v5, %v3705_v4  ;;  %10529 = vrcp.f32 %v3666_v44  ;;  %v15098_v35 = vpop.eup %10521  ;;  %7352 = vmatpush1.bf16.msra.mxu1 %v10333_v8 }
 0x594   : > { %v3788_v0 = vmul.f32 %v14846_v36, %v3776_v26  ;;  %v3847_v37 = vmul.f32 %v14881_v57, %v3787_v50  ;;  %v15086_v62 = vadd.f32 %v9125_v51, %v15020_v33  ;;  %v15089_v20 = vadd.f32 %v9128_v7, %v15020_v33  ;;  %v9129_v57 = vpop.f32.mrb[108].mxu0  ;;  %v10338_v22 = vld [vmem:[%s16608_s10 + $0xd0] ss:$8 sps:$4 sm:$0xff]   ;;  %7353 = vmatprep.subr.bf16.mxu1 %v10340_v39 }
 0x595   : > { %17333 = vst [vmem:[#allocation42_spill] sm:$0xff] %v15069_v27  ;;  %v15091_v36 = vadd.f32 %v9295_v53, %v9294_v58  ;;  %v9130_v30 = vpop.f32.mrb[109].mxu0  ;;  %v3718_v21 = vmul.f32 %v14927_v31, %v3706_v28  ;;  %v3729_v44 = vadd.f32 1.4214138, %v3717_v25  ;;  %vm3613_vm14 = vcmp.ge.f32.partialorder %v14849_v54, 0.0  ;;  %v17341_v54 = vld [vmem:[#allocation82_spill] sm:$0xff] }
 0x596   : > { %v3848_v12 = vmul.f32 %v14887_v52, %v3788_v0  ;;  %v3859_v17 = vsub.f32 1.0, %v3847_v37  ;;  %10531 = vpow2.f32 %v3845_v49  ;;  %v9131_v51 = vadd.f32 %v9130_v30, %v9129_v57  ;;  %v9132_v7 = vpop.f32.mrb[110].mxu0  ;;  %v10345_v58 = vld [vmem:[%s16608_s10 + $0xe4] ss:$8 sps:$4 sm:$0xff]   ;;  %v9297_v0 = vpop.f32.mrb[92].mxu1 }
 0x597   : > { %17335 = vst [vmem:[#allocation56_spill] sm:$0xff] %v15091_v36  ;;  %v3695_v23 = vmul.f32 1.0614054, %v14955_v11  ;;  %v3696_v52 = vmul.f32 1.0614054, %v14988_v45  ;;  %vm3614_vm15 = vcmp.ge.f32.partialorder %v14867_v60, 0.0  ;;  %v3741_v49 = vmul.f32 %v14907_v5, %v3729_v44  ;;  %v15117_v30 = vpop.eup %10523  ;;  %7354 = vmatpush1.bf16.msra.mxu1 %v10338_v22 }
 0x598   : > { %v3860_v26 = vsub.f32 1.0, %v3848_v12  ;;  %v3871_v50 = vmul.f32 %v3859_v17, %v14790_v42  ;;  %v9133_v4 = vpop.f32.mrb[111].mxu0  ;;  %v3730_v19 = vadd.f32 1.4214138, %v3718_v21  ;;  %v15112_v37 = vsel %vm3611_vm2, 1.0, %v17219_v13  ;;  %v9298_v39 = vpop.f32.mrb[93].mxu1  ;;  %7355 = vmatprep.subr.bf16.mxu1 %v10345_v58 }
 0x599   : > { %v9134_v8 = vadd.f32 %v9133_v4, %v9132_v7  ;;  %v3707_v53 = vadd.f32 -1.4531521, %v3695_v23  ;;  %v3708_v28 = vadd.f32 -1.4531521, %v3696_v52  ;;  %v17336_v57 = vld [vmem:[#allocation38_spill] sm:$0xff]  ;;  %v15120_v21 = vadd.f32 %v9131_v51, %v15020_v33  ;;  %v9300_v16 = vpop.f32.mrb[94].mxu1 }
 0x59a   : > { %v3872_v42 = vmul.f32 %v3860_v26, %v14795_v29  ;;  %v3883_v25 = vadd.f32 1.0, %v3871_v50  ;;  %6353 = vmatmul.mubr.bf16.gmra.mrb[216].mxu0 %v17336_v57  ;;  %v3742_v12 = vmul.f32 %v14927_v31, %v3730_v19  ;;  %v3753_v17 = vadd.f32 -0.28449672, %v3741_v49  ;;  %v17338_v7 = vld [vmem:[#allocation80_spill] sm:$0xff]  ;;  %v10343_v29 = vld [vmem:[%s16608_s10 + $0xe0] ss:$8 sps:$4 sm:$0xff]   ;;  %v15134_v26 = vpop.eup %10525 }
 0x59b   : > { %v15122_v44 = vadd.f32 %v9298_v39, %v9297_v0  ;;  %6474 = vmatprep.mubr.bf16.mxu0 %v17338_v7  ;;  %v15131_v23 = vsel %vm3612_vm10, 1.0, %v17219_v13  ;;  %v3719_v52 = vmul.f32 %v14955_v11, %v3707_v53  ;;  %v9301_v22 = vpop.f32.mrb[95].mxu1  ;;  %v10348_v4 = vld [vmem:[%s16608_s10 + $0xf4] ss:$8 sps:$4 sm:$0xff]   ;;  %v9135_v39 = vpop.f32.mrb[112].mxu0  ;;  %7356 = vmatpush1.bf16.msra.mxu1 %v10343_v29  ;;  %v15165_v29 = vadd.f32 %v9134_v8, %v15020_v33 }
 0x59c   : > { %v3884_v51 = vadd.f32 1.0, %v3872_v42  ;;  %v3895_v50 = vmul.f32 %v3883_v25, %v14746_v24  ;;  %v3754_v19 = vadd.f32 -0.28449672, %v3742_v12  ;;  %v3765_v49 = vmul.f32 %v14907_v5, %v3753_v17  ;;  %v15141_v0 = vpop.eup %10527  ;;  %v10346_v53 = vld [vmem:[%s16608_s10 + $0xf0] ss:$8 sps:$4 sm:$0xff]   ;;  %v9136_v57 = vpop.f32.mrb[113].mxu0  ;;  %7357 = vmatprep.subr.bf16.mxu1 %v10348_v4 }
 0x59d   : > { %17337 = vst [vmem:[#allocation96_spill] sm:$0xff] %v15122_v44  ;;  %17339 = vst [vmem:[#allocation72_spill] sm:$0xff] %v15141_v0  ;;  %v15143_v18 = vadd.f32 %v9301_v22, %v9300_v16  ;;  %v3720_v24 = vmul.f32 %v14988_v45, %v3708_v28  ;;  %v3731_v42 = vadd.f32 1.4214138, %v3719_v52  ;;  %v3697_v58 = vmul.f32 1.0614054, %v15028_v14  ;;  %v15153_v16 = vpop.eup %10529 }
 0x59e   : > { %v3896_v25 = vmul.f32 %v3884_v51, %v14780_v63  ;;  %v3766_v12 = vmul.f32 %v14927_v31, %v3754_v19  ;;  %v3777_v17 = vadd.f32 0.2548296, %v3765_v49  ;;  %v3698_v7 = vmul.f32 1.0614054, %v15051_v41  ;;  %v10350_v19 = vld [vmem:[%s16606_s8 + $0x608] sm:$0xff]  }
 0x59f   : > { %17340 = vst [vmem:[#allocation47_spill] sm:$0xff] %v15143_v18  ;;  %v15155_v22 = vadd.f32 %v9136_v57, %v9135_v39  ;;  %v9138_v18 = vpop.f32.mrb[114].mxu0  ;;  %v3732_v44 = vadd.f32 1.4214138, %v3720_v24  ;;  %v3743_v28 = vmul.f32 %v14955_v11, %v3731_v42  ;;  %v3709_v52 = vadd.f32 -1.4531521, %v3697_v58  ;;  %7358 = vmatpush1.bf16.msra.mxu1 %v10346_v53 }
 0x5a0   : > { %v7010_v36 = vpack.c.bf16 %v3896_v25, %v3895_v50  ;;  %v9139_v27 = vpop.f32.mrb[115].mxu0  ;;  %v3778_v63 = vadd.f32 0.2548296, %v3766_v12  ;;  %v3789_v51 = vmul.f32 %v14907_v5, %v3777_v17  ;;  %v3710_v49 = vadd.f32 -1.4531521, %v3698_v7  ;;  %v15162_v0 = vpop.eup %10531  ;;  %v10351_v53 = vld [vmem:[%s16606_s8 + $0x610] sm:$0xff]  }
 0x5a1   : > { %v9140_v39 = vadd.f32 %v9139_v27, %v9138_v18  ;;  %v9303_v24 = vpop.f32.mrb[96].mxu1  ;;  %v3744_v42 = vmul.f32 %v14988_v45, %v3732_v44  ;;  %v3755_v50 = vadd.f32 -0.28449672, %v3743_v28  ;;  %v15174_v25 = vsel %vm3613_vm14, 1.0, %v17219_v13  ;;  %v9141_v7 = vpop.f32.mrb[116].mxu0 }
 0x5a2   : > { %7359 = vmatprep.mubr.bf16.mxu1 %v7010_v36  ;;  %v9304_v4 = vpop.f32.mrb[97].mxu1  ;;  %6475 = vmatmul.mubr.bf16.vlgmr.msra.gmra.mrb[220].mxu0 %v17242_v38  ;;  %v3790_v5 = vmul.f32 %v14927_v31, %v3778_v63  ;;  %v3849_v58 = vmul.f32 %v14924_v9, %v3789_v51  ;;  %v3721_v8 = vmul.f32 %v15028_v14, %v3709_v52  ;;  %v15184_v9 = vsel %vm3614_vm15, 1.0, %v17219_v13  ;;  %v17343_v63 = vld [vmem:[#allocation105_spill] sm:$0xff] }
 0x5a3   : > { %v15177_v27 = vadd.f32 %v9304_v4, %v9303_v24  ;;  %v9306_v44 = vpop.f32.mrb[98].mxu1  ;;  %9796 = vmatpush3.bf16.msra.mxu0 %v15042_v15  ;;  %v3756_v36 = vadd.f32 -0.28449672, %v3744_v42  ;;  %v3767_v38 = vmul.f32 %v14955_v11, %v3755_v50  ;;  %6482 = vmatprep.mubr.bf16.mxu0 %v17341_v54  ;;  %v3722_v15 = vmul.f32 %v15051_v41, %v3710_v49  ;;  %v9142_v50 = vpop.f32.mrb[117].mxu0 }
 0x5a4   : > { %v9307_v31 = vpop.f32.mrb[99].mxu1  ;;  %v3850_v18 = vmul.f32 %v14944_v59, %v3790_v5  ;;  %v3861_v57 = vsub.f32 1.0, %v3849_v58  ;;  %9797 = vmatprep.subr.bf16.mxu0 %v10350_v19  ;;  %v3733_v12 = vadd.f32 1.4214138, %v3721_v8  ;;  %v15197_v52 = vadd.f32 %v14608_v56, %v15057_v6  ;;  %v17342_v59 = vld [vmem:[#allocation106_spill] sm:$0xff]  ;;  %v9144_v58 = vpop.f32.mrb[118].mxu0 }
 0x5a5   : > { %v15192_v17 = vadd.f32 %v9307_v31, %v9306_v44  ;;  %v3768_v60 = vmul.f32 %v14988_v45, %v3756_v36  ;;  %v3779_v28 = vadd.f32 0.2548296, %v3767_v38  ;;  %v17344_v51 = vpack.c.bf16 %v17342_v59, %v17343_v63  ;;  %v10352_v38 = vld [vmem:[%s16606_s8 + $0x618] sm:$0xff]   ;;  %v17345_v59 = vld [vmem:[#allocation83_spill] sm:$0xff] }
 0x5a6   : > { %v3862_v24 = vsub.f32 1.0, %v3850_v18  ;;  %v3873_v42 = vmul.f32 %v3861_v57, %v14825_v3  ;;  %v3734_v49 = vadd.f32 1.4214138, %v3722_v15  ;;  %v3745_v4 = vmul.f32 %v15028_v14, %v3733_v12  ;;  %v9145_v3 = vpop.f32.mrb[119].mxu0 }
 0x5a7   : > { %7360 = vmatmul.mubr.bf16.vlgmr.msra.gmra.mrb[196].mxu1 %v17344_v51  ;;  %v9143_v5 = vadd.f32 %v9142_v50, %v9141_v7  ;;  %9798 = vmatpush3.bf16.msra.mxu0 %v10350_v19  ;;  %v3780_v8 = vadd.f32 0.2548296, %v3768_v60  ;;  %v3791_v44 = vmul.f32 %v14955_v11, %v3779_v28  ;;  %v15207_v56 = vadd.f32 %v14623_v2, %v15067_v46  ;;  %v9377_v46 = vpop.f32.mrb[100].mxu1 }
 0x5a8   : > { %vm3615_vm11 = vcmp.ge.f32.partialorder %v14890_v1, 0.0  ;;  %v3874_v6 = vmul.f32 %v3862_v24, %v15012_v40  ;;  %v3885_v36 = vadd.f32 1.0, %v3873_v42  ;;  %9799 = vmatprep.subr.bf16.mxu0 %v10351_v53  ;;  %v3746_v19 = vmul.f32 %v15051_v41, %v3734_v49  ;;  %v9378_v15 = vpop.f32.mrb[101].mxu1  ;;  %v10353_v42 = vld [vmem:[%s16606_s8 + $0x620] sm:$0xff]   ;;  %v9147_v49 = vpop.f32.mrb[120].mxu0 }
 0x5a9   : > { %v3757_v31 = vadd.f32 -0.28449672, %v3745_v4  ;;  %v15217_v11 = vadd.f32 %v15155_v22, %v15020_v33  ;;  %v15219_v2 = vadd.f32 %v9145_v3, %v9144_v58  ;;  %v3792_v54 = vmul.f32 %v14988_v45, %v3780_v8  ;;  %v9380_v28 = vpop.f32.mrb[102].mxu1 }
 0x5aa   : > { %v3851_v40 = vmul.f32 %v14967_v32, %v3791_v44  ;;  %v15224_v18 = vadd.f32 %v9140_v39, %v15020_v33  ;;  %v3886_v57 = vadd.f32 1.0, %v3874_v6  ;;  %6483 = vmatmul.mubr.bf16.gmra.mrb[224].mxu0 %v17245_v55  ;;  %v3758_v12 = vadd.f32 -0.28449672, %v3746_v19  ;;  %v9381_v55 = vpop.f32.mrb[103].mxu1 }
 0x5ab   : > { %v3769_v7 = vmul.f32 %v15028_v14, %v3757_v31  ;;  %v15229_v22 = vadd.f32 %v9143_v5, %v15020_v33  ;;  %v15231_v60 = vadd.f32 %v9378_v15, %v9377_v46  ;;  %6490 = vmatprep.mubr.bf16.mxu0 %v17345_v59  ;;  %v3852_v32 = vmul.f32 %v15001_v48, %v3792_v54  ;;  %v9148_v5 = vpop.f32.mrb[121].mxu0  ;;  %v17346_v46 = vld [vmem:[#allocation57_spill] sm:$0xff]  ;;  %v17348_v15 = vld [vmem:[#allocation54_spill] sm:$0xff] }
 0x5ac   : > { %v3863_v45 = vsub.f32 1.0, %v3851_v40  ;;  %9800 = vmatpush3.bf16.msra.mxu0 %v10351_v53  ;;  %v3897_v39 = vmul.f32 %v3885_v36, %v14802_v61  ;;  %v3898_v63 = vmul.f32 %v3886_v57, %v14837_v43  ;;  %v3770_v51 = vmul.f32 %v15051_v41, %v3758_v12  ;;  %v9150_v3 = vpop.f32.mrb[122].mxu0  ;;  %v17347_v57 = vld [vmem:[#allocation93_spill] sm:$0xff] }
 0x5ad   : > { %9801 = vmatprep.subr.bf16.mxu0 %v10352_v38  ;;  %v3781_v24 = vadd.f32 0.2548296, %v3769_v7  ;;  %v15241_v50 = vadd.f32 %v9381_v55, %v9380_v28  ;;  %v3864_v4 = vsub.f32 1.0, %v3852_v32  ;;  %v3699_v53 = vmul.f32 1.0614054, %v15075_v34  ;;  %v9151_v31 = vpop.f32.mrb[123].mxu0 }
 0x5ae   : > { %v3875_v48 = vmul.f32 %v3863_v45, %v15112_v37  ;;  %v7013_v61 = vpack.c.bf16 %v3898_v63, %v3897_v39  ;;  %v3782_v43 = vadd.f32 0.2548296, %v3770_v51  ;;  %v3700_v8 = vmul.f32 1.0614054, %v15098_v35  ;;  %v17349_v12 = vld [vmem:[#allocation89_spill] sm:$0xff]  ;;  %v17351_v28 = vld [vmem:[#allocation28_spill] sm:$0xff] }
 0x5af   : > { %v3793_v58 = vmul.f32 %v15028_v14, %v3781_v24  ;;  %v3876_v44 = vmul.f32 %v3864_v4, %v15131_v23  ;;  %v9149_v36 = vadd.f32 %v9148_v5, %v9147_v49  ;;  %v3711_v19 = vadd.f32 -1.4531521, %v3699_v53  ;;  %v10354_v23 = vld [vmem:[%s16606_s8 + $0x628] sm:$0xff]   ;;  %v9383_v45 = vpop.f32.mrb[104].mxu1  ;;  %v17352_v63 = vld [vmem:[#allocation44_spill] sm:$0xff]  ;;  %v17354_v5 = vld [vmem:[#allocation50_spill] sm:$0xff] }
 0x5b0   : > { %v3887_v6 = vadd.f32 1.0, %v3875_v48  ;;  %9802 = vmatpush3.bf16.msra.mxu0 %v10352_v38  ;;  %7369 = vmatprep.mubr.bf16.mxu1 %v7013_v61  ;;  %v3794_v37 = vmul.f32 %v15051_v41, %v3782_v43  ;;  %v3712_v40 = vadd.f32 -1.4531521, %v3700_v8  ;;  %v15252_v14 = vadd.f32 %v17347_v57, %v15086_v62  ;;  %v9384_v39 = vpop.f32.mrb[105].mxu1  ;;  %v17353_v49 = vld [vmem:[#allocation87_spill] sm:$0xff]  ;;  %v10355_v43 = vld [vmem:[%s16606_s8 + $0x630] sm:$0xff]  }
 0x5b1   : > { %v3853_v54 = vmul.f32 %v17346_v46, %v3793_v58  ;;  %9803 = vmatprep.subr.bf16.mxu0 %v10353_v42  ;;  %v17350_v38 = vpack.c.bf16 %v17348_v15, %v17349_v12  ;;  %v3888_v7 = vadd.f32 1.0, %v3876_v44  ;;  %v15262_v41 = vadd.f32 %v9149_v36, %v15020_v33  ;;  %v9386_v61 = vpop.f32.mrb[106].mxu1  ;;  %v9221_v1 = vpop.f32.mrb[124].mxu0  ;;  %v17356_v15 = vld [vmem:[#allocation40_spill] sm:$0xff] }
 0x5b2   : > { %v3899_v59 = vmul.f32 %v3887_v6, %v17351_v28  ;;  %v9152_v32 = vadd.f32 %v9151_v31, %v9150_v3  ;;  %6491 = vmatmul.mubr.bf16.gmra.mrb[228].mxu0 %v17352_v63  ;;  %v3854_v62 = vmul.f32 %v15061_v10, %v3794_v37  ;;  %v3723_v51 = vmul.f32 %v15075_v34, %v3711_v19  ;;  %v9387_v58 = vpop.f32.mrb[107].mxu1  ;;  %v17355_v31 = vld [vmem:[#allocation86_spill] sm:$0xff]  ;;  %v17359_v63 = vld [vmem:[#allocation109_spill] sm:$0xff] }
 0x5b3   : > { %7370 = vmatmul.mubr.bf16.gmra.mrb[200].mxu1 %v17350_v38  ;;  %v3865_v55 = vsub.f32 1.0, %v3853_v54  ;;  %v3724_v24 = vmul.f32 %v15098_v35, %v3712_v40  ;;  %v3900_v4 = vmul.f32 %v3888_v7, %v17353_v49  ;;  %v15272_v53 = vadd.f32 %v9384_v39, %v9383_v45  ;;  %6498 = vmatprep.mubr.bf16.mxu0 %v17354_v5  ;;  %v9222_v40 = vpop.f32.mrb[125].mxu0  ;;  %v17358_v28 = vld [vmem:[#allocation34_spill] sm:$0xff] }
 0x5b4   : > { %v15270_v48 = vadd.f32 %v9152_v32, %v15020_v33  ;;  %9804 = vmatpush3.bf16.msra.mxu0 %v10353_v42  ;;  %v15278_v10 = vsel %vm3615_vm11, 1.0, %v17219_v13  ;;  %v3866_v8 = vsub.f32 1.0, %v3854_v62  ;;  %v3735_v6 = vadd.f32 1.4214138, %v3723_v51  ;;  %v17360_v62 = vld [vmem:[#allocation101_spill] sm:$0xff] }
 0x5b5   : > { %v3877_v44 = vmul.f32 %v3865_v55, %v15174_v25  ;;  %v3736_v36 = vadd.f32 1.4214138, %v3724_v24  ;;  %9805 = vmatprep.subr.bf16.mxu0 %v10354_v23  ;;  %v5702_v3 = vadd.f32 %v15219_v2, %v15020_v33  ;;  %v7016_v42 = vpack.c.bf16 %v3900_v4, %v3899_v59  ;;  %v9224_v2 = vpop.f32.mrb[126].mxu0  ;;  %v9389_v24 = vpop.f32.mrb[108].mxu1 }
 0x5b6   : > { %v15286_v19 = vadd.f32 %v9387_v58, %v9386_v61  ;;  %v15290_v37 = vadd.f32 %v17355_v31, %v15089_v20  ;;  %v3878_v46 = vmul.f32 %v3866_v8, %v15184_v9  ;;  %v3747_v25 = vmul.f32 %v15075_v34, %v3735_v6  ;;  %v17357_v20 = vld [vmem:[#allocation79_spill] sm:$0xff]  ;;  %v9225_v32 = vpop.f32.mrb[127].mxu0  ;;  %v17362_v61 = vld [vmem:[#allocation78_spill] sm:$0xff]  ;;  %v9390_v58 = vpop.f32.mrb[109].mxu1 }
 0x5b7   : > { %v3889_v54 = vadd.f32 1.0, %v3877_v44  ;;  %v3748_v57 = vmul.f32 %v15098_v35, %v3736_v36  ;;  %vm3616_vm7 = vcmp.ge.f32.partialorder %v17356_v15, 0.0  ;;  %7379 = vmatprep.mubr.bf16.mxu1 %v7016_v42  ;;  %v9223_v33 = vadd.f32 %v9222_v40, %v9221_v1  ;;  %v17363_v8 = vld [vmem:[#allocation46_spill] sm:$0xff]  ;;  %v17364_v36 = vld [vmem:[#allocation107_spill] sm:$0xff]  ;;  %v9392_v31 = vpop.f32.mrb[110].mxu1 }
 0x5b8   : > { %9806 = vmatpush3.bf16.msra.mxu0 %v10354_v23  ;;  %v3701_v12 = vmul.f32 1.0614054, %v15134_v26  ;;  %v3702_v38 = vmul.f32 1.0614054, %v15153_v16  ;;  %v15300_v7 = vadd.f32 %v17357_v20, %v15120_v21  ;;  %v3890_v9 = vadd.f32 1.0, %v3878_v46  ;;  %v10356_v21 = vld [vmem:[%s16606_s8 + $0x638] sm:$0xff]  }
 0x5b9   : > { %v3901_v59 = vmul.f32 %v3889_v54, %v17358_v28  ;;  %v3759_v45 = vadd.f32 -0.28449672, %v3747_v25  ;;  %v3760_v39 = vadd.f32 -0.28449672, %v3748_v57  ;;  %9807 = vmatprep.subr.bf16.mxu0 %v10355_v43  ;;  %v17361_v55 = vpack.c.bf16 %v17359_v63, %v17360_v62  ;;  %v17365_v46 = vld [vmem:[#allocation41_spill] sm:$0xff]  ;;  %v9393_v57 = vpop.f32.mrb[111].mxu1 }
 0x5ba   : > { %v5829_v23 = vadd.f32 %v9223_v33, %v15197_v52  ;;  %v9226_v51 = vadd.f32 %v9225_v32, %v9224_v2  ;;  %v3713_v49 = vadd.f32 -1.4531521, %v3701_v12  ;;  %v3714_v4 = vadd.f32 -1.4531521, %v3702_v38  ;;  %6499 = vmatmul.mubr.bf16.gmra.mrb[232].mxu0 %v17363_v8  ;;  %v17366_v12 = vld [vmem:[#allocation59_spill] sm:$0xff]  ;;  %v17367_v28 = vld [vmem:[#allocation104_spill] sm:$0xff] }
 0x5bb   : > { %7380 = vmatmul.mubr.bf16.gmra.mrb[204].mxu1 %v17361_v55  ;;  %v3902_v5 = vmul.f32 %v3890_v9, %v17362_v61  ;;  %v3771_v44 = vmul.f32 %v15075_v34, %v3759_v45  ;;  %v3772_v6 = vmul.f32 %v15098_v35, %v3760_v39  ;;  %v15316_v52 = vadd.f32 %v17364_v36, %v15165_v29  ;;  %v17368_v39 = vld [vmem:[#allocation31_spill] sm:$0xff]  ;;  %v17373_v8 = vld [vmem:[#allocation108_spill] sm:$0xff] }
 0x5bc   : > { %v5832_v42 = vadd.f32 %v9226_v51, %v15207_v56  ;;  %v15319_v1 = vadd.f32 %v9390_v58, %v9389_v24  ;;  %6506 = vmatprep.mubr.bf16.mxu0 %v17365_v46  ;;  %v3725_v54 = vmul.f32 %v15134_v26, %v3713_v49  ;;  %v3726_v40 = vmul.f32 %v15153_v16, %v3714_v4  ;;  %v9227_v56 = vpop.f32.mrb[128].mxu0  ;;  %v17369_v63 = vld [vmem:[#allocation99_spill] sm:$0xff]  ;;  %v17370_v49 = vld [vmem:[#allocation65_spill] sm:$0xff] }
 0x5bd   : > { %v7019_v25 = vpack.c.bf16 %v3902_v5, %v3901_v59  ;;  %v3783_v33 = vadd.f32 0.2548296, %v3771_v44  ;;  %v3784_v2 = vadd.f32 0.2548296, %v3772_v6  ;;  %9808 = vmatpush3.bf16.msra.mxu0 %v10355_v43  ;;  %v15326_v29 = vadd.f32 %v17366_v12, %v15217_v11  ;;  %v9228_v43 = vpop.f32.mrb[129].mxu0  ;;  %v17372_v5 = vld [vmem:[#allocation30_spill] sm:$0xff] }
 0x5be   : > { %v15328_v38 = vadd.f32 %v9393_v57, %v9392_v31  ;;  %v3737_v20 = vadd.f32 1.4214138, %v3725_v54  ;;  %v3738_v9 = vadd.f32 1.4214138, %v3726_v40  ;;  %9809 = vmatprep.subr.bf16.mxu0 %v10356_v21  ;;  %v15332_v32 = vadd.f32 %v17367_v28, %v15224_v18  ;;  %v9230_v51 = vpop.f32.mrb[130].mxu0  ;;  %v17374_v44 = vld [vmem:[#allocation58_spill] sm:$0xff] }
 0x5bf   : > { %7389 = vmatprep.mubr.bf16.mxu1 %v7019_v25  ;;  %v3795_v59 = vmul.f32 %v15075_v34, %v3783_v33  ;;  %v3796_v45 = vmul.f32 %v15098_v35, %v3784_v2  ;;  %v15338_v11 = vadd.f32 %v17368_v39, %v15229_v22  ;;  %v15341_v62 = vadd.f32 %v17369_v63, %v5702_v3  ;;  %v9231_v61 = vpop.f32.mrb[131].mxu0  ;;  %v17371_v22 = vld [vmem:[#allocation37_spill] sm:$0xff]  ;;  %v9395_v31 = vpop.f32.mrb[112].mxu1  ;;  %v17380_v39 = vld [vmem:[#allocation88_spill] sm:$0xff] }
 0x5c0   : > { %v9229_v55 = vadd.f32 %v9228_v43, %v9227_v56  ;;  %v3749_v24 = vmul.f32 %v15134_v26, %v3737_v20  ;;  %v3750_v18 = vmul.f32 %v15153_v16, %v3738_v9  ;;  %v15347_v4 = vadd.f32 %v17370_v49, %v15262_v41  ;;  %v9396_v54 = vpop.f32.mrb[113].mxu1  ;;  %v17376_v40 = vld [vmem:[#allocation81_spill] sm:$0xff] }
 0x5c1   : > { %v3855_v34 = vmul.f32 %v15083_v47, %v3795_v59  ;;  %v3856_v35 = vmul.f32 %v15117_v30, %v3796_v45  ;;  %9810 = vmatpush3.bf16.msra.mxu0 %v10356_v21  ;;  %v15353_v3 = vadd.f32 %v17371_v22, %v15270_v48  ;;  %v15356_v58 = vadd.f32 %v17372_v5, %v5829_v23  ;;  %v17377_v23 = vld [vmem:[#allocation33_spill] sm:$0xff]  ;;  %v9233_v45 = vpop.f32.mrb[132].mxu0 }
 0x5c2   : > { %v17375_v6 = vpack.c.bf16 %v17373_v8, %v17374_v44  ;;  %v5837_v41 = vadd.f32 %v9229_v55, %v15252_v14  ;;  %v9232_v36 = vadd.f32 %v9231_v61, %v9230_v51  ;;  %v3761_v47 = vadd.f32 -0.28449672, %v3749_v24  ;;  %6507 = vmatmul.mubr.bf16.gmra.mrb[236].mxu0 %v17376_v40  ;;  %v9398_v14 = vpop.f32.mrb[114].mxu1  ;;  %v17378_v2 = vld [vmem:[#allocation29_spill] sm:$0xff]  ;;  %v17381_v55 = vld [vmem:[#allocation55_spill] sm:$0xff]  ;;  %v17382_v24 = vld [vmem:[#allocation32_spill] sm:$0xff] }
 0x5c3   : > { %v3762_v46 = vadd.f32 -0.28449672, %v3750_v18  ;;  %v3628_v30 = vsel %vm3616_vm7, 1.0, %v17219_v13  ;;  %v3867_v21 = vsub.f32 1.0, %v3855_v34  ;;  %v3868_v48 = vsub.f32 1.0, %v3856_v35  ;;  %6514 = vmatprep.mubr.bf16.mxu0 %v17378_v2  ;;  %v9399_v9 = vpop.f32.mrb[115].mxu1 }
 0x5c4   : > { %7390 = vmatmul.mubr.bf16.gmra.mrb[208].mxu1 %v17375_v6  ;;  %v15367_v25 = vadd.f32 %v17377_v23, %v5832_v42  ;;  %v5840_v57 = vadd.f32 %v9232_v36, %v15290_v37  ;;  %v15370_v33 = vadd.f32 %v9396_v54, %v9395_v31  ;;  %v3773_v12 = vmul.f32 %v15134_v26, %v3761_v47  ;;  %v17379_v28 = vld [vmem:[#allocation45_spill] sm:$0xff]  ;;  %v17384_v44 = vld [vmem:[#allocation35_spill] sm:$0xff]  ;;  %v17385_v31 = vld [vmem:[#allocation72_spill] sm:$0xff] }
 0x5c5   : > { %v3774_v15 = vmul.f32 %v15153_v16, %v3762_v46  ;;  %v3879_v56 = vmul.f32 %v3867_v21, %v15278_v10  ;;  %v3880_v20 = vmul.f32 %v3868_v48, %v3628_v30  ;;  %v15377_v59 = vadd.f32 %v17379_v28, %v5837_v41  ;;  %v9234_v10 = vpop.f32.mrb[133].mxu0  ;;  %v17383_v8 = vld [vmem:[#allocation61_spill] sm:$0xff]  ;;  %v9401_v48 = vpop.f32.mrb[116].mxu1 }
 0x5c6   : > { %v15379_v42 = vadd.f32 %v9399_v9, %v9398_v14  ;;  %v3785_v37 = vadd.f32 0.2548296, %v3773_v12  ;;  %v15382_v63 = vadd.f32 %v17380_v39, %v5840_v57  ;;  %v3591_v51 = vmul.f32 0.5, %v17381_v55  ;;  %v9236_v5 = vpop.f32.mrb[134].mxu0  ;;  %v9402_v54 = vpop.f32.mrb[117].mxu1  ;;  %v17387_v12 = vld [vmem:[#allocation102_spill] sm:$0xff] }
 0x5c7   : > { %v3786_v43 = vadd.f32 0.2548296, %v3774_v15  ;;  %v3592_v18 = vmul.f32 0.5, %v17382_v24  ;;  %v3891_v49 = vadd.f32 1.0, %v3879_v56  ;;  %v3892_v34 = vadd.f32 1.0, %v3880_v20  ;;  %v9237_v36 = vpop.f32.mrb[135].mxu0 }
 0x5c8   : > { %v3797_v35 = vmul.f32 %v15134_v26, %v3785_v37  ;;  %v9235_v22 = vadd.f32 %v9234_v10, %v9233_v45  ;;  %vm3617_vm13 = vcmp.ge.f32.partialorder %v17383_v8, 0.0  ;;  %vm3618_vm3 = vcmp.ge.f32.partialorder %v17384_v44, 0.0  ;;  %v9404_v2 = vpop.f32.mrb[118].mxu1  ;;  %v17388_v56 = vld [vmem:[#allocation53_spill] sm:$0xff]  ;;  %v17389_v9 = vld [vmem:[#allocation39_spill] sm:$0xff]  ;;  %v9239_v39 = vpop.f32.mrb[136].mxu0 }
 0x5c9   : > { %v3798_v61 = vmul.f32 %v15153_v16, %v3786_v43  ;;  %v3903_v6 = vmul.f32 %v3891_v49, %v3591_v51  ;;  %v3904_v41 = vmul.f32 %v3892_v34, %v3592_v18  ;;  %v9238_v21 = vadd.f32 %v9237_v36, %v9236_v5  ;;  %v17386_v16 = vld [vmem:[#allocation51_spill] sm:$0xff]  ;;  %v9405_v15 = vpop.f32.mrb[119].mxu1  ;;  %v17392_v55 = vld [vmem:[#allocation69_spill] sm:$0xff]  ;;  %v17393_v24 = vld [vmem:[#allocation60_spill] sm:$0xff]  ;;  %v9240_v49 = vpop.f32.mrb[137].mxu0 }
 0x5ca   : > { %v3857_v47 = vmul.f32 %v17385_v31, %v3797_v35  ;;  %v5845_v30 = vadd.f32 %v9235_v22, %v15300_v7  ;;  %6515 = vmatmul.mubr.bf16.gmra.mrb[240].mxu0 %v17386_v16  ;;  %v15395_v14 = vadd.f32 %v9402_v54, %v9401_v48  ;;  %v3630_v7 = vsel %vm3618_vm3, 1.0, %v17219_v13  ;;  %v17394_v34 = vld [vmem:[#allocation43_spill] sm:$0xff]  ;;  %v9242_v5 = vpop.f32.mrb[138].mxu0  ;;  %v17396_v54 = vld [vmem:[#allocation90_spill] sm:$0xff] }
 0x5cb   : > { %v3858_v46 = vmul.f32 %v15162_v0, %v3798_v61  ;;  %v7022_v26 = vpack.c.bf16 %v3904_v41, %v3903_v6  ;;  %v5848_v57 = vadd.f32 %v9238_v21, %v15316_v52  ;;  %9811 = vmatprep.mubr.bf16.mxu0 %v17387_v12  ;;  %v3629_v0 = vsel %vm3617_vm13, 1.0, %v17219_v13  ;;  %v17390_v52 = vld [vmem:[#allocation92_spill] sm:$0xff]  ;;  %v9243_v8 = vpop.f32.mrb[139].mxu0  ;;  %v17397_v16 = vld [vmem:[#allocation42_spill] sm:$0xff] }
 0x5cc   : > { %v3869_v40 = vsub.f32 1.0, %v3857_v47  ;;  %v15405_v20 = vadd.f32 %v17388_v56, %v5845_v30  ;;  %v17391_v28 = vpack.c.bf16 %v17389_v9, %v17390_v52  ;;  %v15410_v43 = vadd.f32 %v9405_v15, %v9404_v2  ;;  %v9407_v31 = vpop.f32.mrb[120].mxu1  ;;  %v17398_v2 = vld [vmem:[#allocation56_spill] sm:$0xff] }
 0x5cd   : > { %v3870_v23 = vsub.f32 1.0, %v3858_v46  ;;  %7399 = vmatprep.mubr.bf16.mxu1 %v7022_v26  ;;  %v15413_v51 = vadd.f32 %v17392_v55, %v5848_v57  ;;  %v3593_v18 = vmul.f32 0.5, %v17393_v24  ;;  %v3594_v10 = vmul.f32 0.5, %v17394_v34  ;;  %v9408_v47 = vpop.f32.mrb[121].mxu1  ;;  %v17395_v46 = vld [vmem:[#allocation103_spill] sm:$0xff]  ;;  %v17403_v24 = vld [vmem:[#allocation85_spill] sm:$0xff] }
 0x5ce   : > { %7400 = vmatmul.mubr.bf16.gmra.mrb[212].mxu1 %v17391_v28  ;;  %v3881_v45 = vmul.f32 %v3869_v40, %v3629_v0  ;;  %v9241_v22 = vadd.f32 %v9240_v49, %v9239_v39  ;;  %v9244_v36 = vadd.f32 %v9243_v8, %v9242_v5  ;;  %v15420_v48 = vadd.f32 %v9408_v47, %v9407_v31  ;;  %v9410_v26 = vpop.f32.mrb[122].mxu1  ;;  %v17399_v0 = vld [vmem:[#allocation52_spill] sm:$0xff] }
 0x5cf   : > { %v3882_v37 = vmul.f32 %v3870_v23, %v3630_v7  ;;  %v9411_v23 = vpop.f32.mrb[123].mxu1  ;;  %v17400_v7 = vld [vmem:[#allocation91_spill] sm:$0xff]  ;;  %v17402_v52 = vmov 0  }
 0x5d0   : > { %v3893_v35 = vadd.f32 1.0, %v3881_v45  ;;  %v5853_v41 = vadd.f32 %v9241_v22, %v15326_v29  ;;  %v5856_v21 = vadd.f32 %v9244_v36, %v15332_v32  ;;  %v15426_v57 = vadd.f32 %v9411_v23, %v9410_v26  ;;  %v9245_v29 = vpop.f32.mrb[140].mxu0 }
 0x5d1   : > { %v3894_v61 = vadd.f32 1.0, %v3882_v37  ;;  %v17401_v15 = vpack.c.bf16 %v17399_v0, %v17400_v7  ;;  %v9246_v32 = vpop.f32.mrb[141].mxu0 }
 0x5d2   : > { %v3905_v44 = vmul.f32 %v3893_v35, %v3593_v18  ;;  %9812 = vmatmul.mubr.bf16.vlgmr.msra.gmra.mrb[244].mxu0 %v17395_v46  ;;  %v15424_v40 = vadd.f32 %v17397_v16, %v5853_v41  ;;  %v15429_v12 = vadd.f32 %v17398_v2, %v5856_v21  ;;  %v9247_v56 = vadd.f32 %v9246_v32, %v9245_v29  ;;  %v9248_v9 = vpop.f32.mrb[142].mxu0  ;;  %v17405_v35 = vld [vmem:[#allocation96_spill] sm:$0xff] }
 0x5d3   : > { %v3906_v6 = vmul.f32 %v3894_v61, %v3594_v10  ;;  %9815 = vmatprep.mubr.bf16.mxu0 %v17396_v54  ;;  %v9249_v28 = vpop.f32.mrb[143].mxu0  ;;  %v17404_v10 = vld [vmem:[#allocation84_spill] sm:$0xff] }
 0x5d4   : > { %v5861_v45 = vadd.f32 %v9247_v56, %v15338_v11  ;;  %v9250_v37 = vadd.f32 %v9249_v28, %v9248_v9  ;;  %v9481_v39 = vpop.f32.mrb[124].mxu1  ;;  %v17406_v11 = vld [vmem:[#allocation47_spill] sm:$0xff]  ;;  %v17407_v21 = vld [vmem:[#allocation100_spill] sm:$0xff] }
 0x5d5   : > { %v7025_v30 = vpack.c.bf16 %v3906_v6, %v3905_v44  ;;  %v9482_v55 = vpop.f32.mrb[125].mxu1 }
 0x5d6   : > { %v5864_v18 = vadd.f32 %v9250_v37, %v15341_v62  ;;  %v15438_v49 = vadd.f32 %v9482_v55, %v9481_v39  ;;  %v9484_v34 = vpop.f32.mrb[126].mxu1  ;;  %v15442_v61 = vadd.f32 %v17405_v35, %v5861_v45 }
 0x5d7   : > { %7409 = vmatprep.mubr.bf16.mxu1 %v7025_v30  ;;  %v9485_v22 = vpop.f32.mrb[127].mxu1 }
 0x5d8   : > { %7410 = vmatmul.mubr.bf16.gmra.mrb[216].mxu1 %v17401_v15  ;;  %v15444_v5 = vadd.f32 %v9485_v22, %v9484_v34  ;;  %v9251_v8 = vpop.f32.mrb[144].mxu0  ;;  %v15447_v44 = vadd.f32 %v17406_v11, %v5864_v18 }
 0x5d9   : > { %7452 = vmatprep.mubr.bf16.mxu1 %v17402_v52  ;;  %v9252_v6 = vpop.f32.mrb[145].mxu0 }
 0x5da   : > { %9816 = vmatmul.mubr.bf16.gmra.mrb[248].mxu0 %v17403_v24  ;;  %v9253_v41 = vadd.f32 %v9252_v6, %v9251_v8  ;;  %v9254_v36 = vpop.f32.mrb[146].mxu0 }
 0x5db   : > { %9819 = vmatprep.mubr.bf16.mxu0 %v17404_v10  ;;  %v9255_v31 = vpop.f32.mrb[147].mxu0 }
 0x5dc   : > { %v5869_v62 = vadd.f32 %v9253_v41, %v15347_v4  ;;  %v9256_v47 = vadd.f32 %v9255_v31, %v9254_v36  ;;  %v9487_v46 = vpop.f32.mrb[128].mxu1 }
 0x5dd   : > { %v9488_v30 = vpop.f32.mrb[129].mxu1 }
 0x5de   : > { %v5872_v26 = vadd.f32 %v9256_v47, %v15353_v3  ;;  %v15452_v54 = vadd.f32 %v9488_v30, %v9487_v46  ;;  %v9490_v16 = vpop.f32.mrb[130].mxu1  ;;  %v15455_v23 = vadd.f32 %v15177_v27, %v5869_v62 }
 0x5df   : > { %v9491_v29 = vpop.f32.mrb[131].mxu1 }
 0x5e0   : > { %v15457_v2 = vadd.f32 %v9491_v29, %v9490_v16  ;;  %v9325_v0 = vpop.f32.mrb[148].mxu0  ;;  %v15460_v7 = vadd.f32 %v15192_v17, %v5872_v26 }
 0x5e1   : > { %v9326_v4 = vpop.f32.mrb[149].mxu0 }
 0x5e2   : > { %9820 = vmatmul.mubr.bf16.gmra.mrb[252].mxu0 %v17407_v21  ;;  %v9327_v15 = vadd.f32 %v9326_v4, %v9325_v0  ;;  %v9328_v32 = vpop.f32.mrb[150].mxu0 }
 0x5e3   : > { %v9329_v56 = vpop.f32.mrb[151].mxu0 }
 0x5e4   : > { %v5991_v9 = vadd.f32 %v9327_v15, %v15356_v58  ;;  %v9330_v3 = vadd.f32 %v9329_v56, %v9328_v32  ;;  %v9493_v28 = vpop.f32.mrb[132].mxu1 }
 0x5e5   : > { %v9494_v45 = vpop.f32.mrb[133].mxu1 }
 0x5e6   : > { %v5994_v37 = vadd.f32 %v9330_v3, %v15367_v25  ;;  %v15464_v27 = vadd.f32 %v9494_v45, %v9493_v28  ;;  %v9496_v39 = vpop.f32.mrb[134].mxu1  ;;  %v15467_v55 = vadd.f32 %v15231_v60, %v5991_v9 }
 0x5e7   : > { %v9497_v24 = vpop.f32.mrb[135].mxu1 }
 0x5e8   : > { %v15469_v17 = vadd.f32 %v9497_v24, %v9496_v39  ;;  %v9331_v18 = vpop.f32.mrb[152].mxu0  ;;  %v15472_v34 = vadd.f32 %v15241_v50, %v5994_v37 }
 0x5e9   : > { %v9332_v10 = vpop.f32.mrb[153].mxu0 }
 0x5ea   : > { %v9333_v58 = vadd.f32 %v9332_v10, %v9331_v18  ;;  %v9334_v35 = vpop.f32.mrb[154].mxu0 }
 0x5eb   : > { %v9335_v22 = vpop.f32.mrb[155].mxu0 }
 0x5ec   : > { %v5999_v8 = vadd.f32 %v9333_v58, %v15377_v59  ;;  %v9336_v25 = vadd.f32 %v9335_v22, %v9334_v35  ;;  %v9499_v11 = vpop.f32.mrb[136].mxu1 }
 0x5ed   : > { %v9500_v6 = vpop.f32.mrb[137].mxu1 }
 0x5ee   : > { %v6002_v41 = vadd.f32 %v9336_v25, %v15382_v63  ;;  %v15476_v60 = vadd.f32 %v9500_v6, %v9499_v11  ;;  %v9502_v36 = vpop.f32.mrb[138].mxu1  ;;  %v15479_v31 = vadd.f32 %v15272_v53, %v5999_v8 }
 0x5ef   : > { %v9503_v62 = vpop.f32.mrb[139].mxu1 }
 0x5f0   : > { %v15481_v50 = vadd.f32 %v9503_v62, %v9502_v36  ;;  %v9337_v47 = vpop.f32.mrb[156].mxu0  ;;  %v15484_v46 = vadd.f32 %v15286_v19, %v6002_v41 }
 0x5f1   : > { %v9338_v30 = vpop.f32.mrb[157].mxu0 }
 0x5f2   : > { %v9339_v59 = vadd.f32 %v9338_v30, %v9337_v47  ;;  %v9340_v21 = vpop.f32.mrb[158].mxu0 }
 0x5f3   : > { %v9341_v26 = vpop.f32.mrb[159].mxu0 }
 0x5f4   : > { %v6007_v16 = vadd.f32 %v9339_v59, %v15405_v20  ;;  %v9342_v63 = vadd.f32 %v9341_v26, %v9340_v21  ;;  %v9505_v29 = vpop.f32.mrb[140].mxu1 }
 0x5f5   : > { %v9506_v0 = vpop.f32.mrb[141].mxu1 }
 0x5f6   : > { %v6010_v4 = vadd.f32 %v9342_v63, %v15413_v51  ;;  %v15488_v53 = vadd.f32 %v9506_v0, %v9505_v29  ;;  %v9508_v15 = vpop.f32.mrb[142].mxu1  ;;  %v15491_v32 = vadd.f32 %v15319_v1, %v6007_v16 }
 0x5f7   : > { %v9509_v56 = vpop.f32.mrb[143].mxu1 }
 0x5f8   : > { %v15493_v19 = vadd.f32 %v9509_v56, %v9508_v15  ;;  %v9343_v9 = vpop.f32.mrb[160].mxu0  ;;  %v15496_v3 = vadd.f32 %v15328_v38, %v6010_v4 }
 0x5f9   : > { %v9344_v28 = vpop.f32.mrb[161].mxu0 }
 0x5fa   : > { %v9345_v20 = vadd.f32 %v9344_v28, %v9343_v9  ;;  %v9346_v45 = vpop.f32.mrb[162].mxu0 }
 0x5fb   : > { %v9347_v37 = vpop.f32.mrb[163].mxu0 }
 0x5fc   : > { %v6015_v39 = vadd.f32 %v9345_v20, %v15424_v40  ;;  %v9348_v51 = vadd.f32 %v9347_v37, %v9346_v45  ;;  %v9511_v24 = vpop.f32.mrb[144].mxu1 }
 0x5fd   : > { %v9512_v18 = vpop.f32.mrb[145].mxu1 }
 0x5fe   : > { %v6018_v10 = vadd.f32 %v9348_v51, %v15429_v12  ;;  %v15500_v1 = vadd.f32 %v9512_v18, %v9511_v24  ;;  %v9514_v58 = vpop.f32.mrb[146].mxu1  ;;  %v15503_v35 = vadd.f32 %v15370_v33, %v6015_v39 }
 0x5ff   : > { %v9515_v22 = vpop.f32.mrb[147].mxu1 }
 0x600   : > { %v15505_v38 = vadd.f32 %v9515_v22, %v9514_v58  ;;  %v9349_v8 = vpop.f32.mrb[164].mxu0  ;;  %v15508_v25 = vadd.f32 %v15379_v42, %v6018_v10 }
 0x601   : > { %v9350_v11 = vpop.f32.mrb[165].mxu0 }
 0x602   : > { %v9351_v40 = vadd.f32 %v9350_v11, %v9349_v8  ;;  %v9352_v6 = vpop.f32.mrb[166].mxu0 }
 0x603   : > { %v9353_v41 = vpop.f32.mrb[167].mxu0 }
 0x604   : > { %v6023_v36 = vadd.f32 %v9351_v40, %v15442_v61  ;;  %v9354_v12 = vadd.f32 %v9353_v41, %v9352_v6  ;;  %v9585_v62 = vpop.f32.mrb[148].mxu1 }
 0x605   : > { %v9586_v47 = vpop.f32.mrb[149].mxu1 }
 0x606   : > { %v6026_v30 = vadd.f32 %v9354_v12, %v15447_v44  ;;  %v15512_v33 = vadd.f32 %v9586_v47, %v9585_v62  ;;  %v9588_v59 = vpop.f32.mrb[150].mxu1  ;;  %v15515_v21 = vadd.f32 %v15395_v14, %v6023_v36 }
 0x607   : > { %v9589_v26 = vpop.f32.mrb[151].mxu1 }
 0x608   : > { %v15517_v42 = vadd.f32 %v9589_v26, %v9588_v59  ;;  %v9355_v16 = vpop.f32.mrb[168].mxu0  ;;  %v15520_v63 = vadd.f32 %v15410_v43, %v6026_v30 }
 0x609   : > { %v9356_v29 = vpop.f32.mrb[169].mxu0 }
 0x60a   : > { %v9357_v61 = vadd.f32 %v9356_v29, %v9355_v16  ;;  %v9358_v0 = vpop.f32.mrb[170].mxu0 }
 0x60b   : > { %v9359_v4 = vpop.f32.mrb[171].mxu0 }
 0x60c   : > { %v6031_v15 = vadd.f32 %v9357_v61, %v15455_v23  ;;  %v9360_v44 = vadd.f32 %v9359_v4, %v9358_v0  ;;  %v9591_v56 = vpop.f32.mrb[152].mxu1 }
 0x60d   : > { %v9592_v9 = vpop.f32.mrb[153].mxu1 }
 0x60e   : > { %v6034_v28 = vadd.f32 %v9360_v44, %v15460_v7  ;;  %v15524_v14 = vadd.f32 %v9592_v9, %v9591_v56  ;;  %v9594_v20 = vpop.f32.mrb[154].mxu1  ;;  %v15527_v45 = vadd.f32 %v15420_v48, %v6031_v15 }
 0x60f   : > { %v9595_v37 = vpop.f32.mrb[155].mxu1 }
 0x610   : > { %v15529_v43 = vadd.f32 %v9595_v37, %v9594_v20  ;;  %v9429_v39 = vpop.f32.mrb[172].mxu0  ;;  %v15532_v51 = vadd.f32 %v15426_v57, %v6034_v28 }
 0x611   : > { %v9430_v24 = vpop.f32.mrb[173].mxu0 }
 0x612   : > { %v9431_v23 = vadd.f32 %v9430_v24, %v9429_v39  ;;  %v9432_v18 = vpop.f32.mrb[174].mxu0 }
 0x613   : > { %v9433_v10 = vpop.f32.mrb[175].mxu0 }
 0x614   : > { %v6153_v58 = vadd.f32 %v9431_v23, %v15467_v55  ;;  %v9434_v7 = vadd.f32 %v9433_v10, %v9432_v18  ;;  %v9597_v22 = vpop.f32.mrb[156].mxu1 }
 0x615   : > { %v9598_v8 = vpop.f32.mrb[157].mxu1 }
 0x616   : > { %v6156_v11 = vadd.f32 %v9434_v7, %v15472_v34  ;;  %v15536_v48 = vadd.f32 %v9598_v8, %v9597_v22  ;;  %v9600_v40 = vpop.f32.mrb[158].mxu1  ;;  %v15539_v6 = vadd.f32 %v15438_v49, %v6153_v58 }
 0x617   : > { %v9601_v41 = vpop.f32.mrb[159].mxu1 }
 0x618   : > { %v15541_v57 = vadd.f32 %v9601_v41, %v9600_v40  ;;  %v9435_v36 = vpop.f32.mrb[176].mxu0  ;;  %v15544_v12 = vadd.f32 %v15444_v5, %v6156_v11 }
 0x619   : > { %v9436_v62 = vpop.f32.mrb[177].mxu0 }
 0x61a   : > { %v9437_v55 = vadd.f32 %v9436_v62, %v9435_v36  ;;  %v9438_v47 = vpop.f32.mrb[178].mxu0 }
 0x61b   : > { %v9439_v30 = vpop.f32.mrb[179].mxu0 }
 0x61c   : > { %v6161_v59 = vadd.f32 %v9437_v55, %v15479_v31  ;;  %v9440_v34 = vadd.f32 %v9439_v30, %v9438_v47  ;;  %v9603_v26 = vpop.f32.mrb[160].mxu1 }
 0x61d   : > { %v9604_v16 = vpop.f32.mrb[161].mxu1 }
 0x61e   : > { %v6164_v29 = vadd.f32 %v9440_v34, %v15484_v46  ;;  %v15548_v49 = vadd.f32 %v9604_v16, %v9603_v26  ;;  %v9606_v61 = vpop.f32.mrb[162].mxu1  ;;  %v15551_v0 = vadd.f32 %v15452_v54, %v6161_v59 }
 0x61f   : > { %v9607_v4 = vpop.f32.mrb[163].mxu1 }
 0x620   : > { %v15553_v5 = vadd.f32 %v9607_v4, %v9606_v61  ;;  %v9441_v15 = vpop.f32.mrb[180].mxu0  ;;  %v15556_v44 = vadd.f32 %v15457_v2, %v6164_v29 }
 0x621   : > { %v9442_v56 = vpop.f32.mrb[181].mxu0 }
 0x622   : > { %v9443_v31 = vadd.f32 %v9442_v56, %v9441_v15  ;;  %v9444_v9 = vpop.f32.mrb[182].mxu0 }
 0x623   : > { %v9445_v28 = vpop.f32.mrb[183].mxu0 }
 0x624   : > { %v6169_v20 = vadd.f32 %v9443_v31, %v15491_v32  ;;  %v9446_v46 = vadd.f32 %v9445_v28, %v9444_v9  ;;  %v9609_v37 = vpop.f32.mrb[164].mxu1 }
 0x625   : > { %v9610_v39 = vpop.f32.mrb[165].mxu1 }
 0x626   : > { %v6172_v24 = vadd.f32 %v9446_v46, %v15496_v3  ;;  %v15560_v54 = vadd.f32 %v9610_v39, %v9609_v37  ;;  %v9612_v23 = vpop.f32.mrb[166].mxu1  ;;  %v15563_v18 = vadd.f32 %v15464_v27, %v6169_v20 }
 0x627   : > { %v9613_v10 = vpop.f32.mrb[167].mxu1 }
 0x628   : > { %v15565_v2 = vadd.f32 %v9613_v10, %v9612_v23  ;;  %v9447_v58 = vpop.f32.mrb[184].mxu0  ;;  %v15568_v7 = vadd.f32 %v15469_v17, %v6172_v24 }
 0x629   : > { %v9448_v22 = vpop.f32.mrb[185].mxu0 }
 0x62a   : > { %v9449_v32 = vadd.f32 %v9448_v22, %v9447_v58  ;;  %v9450_v8 = vpop.f32.mrb[186].mxu0 }
 0x62b   : > { %v9451_v11 = vpop.f32.mrb[187].mxu0 }
 0x62c   : > { %v6177_v40 = vadd.f32 %v9449_v32, %v15503_v35  ;;  %v9452_v3 = vadd.f32 %v9451_v11, %v9450_v8  ;;  %v9615_v41 = vpop.f32.mrb[168].mxu1 }
 0x62d   : > { %v9616_v36 = vpop.f32.mrb[169].mxu1 }
 0x62e   : > { %v6180_v62 = vadd.f32 %v9452_v3, %v15508_v25  ;;  %v15572_v27 = vadd.f32 %v9616_v36, %v9615_v41  ;;  %v9618_v55 = vpop.f32.mrb[170].mxu1  ;;  %v15575_v47 = vadd.f32 %v15476_v60, %v6177_v40 }
 0x62f   : > { %v9619_v30 = vpop.f32.mrb[171].mxu1 }
 0x630   : > { %v15577_v17 = vadd.f32 %v9619_v30, %v9618_v55  ;;  %v9453_v59 = vpop.f32.mrb[188].mxu0  ;;  %v15580_v34 = vadd.f32 %v15481_v50, %v6180_v62 }
 0x631   : > { %v9454_v26 = vpop.f32.mrb[189].mxu0 }
 0x632   : > { %v9455_v35 = vadd.f32 %v9454_v26, %v9453_v59  ;;  %v9456_v16 = vpop.f32.mrb[190].mxu0 }
 0x633   : > { %v9457_v29 = vpop.f32.mrb[191].mxu0 }
 0x634   : > { %v6185_v61 = vadd.f32 %v9455_v35, %v15515_v21  ;;  %v9458_v25 = vadd.f32 %v9457_v29, %v9456_v16  ;;  %v9689_v4 = vpop.f32.mrb[172].mxu1 }
 0x635   : > { %v9690_v15 = vpop.f32.mrb[173].mxu1 }
 0x636   : > { %v6188_v56 = vadd.f32 %v9458_v25, %v15520_v63  ;;  %v15584_v60 = vadd.f32 %v9690_v15, %v9689_v4  ;;  %v9692_v31 = vpop.f32.mrb[174].mxu1  ;;  %v15587_v9 = vadd.f32 %v15488_v53, %v6185_v61 }
 0x637   : > { %v9693_v28 = vpop.f32.mrb[175].mxu1 }
 0x638   : > { %v15589_v50 = vadd.f32 %v9693_v28, %v9692_v31  ;;  %v9459_v20 = vpop.f32.mrb[192].mxu0  ;;  %v15592_v46 = vadd.f32 %v15493_v19, %v6188_v56 }
 0x639   : > { %v9460_v37 = vpop.f32.mrb[193].mxu0 }
 0x63a   : > { %v9461_v21 = vadd.f32 %v9460_v37, %v9459_v20  ;;  %v9462_v39 = vpop.f32.mrb[194].mxu0 }
 0x63b   : > { %v9463_v24 = vpop.f32.mrb[195].mxu0 }
 0x63c   : > { %v6193_v23 = vadd.f32 %v9461_v21, %v15527_v45  ;;  %v9464_v63 = vadd.f32 %v9463_v24, %v9462_v39  ;;  %v9695_v10 = vpop.f32.mrb[176].mxu1 }
 0x63d   : > { %v9696_v58 = vpop.f32.mrb[177].mxu1 }
 0x63e   : > { %v6196_v22 = vadd.f32 %v9464_v63, %v15532_v51  ;;  %v15596_v53 = vadd.f32 %v9696_v58, %v9695_v10  ;;  %v9698_v32 = vpop.f32.mrb[178].mxu1  ;;  %v15599_v8 = vadd.f32 %v15500_v1, %v6193_v23 }
 0x63f   : > { %v9699_v11 = vpop.f32.mrb[179].mxu1 }
 0x640   : > { %v15601_v19 = vadd.f32 %v9699_v11, %v9698_v32  ;;  %v9533_v40 = vpop.f32.mrb[196].mxu0  ;;  %v15604_v3 = vadd.f32 %v15505_v38, %v6196_v22 }
 0x641   : > { %v9534_v41 = vpop.f32.mrb[197].mxu0 }
 0x642   : > { %v9535_v45 = vadd.f32 %v9534_v41, %v9533_v40  ;;  %v9536_v36 = vpop.f32.mrb[198].mxu0 }
 0x643   : > { %v9537_v62 = vpop.f32.mrb[199].mxu0 }
 0x644   : > { %v6315_v55 = vadd.f32 %v9535_v45, %v15539_v6  ;;  %v9538_v51 = vadd.f32 %v9537_v62, %v9536_v36  ;;  %v9701_v30 = vpop.f32.mrb[180].mxu1 }
 0x645   : > { %v9702_v59 = vpop.f32.mrb[181].mxu1 }
 0x646   : > { %v6318_v26 = vadd.f32 %v9538_v51, %v15544_v12  ;;  %v15608_v1 = vadd.f32 %v9702_v59, %v9701_v30  ;;  %v9704_v35 = vpop.f32.mrb[182].mxu1  ;;  %v15611_v16 = vadd.f32 %v15512_v33, %v6315_v55 }
 0x647   : > { %v9705_v29 = vpop.f32.mrb[183].mxu1 }
 0x648   : > { %v15613_v38 = vadd.f32 %v9705_v29, %v9704_v35  ;;  %v9539_v61 = vpop.f32.mrb[200].mxu0  ;;  %v15616_v25 = vadd.f32 %v15517_v42, %v6318_v26 }
 0x649   : > { %v9540_v4 = vpop.f32.mrb[201].mxu0 }
 0x64a   : > { %v9541_v6 = vadd.f32 %v9540_v4, %v9539_v61  ;;  %v9542_v15 = vpop.f32.mrb[202].mxu0 }
 0x64b   : > { %v9543_v56 = vpop.f32.mrb[203].mxu0 }
 0x64c   : > { %v6323_v31 = vadd.f32 %v9541_v6, %v15551_v0  ;;  %v9544_v12 = vadd.f32 %v9543_v56, %v9542_v15 }
 0x64e   : > { %v9707_v28 = vpop.f32.mrb[184].mxu1  ;;  %v6326_v37 = vadd.f32 %v9544_v12, %v15556_v44  ;;  %v15623_v39 = vadd.f32 %v15524_v14, %v6323_v31 }
 0x64f   : > { %v9708_v20 = vpop.f32.mrb[185].mxu1 }
 0x650   : > { %v15620_v33 = vadd.f32 %v9708_v20, %v9707_v28  ;;  %v9710_v21 = vpop.f32.mrb[186].mxu1  ;;  %v9545_v23 = vpop.f32.mrb[204].mxu0  ;;  %v15628_v63 = vadd.f32 %v15529_v43, %v6326_v37 }
 0x651   : > { %v9711_v24 = vpop.f32.mrb[187].mxu1  ;;  %v9546_v10 = vpop.f32.mrb[205].mxu0 }
 0x652   : > { %v15625_v42 = vadd.f32 %v9711_v24, %v9710_v21  ;;  %v9547_v0 = vadd.f32 %v9546_v10, %v9545_v23  ;;  %v9548_v58 = vpop.f32.mrb[206].mxu0 }
 0x653   : > { %v9549_v22 = vpop.f32.mrb[207].mxu0 }
 0x654   : > { %v6331_v32 = vadd.f32 %v9547_v0, %v15563_v18  ;;  %v9550_v44 = vadd.f32 %v9549_v22, %v9548_v58  ;;  %v10357_v18 = vld [vmem:[%s16608_s10 + $0x100] ss:$8 sps:$4 sm:$0xff]  }
 0x656   : > { %v6334_v41 = vadd.f32 %v9550_v44, %v15568_v7  ;;  %v15635_v36 = vadd.f32 %v15536_v48, %v6331_v32  ;;  %v10359_v7 = vld [vmem:[%s16608_s10 + $0x104] ss:$8 sps:$4 sm:$0xff]  }
 0x657   : > { %v9713_v11 = vpop.f32.mrb[188].mxu1  ;;  %7420 = vmatprep.subr.bf16.mxu1 %v10359_v7 }
 0x658   : > { %v9714_v40 = vpop.f32.mrb[189].mxu1  ;;  %v15640_v51 = vadd.f32 %v15541_v57, %v6334_v41  ;;  %7421 = vmatpush1.bf16.msra.mxu1 %v10357_v18 }
 0x659   : > { %v15632_v14 = vadd.f32 %v9714_v40, %v9713_v11  ;;  %v9716_v45 = vpop.f32.mrb[190].mxu1  ;;  %v10360_v11 = vld [vmem:[%s16608_s10 + $0x110] ss:$8 sps:$4 sm:$0xff]  }
 0x65a   : > { %v9717_v62 = vpop.f32.mrb[191].mxu1 }
 0x65b   : > { %v15637_v43 = vadd.f32 %v9717_v62, %v9716_v45 }
 0x65c   : > { %v9551_v55 = vpop.f32.mrb[208].mxu0 }
 0x65d   : > { %v9552_v30 = vpop.f32.mrb[209].mxu0 }
 0x65e   : > { %v9553_v59 = vadd.f32 %v9552_v30, %v9551_v55  ;;  %v9554_v26 = vpop.f32.mrb[210].mxu0 }
 0x65f   : > { %v9555_v48 = vpop.f32.mrb[211].mxu0 }
 0x660   : > { %v6339_v35 = vadd.f32 %v9553_v59, %v15575_v47  ;;  %v9556_v29 = vadd.f32 %v9555_v48, %v9554_v26 }
 0x661   : > { %v9719_v61 = vpop.f32.mrb[192].mxu1 }
 0x662   : > { %v9720_v57 = vpop.f32.mrb[193].mxu1  ;;  %v6342_v4 = vadd.f32 %v9556_v29, %v15580_v34  ;;  %v15653_v56 = vadd.f32 %v15548_v49, %v6339_v35 }
 0x663   : > { %v15650_v6 = vadd.f32 %v9720_v57, %v9719_v61  ;;  %v9722_v15 = vpop.f32.mrb[194].mxu1 }
 0x664   : > { %v9723_v31 = vpop.f32.mrb[195].mxu1  ;;  %v15658_v20 = vadd.f32 %v15553_v5, %v6342_v4 }
 0x665   : > { %v15655_v12 = vadd.f32 %v9723_v31, %v9722_v15  ;;  %v9557_v28 = vpop.f32.mrb[212].mxu0 }
 0x666   : > { %v9558_v37 = vpop.f32.mrb[213].mxu0 }
 0x667   : > { %v9559_v47 = vadd.f32 %v9558_v37, %v9557_v28  ;;  %v9560_v21 = vpop.f32.mrb[214].mxu0 }
 0x668   : > { %v9561_v24 = vpop.f32.mrb[215].mxu0 }
 0x669   : > { %v6347_v23 = vadd.f32 %v9559_v47, %v15587_v9  ;;  %v9562_v34 = vadd.f32 %v9561_v24, %v9560_v21  ;;  %v10362_v9 = vld [vmem:[%s16608_s10 + $0x114] ss:$8 sps:$4 sm:$0xff]  }
 0x66a   : > { %7422 = vmatprep.subr.bf16.mxu1 %v10362_v9 }
 0x66b   : > { %v6350_v10 = vadd.f32 %v9562_v34, %v15592_v46  ;;  %v15663_v0 = vadd.f32 %v15560_v54, %v6347_v23  ;;  %7423 = vmatpush1.bf16.msra.mxu1 %v10360_v11  ;;  %v10368_v23 = vld [vmem:[%s16608_s10 + $0x134] ss:$8 sps:$4 sm:$0xff]  }
 0x66d   : > { %v9563_v49 = vpop.f32.mrb[216].mxu0  ;;  %v15666_v58 = vadd.f32 %v15565_v2, %v6350_v10 }
 0x66e   : > { %v9564_v22 = vpop.f32.mrb[217].mxu0 }
 0x66f   : > { %v9565_v32 = vadd.f32 %v9564_v22, %v9563_v49  ;;  %v9566_v5 = vpop.f32.mrb[218].mxu0 }
 0x670   : > { %v9567_v44 = vpop.f32.mrb[219].mxu0 }
 0x671   : > { %v6355_v46 = vadd.f32 %v9565_v32, %v15599_v8  ;;  %v9568_v54 = vadd.f32 %v9567_v44, %v9566_v5  ;;  %v10369_v44 = vld [vmem:[%s16608_s10 + $0x140] ss:$8 sps:$4 sm:$0xff]  }
 0x673   : > { %v6358_v40 = vadd.f32 %v9568_v54, %v15604_v3  ;;  %v15677_v2 = vadd.f32 %v15572_v27, %v6355_v46  ;;  %v10377_v46 = vld [vmem:[%s16608_s10 + $0x164] ss:$8 sps:$4 sm:$0xff]  }
 0x675   : > { %v9637_v41 = vpop.f32.mrb[220].mxu0  ;;  %v15680_v45 = vadd.f32 %v15577_v17, %v6358_v40 }
 0x676   : > { %v9638_v62 = vpop.f32.mrb[221].mxu0 }
 0x677   : > { %v9639_v55 = vadd.f32 %v9638_v62, %v9637_v41  ;;  %v9640_v18 = vpop.f32.mrb[222].mxu0 }
 0x678   : > { %v9641_v7 = vpop.f32.mrb[223].mxu0 }
 0x679   : > { %v6477_v30 = vadd.f32 %v9639_v55, %v15611_v16  ;;  %v9642_v59 = vadd.f32 %v9641_v7, %v9640_v18  ;;  %v10380_v18 = vld [vmem:[%s16608_s10 + $0x174] ss:$8 sps:$4 sm:$0xff]  }
 0x67b   : > { %v6480_v8 = vadd.f32 %v9642_v59, %v15616_v25  ;;  %v15685_v26 = vadd.f32 %v15584_v60, %v6477_v30 }
 0x67d   : > { %v9643_v3 = vpop.f32.mrb[224].mxu0  ;;  %v15688_v27 = vadd.f32 %v15589_v50, %v6480_v8 }
 0x67e   : > { %v9644_v48 = vpop.f32.mrb[225].mxu0 }
 0x67f   : > { %v9645_v35 = vadd.f32 %v9644_v48, %v9643_v3  ;;  %v9646_v17 = vpop.f32.mrb[226].mxu0 }
 0x680   : > { %v9647_v29 = vpop.f32.mrb[227].mxu0 }
 0x681   : > { %v6485_v61 = vadd.f32 %v9645_v35, %v15623_v39  ;;  %v9648_v57 = vadd.f32 %v9647_v29, %v9646_v17  ;;  %v10365_v39 = vld [vmem:[%s16608_s10 + $0x124] ss:$8 sps:$4 sm:$0xff]  }
 0x682   : > { %7424 = vmatprep.subr.bf16.mxu1 %v10365_v39 }
 0x683   : > { %v6488_v4 = vadd.f32 %v9648_v57, %v15628_v63  ;;  %v15693_v16 = vadd.f32 %v15596_v53, %v6485_v61 }
 0x685   : > { %v9649_v25 = vpop.f32.mrb[228].mxu0  ;;  %v15696_v60 = vadd.f32 %v15601_v19, %v6488_v4  ;;  %v10363_v19 = vld [vmem:[%s16608_s10 + $0x120] ss:$8 sps:$4 sm:$0xff]  }
 0x686   : > { %v9650_v15 = vpop.f32.mrb[229].mxu0  ;;  %7425 = vmatpush1.bf16.msra.mxu1 %v10363_v19 }
 0x687   : > { %v9651_v31 = vadd.f32 %v9650_v15, %v9649_v25  ;;  %v9652_v50 = vpop.f32.mrb[230].mxu0  ;;  %7426 = vmatprep.subr.bf16.mxu1 %v10368_v23 }
 0x688   : > { %v9653_v28 = vpop.f32.mrb[231].mxu0 }
 0x689   : > { %v6493_v37 = vadd.f32 %v9651_v31, %v15635_v36  ;;  %v9654_v47 = vadd.f32 %v9653_v28, %v9652_v50 }
 0x68b   : > { %v6496_v63 = vadd.f32 %v9654_v47, %v15640_v51  ;;  %v15704_v53 = vadd.f32 %v15608_v1, %v6493_v37  ;;  %v10366_v1 = vld [vmem:[%s16608_s10 + $0x130] ss:$8 sps:$4 sm:$0xff]  }
 0x68c   : > { %7427 = vmatpush1.bf16.msra.mxu1 %v10366_v1 }
 0x68d   : > { %v9655_v21 = vpop.f32.mrb[232].mxu0  ;;  %v15710_v24 = vadd.f32 %v15613_v38, %v6496_v63  ;;  %v10371_v38 = vld [vmem:[%s16608_s10 + $0x144] ss:$8 sps:$4 sm:$0xff]  }
 0x68e   : > { %v9656_v36 = vpop.f32.mrb[233].mxu0  ;;  %7428 = vmatprep.subr.bf16.mxu1 %v10371_v38 }
 0x68f   : > { %v9657_v34 = vadd.f32 %v9656_v36, %v9655_v21  ;;  %v9658_v51 = vpop.f32.mrb[234].mxu0 }
 0x690   : > { %v9659_v10 = vpop.f32.mrb[235].mxu0  ;;  %7429 = vmatpush1.bf16.msra.mxu1 %v10369_v44 }
 0x691   : > { %v6501_v49 = vadd.f32 %v9657_v34, %v15653_v56  ;;  %v9660_v22 = vadd.f32 %v9659_v10, %v9658_v51  ;;  %v10374_v56 = vld [vmem:[%s16608_s10 + $0x154] ss:$8 sps:$4 sm:$0xff]  }
 0x692   : > { %7430 = vmatprep.subr.bf16.mxu1 %v10374_v56 }
 0x693   : > { %v6504_v32 = vadd.f32 %v9660_v22, %v15658_v20  ;;  %v15724_v5 = vadd.f32 %v15620_v33, %v6501_v49  ;;  %v10372_v20 = vld [vmem:[%s16608_s10 + $0x150] ss:$8 sps:$4 sm:$0xff]  }
 0x694   : > { %7431 = vmatpush1.bf16.msra.mxu1 %v10372_v20 }
 0x695   : > { %v9661_v11 = vpop.f32.mrb[236].mxu0  ;;  %v15733_v9 = vadd.f32 %v15625_v42, %v6504_v32  ;;  %v10375_v42 = vld [vmem:[%s16608_s10 + $0x160] ss:$8 sps:$4 sm:$0xff]   ;;  %7432 = vmatprep.subr.bf16.mxu1 %v10377_v46 }
 0x696   : > { %v9662_v33 = vpop.f32.mrb[237].mxu0 }
 0x697   : > { %v9663_v54 = vadd.f32 %v9662_v33, %v9661_v11  ;;  %v9664_v40 = vpop.f32.mrb[238].mxu0 }
 0x698   : > { %v9665_v41 = vpop.f32.mrb[239].mxu0  ;;  %7433 = vmatpush1.bf16.msra.mxu1 %v10375_v42 }
 0x699   : > { %v6509_v62 = vadd.f32 %v9663_v54, %v15663_v0  ;;  %v9666_v55 = vadd.f32 %v9665_v41, %v9664_v40  ;;  %v10378_v0 = vld [vmem:[%s16608_s10 + $0x170] ss:$8 sps:$4 sm:$0xff]   ;;  %7434 = vmatprep.subr.bf16.mxu1 %v10380_v18 }
 0x69b   : > { %v6512_v7 = vadd.f32 %v9666_v55, %v15666_v58  ;;  %v15750_v30 = vadd.f32 %v15632_v14, %v6509_v62 }
 0x69c   : > { %7435 = vmatpush1.bf16.msra.mxu1 %v10378_v0 }
 0x69d   : > { %v9667_v59 = vpop.f32.mrb[240].mxu0  ;;  %v15753_v8 = vadd.f32 %v15637_v43, %v6512_v7 }
 0x69e   : > { %v9668_v3 = vpop.f32.mrb[241].mxu0 }
 0x69f   : > { %v9669_v48 = vadd.f32 %v9668_v3, %v9667_v59  ;;  %v9670_v35 = vpop.f32.mrb[242].mxu0 }
 0x6a0   : > { %v9671_v17 = vpop.f32.mrb[243].mxu0 }
 0x6a1   : > { %v6517_v29 = vadd.f32 %v9669_v48, %v15677_v2  ;;  %v9672_v58 = vadd.f32 %v9671_v17, %v9670_v35 }
 0x6a3   : > { %v6520_v14 = vadd.f32 %v9672_v58, %v15680_v45  ;;  %v15761_v61 = vadd.f32 %v15650_v6, %v6517_v29 }
 0x6a5   : > { %v9813_v43 = vpop.f32.mrb[244].mxu0  ;;  %v15764_v57 = vadd.f32 %v15655_v12, %v6520_v14 }
 0x6a6   : > { %v6647_v4 = vadd.f32 %v9813_v43, %v15693_v16  ;;  %v6638_v25 = vpop.f32.mrb[245].mxu0 }
 0x6a7   : > { %v6639_v15 = vadd.f32 %v6638_v25, %v15685_v26  ;;  %v9814_v31 = vpop.f32.mrb[246].mxu0 }
 0x6a8   : > { %v6699_v50 = vmul.f32 0.70710677, %v6647_v4  ;;  %v6650_v2 = vadd.f32 %v9814_v31, %v15696_v60  ;;  %v6641_v28 = vpop.f32.mrb[247].mxu0  ;;  %v15785_v11 = vmul.f32 0.5, %v6647_v4 }
 0x6a9   : > { %v6697_v37 = vmul.f32 0.70710677, %v6639_v15  ;;  %v6642_v45 = vadd.f32 %v6641_v28, %v15688_v27  ;;  %v15787_v20 = vmul.f32 0.5, %v6639_v15 }
 0x6aa   : > { %v6735_v47 = vand.u32 2147483647, %v6699_v50  ;;  %v15770_v6 = vmul.f32 0.70710677, %v6650_v2  ;;  %vm6711_vm0 = vcmp.ge.f32.partialorder %v6699_v50, 0.0  ;;  %v15806_v18 = vmul.f32 0.5, %v6650_v2 }
 0x6ab   : > { %v6733_v39 = vand.u32 2147483647, %v6697_v37  ;;  %v15773_v21 = vmul.f32 0.70710677, %v6642_v45  ;;  %vm6709_vm9 = vcmp.ge.f32.partialorder %v6697_v37, 0.0  ;;  %v15812_v0 = vsel %vm6711_vm0, 1.0, %v17219_v13 }
 0x6ac   : > { %v6747_v63 = vmul.f32 0.3275911, %v6735_v47  ;;  %v6736_v19 = vand.u32 2147483647, %v15770_v6  ;;  %v6903_v60 = vsub.f32 0.0, %v6735_v47  ;;  %v15820_v29 = vmul.f32 0.5, %v6642_v45 }
 0x6ad   : > { %v6745_v12 = vmul.f32 0.3275911, %v6733_v39  ;;  %v9817_v26 = vpop.f32.mrb[248].mxu0  ;;  %v6734_v51 = vand.u32 2147483647, %v15773_v21  ;;  %v6901_v33 = vsub.f32 0.0, %v6733_v39 }
 0x6ae   : > { %v6759_v16 = vadd.f32 1.0, %v6747_v63  ;;  %v6748_v23 = vmul.f32 0.3275911, %v6736_v19  ;;  %v6654_v34 = vpop.f32.mrb[249].mxu0  ;;  %v15777_v22 = vadd.f32 %v9817_v26, %v15724_v5  ;;  %v6915_v32 = vmul.f32 %v6903_v60, %v6735_v47 }
 0x6af   : > { %v6757_v36 = vadd.f32 1.0, %v6745_v12  ;;  %v9818_v27 = vpop.f32.mrb[250].mxu0  ;;  %v6746_v49 = vmul.f32 0.3275911, %v6734_v51  ;;  %v15780_v38 = vadd.f32 %v6654_v34, %v15704_v53  ;;  %v6904_v40 = vsub.f32 0.0, %v6736_v19 }
 0x6b0   : > { %10533 = vrcp.f32 %v6759_v16  ;;  %v6760_v1 = vadd.f32 1.0, %v6748_v23  ;;  %v6657_v10 = vpop.f32.mrb[251].mxu0  ;;  %v15783_v56 = vadd.f32 %v9818_v27, %v15733_v9  ;;  %v15790_v46 = vmul.f32 0.70710677, %v15777_v22 }
 0x6b1   : > { %10535 = vrcp.f32 %v6757_v36  ;;  %v6758_v44 = vadd.f32 1.0, %v6746_v49  ;;  %v15793_v53 = vmul.f32 0.70710677, %v15780_v38  ;;  %v15802_v62 = vadd.f32 %v6657_v10, %v15710_v24 }
 0x6b2   : > { %10537 = vrcp.f32 %v6760_v1  ;;  %v6739_v9 = vand.u32 2147483647, %v15790_v46  ;;  %v15799_v41 = vmul.f32 0.70710677, %v15783_v56  ;;  %v6929_v42 = vmul.f32 1.442695, %v6915_v32 }
 0x6b3   : > { %10539 = vrcp.f32 %v6758_v44  ;;  %v6737_v7 = vand.u32 2147483647, %v15793_v53  ;;  %v6913_v3 = vmul.f32 %v6901_v33, %v6733_v39  ;;  %v6902_v48 = vsub.f32 0.0, %v6734_v51 }
 0x6b4   : > { %v6751_v35 = vmul.f32 0.3275911, %v6739_v9  ;;  %v15818_v24 = vsel %vm6709_vm9, 1.0, %v17219_v13  ;;  %v6740_v14 = vand.u32 2147483647, %v15799_v41  ;;  %v6916_v25 = vmul.f32 %v6904_v40, %v6736_v19 }
 0x6b5   : > { %v9821_v54 = vpop.f32.mrb[252].mxu0  ;;  %v6749_v58 = vmul.f32 0.3275911, %v6737_v7  ;;  %vm6710_vm1 = vcmp.ge.f32.partialorder %v15773_v21, 0.0  ;;  %10541 = vpow2.f32 %v6929_v42  ;;  %v6925_v37 = vmul.f32 1.442695, %v6913_v3 }
 0x6b6   : > { %v15795_v5 = vpop.f32.mrb[253].mxu0  ;;  %v6763_v15 = vadd.f32 1.0, %v6751_v35  ;;  %v6752_v2 = vmul.f32 0.3275911, %v6740_v14  ;;  %v6914_v45 = vmul.f32 %v6902_v48, %v6734_v51  ;;  %v6907_v63 = vsub.f32 0.0, %v6739_v9 }
 0x6b7   : > { %v15804_v55 = vpop.f32.mrb[254].mxu0  ;;  %v6761_v50 = vadd.f32 1.0, %v6749_v58  ;;  %v15835_v26 = vsel %vm6710_vm1, 1.0, %v17219_v13  ;;  %v6905_v36 = vsub.f32 0.0, %v6737_v7  ;;  %v6931_v60 = vmul.f32 1.442695, %v6916_v25 }
 0x6b8   : > { %v15809_v59 = vpop.f32.mrb[255].mxu0  ;;  %10543 = vrcp.f32 %v6763_v15  ;;  %v6764_v12 = vadd.f32 1.0, %v6752_v2  ;;  %v15841_v51 = vmul.f32 0.70710677, %v15802_v62  ;;  %v15844_v27 = vadd.f32 %v9821_v54, %v15761_v61 }
 0x6b9   : > { %10545 = vrcp.f32 %v6761_v50  ;;  %v6927_v32 = vmul.f32 1.442695, %v6914_v45  ;;  %v6919_v44 = vmul.f32 %v6907_v63, %v6739_v9  ;;  %v6917_v3 = vmul.f32 %v6905_v36, %v6737_v7 }
 0x6ba   : > { %v15814_v17 = vpop.eup %10533  ;;  %10547 = vrcp.f32 %v6764_v12  ;;  %v6908_v61 = vsub.f32 0.0, %v6740_v14  ;;  %v15851_v54 = vand.u32 2147483647, %v15841_v51  ;;  %v15856_v9 = vadd.f32 %v15795_v5, %v15750_v30 }
 0x6bb   : > { %v15823_v43 = vpop.eup %10535  ;;  %v6795_v4 = vmul.f32 1.0614054, %v15814_v17  ;;  %10549 = vpow2.f32 %v6925_v37  ;;  %v6933_v45 = vmul.f32 1.442695, %v6917_v3  ;;  %vm6712_vm12 = vcmp.ge.f32.partialorder %v15770_v6, 0.0 }
 0x6bc   : > { %v6793_v31 = vmul.f32 1.0614054, %v15823_v43  ;;  %v15828_v47 = vpop.eup %10537  ;;  %10551 = vpow2.f32 %v6931_v60  ;;  %v6750_v7 = vmul.f32 0.3275911, %v15851_v54  ;;  %v6920_v5 = vmul.f32 %v6908_v61, %v6740_v14 }
 0x6bd   : > { %v6807_v28 = vadd.f32 -1.4531521, %v6795_v4  ;;  %v6796_v16 = vmul.f32 1.0614054, %v15828_v47  ;;  %v15837_v23 = vpop.eup %10539  ;;  %10553 = vpow2.f32 %v6927_v32  ;;  %vm6715_vm5 = vcmp.ge.f32.partialorder %v15790_v46, 0.0 }
 0x6be   : > { %v6805_v39 = vadd.f32 -1.4531521, %v6793_v31  ;;  %v6794_v49 = vmul.f32 1.0614054, %v15837_v23  ;;  %v6937_v31 = vmul.f32 1.442695, %v6919_v44 }
 0x6bf   : > { %v6819_v19 = vmul.f32 %v15814_v17, %v6807_v28  ;;  %v6808_v10 = vadd.f32 -1.4531521, %v6796_v16  ;;  %v10542_v25 = vpop.eup %10541  ;;  %v6762_v12 = vadd.f32 1.0, %v6750_v7  ;;  %v6939_v3 = vmul.f32 1.442695, %v6920_v5 }
 0x6c0   : > { %v6817_v34 = vmul.f32 %v15823_v43, %v6805_v39  ;;  %v6806_v42 = vadd.f32 -1.4531521, %v6794_v49  ;;  %vm6716_vm4 = vcmp.ge.f32.partialorder %v15799_v41, 0.0  ;;  %vm6713_vm6 = vcmp.ge.f32.partialorder %v15793_v53, 0.0 }
 0x6c1   : > { %v6831_v1 = vadd.f32 1.4214138, %v6819_v19  ;;  %v6820_v40 = vmul.f32 %v15828_v47, %v6808_v10  ;;  %10555 = vrcp.f32 %v6762_v12  ;;  %v15870_v10 = vmul.f32 0.70710677, %v15844_v27 }
 0x6c2   : > { %v6829_v21 = vadd.f32 1.4214138, %v6817_v34  ;;  %v6818_v4 = vmul.f32 %v15837_v23, %v6806_v42  ;;  %v15859_v50 = vpop.eup %10543  ;;  %10557 = vpow2.f32 %v6937_v31  ;;  %v6725_v41 = vsel %vm6713_vm6, 1.0, %v17219_v13 }
 0x6c3   : > { %v6843_v33 = vmul.f32 %v15814_v17, %v6831_v1  ;;  %v6832_v58 = vadd.f32 1.4214138, %v6820_v40  ;;  %v15863_v39 = vpop.eup %10545  ;;  %v6799_v30 = vmul.f32 1.0614054, %v15859_v50  ;;  %10559 = vpow2.f32 %v6933_v45 }
 0x6c4   : > { %v6841_v48 = vmul.f32 %v15823_v43, %v6829_v21  ;;  %v6830_v37 = vadd.f32 1.4214138, %v6818_v4  ;;  %v6797_v34 = vmul.f32 1.0614054, %v15863_v39  ;;  %v15872_v49 = vpop.eup %10547  ;;  %10561 = vpow2.f32 %v6939_v3 }
 0x6c5   : > { %v6855_v35 = vadd.f32 -0.28449672, %v6843_v33  ;;  %v6844_v28 = vmul.f32 %v15828_v47, %v6832_v58  ;;  %v6811_v1 = vadd.f32 -1.4531521, %v6799_v30  ;;  %v10550_v44 = vpop.eup %10549  ;;  %v6800_v42 = vmul.f32 1.0614054, %v15872_v49 }
 0x6c6   : > { %v6853_v15 = vadd.f32 -0.28449672, %v6841_v48  ;;  %v6842_v36 = vmul.f32 %v15837_v23, %v6830_v37  ;;  %v6809_v14 = vadd.f32 -1.4531521, %v6797_v34  ;;  %v10552_v4 = vpop.eup %10551  ;;  %vm6714_vm8 = vcmp.ge.f32.partialorder %v15841_v51, 0.0 }
 0x6c7   : > { %v6867_v2 = vmul.f32 %v15814_v17, %v6855_v35  ;;  %v6856_v16 = vadd.f32 -0.28449672, %v6844_v28  ;;  %v6823_v40 = vmul.f32 %v15859_v50, %v6811_v1  ;;  %v6812_v7 = vadd.f32 -1.4531521, %v6800_v42  ;;  %v10554_v30 = vpop.eup %10553 }
 0x6c8   : > { %v6865_v63 = vmul.f32 %v15823_v43, %v6853_v15  ;;  %v6854_v32 = vadd.f32 -0.28449672, %v6842_v36  ;;  %v6821_v58 = vmul.f32 %v15863_v39, %v6809_v14  ;;  %v6726_v51 = vsel %vm6714_vm8, 1.0, %v17219_v13 }
 0x6c9   : > { %v6879_v19 = vadd.f32 0.2548296, %v6867_v2  ;;  %v6868_v21 = vmul.f32 %v15828_v47, %v6856_v16  ;;  %v6835_v31 = vadd.f32 1.4214138, %v6823_v40  ;;  %v6824_v12 = vmul.f32 %v15872_v49, %v6812_v7 }
 0x6ca   : > { %v6877_v60 = vadd.f32 0.2548296, %v6865_v63  ;;  %v6866_v35 = vmul.f32 %v15837_v23, %v6854_v32  ;;  %v6833_v37 = vadd.f32 1.4214138, %v6821_v58  ;;  %v6906_v63 = vsub.f32 0.0, %v15851_v54 }
 0x6cb   : > { %v6891_v48 = vmul.f32 %v15814_v17, %v6879_v19  ;;  %v6880_v61 = vadd.f32 0.2548296, %v6868_v21  ;;  %v6847_v5 = vmul.f32 %v15859_v50, %v6835_v31  ;;  %vm6719_vm2 = vcmp.ge.f32.partialorder %v15870_v10, 0.0 }
 0x6cc   : > { %v6889_v33 = vmul.f32 %v15823_v43, %v6877_v60  ;;  %v15883_v43 = vand.u32 2147483647, %v15870_v10  ;;  %v6878_v28 = vadd.f32 0.2548296, %v6866_v35  ;;  %v6845_v60 = vmul.f32 %v15863_v39, %v6833_v37 }
 0x6cd   : > { %v6892_v2 = vmul.f32 %v15828_v47, %v6880_v61  ;;  %v6951_v16 = vmul.f32 %v10542_v25, %v6891_v48  ;;  %v6859_v1 = vadd.f32 -0.28449672, %v6847_v5  ;;  %v6836_v47 = vadd.f32 1.4214138, %v6824_v12 }
 0x6ce   : > { %v6949_v15 = vmul.f32 %v10550_v44, %v6889_v33  ;;  %v6755_v19 = vmul.f32 0.3275911, %v15883_v43  ;;  %v6890_v34 = vmul.f32 %v15837_v23, %v6878_v28  ;;  %v6857_v44 = vadd.f32 -0.28449672, %v6845_v60  ;;  %v15893_v33 = vpop.eup %10555 }
 0x6cf   : > { %v6952_v36 = vmul.f32 %v10552_v4, %v6892_v2  ;;  %v6871_v40 = vmul.f32 %v15859_v50, %v6859_v1  ;;  %v6848_v25 = vmul.f32 %v15872_v49, %v6836_v47  ;;  %v6918_v42 = vmul.f32 %v6906_v63, %v15851_v54  ;;  %v10558_v23 = vpop.eup %10557 }
 0x6d0   : > { %v6961_v17 = vsub.f32 1.0, %v6949_v15  ;;  %v6767_v21 = vadd.f32 1.0, %v6755_v19  ;;  %v6950_v14 = vmul.f32 %v10554_v30, %v6890_v34  ;;  %v6963_v48 = vsub.f32 1.0, %v6951_v16 }
 0x6d1   : > { %v6964_v61 = vsub.f32 1.0, %v6952_v36  ;;  %v6869_v35 = vmul.f32 %v15863_v39, %v6857_v44  ;;  %v6883_v58 = vadd.f32 0.2548296, %v6871_v40  ;;  %v6798_v4 = vmul.f32 1.0614054, %v15893_v33 }
 0x6d2   : > { %v6973_v32 = vmul.f32 %v6961_v17, %v15818_v24  ;;  %10563 = vrcp.f32 %v6767_v21  ;;  %v6962_v45 = vsub.f32 1.0, %v6950_v14  ;;  %v6860_v24 = vadd.f32 -0.28449672, %v6848_v25 }
 0x6d3   : > { %v6724_v15 = vsel %vm6712_vm12, 1.0, %v17219_v13  ;;  %v6881_v7 = vadd.f32 0.2548296, %v6869_v35  ;;  %v6895_v54 = vmul.f32 %v15859_v50, %v6883_v58  ;;  %v6810_v28 = vadd.f32 -1.4531521, %v6798_v4 }
 0x6d4   : > { %v6985_v3 = vadd.f32 1.0, %v6973_v32  ;;  %v6974_v31 = vmul.f32 %v6962_v45, %v15835_v26  ;;  %v6872_v2 = vmul.f32 %v15872_v49, %v6860_v24  ;;  %v6975_v37 = vmul.f32 %v6963_v48, %v15812_v0  ;;  %v10560_v0 = vpop.eup %10559 }
 0x6d5   : > { %v6976_v63 = vmul.f32 %v6964_v61, %v6724_v15  ;;  %v6935_v17 = vmul.f32 1.442695, %v6918_v42  ;;  %v6955_v5 = vmul.f32 %v10558_v23, %v6895_v54  ;;  %v6822_v6 = vmul.f32 %v15893_v33, %v6810_v28  ;;  %v10562_v21 = vpop.eup %10561 }
 0x6d6   : > { %v6986_v30 = vadd.f32 1.0, %v6974_v31  ;;  %v6884_v12 = vadd.f32 0.2548296, %v6872_v2  ;;  %v15910_v19 = vmul.f32 0.70710677, %v15856_v9  ;;  %v6997_v26 = vmul.f32 %v6985_v3, %v15787_v20 }
 0x6d7   : > { %v6893_v50 = vmul.f32 %v15863_v39, %v6881_v7  ;;  %v15917_v36 = vadd.f32 %v15804_v55, %v15764_v57  ;;  %v6727_v34 = vsel %vm6715_vm5, 1.0, %v17219_v13  ;;  %v6967_v60 = vsub.f32 1.0, %v6955_v5 }
 0x6d8   : > { %v6998_v16 = vmul.f32 %v6986_v30, %v15820_v29  ;;  %v6896_v1 = vmul.f32 %v15872_v49, %v6884_v12  ;;  %v6834_v47 = vadd.f32 1.4214138, %v6822_v6  ;;  %v6988_v32 = vadd.f32 1.0, %v6976_v63 }
 0x6d9   : > { %10565 = vpow2.f32 %v6935_v17  ;;  %v6979_v39 = vmul.f32 %v6967_v60, %v6727_v34  ;;  %v15928_v14 = vand.u32 2147483647, %v15910_v19  ;;  %v6987_v46 = vadd.f32 1.0, %v6975_v37 }
 0x6da   : > { %v7011_v20 = vpack.c.bf16 %v6998_v16, %v6997_v26  ;;  %v6956_v57 = vmul.f32 %v10562_v21, %v6896_v1  ;;  %v6846_v55 = vmul.f32 %v15893_v33, %v6834_v47  ;;  %v6953_v44 = vmul.f32 %v10560_v0, %v6893_v50 }
 0x6db   : > { %v15932_v40 = vmul.f32 0.70710677, %v15917_v36  ;;  %v6691_v25 = vmul.f32 0.5, %v15777_v22  ;;  %v6753_v48 = vmul.f32 0.3275911, %v15928_v14  ;;  %v7000_v61 = vmul.f32 %v6988_v32, %v15806_v18 }
 0x6dc   : > { %v15924_v29 = vpop.eup %10563  ;;  %7453 = vmatmul.mubr.bf16.vlgmr.msra.gmra.mrb[196].mxu1 %v7011_v20  ;;  %v6968_v42 = vsub.f32 1.0, %v6956_v57  ;;  %v6858_v23 = vadd.f32 -0.28449672, %v6846_v55  ;;  %v6728_v45 = vsel %vm6716_vm4, 1.0, %v17219_v13  ;;  %v6991_v58 = vadd.f32 1.0, %v6979_v39 }
 0x6dd   : > { %v6803_v49 = vmul.f32 1.0614054, %v15924_v29  ;;  %7462 = vmatprep.mubr.bf16.mxu1 %v17402_v52  ;;  %v6765_v22 = vadd.f32 1.0, %v6753_v48  ;;  %v6999_v3 = vmul.f32 %v6987_v46, %v15785_v11  ;;  %v6965_v15 = vsub.f32 1.0, %v6953_v44 }
 0x6de   : > { %v6980_v24 = vmul.f32 %v6968_v42, %v6728_v45  ;;  %v6870_v4 = vmul.f32 %v15893_v33, %v6858_v23  ;;  %v6692_v31 = vmul.f32 0.5, %v15783_v56  ;;  %v6744_v53 = vand.u32 2147483647, %v15932_v40 }
 0x6df   : > { %v6815_v35 = vadd.f32 -1.4531521, %v6803_v49  ;;  %10567 = vrcp.f32 %v6765_v22  ;;  %v15950_v2 = vadd.f32 %v15809_v59, %v15753_v8  ;;  %v7014_v28 = vpack.c.bf16 %v7000_v61, %v6999_v3 }
 0x6e0   : > { %v6992_v18 = vadd.f32 1.0, %v6980_v24  ;;  %v6882_v54 = vadd.f32 0.2548296, %v6870_v4  ;;  %v15952_v37 = vmul.f32 %v6991_v58, %v6691_v25  ;;  %v6756_v63 = vmul.f32 0.3275911, %v6744_v53 }
 0x6e1   : > { %v6827_v7 = vmul.f32 %v15924_v29, %v6815_v35  ;;  %v6911_v5 = vsub.f32 0.0, %v15883_v43  ;;  %v15960_v12 = vmul.f32 0.70710677, %v15950_v2  ;;  %v6977_v8 = vmul.f32 %v6965_v15, %v6725_v41 }
 0x6e2   : > { %v15954_v11 = vmul.f32 %v6992_v18, %v6692_v31  ;;  %v6894_v56 = vmul.f32 %v15893_v33, %v6882_v54  ;;  %v6768_v6 = vadd.f32 1.0, %v6756_v63  ;;  %v6909_v47 = vsub.f32 0.0, %v15928_v14 }
 0x6e3   : > { %v10566_v30 = vpop.eup %10565  ;;  %v6839_v17 = vadd.f32 1.4214138, %v6827_v7  ;;  %v6742_v33 = vand.u32 2147483647, %v15960_v12  ;;  %v6923_v0 = vmul.f32 %v6911_v5, %v15883_v43  ;;  %v6989_v60 = vadd.f32 1.0, %v6977_v8 }
 0x6e4   : > { %7463 = vmatmul.mubr.bf16.gmra.mrb[200].mxu1 %v7014_v28  ;;  %v6954_v59 = vmul.f32 %v10566_v30, %v6894_v56  ;;  %v7020_v26 = vpack.c.bf16 %v15954_v11, %v15952_v37  ;;  %10569 = vrcp.f32 %v6768_v6  ;;  %v6689_v20 = vmul.f32 0.5, %v15780_v38 }
 0x6e5   : > { %7472 = vmatprep.mubr.bf16.mxu1 %v17402_v52  ;;  %v6851_v50 = vmul.f32 %v15924_v29, %v6839_v17  ;;  %v6754_v34 = vmul.f32 0.3275911, %v6742_v33  ;;  %v6690_v39 = vmul.f32 0.5, %v15802_v62  ;;  %v6945_v46 = vmul.f32 1.442695, %v6923_v0 }
 0x6e6   : > { %v6966_v16 = vsub.f32 1.0, %v6954_v59  ;;  %v7001_v49 = vmul.f32 %v6989_v60, %v6689_v20  ;;  %v6921_v43 = vmul.f32 %v6909_v47, %v15928_v14  ;;  %v6912_v42 = vsub.f32 0.0, %v6744_v53 }
 0x6e7   : > { %v6766_v21 = vadd.f32 1.0, %v6754_v34  ;;  %v6863_v55 = vadd.f32 -0.28449672, %v6851_v50  ;;  %v6910_v4 = vsub.f32 0.0, %v6742_v33  ;;  %v6731_v47 = vsel %vm6719_vm2, 1.0, %v17219_v13 }
 0x6e8   : > { %v6978_v1 = vmul.f32 %v6966_v16, %v6726_v51  ;;  %v6941_v38 = vmul.f32 1.442695, %v6921_v43  ;;  %v6924_v58 = vmul.f32 %v6912_v42, %v6744_v53  ;;  %vm6720_vm10 = vcmp.ge.f32.partialorder %v15932_v40, 0.0 }
 0x6e9   : > { %v10568_v32 = vpop.eup %10567  ;;  %10571 = vrcp.f32 %v6766_v21  ;;  %v6875_v61 = vmul.f32 %v15924_v29, %v6863_v55  ;;  %v6922_v54 = vmul.f32 %v6910_v4, %v6742_v33  ;;  %vm6717_vm14 = vcmp.ge.f32.partialorder %v15910_v19, 0.0 }
 0x6ea   : > { %v6990_v57 = vadd.f32 1.0, %v6978_v1  ;;  %v6801_v44 = vmul.f32 1.0614054, %v10568_v32  ;;  %10573 = vpow2.f32 %v6945_v46  ;;  %v6947_v14 = vmul.f32 1.442695, %v6924_v58 }
 0x6eb   : > { %v6887_v22 = vadd.f32 0.2548296, %v6875_v61  ;;  %10575 = vpow2.f32 %v6941_v38  ;;  %v6943_v30 = vmul.f32 1.442695, %v6922_v54  ;;  %v6732_v10 = vsel %vm6720_vm10, 1.0, %v17219_v13 }
 0x6ec   : > { %v7002_v25 = vmul.f32 %v6990_v57, %v6690_v39  ;;  %v6813_v23 = vadd.f32 -1.4531521, %v6801_v44  ;;  %10577 = vpow2.f32 %v6947_v14  ;;  %vm6718_vm15 = vcmp.ge.f32.partialorder %v15960_v12, 0.0 }
 0x6ed   : > { %v6899_v28 = vmul.f32 %v15924_v29, %v6887_v22  ;;  %10579 = vpow2.f32 %v6943_v30  ;;  %v6695_v40 = vmul.f32 0.5, %v15844_v27  ;;  %v6730_v38 = vsel %vm6718_vm15, 1.0, %v17219_v13  ;;  %v7075_v27 = vld [vmem:[%s16609_s11] sm:$0x3] }
 0x6ee   : > { %v7017_v48 = vpack.c.bf16 %v7002_v25, %v7001_v49  ;;  %v6825_v45 = vmul.f32 %v10568_v32, %v6813_v23  ;;  %v10570_v35 = vpop.eup %10569  ;;  %v6729_v25 = vsel %vm6717_vm14, 1.0, %v17219_v13  ;;  %v6693_v4 = vmul.f32 0.5, %v15856_v9 }
 0x6ef   : > { %v6804_v24 = vmul.f32 1.0614054, %v10570_v35  ;;  %v6694_v22 = vmul.f32 0.5, %v15950_v2 }
 0x6f0   : > { %7473 = vmatmul.mubr.bf16.gmra.mrb[204].mxu1 %v7017_v48  ;;  %v6837_v62 = vadd.f32 1.4214138, %v6825_v45  ;;  %v6696_v48 = vmul.f32 0.5, %v15917_v36  ;;  %v17408_v36 = vld [vmem:[#allocation2_spill] sm:$0xff] }
 0x6f1   : > { %7482 = vmatprep.mubr.bf16.mxu1 %v17402_v52  ;;  %v6816_v15 = vadd.f32 -1.4531521, %v6804_v24 }
 0x6f2   : > { %v6849_v3 = vmul.f32 %v10568_v32, %v6837_v62 }
 0x6f3   : > { %v10572_v31 = vpop.eup %10571  ;;  %v6828_v18 = vmul.f32 %v10570_v35, %v6816_v15 }
 0x6f4   : > { %v6861_v7 = vadd.f32 -0.28449672, %v6849_v3  ;;  %v6802_v41 = vmul.f32 1.0614054, %v10572_v31  ;;  %v10574_v17 = vpop.eup %10573 }
 0x6f5   : > { %v6840_v53 = vadd.f32 1.4214138, %v6828_v18  ;;  %v6959_v8 = vmul.f32 %v10574_v17, %v6899_v28  ;;  %v10576_v29 = vpop.eup %10575 }
 0x6f6   : > { %v6873_v37 = vmul.f32 %v10568_v32, %v6861_v7  ;;  %v6814_v11 = vadd.f32 -1.4531521, %v6802_v41  ;;  %v10578_v1 = vpop.eup %10577  ;;  %v17409_v7 = vld [vmem:[#allocation3_spill] sm:$0xff] }
 0x6f7   : > { %v6852_v63 = vmul.f32 %v10570_v35, %v6840_v53  ;;  %v6971_v50 = vsub.f32 1.0, %v6959_v8  ;;  %v10580_v44 = vpop.eup %10579  ;;  %v15997_v18 = vrot.slane %v7075_v27, %v17409_v7 }
 0x6f8   : > { %7483 = vmatmul.mubr.bf16.gmra.mrb[208].mxu1 %v7020_v26  ;;  %v6885_v56 = vadd.f32 0.2548296, %v6873_v37  ;;  %v6826_v5 = vmul.f32 %v10572_v31, %v6814_v11 }
 0x6f9   : > { %7492 = vmatprep.mubr.bf16.mxu1 %v17402_v52  ;;  %v6864_v59 = vadd.f32 -0.28449672, %v6852_v63  ;;  %v6983_v20 = vmul.f32 %v6971_v50, %v6731_v47 }
 0x6fa   : > { %v6897_v6 = vmul.f32 %v10568_v32, %v6885_v56  ;;  %v6838_v16 = vadd.f32 1.4214138, %v6826_v5 }
 0x6fb   : > { %v6876_v33 = vmul.f32 %v10570_v35, %v6864_v59  ;;  %v6995_v49 = vadd.f32 1.0, %v6983_v20 }
 0x6fc   : > { %v6850_v51 = vmul.f32 %v10572_v31, %v6838_v16  ;;  %v6957_v26 = vmul.f32 %v10576_v29, %v6897_v6 }
 0x6fd   : > { %v6888_v0 = vadd.f32 0.2548296, %v6876_v33  ;;  %v7007_v45 = vmul.f32 %v6995_v49, %v6695_v40 }
 0x6fe   : > { %v6862_v34 = vadd.f32 -0.28449672, %v6850_v51  ;;  %v6969_v39 = vsub.f32 1.0, %v6957_v26 }
 0x6ff   : > { %v6900_v60 = vmul.f32 %v10570_v35, %v6888_v0 }
 0x700   : > { %v6874_v21 = vmul.f32 %v10572_v31, %v6862_v34  ;;  %v6981_v42 = vmul.f32 %v6969_v39, %v6729_v25 }
 0x701   : > { %v6960_v32 = vmul.f32 %v10578_v1, %v6900_v60 }
 0x702   : > { %v6886_v57 = vadd.f32 0.2548296, %v6874_v21  ;;  %v6993_v58 = vadd.f32 1.0, %v6981_v42 }
 0x703   : > { %v6972_v55 = vsub.f32 1.0, %v6960_v32 }
 0x704   : > { %v6898_v46 = vmul.f32 %v10572_v31, %v6886_v57  ;;  %v7005_v12 = vmul.f32 %v6993_v58, %v6693_v4  ;;  %v15994_v31 = vrot.slane %v7075_v27, %v17408_v36 }
 0x705   : > { %v6984_v43 = vmul.f32 %v6972_v55, %v6732_v10 }
 0x706   : > { %v6958_v23 = vmul.f32 %v10580_v44, %v6898_v46 }
 0x707   : > { %v6996_v19 = vadd.f32 1.0, %v6984_v43 }
 0x708   : > { %v6970_v61 = vsub.f32 1.0, %v6958_v23 }
 0x709   : > { %v7008_v35 = vmul.f32 %v6996_v19, %v6696_v48 }
 0x70a   : > { %v6982_v62 = vmul.f32 %v6970_v61, %v6730_v38 }
 0x70b   : > { %v7026_v24 = vpack.c.bf16 %v7008_v35, %v7007_v45 }
 0x70c   : > { %v6994_v3 = vadd.f32 1.0, %v6982_v62 }
 0x70e   : > { %v7006_v15 = vmul.f32 %v6994_v3, %v6694_v22 }
 0x710   : > { %v7023_v14 = vpack.c.bf16 %v7006_v15, %v7005_v12 }
 0x712   : > { %7493 = vmatmul.mubr.bf16.gmra.mrb[212].mxu1 %v7023_v14 }
 0x713   : > { %7502 = vmatprep.mubr.bf16.mxu1 %v17402_v52 }
 0x71a   : > { %7503 = vmatmul.mubr.bf16.gmra.mrb[216].mxu1 %v7026_v24 }
 0x7af   : > { %v7454_v9 = vpop.f32.mrb[196].mxu1 }
 0x7b0   : > { %v9951_v2 = vadd.f32 %v7454_v9, %v15994_v31  ;;  %v7456_v54 = vpop.f32.mrb[197].mxu1 }
 0x7b1   : > { %v9952_v41 = vadd.f32 %v7456_v54, %v15997_v18  ;;  %v7458_v28 = vpop.f32.mrb[198].mxu1 }
 0x7b2   : > { %v7537_v37 = vmul.f32 0.70710677, %v9951_v2  ;;  %v9953_v52 = vadd.f32 %v7458_v28, %v15994_v31  ;;  %v7460_v53 = vpop.f32.mrb[199].mxu1  ;;  %v16006_v21 = vmul.f32 0.5, %v9951_v2 }
 0x7b3   : > { %v7538_v11 = vmul.f32 0.70710677, %v9952_v41  ;;  %v9954_v30 = vadd.f32 %v7460_v53, %v15997_v18  ;;  %v16008_v57 = vmul.f32 0.5, %v9952_v41 }
 0x7b4   : > { %v7609_v56 = vand.u32 2147483647, %v7537_v37  ;;  %v7539_v63 = vmul.f32 0.70710677, %v9953_v52  ;;  %vm7561_vm11 = vcmp.ge.f32.partialorder %v7537_v37, 0.0  ;;  %v16010_v46 = vmul.f32 0.5, %v9953_v52 }
 0x7b5   : > { %v7610_v17 = vand.u32 2147483647, %v7538_v11  ;;  %v16003_v51 = vmul.f32 0.70710677, %v9954_v30  ;;  %vm7562_vm7 = vcmp.ge.f32.partialorder %v7538_v11, 0.0  ;;  %v16026_v19 = vsel %vm7561_vm11, 1.0, %v17219_v13 }
 0x7b6   : > { %v7633_v5 = vmul.f32 0.3275911, %v7609_v56  ;;  %v7945_v8 = vsub.f32 0.0, %v7609_v56  ;;  %v7611_v16 = vand.u32 2147483647, %v7539_v63  ;;  %vm7563_vm13 = vcmp.ge.f32.partialorder %v7539_v63, 0.0 }
 0x7b7   : > { %v7634_v59 = vmul.f32 0.3275911, %v7610_v17  ;;  %v7946_v6 = vsub.f32 0.0, %v7610_v17  ;;  %v7464_v29 = vpop.f32.mrb[200].mxu1  ;;  %v7612_v1 = vand.u32 2147483647, %v16003_v51 }
 0x7b8   : > { %v7657_v33 = vadd.f32 1.0, %v7633_v5  ;;  %v7635_v0 = vmul.f32 0.3275911, %v7611_v16  ;;  %v7947_v26 = vsub.f32 0.0, %v7611_v16  ;;  %v7466_v34 = vpop.f32.mrb[201].mxu1  ;;  %v7969_v60 = vmul.f32 %v7945_v8, %v7609_v56 }
 0x7b9   : > { %v7658_v50 = vadd.f32 1.0, %v7634_v59  ;;  %v7468_v47 = vpop.f32.mrb[202].mxu1  ;;  %v7970_v20 = vmul.f32 %v7946_v6, %v7610_v17  ;;  %v7636_v10 = vmul.f32 0.3275911, %v7612_v1  ;;  %v16013_v44 = vadd.f32 %v7464_v29, %v15994_v31 }
 0x7ba   : > { %10581 = vrcp.f32 %v7657_v33  ;;  %v7659_v32 = vadd.f32 1.0, %v7635_v0  ;;  %v7470_v39 = vpop.f32.mrb[203].mxu1  ;;  %v7971_v55 = vmul.f32 %v7947_v26, %v7611_v16  ;;  %v16016_v49 = vadd.f32 %v7466_v34, %v15997_v18 }
 0x7bb   : > { %10583 = vrcp.f32 %v7658_v50  ;;  %v7993_v25 = vmul.f32 1.442695, %v7969_v60  ;;  %v7660_v43 = vadd.f32 1.0, %v7636_v10  ;;  %v16019_v42 = vadd.f32 %v7468_v47, %v15994_v31 }
 0x7bc   : > { %10585 = vrcp.f32 %v7659_v32  ;;  %v7995_v23 = vmul.f32 1.442695, %v7970_v20  ;;  %v7948_v40 = vsub.f32 0.0, %v7612_v1  ;;  %v16022_v48 = vmul.f32 0.70710677, %v16013_v44 }
 0x7bd   : > { %v7997_v61 = vmul.f32 1.442695, %v7971_v55  ;;  %10587 = vrcp.f32 %v7660_v43  ;;  %v16029_v45 = vmul.f32 0.70710677, %v16016_v49  ;;  %v16033_v35 = vsel %vm7562_vm7, 1.0, %v17219_v13 }
 0x7be   : > { %v16035_v38 = vmul.f32 0.5, %v9954_v30  ;;  %v7613_v58 = vand.u32 2147483647, %v16022_v48  ;;  %v16039_v62 = vmul.f32 0.70710677, %v16019_v42  ;;  %10589 = vpow2.f32 %v7993_v25 }
 0x7bf   : > { %v16042_v24 = vsel %vm7563_vm13, 1.0, %v17219_v13  ;;  %vm7564_vm3 = vcmp.ge.f32.partialorder %v16003_v51, 0.0  ;;  %v7614_v4 = vand.u32 2147483647, %v16029_v45  ;;  %10591 = vpow2.f32 %v7995_v23 }
 0x7c0   : > { %v7972_v22 = vmul.f32 %v7948_v40, %v7612_v1  ;;  %v7637_v3 = vmul.f32 0.3275911, %v7613_v58  ;;  %v7949_v12 = vsub.f32 0.0, %v7613_v58  ;;  %10593 = vpow2.f32 %v7997_v61 }
 0x7c1   : > { %v7638_v14 = vmul.f32 0.3275911, %v7614_v4  ;;  %v7950_v27 = vsub.f32 0.0, %v7614_v4  ;;  %v7615_v36 = vand.u32 2147483647, %v16039_v62  ;;  %v16053_v41 = vadd.f32 %v7470_v39, %v15997_v18 }
 0x7c2   : > { %v7661_v2 = vadd.f32 1.0, %v7637_v3  ;;  %v7973_v54 = vmul.f32 %v7949_v12, %v7613_v58  ;;  %v16061_v30 = vsel %vm7564_vm3, 1.0, %v17219_v13  ;;  %v7999_v6 = vmul.f32 1.442695, %v7972_v22 }
 0x7c3   : > { %v7474_v28 = vpop.f32.mrb[204].mxu1  ;;  %v7662_v52 = vadd.f32 1.0, %v7638_v14  ;;  %v7974_v53 = vmul.f32 %v7950_v27, %v7614_v4  ;;  %v7639_v11 = vmul.f32 0.3275911, %v7615_v36  ;;  %v7951_v17 = vsub.f32 0.0, %v7615_v36 }
 0x7c4   : > { %v16046_v15 = vpop.eup %10581  ;;  %v16056_v56 = vpop.f32.mrb[205].mxu1  ;;  %10595 = vrcp.f32 %v7661_v2  ;;  %vm7565_vm0 = vcmp.ge.f32.partialorder %v16022_v48, 0.0  ;;  %v8001_v34 = vmul.f32 1.442695, %v7973_v54  ;;  %v16076_v1 = vmul.f32 0.70710677, %v16053_v41 }
 0x7c5   : > { %v16049_v7 = vpop.eup %10583  ;;  %v7729_v9 = vmul.f32 1.0614054, %v16046_v15  ;;  %v16063_v5 = vpop.f32.mrb[206].mxu1  ;;  %10597 = vrcp.f32 %v7662_v52  ;;  %v7663_v16 = vadd.f32 1.0, %v7639_v11  ;;  %v7975_v51 = vmul.f32 %v7951_v17, %v7615_v36 }
 0x7c6   : > { %v7730_v37 = vmul.f32 1.0614054, %v16049_v7  ;;  %v16065_v8 = vpop.eup %10585  ;;  %v16067_v33 = vpop.f32.mrb[207].mxu1  ;;  %v8003_v60 = vmul.f32 1.442695, %v7974_v53  ;;  %v16080_v10 = vmul.f32 0.5, %v16013_v44  ;;  %v16085_v58 = vadd.f32 %v7474_v28, %v15994_v31 }
 0x7c7   : > { %v7753_v63 = vadd.f32 -1.4531521, %v7729_v9  ;;  %v7731_v50 = vmul.f32 1.0614054, %v16065_v8  ;;  %v16072_v0 = vpop.eup %10587  ;;  %10599 = vrcp.f32 %v7663_v16  ;;  %v8005_v25 = vmul.f32 1.442695, %v7975_v51 }
 0x7c8   : > { %v7754_v59 = vadd.f32 -1.4531521, %v7730_v37  ;;  %v7732_v32 = vmul.f32 1.0614054, %v16072_v0  ;;  %v10590_v39 = vpop.eup %10589  ;;  %10601 = vpow2.f32 %v7999_v6  ;;  %v16095_v44 = vsel %vm7565_vm0, 1.0, %v17219_v13 }
 0x7c9   : > { %v7777_v29 = vmul.f32 %v16046_v15, %v7753_v63  ;;  %v7755_v20 = vadd.f32 -1.4531521, %v7731_v50  ;;  %v10592_v43 = vpop.eup %10591  ;;  %10603 = vpow2.f32 %v8001_v34  ;;  %v7616_v12 = vand.u32 2147483647, %v16076_v1 }
 0x7ca   : > { %v7778_v26 = vmul.f32 %v16049_v7, %v7754_v59  ;;  %v7756_v61 = vadd.f32 -1.4531521, %v7732_v32  ;;  %v16089_v22 = vpop.eup %10593  ;;  %10605 = vpow2.f32 %v8003_v60  ;;  %v16108_v63 = vmul.f32 0.70710677, %v16085_v58 }
 0x7cb   : > { %v7801_v47 = vadd.f32 1.4214138, %v7777_v29  ;;  %v7779_v40 = vmul.f32 %v16065_v8, %v7755_v20  ;;  %v16087_v4 = vpop.f32.mrb[208].mxu1  ;;  %10607 = vpow2.f32 %v8005_v25  ;;  %v7640_v28 = vmul.f32 0.3275911, %v7616_v12 }
 0x7cc   : > { %v7802_v55 = vadd.f32 1.4214138, %v7778_v26  ;;  %v16098_v14 = vpop.f32.mrb[209].mxu1  ;;  %v7780_v9 = vmul.f32 %v16072_v0, %v7756_v61  ;;  %v7952_v37 = vsub.f32 0.0, %v7616_v12  ;;  %v16120_v32 = vadd.f32 %v16056_v56, %v15997_v18 }
 0x7cd   : > { %v7825_v23 = vmul.f32 %v16046_v15, %v7801_v47  ;;  %v7803_v36 = vadd.f32 1.4214138, %v7779_v40  ;;  %v16101_v2 = vpop.f32.mrb[210].mxu1  ;;  %v7664_v29 = vadd.f32 1.0, %v7640_v28  ;;  %vm7566_vm9 = vcmp.ge.f32.partialorder %v16029_v45, 0.0  ;;  %v17413_v45 = vld [vmem:[#allocation5_spill] sm:$0xff] }
 0x7ce   : > { %v7826_v3 = vmul.f32 %v16049_v7, %v7802_v55  ;;  %v16103_v52 = vpop.eup %10595  ;;  %v7804_v11 = vadd.f32 1.4214138, %v7780_v9  ;;  %v16110_v17 = vpop.f32.mrb[211].mxu1  ;;  %v7976_v50 = vmul.f32 %v7952_v37, %v7616_v12  ;;  %vm7567_vm1 = vcmp.ge.f32.partialorder %v16039_v62, 0.0 }
 0x7cf   : > { %v7849_v27 = vadd.f32 -0.28449672, %v7825_v23  ;;  %v7827_v53 = vmul.f32 %v16065_v8, %v7803_v36  ;;  %v16112_v59 = vpop.eup %10597  ;;  %v7733_v16 = vmul.f32 1.0614054, %v16103_v52  ;;  %10609 = vrcp.f32 %v7664_v29 }
 0x7d0   : > { %v7850_v54 = vadd.f32 -0.28449672, %v7826_v3  ;;  %v7828_v34 = vmul.f32 %v16072_v0, %v7804_v11  ;;  %v7734_v60 = vmul.f32 1.0614054, %v16112_v59  ;;  %v16129_v9 = vmul.f32 1.442695, %v7976_v50 }
 0x7d1   : > { %v7873_v48 = vmul.f32 %v16046_v15, %v7849_v27  ;;  %v7851_v26 = vadd.f32 -0.28449672, %v7827_v53  ;;  %v7757_v20 = vadd.f32 -1.4531521, %v7733_v16  ;;  %v16122_v55 = vpop.eup %10599  ;;  %vm7568_vm12 = vcmp.ge.f32.partialorder %v16076_v1, 0.0 }
 0x7d2   : > { %v7874_v6 = vmul.f32 %v16049_v7, %v7850_v54  ;;  %v7852_v40 = vadd.f32 -0.28449672, %v7828_v34  ;;  %v7758_v61 = vadd.f32 -1.4531521, %v7734_v60  ;;  %v10602_v3 = vpop.eup %10601  ;;  %v7735_v36 = vmul.f32 1.0614054, %v16122_v55 }
 0x7d3   : > { %v7897_v51 = vadd.f32 0.2548296, %v7873_v48  ;;  %v7875_v23 = vmul.f32 %v16065_v8, %v7851_v26  ;;  %v7781_v27 = vmul.f32 %v16103_v52, %v7757_v20  ;;  %vm7569_vm5 = vcmp.ge.f32.partialorder %v16108_v63, 0.0 }
 0x7d4   : > { %v7898_v47 = vadd.f32 0.2548296, %v7874_v6  ;;  %v7876_v28 = vmul.f32 %v16072_v0, %v7852_v40  ;;  %v7782_v37 = vmul.f32 %v16112_v59, %v7758_v61  ;;  %v7759_v11 = vadd.f32 -1.4531521, %v7735_v36 }
 0x7d5   : > { %v7921_v25 = vmul.f32 %v16046_v15, %v7897_v51  ;;  %v7899_v56 = vadd.f32 0.2548296, %v7875_v23  ;;  %v10604_v15 = vpop.eup %10603  ;;  %v7805_v53 = vadd.f32 1.4214138, %v7781_v27  ;;  %v7617_v6 = vand.u32 2147483647, %v16108_v63 }
 0x7d6   : > { %v7922_v12 = vmul.f32 %v16049_v7, %v7898_v47  ;;  %v10606_v16 = vpop.eup %10605  ;;  %v7900_v51 = vadd.f32 0.2548296, %v7876_v28  ;;  %v7806_v50 = vadd.f32 1.4214138, %v7782_v37  ;;  %v7783_v60 = vmul.f32 %v16122_v55, %v7759_v11 }
 0x7d7   : > { %v8041_v54 = vmul.f32 %v10590_v39, %v7921_v25  ;;  %v7923_v29 = vmul.f32 %v16065_v8, %v7899_v56  ;;  %v16136_v39 = vpop.eup %10607  ;;  %v7829_v34 = vmul.f32 %v16103_v52, %v7805_v53 }
 0x7d8   : > { %v8042_v48 = vmul.f32 %v10592_v43, %v7922_v12  ;;  %v7641_v43 = vmul.f32 0.3275911, %v7617_v6  ;;  %v7924_v25 = vmul.f32 %v16072_v0, %v7900_v51  ;;  %v7830_v8 = vmul.f32 %v16112_v59, %v7806_v50 }
 0x7d9   : > { %v8065_v7 = vsub.f32 1.0, %v8041_v54  ;;  %v8043_v20 = vmul.f32 %v16089_v22, %v7923_v29  ;;  %v7853_v40 = vadd.f32 -0.28449672, %v7829_v34  ;;  %v7807_v61 = vadd.f32 1.4214138, %v7783_v60  ;;  %v16145_v28 = vpop.eup %10609  ;;  %v17411_v34 = vld [vmem:[#allocation4_spill] sm:$0xff] }
 0x7da   : > { %v8066_v26 = vsub.f32 1.0, %v8042_v48  ;;  %v7665_v12 = vadd.f32 1.0, %v7641_v43  ;;  %v8044_v54 = vmul.f32 %v10602_v3, %v7924_v25  ;;  %v7854_v56 = vadd.f32 -0.28449672, %v7830_v8 }
 0x7db   : > { %v8089_v47 = vmul.f32 %v8065_v7, %v16026_v19  ;;  %v8067_v36 = vsub.f32 1.0, %v8043_v20  ;;  %v7877_v19 = vmul.f32 %v16103_v52, %v7853_v40  ;;  %v7831_v22 = vmul.f32 %v16122_v55, %v7807_v61 }
 0x7dc   : > { %v8090_v23 = vmul.f32 %v8066_v26, %v16033_v35  ;;  %10611 = vrcp.f32 %v7665_v12  ;;  %v8068_v48 = vsub.f32 1.0, %v8044_v54  ;;  %v7878_v53 = vmul.f32 %v16112_v59, %v7854_v56  ;;  %v17412_v12 = vld [vmem:[#allocation11_spill] sm:$0xff] }
 0x7dd   : > { %v8113_v27 = vadd.f32 1.0, %v8089_v47  ;;  %v8091_v35 = vmul.f32 %v8067_v36, %v16042_v24  ;;  %v7901_v11 = vadd.f32 0.2548296, %v7877_v19  ;;  %v7855_v7 = vadd.f32 -0.28449672, %v7831_v22 }
 0x7de   : > { %v8114_v37 = vadd.f32 1.0, %v8090_v23  ;;  %v7736_v29 = vmul.f32 1.0614054, %v16145_v28  ;;  %v8092_v50 = vmul.f32 %v8068_v48, %v16061_v30  ;;  %v7902_v26 = vadd.f32 0.2548296, %v7878_v53 }
 0x7df   : > { %v8137_v0 = vmul.f32 %v8113_v27, %v16006_v21  ;;  %v17410_v21 = vld [vmem:[#allocation10_spill] sm:$0xff]  ;;  %v8115_v24 = vadd.f32 1.0, %v8091_v35  ;;  %v7925_v43 = vmul.f32 %v16103_v52, %v7901_v11  ;;  %v7879_v47 = vmul.f32 %v16122_v55, %v7855_v7 }
 0x7e0   : > { %v8138_v3 = vmul.f32 %v8114_v37, %v16008_v57  ;;  %v7760_v20 = vadd.f32 -1.4531521, %v7736_v29  ;;  %v8116_v25 = vadd.f32 1.0, %v8092_v50  ;;  %v7926_v8 = vmul.f32 %v16112_v59, %v7902_v26 }
 0x7e1   : > { %v8161_v51 = vadd.f32 %v8137_v0, %v17410_v21  ;;  %v8139_v57 = vmul.f32 %v8115_v24, %v16010_v46  ;;  %v7953_v23 = vsub.f32 0.0, %v7617_v6  ;;  %v8045_v40 = vmul.f32 %v10604_v15, %v7925_v43 }
 0x7e2   : > { %v8162_v60 = vadd.f32 %v8138_v3, %v17411_v34  ;;  %v7590_v30 = vsel %vm7566_vm9, 1.0, %v17219_v13  ;;  %v7903_v61 = vadd.f32 0.2548296, %v7879_v47  ;;  %v7784_v52 = vmul.f32 %v16145_v28, %v7760_v20 }
 0x7e3   : > { %8185 = vst [vmem:[%s16157_s30] sm:$0xff] %v8161_v51  ;;  %v8163_v27 = vadd.f32 %v8139_v57, %v17412_v12  ;;  %v8140_v36 = vmul.f32 %v8116_v25, %v16035_v38  ;;  %v8046_v54 = vmul.f32 %v10606_v16, %v7926_v8  ;;  %v7977_v46 = vmul.f32 %v7953_v23, %v7617_v6  ;;  %v17414_v57 = vld [vmem:[#allocation16_spill] sm:$0xff] }
 0x7e4   : > { %8186 = vst [vmem:[%s16157_s30 + $0x8] sm:$0xff] %v8162_v60  ;;  %v8069_v56 = vsub.f32 1.0, %v8045_v40  ;;  %v7927_v59 = vmul.f32 %v16122_v55, %v7903_v61  ;;  %v7808_v37 = vadd.f32 1.4214138, %v7784_v52  ;;  %v16178_v15 = vmul.f32 0.70710677, %v16120_v32 }
 0x7e5   : > { %8187 = vst [vmem:[%s16157_s30 + $0x10] sm:$0xff] %v8163_v27  ;;  %v8164_v19 = vadd.f32 %v8140_v36, %v17413_v45  ;;  %v8070_v22 = vsub.f32 1.0, %v8046_v54  ;;  %10613 = vpow2.f32 %v16129_v9  ;;  %v16185_v0 = vadd.f32 %v16063_v5, %v15994_v31  ;;  %v16193_v35 = vpop.f32.mrb[212].mxu1  ;;  %v17415_v40 = vld [vmem:[#allocation6_spill] sm:$0xff] }
 0x7e6   : > { %v16187_v38 = vpop.eup %10611  ;;  %v8093_v6 = vmul.f32 %v8069_v56, %v16095_v44  ;;  %v8047_v55 = vmul.f32 %v16136_v39, %v7927_v59  ;;  %v7832_v16 = vmul.f32 %v16145_v28, %v7808_v37  ;;  %v7518_v48 = vmul.f32 0.5, %v16016_v49  ;;  %v16198_v3 = vpop.f32.mrb[213].mxu1 }
 0x7e7   : > { %8188 = vst [vmem:[%s16157_s30 + $0x18] sm:$0xff] %v8164_v19  ;;  %v8094_v9 = vmul.f32 %v8070_v22, %v7590_v30  ;;  %v7737_v53 = vmul.f32 1.0614054, %v16187_v38  ;;  %v8009_v5 = vmul.f32 1.442695, %v7977_v46  ;;  %v7591_v39 = vsel %vm7567_vm1, 1.0, %v17219_v13 }
 0x7e8   : > { %v8117_v11 = vadd.f32 1.0, %v8093_v6  ;;  %v8071_v7 = vsub.f32 1.0, %v8047_v55  ;;  %v7856_v44 = vadd.f32 -0.28449672, %v7832_v16  ;;  %v7618_v62 = vand.u32 2147483647, %v16178_v15 }
 0x7e9   : > { %v8118_v29 = vadd.f32 1.0, %v8094_v9  ;;  %v7761_v21 = vadd.f32 -1.4531521, %v7737_v53  ;;  %v16203_v51 = vmul.f32 0.70710677, %v16185_v0  ;;  %v16207_v34 = vpop.f32.mrb[214].mxu1  ;;  %10615 = vpow2.f32 %v8009_v5 }
 0x7ea   : > { %v8141_v49 = vmul.f32 %v8117_v11, %v16080_v10  ;;  %v8095_v24 = vmul.f32 %v8071_v7, %v7591_v39  ;;  %v7880_v50 = vmul.f32 %v16145_v28, %v7856_v44  ;;  %v7642_v26 = vmul.f32 0.3275911, %v7618_v62  ;;  %v16211_v20 = vpop.f32.mrb[215].mxu1 }
 0x7eb   : > { %v8142_v60 = vmul.f32 %v8118_v29, %v7518_v48  ;;  %v7519_v43 = vmul.f32 0.5, %v16019_v42  ;;  %v7785_v47 = vmul.f32 %v16187_v38, %v7761_v21  ;;  %v7619_v42 = vand.u32 2147483647, %v16203_v51 }
 0x7ec   : > { %v8165_v25 = vadd.f32 %v8141_v49, %v17414_v57  ;;  %v8119_v8 = vadd.f32 1.0, %v8095_v24  ;;  %v7904_v23 = vadd.f32 0.2548296, %v7880_v50  ;;  %v7666_v10 = vadd.f32 1.0, %v7642_v26 }
 0x7ed   : > { %v8166_v30 = vadd.f32 %v8142_v60, %v17415_v40  ;;  %v7809_v61 = vadd.f32 1.4214138, %v7785_v47  ;;  %v16218_v27 = vpop.f32.mrb[216].mxu1  ;;  %v16224_v46 = vadd.f32 %v16067_v33, %v15997_v18  ;;  %v16228_v56 = vadd.f32 %v16087_v4, %v15994_v31 }
 0x7ee   : > { %8189 = vst [vmem:[%s16157_s30 + $0x20] sm:$0xff] %v8165_v25  ;;  %v8143_v52 = vmul.f32 %v8119_v8, %v7519_v43  ;;  %v7928_v12 = vmul.f32 %v16145_v28, %v7904_v23  ;;  %10617 = vrcp.f32 %v7666_v10  ;;  %v16230_v59 = vpop.f32.mrb[217].mxu1  ;;  %v17416_v28 = vld [vmem:[#allocation17_spill] sm:$0xff]  ;;  %v7643_v19 = vmul.f32 0.3275911, %v7619_v42 }
 0x7ef   : > { %v10614_v36 = vpop.eup %10613  ;;  %8190 = vst [vmem:[%s16157_s30 + $0x28] sm:$0xff] %v8166_v30  ;;  %v7833_v54 = vmul.f32 %v16187_v38, %v7809_v61  ;;  %v16234_v22 = vpop.f32.mrb[218].mxu1  ;;  %v16237_v55 = vmul.f32 0.70710677, %v16224_v46  ;;  %v7954_v4 = vsub.f32 0.0, %v7618_v62  ;;  %v7592_v9 = vsel %vm7568_vm12, 1.0, %v17219_v13 }
 0x7f0   : > { %v8167_v37 = vadd.f32 %v8143_v52, %v17416_v28  ;;  %v8048_v45 = vmul.f32 %v10614_v36, %v7928_v12  ;;  %v16239_v33 = vpop.f32.mrb[219].mxu1  ;;  %v7667_v48 = vadd.f32 1.0, %v7643_v19  ;;  %v16248_v5 = vmul.f32 0.70710677, %v16228_v56 }
 0x7f1   : > { %v7857_v6 = vadd.f32 -0.28449672, %v7833_v54  ;;  %v16245_v1 = vand.u32 2147483647, %v16237_v55  ;;  %v7520_v7 = vmul.f32 0.5, %v16053_v41  ;;  %v7521_v44 = vmul.f32 0.5, %v16085_v58 }
 0x7f2   : > { %8191 = vst [vmem:[%s16157_s30 + $0x30] sm:$0xff] %v8167_v37  ;;  %v8072_v16 = vsub.f32 1.0, %v8048_v45  ;;  %10619 = vrcp.f32 %v7667_v48  ;;  %v7978_v49 = vmul.f32 %v7954_v4, %v7618_v62  ;;  %v7955_v24 = vsub.f32 0.0, %v7619_v42 }
 0x7f3   : > { %v7881_v53 = vmul.f32 %v16187_v38, %v7857_v6  ;;  %v7644_v39 = vmul.f32 0.3275911, %v16245_v1  ;;  %v16255_v50 = vand.u32 2147483647, %v16248_v5  ;;  %v10616_v26 = vpop.eup %10615  ;;  %v7593_v60 = vsel %vm7569_vm5, 1.0, %v17219_v13 }
 0x7f4   : > { %v8096_v11 = vmul.f32 %v8072_v16, %v7592_v9  ;;  %v16261_v41 = vadd.f32 %v16098_v14, %v15997_v18  ;;  %vm7570_vm4 = vcmp.ge.f32.partialorder %v16178_v15, 0.0  ;;  %v16269_v57 = vadd.f32 %v16101_v2, %v15994_v31  ;;  %v17417_v14 = vld [vmem:[#allocation7_spill] sm:$0xff] }
 0x7f5   : > { %v7905_v29 = vadd.f32 0.2548296, %v7881_v53  ;;  %v7668_v63 = vadd.f32 1.0, %v7644_v39  ;;  %v7645_v62 = vmul.f32 0.3275911, %v16255_v50  ;;  %vm7571_vm6 = vcmp.ge.f32.partialorder %v16203_v51, 0.0 }
 0x7f6   : > { %v8120_v21 = vadd.f32 1.0, %v8096_v11  ;;  %v8011_v23 = vmul.f32 1.442695, %v7978_v49  ;;  %v7979_v10 = vmul.f32 %v7955_v24, %v7619_v42  ;;  %v16275_v61 = vmul.f32 0.5, %v16120_v32 }
 0x7f7   : > { %v7929_v43 = vmul.f32 %v16187_v38, %v7905_v29  ;;  %10621 = vrcp.f32 %v7668_v63  ;;  %v7669_v40 = vadd.f32 1.0, %v7645_v62  ;;  %v16278_v12 = vmul.f32 0.70710677, %v16261_v41 }
 0x7f8   : > { %v16263_v58 = vpop.eup %10617  ;;  %v8144_v47 = vmul.f32 %v8120_v21, %v7520_v7  ;;  %v16284_v2 = vsel %vm7570_vm4, 1.0, %v17219_v13  ;;  %v16287_v36 = vmul.f32 0.5, %v16185_v0  ;;  %v16290_v42 = vmul.f32 0.70710677, %v16269_v57 }
 0x7f9   : > { %v8049_v25 = vmul.f32 %v10616_v26, %v7929_v43  ;;  %v7738_v38 = vmul.f32 1.0614054, %v16263_v58  ;;  %10623 = vrcp.f32 %v7669_v40  ;;  %v16296_v28 = vsel %vm7571_vm6, 1.0, %v17219_v13 }
 0x7fa   : > { %v8168_v8 = vadd.f32 %v8144_v47, %v17417_v14  ;;  %v7622_v37 = vand.u32 2147483647, %v16278_v12  ;;  %10625 = vpow2.f32 %v8011_v23  ;;  %v8013_v45 = vmul.f32 1.442695, %v7979_v10 }
 0x7fb   : > { %v8073_v30 = vsub.f32 1.0, %v8049_v25  ;;  %v7762_v52 = vadd.f32 -1.4531521, %v7738_v38  ;;  %v16302_v0 = vmul.f32 0.5, %v16224_v46  ;;  %v7623_v19 = vand.u32 2147483647, %v16290_v42 }
 0x7fc   : > { %8192 = vst [vmem:[%s16157_s30 + $0x38] sm:$0xff] %v8168_v8  ;;  %v16299_v15 = vpop.eup %10619  ;;  %v7956_v48 = vsub.f32 0.0, %v16245_v1  ;;  %vm7572_vm8 = vcmp.ge.f32.partialorder %v16237_v55, 0.0  ;;  %v16309_v51 = vmul.f32 0.5, %v16228_v56  ;;  %v7646_v9 = vmul.f32 0.3275911, %v7622_v37 }
 0x7fd   : > { %v8097_v54 = vmul.f32 %v8073_v30, %v7593_v60  ;;  %v7786_v32 = vmul.f32 %v16263_v58, %v7762_v52  ;;  %v7739_v4 = vmul.f32 1.0614054, %v16299_v15  ;;  %v7647_v53 = vmul.f32 0.3275911, %v7623_v19  ;;  %v17418_v56 = vld [vmem:[#allocation20_spill] sm:$0xff] }
 0x7fe   : > { %v7957_v29 = vsub.f32 0.0, %v16255_v50  ;;  %10627 = vpow2.f32 %v8013_v45  ;;  %v7670_v39 = vadd.f32 1.0, %v7646_v9  ;;  %v16315_v49 = vadd.f32 %v16110_v17, %v15997_v18 }
 0x7ff   : > { %v8121_v6 = vadd.f32 1.0, %v8097_v54  ;;  %v7810_v16 = vadd.f32 1.4214138, %v7786_v32  ;;  %v7763_v46 = vadd.f32 -1.4531521, %v7739_v4  ;;  %v7671_v21 = vadd.f32 1.0, %v7647_v53 }
 0x800   : > { %v7980_v43 = vmul.f32 %v7956_v48, %v16245_v1  ;;  %v16325_v63 = vsel %vm7572_vm8, 1.0, %v17219_v13  ;;  %10629 = vrcp.f32 %v7670_v39  ;;  %v7958_v62 = vsub.f32 0.0, %v7622_v37 }
 0x801   : > { %v8145_v11 = vmul.f32 %v8121_v6, %v7521_v44  ;;  %v7834_v7 = vmul.f32 %v16263_v58, %v7810_v16  ;;  %v16317_v24 = vpop.eup %10621  ;;  %v7787_v44 = vmul.f32 %v16299_v15, %v7763_v46  ;;  %v7981_v38 = vmul.f32 %v7957_v29, %v16255_v50 }
 0x802   : > { %v7740_v47 = vmul.f32 1.0614054, %v16317_v24  ;;  %v16332_v14 = vmul.f32 0.70710677, %v16315_v49  ;;  %vm7573_vm2 = vcmp.ge.f32.partialorder %v16248_v5, 0.0  ;;  %10631 = vrcp.f32 %v7671_v21 }
 0x803   : > { %v8169_v26 = vadd.f32 %v8145_v11, %v17418_v56  ;;  %v7858_v60 = vadd.f32 -0.28449672, %v7834_v7  ;;  %v7811_v25 = vadd.f32 1.4214138, %v7787_v44  ;;  %v16334_v8 = vpop.eup %10623  ;;  %v7959_v55 = vsub.f32 0.0, %v7623_v19 }
 0x804   : > { %v7764_v1 = vadd.f32 -1.4531521, %v7740_v47  ;;  %v8015_v40 = vmul.f32 1.442695, %v7980_v43  ;;  %v7741_v30 = vmul.f32 1.0614054, %v16334_v8  ;;  %v10626_v52 = vpop.eup %10625  ;;  %v7982_v50 = vmul.f32 %v7958_v62, %v7622_v37 }
 0x805   : > { %8193 = vst [vmem:[%s16157_s30 + $0x40] sm:$0xff] %v8169_v26  ;;  %v7882_v17 = vmul.f32 %v16263_v58, %v7858_v60  ;;  %v7835_v10 = vmul.f32 %v16299_v15, %v7811_v25  ;;  %v7624_v32 = vand.u32 2147483647, %v16332_v14  ;;  %v16343_v45 = vadd.f32 %v16193_v35, %v15994_v31 }
 0x806   : > { %v7788_v54 = vmul.f32 %v16317_v24, %v7764_v1  ;;  %v7765_v4 = vadd.f32 -1.4531521, %v7741_v30  ;;  %v8017_v48 = vmul.f32 1.442695, %v7981_v38  ;;  %v16349_v53 = vsel %vm7573_vm2, 1.0, %v17219_v13 }
 0x807   : > { %v7906_v23 = vadd.f32 0.2548296, %v7882_v17  ;;  %v7859_v16 = vadd.f32 -0.28449672, %v7835_v10  ;;  %v7983_v11 = vmul.f32 %v7959_v55, %v7623_v19  ;;  %v7648_v7 = vmul.f32 0.3275911, %v7624_v32 }
 0x808   : > { %v7812_v9 = vadd.f32 1.4214138, %v7788_v54  ;;  %10633 = vpow2.f32 %v8015_v40  ;;  %v7789_v35 = vmul.f32 %v16334_v8, %v7765_v4  ;;  %v10628_v29 = vpop.eup %10627  ;;  %v8019_v39 = vmul.f32 1.442695, %v7982_v50 }
 0x809   : > { %v7930_v6 = vmul.f32 %v16263_v58, %v7906_v23  ;;  %v7883_v46 = vmul.f32 %v16299_v15, %v7859_v16  ;;  %v7672_v21 = vadd.f32 1.0, %v7648_v7  ;;  %v16355_v56 = vmul.f32 0.70710677, %v16343_v45 }
 0x80a   : > { %v7836_v58 = vmul.f32 %v16317_v24, %v7812_v9  ;;  %v7813_v60 = vadd.f32 1.4214138, %v7789_v35  ;;  %10635 = vpow2.f32 %v8017_v48  ;;  %v16357_v19 = vpop.eup %10629  ;;  %v16360_v43 = vmul.f32 0.5, %v16261_v41  ;;  %v17419_v35 = vld [vmem:[#allocation8_spill] sm:$0xff] }
 0x80b   : > { %v8050_v37 = vmul.f32 %v10626_v52, %v7930_v6  ;;  %v7907_v5 = vadd.f32 0.2548296, %v7883_v46  ;;  %v8021_v47 = vmul.f32 1.442695, %v7983_v11  ;;  %10637 = vrcp.f32 %v7672_v21 }
 0x80c   : > { %v7860_v44 = vadd.f32 -0.28449672, %v7836_v58  ;;  %v7837_v25 = vmul.f32 %v16334_v8, %v7813_v60  ;;  %v7742_v38 = vmul.f32 1.0614054, %v16357_v19  ;;  %v16366_v1 = vpop.eup %10631  ;;  %10639 = vpow2.f32 %v8019_v39 }
 0x80d   : > { %v8074_v26 = vsub.f32 1.0, %v8050_v37  ;;  %v7931_v17 = vmul.f32 %v16299_v15, %v7907_v5  ;;  %v7960_v23 = vsub.f32 0.0, %v7624_v32  ;;  %v7625_v10 = vand.u32 2147483647, %v16355_v56 }
 0x80e   : > { %v7884_v55 = vmul.f32 %v16317_v24, %v7860_v44  ;;  %v7861_v30 = vadd.f32 -0.28449672, %v7837_v25  ;;  %v7766_v52 = vadd.f32 -1.4531521, %v7742_v38  ;;  %v16373_v50 = vadd.f32 %v16198_v3, %v15997_v18 }
 0x80f   : > { %v8098_v62 = vmul.f32 %v8074_v26, %v16284_v2  ;;  %v8051_v40 = vmul.f32 %v10628_v29, %v7931_v17  ;;  %v7743_v2 = vmul.f32 1.0614054, %v16366_v1  ;;  %v7649_v15 = vmul.f32 0.3275911, %v7625_v10 }
 0x810   : > { %v7908_v54 = vadd.f32 0.2548296, %v7884_v55  ;;  %v7885_v4 = vmul.f32 %v16334_v8, %v7861_v30  ;;  %v7790_v48 = vmul.f32 %v16357_v19, %v7766_v52  ;;  %v7984_v7 = vmul.f32 %v7960_v23, %v7624_v32 }
 0x811   : > { %v8122_v41 = vadd.f32 1.0, %v8098_v62  ;;  %v8075_v16 = vsub.f32 1.0, %v8051_v40  ;;  %v7767_v11 = vadd.f32 -1.4531521, %v7743_v2  ;;  %v7673_v37 = vadd.f32 1.0, %v7649_v15 }
 0x812   : > { %v7932_v9 = vmul.f32 %v16317_v24, %v7908_v54  ;;  %v10634_v46 = vpop.eup %10633  ;;  %v7909_v3 = vadd.f32 0.2548296, %v7885_v4  ;;  %v7814_v39 = vadd.f32 1.4214138, %v7790_v48  ;;  %v16383_v26 = vmul.f32 0.70710677, %v16373_v50 }
 0x813   : > { %v8146_v6 = vmul.f32 %v8122_v41, %v16275_v61  ;;  %v8099_v58 = vmul.f32 %v8075_v16, %v16296_v28  ;;  %v7791_v61 = vmul.f32 %v16366_v1, %v7767_v11  ;;  %10641 = vrcp.f32 %v7673_v37  ;;  %v17420_v54 = vld [vmem:[#allocation21_spill] sm:$0xff] }
 0x814   : > { %v8052_v21 = vmul.f32 %v10634_v46, %v7932_v9  ;;  %v10636_v5 = vpop.eup %10635  ;;  %v7933_v32 = vmul.f32 %v16334_v8, %v7909_v3  ;;  %v7838_v60 = vmul.f32 %v16357_v19, %v7814_v39  ;;  %10643 = vpow2.f32 %v8021_v47 }
 0x815   : > { %v8170_v29 = vadd.f32 %v8146_v6, %v17419_v35  ;;  %v8123_v24 = vadd.f32 1.0, %v8099_v58  ;;  %v16388_v44 = vpop.eup %10637  ;;  %v7815_v62 = vadd.f32 1.4214138, %v7791_v61  ;;  %v8023_v17 = vmul.f32 1.442695, %v7984_v7 }
 0x816   : > { %v8076_v28 = vsub.f32 1.0, %v8052_v21  ;;  %v7961_v25 = vsub.f32 0.0, %v7625_v10  ;;  %v8053_v55 = vmul.f32 %v10636_v5, %v7933_v32  ;;  %v7862_v23 = vadd.f32 -0.28449672, %v7838_v60  ;;  %v10640_v40 = vpop.eup %10639 }
 0x817   : > { %8194 = vst [vmem:[%s16157_s30 + $0x48] sm:$0xff] %v8170_v29  ;;  %v8147_v38 = vmul.f32 %v8123_v24, %v16287_v36  ;;  %v7744_v41 = vmul.f32 1.0614054, %v16388_v44  ;;  %v7839_v8 = vmul.f32 %v16366_v1, %v7815_v62  ;;  %v16395_v47 = vand.u32 2147483647, %v16383_v26  ;;  %v17422_v62 = vld [vmem:[#allocation22_spill] sm:$0xff] }
 0x818   : > { %v8100_v30 = vmul.f32 %v8076_v28, %v16325_v63  ;;  %v16399_v52 = vadd.f32 %v16207_v34, %v15994_v31  ;;  %v8077_v36 = vsub.f32 1.0, %v8053_v55  ;;  %v7886_v15 = vmul.f32 %v16357_v19, %v7862_v23 }
 0x819   : > { %v8171_v2 = vadd.f32 %v8147_v38, %v17420_v54  ;;  %v7768_v6 = vadd.f32 -1.4531521, %v7744_v41  ;;  %v16404_v4 = vmul.f32 0.5, %v16269_v57  ;;  %v7863_v63 = vadd.f32 -0.28449672, %v7839_v8 }
 0x81a   : > { %v8124_v16 = vadd.f32 1.0, %v8100_v30  ;;  %v7650_v48 = vmul.f32 0.3275911, %v16395_v47  ;;  %v8101_v9 = vmul.f32 %v8077_v36, %v16349_v53  ;;  %v7910_v11 = vadd.f32 0.2548296, %v7886_v15  ;;  %v17421_v53 = vld [vmem:[#allocation9_spill] sm:$0xff] }
 0x81b   : > { %8195 = vst [vmem:[%s16157_s30 + $0x50] sm:$0xff] %v8171_v2  ;;  %v7792_v34 = vmul.f32 %v16388_v44, %v7768_v6  ;;  %v7985_v7 = vmul.f32 %v7961_v25, %v7625_v10  ;;  %v7887_v46 = vmul.f32 %v16366_v1, %v7863_v63  ;;  %v16413_v29 = vmul.f32 0.70710677, %v16399_v52 }
 0x81c   : > { %v8148_v37 = vmul.f32 %v8124_v16, %v16302_v0  ;;  %v7674_v35 = vadd.f32 1.0, %v7650_v48  ;;  %v8125_v57 = vadd.f32 1.0, %v8101_v9  ;;  %v7934_v58 = vmul.f32 %v16357_v19, %v7910_v11 }
 0x81d   : > { %v7816_v3 = vadd.f32 1.4214138, %v7792_v34  ;;  %10645 = vpow2.f32 %v8023_v17  ;;  %v16416_v39 = vpop.eup %10641  ;;  %vm7574_vm10 = vcmp.ge.f32.partialorder %v16278_v12, 0.0  ;;  %v7911_v10 = vadd.f32 0.2548296, %v7887_v46 }
 0x81e   : > { %v8172_v21 = vadd.f32 %v8148_v37, %v17421_v53  ;;  %10647 = vrcp.f32 %v7674_v35  ;;  %v10644_v0 = vpop.eup %10643  ;;  %v8149_v61 = vmul.f32 %v8125_v57, %v16309_v51  ;;  %v8054_v5 = vmul.f32 %v10640_v40, %v7934_v58  ;;  %v17423_v58 = vld [vmem:[#allocation12_spill] sm:$0xff] }
 0x81f   : > { %v7840_v24 = vmul.f32 %v16388_v44, %v7816_v3  ;;  %v7745_v32 = vmul.f32 1.0614054, %v16416_v39  ;;  %vm7575_vm14 = vcmp.ge.f32.partialorder %v16290_v42, 0.0  ;;  %v7935_v19 = vmul.f32 %v16366_v1, %v7911_v10 }
 0x820   : > { %8196 = vst [vmem:[%s16157_s30 + $0x58] sm:$0xff] %v8172_v21  ;;  %v8025_v60 = vmul.f32 1.442695, %v7985_v7  ;;  %v7627_v28 = vand.u32 2147483647, %v16413_v29  ;;  %v8173_v17 = vadd.f32 %v8149_v61, %v17422_v62  ;;  %v8078_v25 = vsub.f32 1.0, %v8054_v5 }
 0x821   : > { %v7864_v38 = vadd.f32 -0.28449672, %v7840_v24  ;;  %v7769_v55 = vadd.f32 -1.4531521, %v7745_v32  ;;  %v7598_v51 = vsel %vm7574_vm10, 1.0, %v17219_v13  ;;  %v8055_v23 = vmul.f32 %v10644_v0, %v7935_v19  ;;  %v17424_v24 = vld [vmem:[#allocation23_spill] sm:$0xff] }
 0x822   : > { %v7651_v41 = vmul.f32 0.3275911, %v7627_v28  ;;  %v16433_v40 = vadd.f32 %v16211_v20, %v15997_v18  ;;  %8197 = vst [vmem:[%s16157_s30 + $0x60] sm:$0xff] %v8173_v17  ;;  %v8102_v1 = vmul.f32 %v8078_v25, %v7598_v51  ;;  %v7962_v54 = vsub.f32 0.0, %v16395_v47 }
 0x823   : > { %v7888_v30 = vmul.f32 %v16388_v44, %v7864_v38  ;;  %v7793_v8 = vmul.f32 %v16416_v39, %v7769_v55  ;;  %v7599_v2 = vsel %vm7575_vm14, 1.0, %v17219_v13  ;;  %v8079_v12 = vsub.f32 1.0, %v8055_v23 }
 0x824   : > { %v7675_v36 = vadd.f32 1.0, %v7651_v41  ;;  %v16444_v15 = vadd.f32 %v16218_v27, %v15994_v31  ;;  %v8126_v20 = vadd.f32 1.0, %v8102_v1  ;;  %10649 = vpow2.f32 %v8025_v60 }
 0x825   : > { %v7912_v6 = vadd.f32 0.2548296, %v7888_v30  ;;  %v7817_v16 = vadd.f32 1.4214138, %v7793_v8  ;;  %v8103_v63 = vmul.f32 %v8079_v12, %v7599_v2  ;;  %vm7576_vm15 = vcmp.ge.f32.partialorder %v16332_v14, 0.0 }
 0x826   : > { %10651 = vrcp.f32 %v7675_v36  ;;  %v16448_v48 = vmul.f32 0.70710677, %v16433_v40  ;;  %v8150_v42 = vmul.f32 %v8126_v20, %v16360_v43  ;;  %v7986_v34 = vmul.f32 %v7962_v54, %v16395_v47 }
 0x827   : > { %v10646_v9 = vpop.eup %10645  ;;  %v7936_v11 = vmul.f32 %v16388_v44, %v7912_v6  ;;  %v7841_v27 = vmul.f32 %v16416_v39, %v7817_v16  ;;  %v8127_v37 = vadd.f32 1.0, %v8103_v63  ;;  %v7963_v46 = vsub.f32 0.0, %v7627_v28  ;;  %v17425_v16 = vld [vmem:[#allocation13_spill] sm:$0xff] }
 0x828   : > { %v16454_v7 = vpop.eup %10647  ;;  %v7628_v35 = vand.u32 2147483647, %v16448_v48  ;;  %v16458_v57 = vmul.f32 0.70710677, %v16444_v15  ;;  %v8174_v3 = vadd.f32 %v8150_v42, %v17423_v58  ;;  %v7600_v47 = vsel %vm7576_vm15, 1.0, %v17219_v13 }
 0x829   : > { %v8056_v53 = vmul.f32 %v10646_v9, %v7936_v11  ;;  %v7865_v21 = vadd.f32 -0.28449672, %v7841_v27  ;;  %v7746_v43 = vmul.f32 1.0614054, %v16454_v7  ;;  %v8151_v44 = vmul.f32 %v8127_v37, %v16404_v4 }
 0x82a   : > { %v7652_v10 = vmul.f32 0.3275911, %v7628_v35  ;;  %8198 = vst [vmem:[%s16157_s30 + $0x68] sm:$0xff] %v8174_v3  ;;  %v8027_v19 = vmul.f32 1.442695, %v7986_v34  ;;  %v7987_v60 = vmul.f32 %v7963_v46, %v7627_v28  ;;  %v7528_v55 = vmul.f32 0.5, %v16315_v49 }
 0x82b   : > { %v8080_v0 = vsub.f32 1.0, %v8056_v53  ;;  %v7889_v61 = vmul.f32 %v16416_v39, %v7865_v21  ;;  %v7770_v5 = vadd.f32 -1.4531521, %v7746_v43  ;;  %v8175_v32 = vadd.f32 %v8151_v44, %v17424_v24 }
 0x82c   : > { %v7676_v62 = vadd.f32 1.0, %v7652_v10  ;;  %v7629_v4 = vand.u32 2147483647, %v16458_v57  ;;  %v16475_v14 = vadd.f32 %v16230_v59, %v15997_v18  ;;  %vm7577_vm11 = vcmp.ge.f32.partialorder %v16355_v56, 0.0 }
 0x82d   : > { %v8104_v17 = vmul.f32 %v8080_v0, %v7600_v47  ;;  %v7913_v25 = vadd.f32 0.2548296, %v7889_v61  ;;  %v7794_v38 = vmul.f32 %v16454_v7, %v7770_v5  ;;  %8199 = vst [vmem:[%s16157_s30 + $0x70] sm:$0xff] %v8175_v32  ;;  %v8029_v8 = vmul.f32 1.442695, %v7987_v60 }
 0x82e   : > { %10653 = vrcp.f32 %v7676_v62  ;;  %v10650_v51 = vpop.eup %10649  ;;  %v7653_v1 = vmul.f32 0.3275911, %v7629_v4  ;;  %v16482_v54 = vmul.f32 0.70710677, %v16475_v14  ;;  %v7964_v36 = vsub.f32 0.0, %v7628_v35 }
 0x82f   : > { %v8128_v23 = vadd.f32 1.0, %v8104_v17  ;;  %v7937_v41 = vmul.f32 %v16416_v39, %v7913_v25  ;;  %v7818_v28 = vadd.f32 1.4214138, %v7794_v38  ;;  %10655 = vpow2.f32 %v8027_v19  ;;  %v17426_v19 = vld [vmem:[#allocation24_spill] sm:$0xff] }
 0x830   : > { %v16478_v30 = vpop.eup %10651  ;;  %v7677_v39 = vadd.f32 1.0, %v7653_v1  ;;  %v16487_v20 = vand.u32 2147483647, %v16482_v54  ;;  %v16491_v6 = vadd.f32 %v16234_v22, %v15994_v31  ;;  %v7601_v27 = vsel %vm7577_vm11, 1.0, %v17219_v13 }
 0x831   : > { %v8152_v49 = vmul.f32 %v8128_v23, %v7528_v55  ;;  %v8057_v2 = vmul.f32 %v10650_v51, %v7937_v41  ;;  %v7842_v59 = vmul.f32 %v16454_v7, %v7818_v28  ;;  %v7747_v12 = vmul.f32 1.0614054, %v16478_v30 }
 0x832   : > { %10657 = vrcp.f32 %v7677_v39  ;;  %v7654_v34 = vmul.f32 0.3275911, %v16487_v20  ;;  %v7529_v31 = vmul.f32 0.5, %v16343_v45  ;;  %v16503_v3 = vmul.f32 0.70710677, %v16491_v6 }
 0x833   : > { %v8176_v63 = vadd.f32 %v8152_v49, %v17425_v16  ;;  %v8081_v9 = vsub.f32 1.0, %v8057_v2  ;;  %v7866_v42 = vadd.f32 -0.28449672, %v7842_v59  ;;  %v7771_v11 = vadd.f32 -1.4531521, %v7747_v12 }
 0x834   : > { %10659 = vpow2.f32 %v8029_v8  ;;  %v7678_v22 = vadd.f32 1.0, %v7654_v34  ;;  %v7988_v43 = vmul.f32 %v7964_v36, %v7628_v35  ;;  %v7965_v10 = vsub.f32 0.0, %v7629_v4 }
 0x835   : > { %8200 = vst [vmem:[%s16157_s30 + $0x78] sm:$0xff] %v8176_v63  ;;  %v8105_v37 = vmul.f32 %v8081_v9, %v7601_v27  ;;  %v7890_v46 = vmul.f32 %v16454_v7, %v7866_v42  ;;  %v7795_v58 = vmul.f32 %v16478_v30, %v7771_v11  ;;  %v16508_v47 = vand.u32 2147483647, %v16503_v3 }
 0x836   : > { %10661 = vrcp.f32 %v7678_v22  ;;  %v16512_v45 = vadd.f32 %v16239_v33, %v15997_v18  ;;  %vm7578_vm7 = vcmp.ge.f32.partialorder %v16383_v26, 0.0  ;;  %v8031_v38 = vmul.f32 1.442695, %v7988_v43  ;;  %v17427_v22 = vld [vmem:[#allocation14_spill] sm:$0xff] }
 0x837   : > { %v8129_v53 = vadd.f32 1.0, %v8105_v37  ;;  %v7914_v21 = vadd.f32 0.2548296, %v7890_v46  ;;  %v7819_v56 = vadd.f32 1.4214138, %v7795_v58  ;;  %v7989_v18 = vmul.f32 %v7965_v10, %v7629_v4 }
 0x838   : > { %v16505_v44 = vpop.eup %10653  ;;  %v7655_v32 = vmul.f32 0.3275911, %v16508_v47  ;;  %v16524_v23 = vmul.f32 0.70710677, %v16512_v45  ;;  %v7602_v41 = vsel %vm7578_vm7, 1.0, %v17219_v13  ;;  %v7966_v28 = vsub.f32 0.0, %v16487_v20 }
 0x839   : > { %v8153_v0 = vmul.f32 %v8129_v53, %v7529_v31  ;;  %v7938_v61 = vmul.f32 %v16454_v7, %v7914_v21  ;;  %v7843_v5 = vmul.f32 %v16478_v30, %v7819_v56  ;;  %v7748_v24 = vmul.f32 1.0614054, %v16505_v44  ;;  %v10656_v35 = vpop.eup %10655 }
 0x83a   : > { %v7679_v33 = vadd.f32 1.0, %v7655_v32  ;;  %v7530_v59 = vmul.f32 0.5, %v16373_v50  ;;  %v8033_v12 = vmul.f32 1.442695, %v7989_v18  ;;  %v16533_v36 = vand.u32 2147483647, %v16524_v23 }
 0x83b   : > { %v8177_v60 = vadd.f32 %v8153_v0, %v17426_v19  ;;  %v8058_v62 = vmul.f32 %v10656_v35, %v7938_v61  ;;  %v7867_v17 = vadd.f32 -0.28449672, %v7843_v5  ;;  %v7772_v25 = vadd.f32 -1.4531521, %v7748_v24 }
 0x83c   : > { %v16526_v26 = vpop.eup %10657  ;;  %10663 = vrcp.f32 %v7679_v33  ;;  %vm7579_vm13 = vcmp.ge.f32.partialorder %v16413_v29, 0.0  ;;  %v7990_v11 = vmul.f32 %v7966_v28, %v16487_v20  ;;  %v7656_v27 = vmul.f32 0.3275911, %v16533_v36 }
 0x83d   : > { %8201 = vst [vmem:[%s16157_s30 + $0x80] sm:$0xff] %v8177_v60  ;;  %v8082_v55 = vsub.f32 1.0, %v8058_v62  ;;  %v7891_v7 = vmul.f32 %v16478_v30, %v7867_v17  ;;  %v7796_v51 = vmul.f32 %v16505_v44, %v7772_v25  ;;  %v7749_v49 = vmul.f32 1.0614054, %v16526_v26 }
 0x83e   : > { %v10660_v2 = vpop.eup %10659  ;;  %10665 = vpow2.f32 %v8031_v38  ;;  %v7967_v58 = vsub.f32 0.0, %v16508_v47  ;;  %v7680_v31 = vadd.f32 1.0, %v7656_v27  ;;  %v7603_v56 = vsel %vm7579_vm13, 1.0, %v17219_v13 }
 0x83f   : > { %v8106_v1 = vmul.f32 %v8082_v55, %v7602_v41  ;;  %v7915_v8 = vadd.f32 0.2548296, %v7891_v7  ;;  %v7820_v4 = vadd.f32 1.4214138, %v7796_v51  ;;  %v7773_v9 = vadd.f32 -1.4531521, %v7749_v49 }
 0x840   : > { %v16537_v42 = vpop.eup %10661  ;;  %10667 = vpow2.f32 %v8033_v12  ;;  %v8035_v10 = vmul.f32 1.442695, %v7990_v11  ;;  %v7531_v35 = vmul.f32 0.5, %v16399_v52  ;;  %v7991_v19 = vmul.f32 %v7967_v58, %v16508_v47 }
 0x841   : > { %v8130_v39 = vadd.f32 1.0, %v8106_v1  ;;  %v7939_v16 = vmul.f32 %v16478_v30, %v7915_v8  ;;  %v7844_v63 = vmul.f32 %v16505_v44, %v7820_v4  ;;  %v7797_v46 = vmul.f32 %v16526_v26, %v7773_v9 }
 0x842   : > { %v7750_v30 = vmul.f32 1.0614054, %v16537_v42  ;;  %10669 = vrcp.f32 %v7680_v31  ;;  %vm7580_vm3 = vcmp.ge.f32.partialorder %v16448_v48, 0.0  ;;  %v8037_v47 = vmul.f32 1.442695, %v7991_v19 }
 0x843   : > { %v8154_v50 = vmul.f32 %v8130_v39, %v7530_v59  ;;  %v8059_v34 = vmul.f32 %v10660_v2, %v7939_v16  ;;  %v7868_v37 = vadd.f32 -0.28449672, %v7844_v63  ;;  %v7821_v20 = vadd.f32 1.4214138, %v7797_v46 }
 0x844   : > { %v7774_v43 = vadd.f32 -1.4531521, %v7750_v30  ;;  %10671 = vpow2.f32 %v8035_v10  ;;  %v7968_v41 = vsub.f32 0.0, %v16533_v36  ;;  %v7604_v49 = vsel %vm7580_vm3, 1.0, %v17219_v13 }
 0x845   : > { %v8178_v53 = vadd.f32 %v8154_v50, %v17427_v22  ;;  %v8083_v21 = vsub.f32 1.0, %v8059_v34  ;;  %v7892_v29 = vmul.f32 %v16505_v44, %v7868_v37  ;;  %v7845_v5 = vmul.f32 %v16526_v26, %v7821_v20 }
 0x846   : > { %v16550_v24 = vpop.eup %10663  ;;  %v7798_v32 = vmul.f32 %v16537_v42, %v7774_v43  ;;  %v7532_v59 = vmul.f32 0.5, %v16433_v40  ;;  %vm7581_vm0 = vcmp.ge.f32.partialorder %v16458_v57, 0.0  ;;  %10673 = vpow2.f32 %v8037_v47 }
 0x847   : > { %8202 = vst [vmem:[%s16157_s30 + $0x88] sm:$0xff] %v8178_v53  ;;  %v8107_v0 = vmul.f32 %v8083_v21, %v7603_v56  ;;  %v7916_v61 = vadd.f32 0.2548296, %v7892_v29  ;;  %v7869_v17 = vadd.f32 -0.28449672, %v7845_v5  ;;  %v7992_v11 = vmul.f32 %v7968_v41, %v16533_v36  ;;  %v17429_v21 = vld [vmem:[#allocation15_spill] sm:$0xff] }
 0x848   : > { %v7751_v25 = vmul.f32 1.0614054, %v16550_v24  ;;  %v10666_v38 = vpop.eup %10665  ;;  %v7822_v18 = vadd.f32 1.4214138, %v7798_v32  ;;  %v7605_v22 = vsel %vm7581_vm0, 1.0, %v17219_v13  ;;  %vm7582_vm9 = vcmp.ge.f32.partialorder %v16482_v54, 0.0 }
 0x849   : > { %v8131_v60 = vadd.f32 1.0, %v8107_v0  ;;  %v7940_v62 = vmul.f32 %v16505_v44, %v7916_v61  ;;  %v7893_v52 = vmul.f32 %v16526_v26, %v7869_v17  ;;  %v17428_v44 = vld [vmem:[#allocation25_spill] sm:$0xff]  ;;  %v8039_v53 = vmul.f32 1.442695, %v7992_v11  ;;  %v17431_v41 = vld [vmem:[#allocation18_spill] sm:$0xff] }
 0x84a   : > { %v7775_v7 = vadd.f32 -1.4531521, %v7751_v25  ;;  %v7846_v51 = vmul.f32 %v16537_v42, %v7822_v18  ;;  %v10668_v48 = vpop.eup %10667  ;;  %v7533_v10 = vmul.f32 0.5, %v16444_v15  ;;  %v7606_v32 = vsel %vm7582_vm9, 1.0, %v17219_v13  ;;  %v17430_v25 = vld [vmem:[#allocation26_spill] sm:$0xff] }
 0x84b   : > { %v8155_v33 = vmul.f32 %v8131_v60, %v7531_v35  ;;  %v8060_v55 = vmul.f32 %v10666_v38, %v7940_v62  ;;  %v7917_v8 = vadd.f32 0.2548296, %v7893_v52  ;;  %10675 = vpow2.f32 %v8039_v53 }
 0x84c   : > { %v7799_v4 = vmul.f32 %v16550_v24, %v7775_v7  ;;  %v7870_v2 = vadd.f32 -0.28449672, %v7846_v51  ;;  %v10670_v63 = vpop.eup %10669  ;;  %vm7583_vm1 = vcmp.ge.f32.partialorder %v16503_v3, 0.0  ;;  %v7534_v18 = vmul.f32 0.5, %v16475_v14 }
 0x84d   : > { %v8179_v28 = vadd.f32 %v8155_v33, %v17428_v44  ;;  %v8084_v1 = vsub.f32 1.0, %v8060_v55  ;;  %v7941_v39 = vmul.f32 %v16526_v26, %v7917_v8  ;;  %v7752_v37 = vmul.f32 1.0614054, %v10670_v63 }
 0x84e   : > { %v7823_v16 = vadd.f32 1.4214138, %v7799_v4  ;;  %v7894_v9 = vmul.f32 %v16537_v42, %v7870_v2  ;;  %v10672_v31 = vpop.eup %10671  ;;  %vm7584_vm12 = vcmp.ge.f32.partialorder %v16524_v23, 0.0 }
 0x84f   : > { %8203 = vst [vmem:[%s16157_s30 + $0x90] sm:$0xff] %v8179_v28  ;;  %v8108_v12 = vmul.f32 %v8084_v1, %v7604_v49  ;;  %v8061_v50 = vmul.f32 %v10668_v48, %v7941_v39  ;;  %v7776_v26 = vadd.f32 -1.4531521, %v7752_v37  ;;  %v7535_v28 = vmul.f32 0.5, %v16491_v6  ;;  %v17432_v48 = vld [vmem:[#allocation27_spill] sm:$0xff] }
 0x850   : > { %v7847_v34 = vmul.f32 %v16550_v24, %v7823_v16  ;;  %v7918_v46 = vadd.f32 0.2548296, %v7894_v9  ;;  %v10674_v62 = vpop.eup %10673  ;;  %v7536_v39 = vmul.f32 0.5, %v16512_v45  ;;  %v17433_v9 = vld [vmem:[#allocation19_spill] sm:$0xff] }
 0x851   : > { %v8132_v27 = vadd.f32 1.0, %v8108_v12  ;;  %v8085_v30 = vsub.f32 1.0, %v8061_v50  ;;  %v7800_v56 = vmul.f32 %v10670_v63, %v7776_v26 }
 0x852   : > { %v7871_v58 = vadd.f32 -0.28449672, %v7847_v34  ;;  %v7942_v57 = vmul.f32 %v16537_v42, %v7918_v46 }
 0x853   : > { %v8156_v40 = vmul.f32 %v8132_v27, %v7532_v59  ;;  %v8109_v36 = vmul.f32 %v8085_v30, %v7605_v22  ;;  %v7824_v5 = vadd.f32 1.4214138, %v7800_v56  ;;  %v7608_v59 = vsel %vm7584_vm12, 1.0, %v17219_v13 }
 0x854   : > { %v7895_v20 = vmul.f32 %v16550_v24, %v7871_v58  ;;  %v8062_v43 = vmul.f32 %v10672_v31, %v7942_v57 }
 0x855   : > { %v8180_v29 = vadd.f32 %v8156_v40, %v17429_v21  ;;  %v8133_v0 = vadd.f32 1.0, %v8109_v36  ;;  %v7848_v60 = vmul.f32 %v10670_v63, %v7824_v5  ;;  %v10676_v8 = vpop.eup %10675 }
 0x856   : > { %v7919_v61 = vadd.f32 0.2548296, %v7895_v20  ;;  %v8086_v35 = vsub.f32 1.0, %v8062_v43 }
 0x857   : > { %8204 = vst [vmem:[%s16157_s30 + $0x98] sm:$0xff] %v8180_v29  ;;  %v8157_v42 = vmul.f32 %v8133_v0, %v7533_v10  ;;  %v7872_v15 = vadd.f32 -0.28449672, %v7848_v60 }
 0x858   : > { %v7943_v19 = vmul.f32 %v16550_v24, %v7919_v61  ;;  %v8110_v17 = vmul.f32 %v8086_v35, %v7606_v32  ;;  %v7607_v24 = vsel %vm7583_vm1, 1.0, %v17219_v13 }
 0x859   : > { %v8181_v54 = vadd.f32 %v8157_v42, %v17430_v25  ;;  %v7896_v52 = vmul.f32 %v10670_v63, %v7872_v15 }
 0x85a   : > { %v8063_v38 = vmul.f32 %v10674_v62, %v7943_v19  ;;  %v8134_v33 = vadd.f32 1.0, %v8110_v17 }
 0x85b   : > { %8205 = vst [vmem:[%s16157_s30 + $0xa0] sm:$0xff] %v8181_v54  ;;  %v7920_v47 = vadd.f32 0.2548296, %v7896_v52 }
 0x85c   : > { %v8087_v55 = vsub.f32 1.0, %v8063_v38  ;;  %v8158_v7 = vmul.f32 %v8134_v33, %v7534_v18 }
 0x85d   : > { %v7944_v1 = vmul.f32 %v10670_v63, %v7920_v47 }
 0x85e   : > { %v8111_v51 = vmul.f32 %v8087_v55, %v7607_v24  ;;  %v8182_v44 = vadd.f32 %v8158_v7, %v17431_v41 }
 0x85f   : > { %v8064_v4 = vmul.f32 %v10676_v8, %v7944_v1 }
 0x860   : > { %v8135_v3 = vadd.f32 1.0, %v8111_v51  ;;  %8206 = vst [vmem:[%s16157_s30 + $0xa8] sm:$0xff] %v8182_v44 }
 0x861   : > { %v8088_v2 = vsub.f32 1.0, %v8064_v4 }
 0x862   : > { %v8159_v14 = vmul.f32 %v8135_v3, %v7535_v28 }
 0x863   : > { %v8112_v12 = vmul.f32 %v8088_v2, %v7608_v59 }
 0x864   : > { %v8183_v49 = vadd.f32 %v8159_v14, %v17432_v48 }
 0x865   : > { %v8136_v16 = vadd.f32 1.0, %v8112_v12 }
 0x866   : > { %8207 = vst [vmem:[%s16157_s30 + $0xb0] sm:$0xff] %v8183_v49 }
 0x867   : > { %v8160_v6 = vmul.f32 %v8136_v16, %v7536_v39 }
 0x869   : > { %v8184_v11 = vadd.f32 %v8160_v6, %v17433_v9 }
 0x86b   : > { %8208 = vst [vmem:[%s16157_s30 + $0xb8] sm:$0xff] %v8184_v11 }
 0x86c PF: > { %s22_s21 = sadd.s32 1, %s10689_s21  }
 0x86d   : > { %p19_p4 = scmp.ge.s32.totalorder %s22_s21, 4  }
 0x86f   :  { %21 = sbr.rel (!%p19_p4) target bundleno = 1 (0x1), region = 98 }

</bundles_post_ra>
